<compile_context>
chip_gen: v7x
topology: tpu7x:2x2x1
jax: 0.10.0
libtpu: 0.0.40
codegen_flags: <defaults>
</compile_context>

<pallas_src>
import numpy as np
import jax
import jax.numpy as jnp
from jax.experimental import pallas as pl
from jax.experimental.pallas import tpu as pltpu


# ---------------------------------------------------------------------------
# Architecture constants (W of the NCHW input is always 1 and is squeezed).
# ---------------------------------------------------------------------------
H0 = 250          # input height; forced by Flatten -> Linear(600): 200*3*1 == 600
C0 = 22
LAYER_CFG = [     # (kh, stride, pad, Cin, Cout)
    (11, 3, 5, 22, 25),
    (11, 3, 4, 25, 50),
    (3,  3, 1, 50, 100),
    (4,  3, 0, 100, 200),
]
N_CLASSES = 4
HEAD_OUT = 1 + N_CLASSES       # fused [dense | aux1]
HEAD_PAD = 8                   # head output padded to 8 lanes (cols 5..7 are zero)
TB = 16                        # batch elements per grid step (== one bf16 sublane tile)


def _round_up(x, m):
    return (x + m - 1) // m * m


def _geometry():
    """Per-layer geometry for the stride-3 phase decomposition.

    Activations are stored (H, TB, C).  Each conv input is zero-padded along H
    to `hp3` rows (left pad `off`, a multiple of 3 >= pad), reshaped to
    (hp3//3, 3, TB, C) and its 3 phases merged into lanes -> rows of 3*Cin.
    Output position j, tap t reads padded row 3*j + (t + d) (d = off - pad),
    i.e. merged row j + r, lane block m with (r, m) = divmod(t + d, 3), so the
    conv is G = max_r + 1 matmul-accumulates with K = 3*Cin and M = Hout*TB.
    Missing (r, m) slots at the boundaries get zero weights (exact).
    """
    geom = []
    hin = H0
    for (kh, s, pad, cin, cout) in LAYER_CFG:
        assert s == 3, "phase decomposition assumes stride 3"
        hout = (hin + 2 * pad - kh) // s + 1
        off = _round_up(pad, 3)
        d = off - pad
        G = (kh - 1 + d) // 3 + 1
        hp3 = 3 * max(hout + G - 1, -(-(off + hin) // 3))
        pr = hp3 - off - hin
        assert pr >= 0
        geom.append(dict(hin=hin, hout=hout, off=off, pr=pr, hp3=hp3, G=G, d=d))
        hin = hout
    return geom


GEOM = _geometry()               # Hout per layer: 84, 28, 10, 3
H4 = GEOM[-1]["hout"]            # 3
C4 = LAYER_CFG[-1][4]            # 200
assert C4 * H4 == 600


# ---------------------------------------------------------------------------
# Fused Pallas kernel: TB batch elements per grid step.
# ---------------------------------------------------------------------------
def _fused_disc_kernel(x_ref, w1, b1, w2, b2, w3, b3, w4, b4, wh, bh, out_ref):
    act = x_ref[...]                                         # (H0, TB, C0) bf16

    for (w_ref, b_ref), (kh, _s, pad, cin, cout), geo in zip(
            [(w1, b1), (w2, b2), (w3, b3), (w4, b4)], LAYER_CFG, GEOM):
        hout, off, pr, hp3, G = geo["hout"], geo["off"], geo["pr"], geo["hp3"], geo["G"]

        # Explicit zero padding along H (leading, untiled axis -> tile-granular
        # concat; padding rows are exact zeros, no inert-row bookkeeping).
        pieces = []
        if off:
            pieces.append(jnp.zeros((off, TB, cin), jnp.bfloat16))
        pieces.append(act)
        if pr:
            pieces.append(jnp.zeros((pr, TB, cin), jnp.bfloat16))
        apad = jnp.concatenate(pieces, axis=0) if len(pieces) > 1 else act

        # Fold the 3 stride phases into the lane axis: (hp3//3, TB, 3*cin).
        apr = apad.reshape(hp3 // 3, 3, TB, cin)
        amerged = jnp.concatenate([apr[:, m] for m in range(3)], axis=-1)

        # G macro-tap matmul-accumulates: M = hout*TB, K = 3*cin, N = cout.
        # Accumulator initialized with the first matmul + broadcast bias.
        def macro_slab(r):
            return amerged[r:r + hout].reshape(hout * TB, 3 * cin)

        acc = jnp.dot(macro_slab(0), w_ref[0],
                      preferred_element_type=jnp.float32) + b_ref[...]
        for r in range(1, G):                                 # static unroll
            acc = acc + jnp.dot(macro_slab(r), w_ref[r],
                                preferred_element_type=jnp.float32)

        # Bias+ReLU in f32, cast to bf16 once, back to (hout, TB, cout).
        act = jnp.maximum(acc, 0.0).astype(jnp.bfloat16).reshape(hout, TB, cout)

    # Fused heads [dense | aux1 | zero pad]: Flatten(NCHW, W=1) over the H4=3
    # spatial rows with the head weight re-ordered to (h, c, out).
    head = jnp.dot(act[0], wh[0], preferred_element_type=jnp.float32) + bh[...]
    for h in range(1, H4):                                    # static unroll
        head = head + jnp.dot(act[h], wh[h], preferred_element_type=jnp.float32)
    out_ref[...] = head                                       # (TB, HEAD_PAD) f32


# ---------------------------------------------------------------------------
# Parameters (synthetic, deterministic) and one-time host-side preprocessing.
# ---------------------------------------------------------------------------
def init_params(key):
    ks = jax.random.split(key, 6)
    p = {}
    for li, (kh, _, _, cin, cout) in enumerate(LAYER_CFG):
        p[f"conv{li + 1}"] = (
            jax.random.normal(ks[li], (cout, cin, kh), jnp.float32) * 0.02,
            jnp.zeros((cout,), jnp.float32))
    # Linear weights stored (in, out).
    # TODO(synk): transpose real PyTorch (out, in) Linear weights on import.
    p["dense"] = (jax.random.normal(ks[4], (600, 1), jnp.float32) * 0.02,
                  jnp.zeros((1,), jnp.float32))
    p["aux1"] = (jax.random.normal(ks[5], (600, N_CLASSES), jnp.float32) * 0.02,
                 jnp.zeros((N_CLASSES,), jnp.float32))
    return p


def prepare_tables(params):
    """Macro-tap conv weights (G, 3*Cin, Cout), biases (1, Cout) and the fused,
    re-ordered, lane-padded head weight/bias.  Called once, outside jit."""
    tables = {}
    for li, ((kh, _, pad, cin, cout), geo) in enumerate(zip(LAYER_CFG, GEOM)):
        w, b = params[f"conv{li + 1}"]                 # w: (Cout, Cin, kh)
        wm = np.zeros((geo["G"], 3, cin, cout), np.float32)
        for t in range(kh):
            r, m = divmod(t + geo["d"], 3)
            wm[r, m] = np.asarray(w)[:, :, t].T        # (Cin, Cout)
        tables[f"w{li + 1}"] = jnp.asarray(wm.reshape(geo["G"], 3 * cin, cout),
                                           jnp.bfloat16)
        tables[f"b{li + 1}"] = jnp.asarray(np.asarray(b).reshape(1, cout),
                                           jnp.float32)

    wd, bd = params["dense"]
    wa, ba = params["aux1"]
    w_cat = np.concatenate([np.asarray(wd), np.asarray(wa)], axis=1)   # (600, 5)
    b_cat = np.concatenate([np.asarray(bd), np.asarray(ba)], axis=0)   # (5,)
    # PyTorch flatten index = c*H4 + h  ->  re-order to (h, c, out), pad to 8.
    wh = np.zeros((H4, C4, HEAD_PAD), np.float32)
    wh[:, :, :HEAD_OUT] = w_cat.reshape(C4, H4, HEAD_OUT).transpose(1, 0, 2)
    bh = np.zeros((1, HEAD_PAD), np.float32)
    bh[0, :HEAD_OUT] = b_cat
    tables["wh"] = jnp.asarray(wh, jnp.bfloat16)
    tables["bh"] = jnp.asarray(bh, jnp.float32)
    return tables


_IN_KEYS = ["w1", "b1", "w2", "b2", "w3", "b3", "w4", "b4", "wh", "bh"]


def _const_spec(arr):
    zeros = (0,) * arr.ndim
    return pl.BlockSpec(arr.shape, lambda i, _z=zeros: _z)   # full-array, resident


def _cost_estimate(npad, tables):
    flops = 0
    for (_, _, _, cin, cout), geo in zip(LAYER_CFG, GEOM):
        flops += 2 * geo["G"] * geo["hout"] * (3 * cin) * cout
    flops += 2 * H4 * C4 * HEAD_PAD
    flops *= npad
    table_bytes = sum(int(np.prod(tables[k].shape)) * tables[k].dtype.itemsize
                      for k in _IN_KEYS)
    bytes_accessed = npad * H0 * C0 * 2 + table_bytes + npad * HEAD_PAD * 4
    return pl.CostEstimate(flops=flops, transcendentals=0,
                           bytes_accessed=bytes_accessed)


# ---------------------------------------------------------------------------
# Forward pass (matches discriminator.forward, eval mode)
# ---------------------------------------------------------------------------
def discriminator_forward(tables, x_nchw):
    # x_nchw: (N, 22, 250, 1) float32 (NCHW, same as PyTorch; W == 1).
    n = x_nchw.shape[0]
    npad = _round_up(n, TB)
    # Channel-last, batch on the sublane axis: (H0, Npad, C0), shipped as bf16
    # (matmul operands are bf16 anyway; accumulation stays f32).
    x = jnp.transpose(x_nchw[..., 0], (2, 0, 1)).astype(jnp.bfloat16)
    if npad != n:
        x = jnp.pad(x, ((0, 0), (0, npad - n), (0, 0)))

    ins = [x] + [tables[k] for k in _IN_KEYS]
    in_specs = [pl.BlockSpec((H0, TB, C0), lambda i: (0, i, 0))] + \
               [_const_spec(tables[k]) for k in _IN_KEYS]

    out = pl.pallas_call(
        _fused_disc_kernel,
        grid=(npad // TB,),
        in_specs=in_specs,
        out_specs=pl.BlockSpec((TB, HEAD_PAD), lambda i: (i, 0)),
        out_shape=jax.ShapeDtypeStruct((npad, HEAD_PAD), jnp.float32),
        compiler_params=pltpu.CompilerParams(dimension_semantics=("parallel",)),
        cost_estimate=_cost_estimate(npad, tables),
    )(*ins)
    return out[:n, 0:1], out[:n, 1:1 + N_CLASSES]            # (N, 1), (N, 4)


# ---------------------------------------------------------------------------
# Pure-jnp reference (f32, same math) for a loose numeric cross-check.
# ---------------------------------------------------------------------------
def _reference_forward(params, x_nchw):
    x = x_nchw[..., 0]                                        # (N, C, H)
    for li, (kh, s, p, _, cout) in enumerate(LAYER_CFG):
        w, b = params[f"conv{li + 1}"]
        n, c, h = x.shape
        xp = jnp.pad(x, ((0, 0), (0, 0), (p, p)))
        hout = (h + 2 * p - kh) // s + 1
        idx = jnp.arange(hout)[:, None] * s + jnp.arange(kh)[None, :]
        patches = xp[:, :, idx]                               # (N, C, Hout, kh)
        patches = jnp.transpose(patches, (0, 2, 1, 3)).reshape(n * hout, c * kh)
        wm = jnp.transpose(w.reshape(cout, c * kh))
        y = jnp.maximum(patches @ wm + b[None, :], 0.0)
        x = jnp.transpose(y.reshape(n, hout, cout), (0, 2, 1))
    n = x.shape[0]
    flat = x.reshape(n, -1)                                   # (N, 600), c-major
    out = flat @ params["dense"][0] + params["dense"][1]
    aux = flat @ params["aux1"][0] + params["aux1"][1]
    return out, aux


if __name__ == "__main__":
    key = jax.random.PRNGKey(0)
    pkey, xkey = jax.random.split(key)
    params = init_params(pkey)
    tables = prepare_tables(params)          # one-time host-side preprocessing

    # Input shape implied by the module: Flatten -> Linear(600) forces
    # 200 * H4 * W == 600, i.e. H=250, W=1 (22-channel EEG-style window).
    x = jax.random.normal(xkey, (2, 22, H0, 1), jnp.float32)

    fwd = jax.jit(discriminator_forward)
    out, auxout = fwd(tables, x)
    jax.block_until_ready((out, auxout))

    assert out.shape == (2, 1), out.shape
    assert auxout.shape == (2, 4), auxout.shape
    assert jnp.isfinite(out).all() and jnp.isfinite(auxout).all()

    # Loose cross-check vs f32 reference (kernel uses bf16 MXU operands).
    ref_out, ref_aux = _reference_forward(params, x)
    np.testing.assert_allclose(np.asarray(out), np.asarray(ref_out),
                               rtol=0.1, atol=2e-3)
    np.testing.assert_allclose(np.asarray(auxout), np.asarray(ref_aux),
                               rtol=0.1, atol=2e-3)

    print("KERNEL_OK")
</pallas_src>

<mosaic_0001>
module attributes {stable_mosaic.version = 11 : i64} {
  func.func @_fused_disc_kernel(%arg0: i32, %arg1: memref<250x16x22xbf16, #tpu.memory_space<vmem>>, %arg2: memref<4x66x25xbf16, #tpu.memory_space<vmem>>, %arg3: memref<1x25xf32, #tpu.memory_space<vmem>>, %arg4: memref<5x75x50xbf16, #tpu.memory_space<vmem>>, %arg5: memref<1x50xf32, #tpu.memory_space<vmem>>, %arg6: memref<2x150x100xbf16, #tpu.memory_space<vmem>>, %arg7: memref<1x100xf32, #tpu.memory_space<vmem>>, %arg8: memref<2x300x200xbf16, #tpu.memory_space<vmem>>, %arg9: memref<1x200xf32, #tpu.memory_space<vmem>>, %arg10: memref<3x200x8xbf16, #tpu.memory_space<vmem>>, %arg11: memref<1x8xf32, #tpu.memory_space<vmem>>, %arg12: memref<16x8xf32, #tpu.memory_space<vmem>>) attributes {dimension_semantics = [#tpu.dimension_semantics<parallel>], iteration_bounds = array<i64: 1>, scalar_prefetch = 0 : i64, scratch_operands = 0 : i64, tpu.core_type = #tpu.core_type<tc>, window_params = [{transform_indices = @transform_0, window_bounds = array<i64: 250, 16, 22>}, {pipeline_mode = #tpu.pipeline_mode<synchronous>, transform_indices = @transform_1, window_bounds = array<i64: 4, 66, 25>}, {pipeline_mode = #tpu.pipeline_mode<synchronous>, transform_indices = @transform_2, window_bounds = array<i64: 1, 25>}, {pipeline_mode = #tpu.pipeline_mode<synchronous>, transform_indices = @transform_3, window_bounds = array<i64: 5, 75, 50>}, {pipeline_mode = #tpu.pipeline_mode<synchronous>, transform_indices = @transform_4, window_bounds = array<i64: 1, 50>}, {pipeline_mode = #tpu.pipeline_mode<synchronous>, transform_indices = @transform_5, window_bounds = array<i64: 2, 150, 100>}, {pipeline_mode = #tpu.pipeline_mode<synchronous>, transform_indices = @transform_6, window_bounds = array<i64: 1, 100>}, {pipeline_mode = #tpu.pipeline_mode<synchronous>, transform_indices = @transform_7, window_bounds = array<i64: 2, 300, 200>}, {pipeline_mode = #tpu.pipeline_mode<synchronous>, transform_indices = @transform_8, window_bounds = array<i64: 1, 200>}, {pipeline_mode = #tpu.pipeline_mode<synchronous>, transform_indices = @transform_9, window_bounds = array<i64: 3, 200, 8>}, {pipeline_mode = #tpu.pipeline_mode<synchronous>, transform_indices = @transform_10, window_bounds = array<i64: 1, 8>}, {transform_indices = @transform_11, window_bounds = array<i64: 16, 8>}]} {
    %c0 = arith.constant 0 : index
    %c0_0 = arith.constant 0 : index
    %c0_1 = arith.constant 0 : index
    %0 = vector.load %arg1[%c0, %c0_0, %c0_1] : memref<250x16x22xbf16, #tpu.memory_space<vmem>>, vector<250x16x22xbf16>
    %cst = arith.constant 0.000000e+00 : bf16
    %1 = vector.broadcast %cst : bf16 to vector<6x16x22xbf16>
    %cst_2 = arith.constant 0.000000e+00 : bf16
    %2 = vector.broadcast %cst_2 : bf16 to vector<5x16x22xbf16>
    %3 = tpu.concatenate %1, %0, %2 in 0 : vector<6x16x22xbf16>, vector<250x16x22xbf16>, vector<5x16x22xbf16> -> vector<261x16x22xbf16>
    %4 = vector.shape_cast %3 : vector<261x16x22xbf16> to vector<87x3x16x22xbf16>
    %5 = vector.extract_strided_slice %4 {offsets = [0, 0, 0, 0], sizes = [87, 1, 16, 22], strides = [1, 1, 1, 1]} : vector<87x3x16x22xbf16> to vector<87x1x16x22xbf16>
    %6 = vector.shape_cast %5 : vector<87x1x16x22xbf16> to vector<87x16x22xbf16>
    %7 = vector.extract_strided_slice %4 {offsets = [0, 1, 0, 0], sizes = [87, 1, 16, 22], strides = [1, 1, 1, 1]} : vector<87x3x16x22xbf16> to vector<87x1x16x22xbf16>
    %8 = vector.shape_cast %7 : vector<87x1x16x22xbf16> to vector<87x16x22xbf16>
    %9 = vector.extract_strided_slice %4 {offsets = [0, 2, 0, 0], sizes = [87, 1, 16, 22], strides = [1, 1, 1, 1]} : vector<87x3x16x22xbf16> to vector<87x1x16x22xbf16>
    %10 = vector.shape_cast %9 : vector<87x1x16x22xbf16> to vector<87x16x22xbf16>
    %11 = tpu.concatenate %6, %8, %10 in 2 : vector<87x16x22xbf16>, vector<87x16x22xbf16>, vector<87x16x22xbf16> -> vector<87x16x66xbf16>
    %12 = vector.extract_strided_slice %11 {offsets = [0, 0, 0], sizes = [84, 16, 66], strides = [1, 1, 1]} : vector<87x16x66xbf16> to vector<84x16x66xbf16>
    %13 = vector.shape_cast %12 : vector<84x16x66xbf16> to vector<1344x66xbf16>
    %c0_3 = arith.constant 0 : index
    %c0_4 = arith.constant 0 : index
    %c0_5 = arith.constant 0 : index
    %14 = vector.load %arg2[%c0_3, %c0_4, %c0_5] : memref<4x66x25xbf16, #tpu.memory_space<vmem>>, vector<1x66x25xbf16>
    %15 = vector.shape_cast %14 : vector<1x66x25xbf16> to vector<66x25xbf16>
    %cst_6 = arith.constant dense<0.000000e+00> : vector<1344x25xf32>
    %16 = tpu.matmul %13, %15, %cst_6 {dimension_numbers = #tpu.dot_dimension_numbers<[1], [0], [0], [1], [0, 0, 1, 1], [], []>} : vector<1344x66xbf16>, vector<66x25xbf16>, vector<1344x25xf32> -> vector<1344x25xf32>
    %c0_7 = arith.constant 0 : index
    %c0_8 = arith.constant 0 : index
    %17 = vector.load %arg3[%c0_7, %c0_8] : memref<1x25xf32, #tpu.memory_space<vmem>>, vector<1x25xf32>
    %18 = vector.broadcast %17 : vector<1x25xf32> to vector<1344x25xf32>
    %19 = arith.addf %16, %18 : vector<1344x25xf32>
    %20 = vector.extract_strided_slice %11 {offsets = [1, 0, 0], sizes = [84, 16, 66], strides = [1, 1, 1]} : vector<87x16x66xbf16> to vector<84x16x66xbf16>
    %21 = vector.shape_cast %20 : vector<84x16x66xbf16> to vector<1344x66xbf16>
    %c1 = arith.constant 1 : index
    %c0_9 = arith.constant 0 : index
    %c0_10 = arith.constant 0 : index
    %22 = vector.load %arg2[%c1, %c0_9, %c0_10] : memref<4x66x25xbf16, #tpu.memory_space<vmem>>, vector<1x66x25xbf16>
    %23 = vector.shape_cast %22 : vector<1x66x25xbf16> to vector<66x25xbf16>
    %cst_11 = arith.constant dense<0.000000e+00> : vector<1344x25xf32>
    %24 = tpu.matmul %21, %23, %cst_11 {dimension_numbers = #tpu.dot_dimension_numbers<[1], [0], [0], [1], [0, 0, 1, 1], [], []>} : vector<1344x66xbf16>, vector<66x25xbf16>, vector<1344x25xf32> -> vector<1344x25xf32>
    %25 = arith.addf %19, %24 : vector<1344x25xf32>
    %26 = vector.extract_strided_slice %11 {offsets = [2, 0, 0], sizes = [84, 16, 66], strides = [1, 1, 1]} : vector<87x16x66xbf16> to vector<84x16x66xbf16>
    %27 = vector.shape_cast %26 : vector<84x16x66xbf16> to vector<1344x66xbf16>
    %c2 = arith.constant 2 : index
    %c0_12 = arith.constant 0 : index
    %c0_13 = arith.constant 0 : index
    %28 = vector.load %arg2[%c2, %c0_12, %c0_13] : memref<4x66x25xbf16, #tpu.memory_space<vmem>>, vector<1x66x25xbf16>
    %29 = vector.shape_cast %28 : vector<1x66x25xbf16> to vector<66x25xbf16>
    %cst_14 = arith.constant dense<0.000000e+00> : vector<1344x25xf32>
    %30 = tpu.matmul %27, %29, %cst_14 {dimension_numbers = #tpu.dot_dimension_numbers<[1], [0], [0], [1], [0, 0, 1, 1], [], []>} : vector<1344x66xbf16>, vector<66x25xbf16>, vector<1344x25xf32> -> vector<1344x25xf32>
    %31 = arith.addf %25, %30 : vector<1344x25xf32>
    %32 = vector.extract_strided_slice %11 {offsets = [3, 0, 0], sizes = [84, 16, 66], strides = [1, 1, 1]} : vector<87x16x66xbf16> to vector<84x16x66xbf16>
    %33 = vector.shape_cast %32 : vector<84x16x66xbf16> to vector<1344x66xbf16>
    %c3 = arith.constant 3 : index
    %c0_15 = arith.constant 0 : index
    %c0_16 = arith.constant 0 : index
    %34 = vector.load %arg2[%c3, %c0_15, %c0_16] : memref<4x66x25xbf16, #tpu.memory_space<vmem>>, vector<1x66x25xbf16>
    %35 = vector.shape_cast %34 : vector<1x66x25xbf16> to vector<66x25xbf16>
    %cst_17 = arith.constant dense<0.000000e+00> : vector<1344x25xf32>
    %36 = tpu.matmul %33, %35, %cst_17 {dimension_numbers = #tpu.dot_dimension_numbers<[1], [0], [0], [1], [0, 0, 1, 1], [], []>} : vector<1344x66xbf16>, vector<66x25xbf16>, vector<1344x25xf32> -> vector<1344x25xf32>
    %37 = arith.addf %31, %36 : vector<1344x25xf32>
    %cst_18 = arith.constant 0.000000e+00 : f32
    %38 = vector.broadcast %cst_18 : f32 to vector<1344x25xf32>
    %39 = arith.maximumf %37, %38 : vector<1344x25xf32>
    %40 = arith.truncf %39 : vector<1344x25xf32> to vector<1344x25xbf16>
    %41 = vector.shape_cast %40 : vector<1344x25xbf16> to vector<84x16x25xbf16>
    %cst_19 = arith.constant 0.000000e+00 : bf16
    %42 = vector.broadcast %cst_19 : bf16 to vector<6x16x25xbf16>
    %cst_20 = arith.constant 0.000000e+00 : bf16
    %43 = vector.broadcast %cst_20 : bf16 to vector<6x16x25xbf16>
    %44 = tpu.concatenate %42, %41, %43 in 0 : vector<6x16x25xbf16>, vector<84x16x25xbf16>, vector<6x16x25xbf16> -> vector<96x16x25xbf16>
    %45 = vector.shape_cast %44 : vector<96x16x25xbf16> to vector<32x3x16x25xbf16>
    %46 = vector.extract_strided_slice %45 {offsets = [0, 0, 0, 0], sizes = [32, 1, 16, 25], strides = [1, 1, 1, 1]} : vector<32x3x16x25xbf16> to vector<32x1x16x25xbf16>
    %47 = vector.shape_cast %46 : vector<32x1x16x25xbf16> to vector<32x16x25xbf16>
    %48 = vector.extract_strided_slice %45 {offsets = [0, 1, 0, 0], sizes = [32, 1, 16, 25], strides = [1, 1, 1, 1]} : vector<32x3x16x25xbf16> to vector<32x1x16x25xbf16>
    %49 = vector.shape_cast %48 : vector<32x1x16x25xbf16> to vector<32x16x25xbf16>
    %50 = vector.extract_strided_slice %45 {offsets = [0, 2, 0, 0], sizes = [32, 1, 16, 25], strides = [1, 1, 1, 1]} : vector<32x3x16x25xbf16> to vector<32x1x16x25xbf16>
    %51 = vector.shape_cast %50 : vector<32x1x16x25xbf16> to vector<32x16x25xbf16>
    %52 = tpu.concatenate %47, %49, %51 in 2 : vector<32x16x25xbf16>, vector<32x16x25xbf16>, vector<32x16x25xbf16> -> vector<32x16x75xbf16>
    %53 = vector.extract_strided_slice %52 {offsets = [0, 0, 0], sizes = [28, 16, 75], strides = [1, 1, 1]} : vector<32x16x75xbf16> to vector<28x16x75xbf16>
    %54 = vector.shape_cast %53 : vector<28x16x75xbf16> to vector<448x75xbf16>
    %c0_21 = arith.constant 0 : index
    %c0_22 = arith.constant 0 : index
    %c0_23 = arith.constant 0 : index
    %55 = vector.load %arg4[%c0_21, %c0_22, %c0_23] : memref<5x75x50xbf16, #tpu.memory_space<vmem>>, vector<1x75x50xbf16>
    %56 = vector.shape_cast %55 : vector<1x75x50xbf16> to vector<75x50xbf16>
    %cst_24 = arith.constant dense<0.000000e+00> : vector<448x50xf32>
    %57 = tpu.matmul %54, %56, %cst_24 {dimension_numbers = #tpu.dot_dimension_numbers<[1], [0], [0], [1], [0, 0, 1, 1], [], []>} : vector<448x75xbf16>, vector<75x50xbf16>, vector<448x50xf32> -> vector<448x50xf32>
    %c0_25 = arith.constant 0 : index
    %c0_26 = arith.constant 0 : index
    %58 = vector.load %arg5[%c0_25, %c0_26] : memref<1x50xf32, #tpu.memory_space<vmem>>, vector<1x50xf32>
    %59 = vector.broadcast %58 : vector<1x50xf32> to vector<448x50xf32>
    %60 = arith.addf %57, %59 : vector<448x50xf32>
    %61 = vector.extract_strided_slice %52 {offsets = [1, 0, 0], sizes = [28, 16, 75], strides = [1, 1, 1]} : vector<32x16x75xbf16> to vector<28x16x75xbf16>
    %62 = vector.shape_cast %61 : vector<28x16x75xbf16> to vector<448x75xbf16>
    %c1_27 = arith.constant 1 : index
    %c0_28 = arith.constant 0 : index
    %c0_29 = arith.constant 0 : index
    %63 = vector.load %arg4[%c1_27, %c0_28, %c0_29] : memref<5x75x50xbf16, #tpu.memory_space<vmem>>, vector<1x75x50xbf16>
    %64 = vector.shape_cast %63 : vector<1x75x50xbf16> to vector<75x50xbf16>
    %cst_30 = arith.constant dense<0.000000e+00> : vector<448x50xf32>
    %65 = tpu.matmul %62, %64, %cst_30 {dimension_numbers = #tpu.dot_dimension_numbers<[1], [0], [0], [1], [0, 0, 1, 1], [], []>} : vector<448x75xbf16>, vector<75x50xbf16>, vector<448x50xf32> -> vector<448x50xf32>
    %66 = arith.addf %60, %65 : vector<448x50xf32>
    %67 = vector.extract_strided_slice %52 {offsets = [2, 0, 0], sizes = [28, 16, 75], strides = [1, 1, 1]} : vector<32x16x75xbf16> to vector<28x16x75xbf16>
    %68 = vector.shape_cast %67 : vector<28x16x75xbf16> to vector<448x75xbf16>
    %c2_31 = arith.constant 2 : index
    %c0_32 = arith.constant 0 : index
    %c0_33 = arith.constant 0 : index
    %69 = vector.load %arg4[%c2_31, %c0_32, %c0_33] : memref<5x75x50xbf16, #tpu.memory_space<vmem>>, vector<1x75x50xbf16>
    %70 = vector.shape_cast %69 : vector<1x75x50xbf16> to vector<75x50xbf16>
    %cst_34 = arith.constant dense<0.000000e+00> : vector<448x50xf32>
    %71 = tpu.matmul %68, %70, %cst_34 {dimension_numbers = #tpu.dot_dimension_numbers<[1], [0], [0], [1], [0, 0, 1, 1], [], []>} : vector<448x75xbf16>, vector<75x50xbf16>, vector<448x50xf32> -> vector<448x50xf32>
    %72 = arith.addf %66, %71 : vector<448x50xf32>
    %73 = vector.extract_strided_slice %52 {offsets = [3, 0, 0], sizes = [28, 16, 75], strides = [1, 1, 1]} : vector<32x16x75xbf16> to vector<28x16x75xbf16>
    %74 = vector.shape_cast %73 : vector<28x16x75xbf16> to vector<448x75xbf16>
    %c3_35 = arith.constant 3 : index
    %c0_36 = arith.constant 0 : index
    %c0_37 = arith.constant 0 : index
    %75 = vector.load %arg4[%c3_35, %c0_36, %c0_37] : memref<5x75x50xbf16, #tpu.memory_space<vmem>>, vector<1x75x50xbf16>
    %76 = vector.shape_cast %75 : vector<1x75x50xbf16> to vector<75x50xbf16>
    %cst_38 = arith.constant dense<0.000000e+00> : vector<448x50xf32>
    %77 = tpu.matmul %74, %76, %cst_38 {dimension_numbers = #tpu.dot_dimension_numbers<[1], [0], [0], [1], [0, 0, 1, 1], [], []>} : vector<448x75xbf16>, vector<75x50xbf16>, vector<448x50xf32> -> vector<448x50xf32>
    %78 = arith.addf %72, %77 : vector<448x50xf32>
    %79 = vector.extract_strided_slice %52 {offsets = [4, 0, 0], sizes = [28, 16, 75], strides = [1, 1, 1]} : vector<32x16x75xbf16> to vector<28x16x75xbf16>
    %80 = vector.shape_cast %79 : vector<28x16x75xbf16> to vector<448x75xbf16>
    %c4 = arith.constant 4 : index
    %c0_39 = arith.constant 0 : index
    %c0_40 = arith.constant 0 : index
    %81 = vector.load %arg4[%c4, %c0_39, %c0_40] : memref<5x75x50xbf16, #tpu.memory_space<vmem>>, vector<1x75x50xbf16>
    %82 = vector.shape_cast %81 : vector<1x75x50xbf16> to vector<75x50xbf16>
    %cst_41 = arith.constant dense<0.000000e+00> : vector<448x50xf32>
    %83 = tpu.matmul %80, %82, %cst_41 {dimension_numbers = #tpu.dot_dimension_numbers<[1], [0], [0], [1], [0, 0, 1, 1], [], []>} : vector<448x75xbf16>, vector<75x50xbf16>, vector<448x50xf32> -> vector<448x50xf32>
    %84 = arith.addf %78, %83 : vector<448x50xf32>
    %cst_42 = arith.constant 0.000000e+00 : f32
    %85 = vector.broadcast %cst_42 : f32 to vector<448x50xf32>
    %86 = arith.maximumf %84, %85 : vector<448x50xf32>
    %87 = arith.truncf %86 : vector<448x50xf32> to vector<448x50xbf16>
    %88 = vector.shape_cast %87 : vector<448x50xbf16> to vector<28x16x50xbf16>
    %cst_43 = arith.constant 0.000000e+00 : bf16
    %89 = vector.broadcast %cst_43 : bf16 to vector<3x16x50xbf16>
    %cst_44 = arith.constant 0.000000e+00 : bf16
    %90 = vector.broadcast %cst_44 : bf16 to vector<2x16x50xbf16>
    %91 = tpu.concatenate %89, %88, %90 in 0 : vector<3x16x50xbf16>, vector<28x16x50xbf16>, vector<2x16x50xbf16> -> vector<33x16x50xbf16>
    %92 = vector.shape_cast %91 : vector<33x16x50xbf16> to vector<11x3x16x50xbf16>
    %93 = vector.extract_strided_slice %92 {offsets = [0, 0, 0, 0], sizes = [11, 1, 16, 50], strides = [1, 1, 1, 1]} : vector<11x3x16x50xbf16> to vector<11x1x16x50xbf16>
    %94 = vector.shape_cast %93 : vector<11x1x16x50xbf16> to vector<11x16x50xbf16>
    %95 = vector.extract_strided_slice %92 {offsets = [0, 1, 0, 0], sizes = [11, 1, 16, 50], strides = [1, 1, 1, 1]} : vector<11x3x16x50xbf16> to vector<11x1x16x50xbf16>
    %96 = vector.shape_cast %95 : vector<11x1x16x50xbf16> to vector<11x16x50xbf16>
    %97 = vector.extract_strided_slice %92 {offsets = [0, 2, 0, 0], sizes = [11, 1, 16, 50], strides = [1, 1, 1, 1]} : vector<11x3x16x50xbf16> to vector<11x1x16x50xbf16>
    %98 = vector.shape_cast %97 : vector<11x1x16x50xbf16> to vector<11x16x50xbf16>
    %99 = tpu.concatenate %94, %96, %98 in 2 : vector<11x16x50xbf16>, vector<11x16x50xbf16>, vector<11x16x50xbf16> -> vector<11x16x150xbf16>
    %100 = vector.extract_strided_slice %99 {offsets = [0, 0, 0], sizes = [10, 16, 150], strides = [1, 1, 1]} : vector<11x16x150xbf16> to vector<10x16x150xbf16>
    %101 = vector.shape_cast %100 : vector<10x16x150xbf16> to vector<160x150xbf16>
    %c0_45 = arith.constant 0 : index
    %c0_46 = arith.constant 0 : index
    %c0_47 = arith.constant 0 : index
    %102 = vector.load %arg6[%c0_45, %c0_46, %c0_47] : memref<2x150x100xbf16, #tpu.memory_space<vmem>>, vector<1x150x100xbf16>
    %103 = vector.shape_cast %102 : vector<1x150x100xbf16> to vector<150x100xbf16>
    %cst_48 = arith.constant dense<0.000000e+00> : vector<160x100xf32>
    %104 = tpu.matmul %101, %103, %cst_48 {dimension_numbers = #tpu.dot_dimension_numbers<[1], [0], [0], [1], [0, 0, 1, 1], [], []>} : vector<160x150xbf16>, vector<150x100xbf16>, vector<160x100xf32> -> vector<160x100xf32>
    %c0_49 = arith.constant 0 : index
    %c0_50 = arith.constant 0 : index
    %105 = vector.load %arg7[%c0_49, %c0_50] : memref<1x100xf32, #tpu.memory_space<vmem>>, vector<1x100xf32>
    %106 = vector.broadcast %105 : vector<1x100xf32> to vector<160x100xf32>
    %107 = arith.addf %104, %106 : vector<160x100xf32>
    %108 = vector.extract_strided_slice %99 {offsets = [1, 0, 0], sizes = [10, 16, 150], strides = [1, 1, 1]} : vector<11x16x150xbf16> to vector<10x16x150xbf16>
    %109 = vector.shape_cast %108 : vector<10x16x150xbf16> to vector<160x150xbf16>
    %c1_51 = arith.constant 1 : index
    %c0_52 = arith.constant 0 : index
    %c0_53 = arith.constant 0 : index
    %110 = vector.load %arg6[%c1_51, %c0_52, %c0_53] : memref<2x150x100xbf16, #tpu.memory_space<vmem>>, vector<1x150x100xbf16>
    %111 = vector.shape_cast %110 : vector<1x150x100xbf16> to vector<150x100xbf16>
    %cst_54 = arith.constant dense<0.000000e+00> : vector<160x100xf32>
    %112 = tpu.matmul %109, %111, %cst_54 {dimension_numbers = #tpu.dot_dimension_numbers<[1], [0], [0], [1], [0, 0, 1, 1], [], []>} : vector<160x150xbf16>, vector<150x100xbf16>, vector<160x100xf32> -> vector<160x100xf32>
    %113 = arith.addf %107, %112 : vector<160x100xf32>
    %cst_55 = arith.constant 0.000000e+00 : f32
    %114 = vector.broadcast %cst_55 : f32 to vector<160x100xf32>
    %115 = arith.maximumf %113, %114 : vector<160x100xf32>
    %116 = arith.truncf %115 : vector<160x100xf32> to vector<160x100xbf16>
    %117 = vector.shape_cast %116 : vector<160x100xbf16> to vector<10x16x100xbf16>
    %cst_56 = arith.constant 0.000000e+00 : bf16
    %118 = vector.broadcast %cst_56 : bf16 to vector<2x16x100xbf16>
    %119 = tpu.concatenate %117, %118 in 0 : vector<10x16x100xbf16>, vector<2x16x100xbf16> -> vector<12x16x100xbf16>
    %120 = vector.shape_cast %119 : vector<12x16x100xbf16> to vector<4x3x16x100xbf16>
    %121 = vector.extract_strided_slice %120 {offsets = [0, 0, 0, 0], sizes = [4, 1, 16, 100], strides = [1, 1, 1, 1]} : vector<4x3x16x100xbf16> to vector<4x1x16x100xbf16>
    %122 = vector.shape_cast %121 : vector<4x1x16x100xbf16> to vector<4x16x100xbf16>
    %123 = vector.extract_strided_slice %120 {offsets = [0, 1, 0, 0], sizes = [4, 1, 16, 100], strides = [1, 1, 1, 1]} : vector<4x3x16x100xbf16> to vector<4x1x16x100xbf16>
    %124 = vector.shape_cast %123 : vector<4x1x16x100xbf16> to vector<4x16x100xbf16>
    %125 = vector.extract_strided_slice %120 {offsets = [0, 2, 0, 0], sizes = [4, 1, 16, 100], strides = [1, 1, 1, 1]} : vector<4x3x16x100xbf16> to vector<4x1x16x100xbf16>
    %126 = vector.shape_cast %125 : vector<4x1x16x100xbf16> to vector<4x16x100xbf16>
    %127 = tpu.concatenate %122, %124, %126 in 2 : vector<4x16x100xbf16>, vector<4x16x100xbf16>, vector<4x16x100xbf16> -> vector<4x16x300xbf16>
    %128 = vector.extract_strided_slice %127 {offsets = [0, 0, 0], sizes = [3, 16, 300], strides = [1, 1, 1]} : vector<4x16x300xbf16> to vector<3x16x300xbf16>
    %129 = vector.shape_cast %128 : vector<3x16x300xbf16> to vector<48x300xbf16>
    %c0_57 = arith.constant 0 : index
    %c0_58 = arith.constant 0 : index
    %c0_59 = arith.constant 0 : index
    %130 = vector.load %arg8[%c0_57, %c0_58, %c0_59] : memref<2x300x200xbf16, #tpu.memory_space<vmem>>, vector<1x300x200xbf16>
    %131 = vector.shape_cast %130 : vector<1x300x200xbf16> to vector<300x200xbf16>
    %cst_60 = arith.constant dense<0.000000e+00> : vector<48x200xf32>
    %132 = tpu.matmul %129, %131, %cst_60 {dimension_numbers = #tpu.dot_dimension_numbers<[1], [0], [0], [1], [0, 0, 1, 1], [], []>} : vector<48x300xbf16>, vector<300x200xbf16>, vector<48x200xf32> -> vector<48x200xf32>
    %c0_61 = arith.constant 0 : index
    %c0_62 = arith.constant 0 : index
    %133 = vector.load %arg9[%c0_61, %c0_62] : memref<1x200xf32, #tpu.memory_space<vmem>>, vector<1x200xf32>
    %134 = vector.broadcast %133 : vector<1x200xf32> to vector<48x200xf32>
    %135 = arith.addf %132, %134 : vector<48x200xf32>
    %136 = vector.extract_strided_slice %127 {offsets = [1, 0, 0], sizes = [3, 16, 300], strides = [1, 1, 1]} : vector<4x16x300xbf16> to vector<3x16x300xbf16>
    %137 = vector.shape_cast %136 : vector<3x16x300xbf16> to vector<48x300xbf16>
    %c1_63 = arith.constant 1 : index
    %c0_64 = arith.constant 0 : index
    %c0_65 = arith.constant 0 : index
    %138 = vector.load %arg8[%c1_63, %c0_64, %c0_65] : memref<2x300x200xbf16, #tpu.memory_space<vmem>>, vector<1x300x200xbf16>
    %139 = vector.shape_cast %138 : vector<1x300x200xbf16> to vector<300x200xbf16>
    %cst_66 = arith.constant dense<0.000000e+00> : vector<48x200xf32>
    %140 = tpu.matmul %137, %139, %cst_66 {dimension_numbers = #tpu.dot_dimension_numbers<[1], [0], [0], [1], [0, 0, 1, 1], [], []>} : vector<48x300xbf16>, vector<300x200xbf16>, vector<48x200xf32> -> vector<48x200xf32>
    %141 = arith.addf %135, %140 : vector<48x200xf32>
    %cst_67 = arith.constant 0.000000e+00 : f32
    %142 = vector.broadcast %cst_67 : f32 to vector<48x200xf32>
    %143 = arith.maximumf %141, %142 : vector<48x200xf32>
    %144 = arith.truncf %143 : vector<48x200xf32> to vector<48x200xbf16>
    %145 = vector.shape_cast %144 : vector<48x200xbf16> to vector<3x16x200xbf16>
    %146 = vector.extract_strided_slice %145 {offsets = [0, 0, 0], sizes = [1, 16, 200], strides = [1, 1, 1]} : vector<3x16x200xbf16> to vector<1x16x200xbf16>
    %147 = vector.shape_cast %146 : vector<1x16x200xbf16> to vector<16x200xbf16>
    %c0_68 = arith.constant 0 : index
    %c0_69 = arith.constant 0 : index
    %c0_70 = arith.constant 0 : index
    %148 = vector.load %arg10[%c0_68, %c0_69, %c0_70] : memref<3x200x8xbf16, #tpu.memory_space<vmem>>, vector<1x200x8xbf16>
    %149 = vector.shape_cast %148 : vector<1x200x8xbf16> to vector<200x8xbf16>
    %cst_71 = arith.constant dense<0.000000e+00> : vector<16x8xf32>
    %150 = tpu.matmul %147, %149, %cst_71 {dimension_numbers = #tpu.dot_dimension_numbers<[1], [0], [0], [1], [0, 0, 1, 1], [], []>} : vector<16x200xbf16>, vector<200x8xbf16>, vector<16x8xf32> -> vector<16x8xf32>
    %c0_72 = arith.constant 0 : index
    %c0_73 = arith.constant 0 : index
    %151 = vector.load %arg11[%c0_72, %c0_73] : memref<1x8xf32, #tpu.memory_space<vmem>>, vector<1x8xf32>
    %152 = vector.broadcast %151 : vector<1x8xf32> to vector<16x8xf32>
    %153 = arith.addf %150, %152 : vector<16x8xf32>
    %154 = vector.extract_strided_slice %145 {offsets = [1, 0, 0], sizes = [1, 16, 200], strides = [1, 1, 1]} : vector<3x16x200xbf16> to vector<1x16x200xbf16>
    %155 = vector.shape_cast %154 : vector<1x16x200xbf16> to vector<16x200xbf16>
    %c1_74 = arith.constant 1 : index
    %c0_75 = arith.constant 0 : index
    %c0_76 = arith.constant 0 : index
    %156 = vector.load %arg10[%c1_74, %c0_75, %c0_76] : memref<3x200x8xbf16, #tpu.memory_space<vmem>>, vector<1x200x8xbf16>
    %157 = vector.shape_cast %156 : vector<1x200x8xbf16> to vector<200x8xbf16>
    %cst_77 = arith.constant dense<0.000000e+00> : vector<16x8xf32>
    %158 = tpu.matmul %155, %157, %cst_77 {dimension_numbers = #tpu.dot_dimension_numbers<[1], [0], [0], [1], [0, 0, 1, 1], [], []>} : vector<16x200xbf16>, vector<200x8xbf16>, vector<16x8xf32> -> vector<16x8xf32>
    %159 = arith.addf %153, %158 : vector<16x8xf32>
    %160 = vector.extract_strided_slice %145 {offsets = [2, 0, 0], sizes = [1, 16, 200], strides = [1, 1, 1]} : vector<3x16x200xbf16> to vector<1x16x200xbf16>
    %161 = vector.shape_cast %160 : vector<1x16x200xbf16> to vector<16x200xbf16>
    %c2_78 = arith.constant 2 : index
    %c0_79 = arith.constant 0 : index
    %c0_80 = arith.constant 0 : index
    %162 = vector.load %arg10[%c2_78, %c0_79, %c0_80] : memref<3x200x8xbf16, #tpu.memory_space<vmem>>, vector<1x200x8xbf16>
    %163 = vector.shape_cast %162 : vector<1x200x8xbf16> to vector<200x8xbf16>
    %cst_81 = arith.constant dense<0.000000e+00> : vector<16x8xf32>
    %164 = tpu.matmul %161, %163, %cst_81 {dimension_numbers = #tpu.dot_dimension_numbers<[1], [0], [0], [1], [0, 0, 1, 1], [], []>} : vector<16x200xbf16>, vector<200x8xbf16>, vector<16x8xf32> -> vector<16x8xf32>
    %165 = arith.addf %159, %164 : vector<16x8xf32>
    %c0_82 = arith.constant 0 : index
    %c0_83 = arith.constant 0 : index
    %166 = vector.load %arg12[%c0_82, %c0_83] : memref<16x8xf32, #tpu.memory_space<vmem>>, vector<16x8xf32>
    tpu.vector_store %arg12[%c0_82, %c0_83], %165 {strides = array<i32>} : memref<16x8xf32, #tpu.memory_space<vmem>>, vector<16x8xf32>,
    return
  }
  func.func @transform_0(%arg0: i32) -> (i32, i32, i32) {
    %c0_i32 = arith.constant 0 : i32
    %c0_i32_0 = arith.constant 0 : i32
    %c0_i32_1 = arith.constant 0 : i32
    return %c0_i32, %arg0, %c0_i32_0 : i32, i32, i32
  }
  func.func @transform_1(%arg0: i32) -> (i32, i32, i32) {
    %c0_i32 = arith.constant 0 : i32
    %c0_i32_0 = arith.constant 0 : i32
    %c0_i32_1 = arith.constant 0 : i32
    %c0_i32_2 = arith.constant 0 : i32
    return %c0_i32, %c0_i32_0, %c0_i32_1 : i32, i32, i32
  }
  func.func @transform_2(%arg0: i32) -> (i32, i32) {
    %c0_i32 = arith.constant 0 : i32
    %c0_i32_0 = arith.constant 0 : i32
    %c0_i32_1 = arith.constant 0 : i32
    return %c0_i32, %c0_i32_0 : i32, i32
  }
  func.func @transform_3(%arg0: i32) -> (i32, i32, i32) {
    %c0_i32 = arith.constant 0 : i32
    %c0_i32_0 = arith.constant 0 : i32
    %c0_i32_1 = arith.constant 0 : i32
    %c0_i32_2 = arith.constant 0 : i32
    return %c0_i32, %c0_i32_0, %c0_i32_1 : i32, i32, i32
  }
  func.func @transform_4(%arg0: i32) -> (i32, i32) {
    %c0_i32 = arith.constant 0 : i32
    %c0_i32_0 = arith.constant 0 : i32
    %c0_i32_1 = arith.constant 0 : i32
    return %c0_i32, %c0_i32_0 : i32, i32
  }
  func.func @transform_5(%arg0: i32) -> (i32, i32, i32) {
    %c0_i32 = arith.constant 0 : i32
    %c0_i32_0 = arith.constant 0 : i32
    %c0_i32_1 = arith.constant 0 : i32
    %c0_i32_2 = arith.constant 0 : i32
    return %c0_i32, %c0_i32_0, %c0_i32_1 : i32, i32, i32
  }
  func.func @transform_6(%arg0: i32) -> (i32, i32) {
    %c0_i32 = arith.constant 0 : i32
    %c0_i32_0 = arith.constant 0 : i32
    %c0_i32_1 = arith.constant 0 : i32
    return %c0_i32, %c0_i32_0 : i32, i32
  }
  func.func @transform_7(%arg0: i32) -> (i32, i32, i32) {
    %c0_i32 = arith.constant 0 : i32
    %c0_i32_0 = arith.constant 0 : i32
    %c0_i32_1 = arith.constant 0 : i32
    %c0_i32_2 = arith.constant 0 : i32
    return %c0_i32, %c0_i32_0, %c0_i32_1 : i32, i32, i32
  }
  func.func @transform_8(%arg0: i32) -> (i32, i32) {
    %c0_i32 = arith.constant 0 : i32
    %c0_i32_0 = arith.constant 0 : i32
    %c0_i32_1 = arith.constant 0 : i32
    return %c0_i32, %c0_i32_0 : i32, i32
  }
  func.func @transform_9(%arg0: i32) -> (i32, i32, i32) {
    %c0_i32 = arith.constant 0 : i32
    %c0_i32_0 = arith.constant 0 : i32
    %c0_i32_1 = arith.constant 0 : i32
    %c0_i32_2 = arith.constant 0 : i32
    return %c0_i32, %c0_i32_0, %c0_i32_1 : i32, i32, i32
  }
  func.func @transform_10(%arg0: i32) -> (i32, i32) {
    %c0_i32 = arith.constant 0 : i32
    %c0_i32_0 = arith.constant 0 : i32
    %c0_i32_1 = arith.constant 0 : i32
    return %c0_i32, %c0_i32_0 : i32, i32
  }
  func.func @transform_11(%arg0: i32) -> (i32, i32) {
    %c0_i32 = arith.constant 0 : i32
    %c0_i32_0 = arith.constant 0 : i32
    return %arg0, %c0_i32 : i32, i32
  }
}

</mosaic_0001>

<bundles_post_ra>
// kernel: discriminator_forward.1
= control target key start
LH: loop header
LB: loop body
LE: loop exit
PB: predicated region body
PF: predicated region fallthrough
CT: control target
= control target key end

     0   :  { %v18661_v0 = vmov 0   ;;  %s14760_s17 = smov 22   ;;  %s14761_s22 = smov 44   ;;  %vm2761_vm0 = vcmask 1040384   ;;  %vm2126_vm1 = vcmask 179200   ;;  %vm2381_vm2 = vcmask 359424   ;;  %s18649_s0 = inlined_call_operand.vmem [shape: bf16[250,16,22], index: 0, kind: input, shape index: {}]   ;;  %s18650_s1 = inlined_call_operand.vmem [shape: bf16[4,66,25], index: 1, kind: input, shape index: {}]   ;;  %s18651_s3 = inlined_call_operand.vmem [shape: bf16[5,75,50], index: 3, kind: input, shape index: {}]   ;;  %s18652_s2 = inlined_call_operand.vmem [shape: f32[1,25], index: 2, kind: input, shape index: {}]   ;;  %s18653_s5 = inlined_call_operand.vmem [shape: bf16[2,150,100], index: 5, kind: input, shape index: {}]   ;;  %s18654_s4 = inlined_call_operand.vmem [shape: f32[1,50], index: 4, kind: input, shape index: {}]   ;;  %s18655_s7 = inlined_call_operand.vmem [shape: bf16[2,300,200], index: 7, kind: input, shape index: {}]   ;;  %s18656_s6 = inlined_call_operand.vmem [shape: f32[1,100], index: 6, kind: input, shape index: {}]   ;;  %s18657_s9 = inlined_call_operand.vmem [shape: bf16[3,200,8], index: 9, kind: input, shape index: {}]   ;;  %s18658_s8 = inlined_call_operand.vmem [shape: f32[1,200], index: 8, kind: input, shape index: {}]   ;;  %s18659_s10 = inlined_call_operand.vmem [shape: f32[1,8], index: 10, kind: input, shape index: {}]   ;;  %s18660_s11 = inlined_call_operand.vmem [shape: f32[16,8], index: 11, kind: output, shape index: {}]  }
   0x1   :  { %1790 = vrot.lane.b32.xlu0 %v18661_v0, %s14760_s17  ;;  %v14290_v1 = vld [vmem:[%s18649_s0 + $0x8] sm:$0xff]   ;;  %v14291_v2 = vld [vmem:[%s18649_s0 + $0x20] sm:$0xff]   ;;  %v14292_v3 = vld [vmem:[%s18649_s0 + $0x10] sm:$0xff]   ;;  %vm2594_vm3 = vcmask 539648   ;;  %s14763_s23 = smov 50   ;;  %vm6884_vm4 = vcmask 1044480  }
   0x2   :  { %1792 = vrot.lane.b32.xlu1 %v14290_v1, %s14760_s17  ;;  %v14293_v4 = vld [vmem:[%s18649_s0 + $0x28] sm:$0xff]   ;;  %v14294_v5 = vld [vmem:[%s18649_s0 + $0x38] sm:$0xff]   ;;  %v14295_v6 = vld [vmem:[%s18649_s0 + $0x50] sm:$0xff]   ;;  %vm6885_vm5 = vcmask 1045504   ;;  %vm6637_vm6 = vcmask 203776   ;;  %vm6724_vm7 = vcmask 408576  }
   0x3   :  { %v14296_v7 = vld [vmem:[%s18649_s0 + $0x40] sm:$0xff]   ;;  %v14297_v8 = vld [vmem:[%s18649_s0 + $0x58] sm:$0xff]   ;;  %v14298_v9 = vld [vmem:[%s18649_s0 + $0x68] sm:$0xff]   ;;  %vm6829_vm8 = vcmask 613376   ;;  %vm8882_vm9 = vcmask 1042432   ;;  %vm8746_vm10 = vcmask 818176  }
   0x4   :  { %v14299_v10 = vld [vmem:[%s18649_s0 + $0x80] sm:$0xff]   ;;  %v14300_v11 = vld [vmem:[%s18649_s0 + $0x70] sm:$0xff]   ;;  %v14301_v12 = vld [vmem:[%s18649_s0 + $0x88] sm:$0xff]   ;;  %vm9277_vm11 = vcmask 588800   ;;  %vm10167_vm12 = vcmask 1043456   ;;  %vm10512_vm13 = vcmask 64512  }
   0x5   :  { %1958 = vrot.lane.b32.xlu0 %v18661_v0, %s14761_s22  ;;  %v14302_v13 = vld [vmem:[%s18649_s0 + $0x98] sm:$0xff]   ;;  %v14303_v14 = vld [vmem:[%s18649_s0 + $0xb0] sm:$0xff]   ;;  %v14304_v15 = vld [vmem:[%s18649_s0 + $0xa0] sm:$0xff]  }
   0x6   :  { %1794 = vrot.lane.b32.xlu1 %v14291_v2, %s14760_s17  ;;  %v14305_v16 = vld [vmem:[%s18649_s0 + $0xb8] sm:$0xff]   ;;  %v14306_v17 = vld [vmem:[%s18649_s0 + $0xc8] sm:$0xff]   ;;  %v14307_v18 = vld [vmem:[%s18649_s0 + $0xe0] sm:$0xff]  }
   0x7   :  { %v14308_v19 = vld [vmem:[%s18649_s0 + $0xd0] sm:$0xff]   ;;  %v14309_v20 = vld [vmem:[%s18649_s0 + $0xe8] sm:$0xff]   ;;  %v14310_v21 = vld [vmem:[%s18649_s0 + $0xf8] sm:$0xff]  }
   0x8   :  { %v14311_v22 = vld [vmem:[%s18649_s0 + $0x110] sm:$0xff]   ;;  %v14312_v23 = vld [vmem:[%s18649_s0 + $0x100] sm:$0xff]   ;;  %v14313_v24 = vld [vmem:[%s18649_s0 + $0x118] sm:$0xff]  }
   0x9   :  { %1960 = vrot.lane.b32.xlu0 %v14292_v3, %s14761_s22  ;;  %v14314_v25 = vld [vmem:[%s18649_s0 + $0x128] sm:$0xff]   ;;  %v14338_v26 = vld [vmem:[%s18650_s1] sm:$0xff]   ;;  %v14316_v29 = vld [vmem:[%s18649_s0 + $0x130] sm:$0xff]  }
   0xa   :  { %1962 = vrot.lane.b32.xlu1 %v14293_v4, %s14761_s22  ;;  %v14315_v27 = vld [vmem:[%s18649_s0 + $0x140] sm:$0xff]   ;;  %12155 = vmatprep.subr.bf16.mxu0 %v14338_v26  ;;  %v14341_v28 = vld [vmem:[%s18650_s1 + $0x8] sm:$0xff]   ;;  %v14344_v31 = vld [vmem:[%s18650_s1 + $0x10] sm:$0xff]  }
   0xb   :  { %12156 = vmatpush3.bf16.msra.mxu0 %v14338_v26  ;;  %13197 = vmatprep.subr.bf16.mxu1 %v14338_v26  ;;  %v14317_v30 = vld [vmem:[%s18649_s0 + $0x148] sm:$0xff]   ;;  %v14318_v32 = vld [vmem:[%s18649_s0 + $0x158] sm:$0xff]   ;;  %v14319_v34 = vld [vmem:[%s18649_s0 + $0x170] sm:$0xff]  }
   0xc   :  { %13202 = vmatpush3.bf16.msra.mxu1 %v14338_v26  ;;  %12157 = vmatprep.subr.bf16.mxu0 %v14341_v28  ;;  %v14347_v33 = vld [vmem:[%s18650_s1 + $0x18] sm:$0xff]   ;;  %v14320_v35 = vld [vmem:[%s18649_s0 + $0x160] sm:$0xff]   ;;  %v14322_v38 = vld [vmem:[%s18649_s0 + $0x188] sm:$0xff]  }
   0xd   :  { %1796 = vrot.lane.b32.xlu0 %v14294_v5, %s14760_s17  ;;  %13198 = vmatprep.subr.bf16.mxu1 %v14341_v28  ;;  %v14321_v36 = vld [vmem:[%s18649_s0 + $0x178] sm:$0xff]   ;;  %v14351_v37 = vld [vmem:[%s18650_s1 + $0x20] ss:$0 sps:$4 sm:$0x11]   ;;  %v14981_v40 = vld [vmem:[%s18650_s1 + $0x24] sm:$0xff]  }
   0xe   :  { %1798 = vrot.lane.b32.xlu1 %v14295_v6, %s14760_s17  ;;  %v2763_v39 = vsel %vm2761_vm0, %v14351_v37, 0  ;;  %v14323_v41 = vld [vmem:[%s18649_s0 + $0x1a0] sm:$0xff]   ;;  %v14324_v42 = vld [vmem:[%s18649_s0 + $0x190] sm:$0xff]   ;;  %v14325_v43 = vld [vmem:[%s18649_s0 + $0x1a8] sm:$0xff]  }
   0xf   :  { %12158 = vmatpush3.bf16.msra.mxu0 %v14341_v28  ;;  %v14326_v44 = vld [vmem:[%s18649_s0 + $0x1b8] sm:$0xff]   ;;  %v14327_v45 = vld [vmem:[%s18649_s0 + $0x1d0] sm:$0xff]   ;;  %v14328_v46 = vld [vmem:[%s18649_s0 + $0x1c0] sm:$0xff]  }
  0x10   :  { %12159 = vmatprep.subr.bf16.mxu0 %v14344_v31  ;;  %13203 = vmatpush3.bf16.msra.mxu1 %v14341_v28  ;;  %v14329_v47 = vld [vmem:[%s18649_s0 + $0x1d8] sm:$0xff]   ;;  %v14330_v48 = vld [vmem:[%s18649_s0 + $0x1e8] sm:$0xff]   ;;  %v14331_v49 = vld [vmem:[%s18649_s0 + $0x200] sm:$0xff]  }
  0x11   :  { %1964 = vrot.lane.b32.xlu0 %v14296_v7, %s14761_s22  ;;  %13199 = vmatprep.subr.bf16.mxu1 %v14344_v31  ;;  %v14332_v50 = vld [vmem:[%s18649_s0 + $0x1f0] sm:$0xff]   ;;  %v14333_v51 = vld [vmem:[%s18649_s0 + $0x208] sm:$0xff]   ;;  %v14334_v52 = vld [vmem:[%s18649_s0 + $0x218] sm:$0xff]  }
  0x12   :  { %1966 = vrot.lane.b32.xlu1 %v14297_v8, %s14761_s22  ;;  %v14335_v53 = vld [vmem:[%s18649_s0 + $0x230] sm:$0xff]   ;;  %v14336_v54 = vld [vmem:[%s18649_s0 + $0x220] sm:$0xff]   ;;  %v14337_v55 = vld [vmem:[%s18649_s0 + $0x238] sm:$0xff]  }
  0x13   :  { %12160 = vmatpush3.bf16.msra.mxu0 %v14344_v31  ;;  %v14339_v56 = vld [vmem:[%s18649_s0 + $0x248] sm:$0xff]   ;;  %v14340_v57 = vld [vmem:[%s18649_s0 + $0x260] sm:$0xff]   ;;  %v14342_v58 = vld [vmem:[%s18649_s0 + $0x250] sm:$0xff]  }
  0x14   :  { %12161 = vmatprep.subr.bf16.mxu0 %v14347_v33  ;;  %13204 = vmatpush3.bf16.msra.mxu1 %v14344_v31  ;;  %v14343_v59 = vld [vmem:[%s18649_s0 + $0x268] sm:$0xff]   ;;  %v14345_v60 = vld [vmem:[%s18649_s0 + $0x278] sm:$0xff]   ;;  %v14346_v61 = vld [vmem:[%s18649_s0 + $0x290] sm:$0xff]  }
  0x15   :  { %1800 = vrot.lane.b32.xlu0 %v14298_v9, %s14760_s17  ;;  %13200 = vmatprep.subr.bf16.mxu1 %v14347_v33  ;;  %v14348_v62 = vld [vmem:[%s18649_s0 + $0x280] sm:$0xff]   ;;  %v14350_v63 = vld [vmem:[%s18649_s0 + $0x298] sm:$0xff]   ;;  %v14352_v1 = vld [vmem:[%s18649_s0 + $0x2a8] sm:$0xff]  }
  0x16   :  { %1802 = vrot.lane.b32.xlu1 %v14299_v10, %s14760_s17  ;;  %v14354_v3 = vld [vmem:[%s18649_s0 + $0x2c0] sm:$0xff]   ;;  %v14356_v5 = vld [vmem:[%s18649_s0 + $0x2b0] sm:$0xff]   ;;  %v14358_v9 = vld [vmem:[%s18649_s0 + $0x2c8] sm:$0xff]  }
  0x17   :  { %12162 = vmatpush3.bf16.msra.mxu0 %v14347_v33  ;;  %v14353_v6 = vld [vmem:[%s18649_s0] sm:$0xff]   ;;  %v14363_v26 = vld [vmem:[%s18649_s0 + $0x48] sm:$0xff]  }
  0x18   :  { %14277 = vmatprep.subr.msk.bf16.mxu0 %vm2761_vm0, %v14351_v37  ;;  %13205 = vmatpush3.bf16.msra.mxu1 %v14347_v33  ;;  %v14405_v28 = vld [vmem:[%s18650_s1 + $0x3c] sm:$0xff]   ;;  %v14415_v33 = vld [vmem:[%s18650_s1 + $0x44] ss:$0 sps:$4 sm:$0x11]  }
  0x19   :  { %1968 = vrot.lane.b32.xlu0 %v14300_v11, %s14761_s22  ;;  %14278 = vmatprep.subr.msk.bf16.mxu1 %vm2761_vm0, %v14351_v37  ;;  %v14357_v11 = vld [vmem:[%s18649_s0 + $0x18] sm:$0xff]  }
  0x1a   :  { %1970 = vrot.lane.b32.xlu1 %v14301_v12, %s14761_s22  ;;  %v14382_v12 = vld [vmem:[%s18650_s1 + $0x2c] sm:$0xff]  }
  0x1b   :  { %12164 = vmatpush3.bf16.msra.mxu0 %v2763_v39 }
  0x1c   :  { %12333 = vmatprep.subr.bf16.mxu0 %v14981_v40  ;;  %13206 = vmatpush3.bf16.msra.mxu1 %v2763_v39 }
  0x1d   :  { %1804 = vrot.lane.b32.xlu0 %v14302_v13, %s14760_s17 }
  0x1e   :  { %1806 = vrot.lane.b32.xlu1 %v14303_v14, %s14760_s17  ;;  %v14359_v14 = vld [vmem:[%s18649_s0 + $0x2d8] sm:$0xff]  }
  0x21   :  { %1972 = vrot.lane.b32.xlu0 %v14304_v15, %s14761_s22  ;;  %v14361_v15 = vld [vmem:[%s18649_s0 + $0x2f0] sm:$0xff]  }
  0x22   :  { %1974 = vrot.lane.b32.xlu1 %v14305_v16, %s14761_s22 }
  0x25   :  { %1808 = vrot.lane.b32.xlu0 %v14306_v17, %s14760_s17 }
  0x26   :  { %1810 = vrot.lane.b32.xlu1 %v14307_v18, %s14760_s17  ;;  %v14360_v18 = vld [vmem:[%s18649_s0 + $0x30] sm:$0xff]  }
  0x29   :  { %1976 = vrot.lane.b32.xlu0 %v14308_v19, %s14761_s22  ;;  %v14362_v19 = vld [vmem:[%s18649_s0 + $0x2e0] sm:$0xff]  }
  0x2a   :  { %1978 = vrot.lane.b32.xlu1 %v14309_v20, %s14761_s22 }
  0x2d   :  { %1812 = vrot.lane.b32.xlu0 %v14310_v21, %s14760_s17  ;;  %v14396_v21 = vld [vmem:[%s18650_s1 + $0x34] sm:$0xff]  }
  0x2e   :  { %1814 = vrot.lane.b32.xlu1 %v14311_v22, %s14760_s17 }
  0x31   :  { %1980 = vrot.lane.b32.xlu0 %v14312_v23, %s14761_s22 }
  0x32   :  { %1982 = vrot.lane.b32.xlu1 %v14313_v24, %s14761_s22  ;;  %v14364_v24 = vld [vmem:[%s18649_s0 + $0x2f8] sm:$0xff]  }
  0x35   :  { %1816 = vrot.lane.b32.xlu0 %v14314_v25, %s14760_s17 }
  0x36   :  { %1818 = vrot.lane.b32.xlu1 %v14315_v27, %s14760_s17  ;;  %v14365_v27 = vld [vmem:[%s18649_s0 + $0x308] sm:$0xff]  }
  0x39   :  { %1984 = vrot.lane.b32.xlu0 %v14316_v29, %s14761_s22 }
  0x3a   :  { %1986 = vrot.lane.b32.xlu1 %v14317_v30, %s14761_s22 }
  0x3d   :  { %1820 = vrot.lane.b32.xlu0 %v14318_v32, %s14760_s17  ;;  %v14367_v32 = vld [vmem:[%s18649_s0 + $0x320] sm:$0xff]  }
  0x3e   :  { %1822 = vrot.lane.b32.xlu1 %v14319_v34, %s14760_s17 }
  0x41   :  { %1988 = vrot.lane.b32.xlu0 %v14320_v35, %s14761_s22  ;;  %v14366_v35 = vld [vmem:[%s18649_s0 + $0x60] sm:$0xff]  }
  0x42   :  { %1990 = vrot.lane.b32.xlu1 %v14321_v36, %s14761_s22  ;;  %v14368_v36 = vld [vmem:[%s18649_s0 + $0x310] sm:$0xff]  }
  0x45   :  { %1824 = vrot.lane.b32.xlu0 %v14322_v38, %s14760_s17 }
  0x46   :  { %1826 = vrot.lane.b32.xlu1 %v14323_v41, %s14760_s17 }
  0x49   :  { %1992 = vrot.lane.b32.xlu0 %v14324_v42, %s14761_s22  ;;  %v14369_v42 = vld [vmem:[%s18649_s0 + $0x78] sm:$0xff]  }
  0x4a   :  { %1994 = vrot.lane.b32.xlu1 %v14325_v43, %s14761_s22  ;;  %v14371_v43 = vld [vmem:[%s18649_s0 + $0x338] sm:$0xff]  }
  0x4d   :  { %1828 = vrot.lane.b32.xlu0 %v14326_v44, %s14760_s17  ;;  %v3510_v44 = vsel %vm2761_vm0, %v14415_v33, 0 }
  0x4e   :  { %1830 = vrot.lane.b32.xlu1 %v14327_v45, %s14760_s17 }
  0x51   :  { %1996 = vrot.lane.b32.xlu0 %v14328_v46, %s14761_s22 }
  0x52   :  { %1998 = vrot.lane.b32.xlu1 %v14329_v47, %s14761_s22 }
  0x55   :  { %1832 = vrot.lane.b32.xlu0 %v14330_v48, %s14760_s17  ;;  %v14373_v48 = vld [vmem:[%s18649_s0 + $0x350] sm:$0xff]  }
  0x56   :  { %1834 = vrot.lane.b32.xlu1 %v14331_v49, %s14760_s17 }
  0x59   :  { %2000 = vrot.lane.b32.xlu0 %v14332_v50, %s14761_s22  ;;  %v14372_v50 = vld [vmem:[%s18649_s0 + $0x90] sm:$0xff]  }
  0x5a   :  { %2002 = vrot.lane.b32.xlu1 %v14333_v51, %s14761_s22  ;;  %v14374_v51 = vld [vmem:[%s18649_s0 + $0x340] sm:$0xff]  }
  0x5d   :  { %1836 = vrot.lane.b32.xlu0 %v14334_v52, %s14760_s17 }
  0x5e   :  { %1838 = vrot.lane.b32.xlu1 %v14335_v53, %s14760_s17 }
  0x61   :  { %2004 = vrot.lane.b32.xlu0 %v14336_v54, %s14761_s22 }
  0x62   :  { %2006 = vrot.lane.b32.xlu1 %v14337_v55, %s14761_s22  ;;  %v14376_v55 = vld [vmem:[%s18649_s0 + $0x358] sm:$0xff]  }
  0x65   :  { %1840 = vrot.lane.b32.xlu0 %v14339_v56, %s14760_s17 }
  0x66   :  { %1842 = vrot.lane.b32.xlu1 %v14340_v57, %s14760_s17  ;;  %v14375_v57 = vld [vmem:[%s18649_s0 + $0xa8] sm:$0xff]  }
  0x69   :  { %2008 = vrot.lane.b32.xlu0 %v14342_v58, %s14761_s22  ;;  %v14377_v58 = vld [vmem:[%s18649_s0 + $0x368] sm:$0xff]  }
  0x6a   :  { %2010 = vrot.lane.b32.xlu1 %v14343_v59, %s14761_s22 }
  0x6d   :  { %1844 = vrot.lane.b32.xlu0 %v14345_v60, %s14760_s17 }
  0x6e   :  { %1846 = vrot.lane.b32.xlu1 %v14346_v61, %s14760_s17 }
  0x71   :  { %2012 = vrot.lane.b32.xlu0 %v14348_v62, %s14761_s22  ;;  %v14379_v62 = vld [vmem:[%s18649_s0 + $0x380] sm:$0xff]  }
  0x72   :  { %2014 = vrot.lane.b32.xlu1 %v14350_v63, %s14761_s22 }
  0x73   :  { %v15081_v2 = vpop.permute.xlu0 %1790 }
  0x74   :  { %18732 = vst [vmem:[#allocation2_spill] sm:$0xff] %v15081_v2  ;;  %v1793_v4 = vpop.permute.xlu1 %1792  ;;  %v2129_v7 = vsel %vm2126_vm1, 0, %v15081_v2 }
  0x75   :  { %1848 = vrot.lane.b32.xlu0 %v14352_v1, %s14760_s17  ;;  %v2132_v16 = vsel %vm2126_vm1, %v14353_v6, %v1793_v4  ;;  %v14378_v1 = vld [vmem:[%s18649_s0 + $0xc0] sm:$0xff]   ;;  %v14383_v6 = vld [vmem:[%s18649_s0 + $0x388] sm:$0xff]  }
  0x76   :  { %1850 = vrot.lane.b32.xlu1 %v14354_v3, %s14760_s17  ;;  %v14380_v3 = vld [vmem:[%s18649_s0 + $0x370] sm:$0xff]  }
  0x77   :  { %v15096_v8 = vpop.permute.xlu0 %1958 }
  0x78   :  { %18733 = vst [vmem:[#allocation3_spill] sm:$0xff] %v15096_v8  ;;  %v15104_v10 = vsel %vm2381_vm2, %v2129_v7, %v15096_v8  ;;  %v1795_v13 = vpop.permute.xlu1 %1794 }
  0x79   :  { %18734 = vst [vmem:[#allocation4_spill] sm:$0xff] %v15104_v10  ;;  %12165 = vmatprep.mubr.msk.bf16.mxu0 %vm2594_vm3, %v15104_v10  ;;  %2016 = vrot.lane.b32.xlu0 %v14356_v5, %s14761_s22  ;;  %v2135_v23 = vsel %vm2126_vm1, %v14357_v11, %v1795_v13  ;;  %v14384_v11 = vld [vmem:[%s18649_s0 + $0x398] sm:$0xff]  }
  0x7a   :  { %12166 = vmatmul.mubr.msk.bf16.vlgmr.msra.gmra.mrb[0].mxu0 %vm2594_vm3, %v15104_v10  ;;  %2018 = vrot.lane.b32.xlu1 %v14358_v9, %s14761_s22 }
  0x7b   :  { %12334 = vmatpush3.bf16.msra.mxu0 %v14981_v40  ;;  %v1961_v17 = vpop.permute.xlu0 %1960  ;;  %v14370_v40 = vld [vmem:[%s18649_s0 + $0x328] sm:$0xff]  }
  0x7c   :  { %v15133_v20 = vsel %vm2381_vm2, %v2132_v16, %v1961_v17  ;;  %12335 = vmatprep.subr.bf16.mxu0 %v14382_v12  ;;  %v1963_v22 = vpop.permute.xlu1 %1962  ;;  %v14386_v16 = vld [vmem:[%s18649_s0 + $0x3b0] sm:$0xff]  }
  0x7d   :  { %12169 = vmatprep.mubr.msk.bf16.mxu0 %vm2594_vm3, %v15133_v20  ;;  %1852 = vrot.lane.b32.xlu0 %v14359_v14, %s14760_s17  ;;  %v15156_v29 = vsel %vm2381_vm2, %v2135_v23, %v1963_v22  ;;  %v14389_v23 = vld [vmem:[%s18649_s0 + $0x3b8] sm:$0xff]  }
  0x7e   :  { %1854 = vrot.lane.b32.xlu1 %v14361_v15, %s14760_s17 }
  0x7f   :  { %v1797_v25 = vpop.permute.xlu0 %1796  ;;  %12336 = vmatpush3.bf16.msra.mxu0 %v14382_v12  ;;  %v14381_v12 = vld [vmem:[%s18649_s0 + $0xd8] sm:$0xff]  }
  0x80   :  { %12337 = vmatprep.subr.bf16.mxu0 %v14396_v21  ;;  %v2138_v30 = vsel %vm2126_vm1, %v14360_v18, %v1797_v25  ;;  %v1799_v31 = vpop.permute.xlu1 %1798  ;;  %v14385_v18 = vld [vmem:[%s18649_s0 + $0xf0] sm:$0xff]  }
  0x81   :  { %2020 = vrot.lane.b32.xlu0 %v14362_v19, %s14761_s22  ;;  %v2141_v39 = vsel %vm2126_vm1, %v14363_v26, %v1799_v31  ;;  %v14387_v19 = vld [vmem:[%s18649_s0 + $0x3a0] sm:$0xff]   ;;  %v14388_v26 = vld [vmem:[%s18649_s0 + $0x108] sm:$0xff]  }
  0x82   :  { %12170 = vmatmul.mubr.msk.bf16.gmra.mrb[4].mxu0 %vm2594_vm3, %v15156_v29  ;;  %2022 = vrot.lane.b32.xlu1 %v14364_v24, %s14761_s22  ;;  %v15303_v31 = vld [vmem:[%s18650_s1 + $0x48] sm:$0xff]  }
  0x83   :  { %v1965_v34 = vpop.permute.xlu0 %1964  ;;  %12338 = vmatpush3.bf16.msra.mxu0 %v14396_v21 }
  0x84   :  { %v15176_v37 = vsel %vm2381_vm2, %v2138_v30, %v1965_v34  ;;  %12339 = vmatprep.subr.bf16.mxu0 %v14405_v28  ;;  %v1967_v38 = vpop.permute.xlu1 %1966 }
  0x85   :  { %1856 = vrot.lane.b32.xlu0 %v14365_v27, %s14760_s17  ;;  %12173 = vmatprep.mubr.msk.bf16.mxu0 %vm2594_vm3, %v15176_v37  ;;  %v15195_v45 = vsel %vm2381_vm2, %v2141_v39, %v1967_v38  ;;  %v14391_v39 = vld [vmem:[%s18649_s0 + $0x138] sm:$0xff]  }
  0x86   :  { %1858 = vrot.lane.b32.xlu1 %v14367_v32, %s14760_s17 }
  0x87   :  { %v1801_v41 = vpop.permute.xlu0 %1800  ;;  %12340 = vmatpush3.bf16.msra.mxu0 %v14405_v28 }
  0x88   :  { %14279 = vmatprep.subr.msk.bf16.mxu0 %vm2761_vm0, %v14415_v33  ;;  %v2144_v46 = vsel %vm2126_vm1, %v14366_v35, %v1801_v41  ;;  %v1803_v47 = vpop.permute.xlu1 %1802  ;;  %v14390_v33 = vld [vmem:[%s18649_s0 + $0x120] sm:$0xff]  }
  0x89   :  { %2024 = vrot.lane.b32.xlu0 %v14368_v36, %s14761_s22  ;;  %v2147_v54 = vsel %vm2126_vm1, %v14369_v42, %v1803_v47 }
  0x8a   :  { %12174 = vmatmul.mubr.msk.bf16.gmra.mrb[8].mxu0 %vm2594_vm3, %v15195_v45  ;;  %2026 = vrot.lane.b32.xlu1 %v14370_v40, %s14761_s22 }
  0x8b   :  { %v1969_v49 = vpop.permute.xlu0 %1968  ;;  %12342 = vmatpush3.bf16.msra.mxu0 %v3510_v44  ;;  %v14392_v44 = vld [vmem:[%s18649_s0 + $0x150] sm:$0xff]  }
  0x8c   :  { %v15212_v52 = vsel %vm2381_vm2, %v2144_v46, %v1969_v49  ;;  %v1971_v53 = vpop.permute.xlu1 %1970  ;;  %12511 = vmatprep.subr.bf16.mxu0 %v15303_v31 }
  0x8d   :  { %1860 = vrot.lane.b32.xlu0 %v14371_v43, %s14760_s17  ;;  %12177 = vmatprep.mubr.msk.bf16.mxu0 %vm2594_vm3, %v15212_v52  ;;  %v15229_v59 = vsel %vm2381_vm2, %v2147_v54, %v1971_v53 }
  0x8e   :  { %1862 = vrot.lane.b32.xlu1 %v14373_v48, %s14760_s17 }
  0x8f   :  { %v1805_v56 = vpop.permute.xlu0 %1804 }
  0x90   :  { %v2150_v60 = vsel %vm2126_vm1, %v14372_v50, %v1805_v56  ;;  %v1807_v61 = vpop.permute.xlu1 %1806  ;;  %v14393_v50 = vld [vmem:[%s18649_s0 + $0x168] sm:$0xff]   ;;  %v14394_v56 = vld [vmem:[%s18649_s0 + $0x180] sm:$0xff]  }
  0x91   :  { %2028 = vrot.lane.b32.xlu0 %v14374_v51, %s14761_s22  ;;  %v2153_v7 = vsel %vm2126_vm1, %v14375_v57, %v1807_v61 }
  0x92   :  { %12178 = vmatmul.mubr.msk.bf16.gmra.mrb[12].mxu0 %vm2594_vm3, %v15229_v59  ;;  %2030 = vrot.lane.b32.xlu1 %v14376_v55, %s14761_s22 }
  0x93   :  { %v1973_v63 = vpop.permute.xlu0 %1972 }
  0x94   :  { %v15246_v4 = vsel %vm2381_vm2, %v2150_v60, %v1973_v63  ;;  %v1975_v5 = vpop.permute.xlu1 %1974 }
  0x95   :  { %1864 = vrot.lane.b32.xlu0 %v14377_v58, %s14760_s17  ;;  %12181 = vmatprep.mubr.msk.bf16.mxu0 %vm2594_vm3, %v15246_v4  ;;  %v15263_v13 = vsel %vm2381_vm2, %v2153_v7, %v1975_v5 }
  0x96   :  { %1866 = vrot.lane.b32.xlu1 %v14379_v62, %s14760_s17  ;;  %v14395_v62 = vld [vmem:[%s18649_s0 + $0x198] sm:$0xff]  }
  0x97   :  { %v1809_v9 = vpop.permute.xlu0 %1808 }
  0x98   :  { %v2156_v14 = vsel %vm2126_vm1, %v14378_v1, %v1809_v9  ;;  %v1811_v15 = vpop.permute.xlu1 %1810 }
  0x99   :  { %2032 = vrot.lane.b32.xlu0 %v14380_v3, %s14761_s22  ;;  %v2159_v24 = vsel %vm2126_vm1, %v14381_v12, %v1811_v15 }
  0x9a   :  { %12182 = vmatmul.mubr.msk.bf16.gmra.mrb[16].mxu0 %vm2594_vm3, %v15263_v13  ;;  %2034 = vrot.lane.b32.xlu1 %v14383_v6, %s14761_s22  ;;  %v14397_v6 = vld [vmem:[%s18649_s0 + $0x1b0] sm:$0xff]  }
  0x9b   :  { %v1977_v17 = vpop.permute.xlu0 %1976 }
  0x9c   :  { %v15280_v21 = vsel %vm2381_vm2, %v2156_v14, %v1977_v17  ;;  %v1979_v22 = vpop.permute.xlu1 %1978  ;;  %v14398_v14 = vld [vmem:[%s18649_s0 + $0x1c8] sm:$0xff]  }
  0x9d   :  { %1868 = vrot.lane.b32.xlu0 %v14384_v11, %s14760_s17  ;;  %12185 = vmatprep.mubr.msk.bf16.mxu0 %vm2594_vm3, %v15280_v21  ;;  %v15294_v27 = vsel %vm2381_vm2, %v2159_v24, %v1979_v22  ;;  %v14422_v22 = vld [vmem:[%s18649_s0 + $0x3c8] sm:$0xff]  }
  0x9e   :  { %1870 = vrot.lane.b32.xlu1 %v14386_v16, %s14760_s17 }
  0x9f   :  { %v1813_v25 = vpop.permute.xlu0 %1812 }
  0xa0   :  { %v2162_v28 = vsel %vm2126_vm1, %v14385_v18, %v1813_v25  ;;  %v1815_v30 = vpop.permute.xlu1 %1814 }
  0xa1   :  { %2036 = vrot.lane.b32.xlu0 %v14387_v19, %s14761_s22  ;;  %v2165_v36 = vsel %vm2126_vm1, %v14388_v26, %v1815_v30  ;;  %v14399_v19 = vld [vmem:[%s18649_s0 + $0x1e0] sm:$0xff]  }
  0xa2   :  { %12186 = vmatmul.mubr.msk.bf16.gmra.mrb[20].mxu0 %vm2594_vm3, %v15294_v27  ;;  %2038 = vrot.lane.b32.xlu1 %v14389_v23, %s14761_s22 }
  0xa3   :  { %v1981_v32 = vpop.permute.xlu0 %1980 }
  0xa4   :  { %v15310_v34 = vsel %vm2381_vm2, %v2162_v28, %v1981_v32  ;;  %v1983_v35 = vpop.permute.xlu1 %1982  ;;  %v14400_v28 = vld [vmem:[%s18649_s0 + $0x1f8] sm:$0xff]  }
  0xa5   :  { %12189 = vmatprep.mubr.msk.bf16.mxu0 %vm2594_vm3, %v15310_v34  ;;  %v15320_v40 = vsel %vm2381_vm2, %v2165_v36, %v1983_v35  ;;  %1872 = vrot.lane.b32.xlu0 %v14422_v22, %s14760_s17  ;;  %v14423_v35 = vld [vmem:[%s18649_s0 + $0x3e0] sm:$0xff]   ;;  %v14424_v36 = vld [vmem:[%s18649_s0 + $0x3d0] sm:$0xff]   ;;  %v14433_v22 = vld [vmem:[%s18649_s0 + $0x448] sm:$0xff]  }
  0xa6   :  { %2040 = vrot.lane.b32.xlu1 %v14424_v36, %s14761_s22 }
  0xa7   :  { %v1817_v38 = vpop.permute.xlu0 %1816 }
  0xa8   :  { %v2168_v41 = vsel %vm2126_vm1, %v14390_v33, %v1817_v38  ;;  %v1819_v42 = vpop.permute.xlu1 %1818 }
  0xa9   :  { %v2171_v48 = vsel %vm2126_vm1, %v14391_v39, %v1819_v42  ;;  %v14401_v39 = vld [vmem:[%s18649_s0 + $0x210] sm:$0xff]   ;;  %1874 = vrot.lane.b32.xlu0 %v14423_v35, %s14760_s17  ;;  %v14426_v42 = vld [vmem:[%s18649_s0 + $0x3f8] sm:$0xff]  }
  0xaa   :  { %12190 = vmatmul.mubr.msk.bf16.gmra.mrb[24].mxu0 %vm2594_vm3, %v15320_v40  ;;  %1876 = vrot.lane.b32.xlu1 %v14426_v42, %s14760_s17 }
  0xab   :  { %v1985_v43 = vpop.permute.xlu0 %1984 }
  0xac   :  { %v15329_v46 = vsel %vm2381_vm2, %v2168_v41, %v1985_v43  ;;  %v1987_v47 = vpop.permute.xlu1 %1986  ;;  %v14425_v41 = vld [vmem:[%s18649_s0 + $0x3e8] sm:$0xff]  }
  0xad   :  { %12193 = vmatprep.mubr.msk.bf16.mxu0 %vm2594_vm3, %v15329_v46  ;;  %v15338_v51 = vsel %vm2381_vm2, %v2171_v48, %v1987_v47  ;;  %2042 = vrot.lane.b32.xlu0 %v14425_v41, %s14761_s22  ;;  %v14436_v41 = vld [vmem:[%s18649_s0 + $0x460] sm:$0xff]  }
  0xaf   :  { %v1821_v49 = vpop.permute.xlu0 %1820 }
  0xb0   :  { %v2174_v53 = vsel %vm2126_vm1, %v14392_v44, %v1821_v49  ;;  %v1823_v54 = vpop.permute.xlu1 %1822  ;;  %v14402_v49 = vld [vmem:[%s18649_s0 + $0x228] sm:$0xff]  }
  0xb1   :  { %v2177_v60 = vsel %vm2126_vm1, %v14393_v50, %v1823_v54 }
  0xb2   :  { %12194 = vmatmul.mubr.msk.bf16.gmra.mrb[28].mxu0 %vm2594_vm3, %v15338_v51 }
  0xb3   :  { %v1989_v55 = vpop.permute.xlu0 %1988 }
  0xb4   :  { %v15347_v57 = vsel %vm2381_vm2, %v2174_v53, %v1989_v55  ;;  %v1991_v58 = vpop.permute.xlu1 %1990  ;;  %v14427_v55 = vld [vmem:[%s18649_s0 + $0x410] sm:$0xff]  }
  0xb5   :  { %12197 = vmatprep.mubr.msk.bf16.mxu0 %vm2594_vm3, %v15347_v57  ;;  %v15356_v63 = vsel %vm2381_vm2, %v2177_v60, %v1991_v58  ;;  %v14403_v60 = vld [vmem:[%s18649_s0 + $0x240] sm:$0xff]   ;;  %1878 = vrot.lane.b32.xlu0 %v14427_v55, %s14760_s17 }
  0xb7   :  { %v1825_v61 = vpop.permute.xlu0 %1824 }
  0xb8   :  { %v2180_v1 = vsel %vm2126_vm1, %v14394_v56, %v1825_v61  ;;  %v1827_v3 = vpop.permute.xlu1 %1826  ;;  %v14428_v56 = vld [vmem:[%s18649_s0 + $0x400] sm:$0xff]   ;;  %v14429_v61 = vld [vmem:[%s18649_s0 + $0x418] sm:$0xff]  }
  0xb9   :  { %v2183_v11 = vsel %vm2126_vm1, %v14395_v62, %v1827_v3  ;;  %2044 = vrot.lane.b32.xlu1 %v14428_v56, %s14761_s22  ;;  %v14430_v62 = vld [vmem:[%s18649_s0 + $0x428] sm:$0xff]   ;;  %2046 = vrot.lane.b32.xlu0 %v14429_v61, %s14761_s22  ;;  %v14440_v61 = vld [vmem:[%s18649_s0 + $0x4a0] sm:$0xff]  }
  0xba   :  { %12198 = vmatmul.mubr.msk.bf16.gmra.mrb[32].mxu0 %vm2594_vm3, %v15356_v63 }
  0xbb   :  { %v1993_v5 = vpop.permute.xlu0 %1992 }
  0xbc   :  { %v15365_v7 = vsel %vm2381_vm2, %v2180_v1, %v1993_v5  ;;  %v1995_v9 = vpop.permute.xlu1 %1994 }
  0xbd   :  { %12201 = vmatprep.mubr.msk.bf16.mxu0 %vm2594_vm3, %v15365_v7  ;;  %v15374_v15 = vsel %vm2381_vm2, %v2183_v11, %v1995_v9  ;;  %1880 = vrot.lane.b32.xlu1 %v14430_v62, %s14760_s17  ;;  %v14404_v9 = vld [vmem:[%s18649_s0 + $0x258] sm:$0xff]   ;;  %v14441_v62 = vld [vmem:[%s18649_s0 + $0x490] sm:$0xff]  }
  0xbf   :  { %v1829_v12 = vpop.permute.xlu0 %1828 }
  0xc0   :  { %v2186_v16 = vsel %vm2126_vm1, %v14397_v6, %v1829_v12  ;;  %v1831_v17 = vpop.permute.xlu1 %1830 }
  0xc1   :  { %v2189_v25 = vsel %vm2126_vm1, %v14398_v14, %v1831_v17  ;;  %v14432_v17 = vld [vmem:[%s18649_s0 + $0x430] sm:$0xff]  }
  0xc2   :  { %12202 = vmatmul.mubr.msk.bf16.gmra.mrb[36].mxu0 %vm2594_vm3, %v15374_v15  ;;  %2048 = vrot.lane.b32.xlu1 %v14432_v17, %s14761_s22 }
  0xc3   :  { %v1997_v18 = vpop.permute.xlu0 %1996 }
  0xc4   :  { %v15386_v23 = vsel %vm2381_vm2, %v2186_v16, %v1997_v18  ;;  %v1999_v24 = vpop.permute.xlu1 %1998  ;;  %v14431_v16 = vld [vmem:[%s18649_s0 + $0x440] sm:$0xff]  }
  0xc5   :  { %12205 = vmatprep.mubr.msk.bf16.mxu0 %vm2594_vm3, %v15386_v23  ;;  %v15396_v30 = vsel %vm2381_vm2, %v2189_v25, %v1999_v24  ;;  %1882 = vrot.lane.b32.xlu0 %v14431_v16, %s14760_s17  ;;  %v14434_v24 = vld [vmem:[%s18649_s0 + $0x458] sm:$0xff]   ;;  %v14410_v16 = vld [vmem:[%s18649_s0 + $0x2d0] sm:$0xff]  }
  0xc6   :  { %1884 = vrot.lane.b32.xlu1 %v14434_v24, %s14760_s17 }
  0xc7   :  { %v1833_v26 = vpop.permute.xlu0 %1832 }
  0xc8   :  { %v2192_v32 = vsel %vm2126_vm1, %v14399_v19, %v1833_v26  ;;  %v1835_v33 = vpop.permute.xlu1 %1834  ;;  %v14406_v19 = vld [vmem:[%s18649_s0 + $0x270] sm:$0xff]  }
  0xc9   :  { %v2195_v47 = vsel %vm2126_vm1, %v14400_v28, %v1835_v33  ;;  %2050 = vrot.lane.b32.xlu0 %v14433_v22, %s14761_s22  ;;  %v14407_v33 = vld [vmem:[%s18649_s0 + $0x288] sm:$0xff]  }
  0xca   :  { %12206 = vmatmul.mubr.msk.bf16.gmra.mrb[40].mxu0 %vm2594_vm3, %v15396_v30  ;;  %2052 = vrot.lane.b32.xlu1 %v14436_v41, %s14761_s22 }
  0xcb   :  { %v2001_v38 = vpop.permute.xlu0 %2000 }
  0xcc   :  { %v15419_v43 = vsel %vm2381_vm2, %v2192_v32, %v2001_v38  ;;  %v2003_v44 = vpop.permute.xlu1 %2002 }
  0xcd   :  { %12209 = vmatprep.mubr.msk.bf16.mxu0 %vm2594_vm3, %v15419_v43  ;;  %v15430_v50 = vsel %vm2381_vm2, %v2195_v47, %v2003_v44  ;;  %v14408_v44 = vld [vmem:[%s18649_s0 + $0x2a0] sm:$0xff]   ;;  %v14438_v47 = vld [vmem:[%s18649_s0 + $0x478] sm:$0xff]  }
  0xce   :  { %18735 = vst [vmem:[#allocation5_spill] sm:$0xff] %v15430_v50 }
  0xcf   :  { %v1837_v48 = vpop.permute.xlu0 %1836 }
  0xd0   :  { %v2198_v53 = vsel %vm2126_vm1, %v14401_v39, %v1837_v48  ;;  %v1839_v54 = vpop.permute.xlu1 %1838  ;;  %v14435_v39 = vld [vmem:[%s18649_s0 + $0x470] sm:$0xff]  }
  0xd1   :  { %v2201_v5 = vsel %vm2126_vm1, %v14402_v49, %v1839_v54  ;;  %1886 = vrot.lane.b32.xlu0 %v14435_v39, %s14760_s17  ;;  %v14439_v49 = vld [vmem:[%s18649_s0 + $0x488] sm:$0xff]  }
  0xd2   :  { %12210 = vmatmul.mubr.msk.bf16.gmra.mrb[44].mxu0 %vm2594_vm3, %v15430_v50  ;;  %1888 = vrot.lane.b32.xlu1 %v14439_v49, %s14760_s17 }
  0xd3   :  { %v2005_v58 = vpop.permute.xlu0 %2004 }
  0xd4   :  { %v15453_v1 = vsel %vm2381_vm2, %v2198_v53, %v2005_v58  ;;  %v2007_v3 = vpop.permute.xlu1 %2006 }
  0xd5   :  { %18736 = vst [vmem:[#allocation6_spill] sm:$0xff] %v15453_v1  ;;  %12213 = vmatprep.mubr.msk.bf16.mxu0 %vm2594_vm3, %v15453_v1  ;;  %v15464_v11 = vsel %vm2381_vm2, %v2201_v5, %v2007_v3  ;;  %2054 = vrot.lane.b32.xlu0 %v14438_v47, %s14761_s22  ;;  %v14409_v3 = vld [vmem:[%s18649_s0 + $0x2b8] sm:$0xff]  }
  0xd6   :  { %18737 = vst [vmem:[#allocation7_spill] sm:$0xff] %v15464_v11  ;;  %2056 = vrot.lane.b32.xlu1 %v14441_v62, %s14761_s22  ;;  %v14450_v62 = vld [vmem:[%s18649_s0 + $0x508] sm:$0xff]  }
  0xd7   :  { %v1841_v6 = vpop.permute.xlu0 %1840 }
  0xd8   :  { %v2204_v12 = vsel %vm2126_vm1, %v14403_v60, %v1841_v6  ;;  %v1843_v14 = vpop.permute.xlu1 %1842  ;;  %v14442_v6 = vld [vmem:[%s18649_s0 + $0x4a8] sm:$0xff]  }
  0xd9   :  { %v2207_v28 = vsel %vm2126_vm1, %v14404_v9, %v1843_v14  ;;  %1890 = vrot.lane.b32.xlu0 %v14440_v61, %s14760_s17  ;;  %v14443_v9 = vld [vmem:[%s18649_s0 + $0x4b8] sm:$0xff]  }
  0xda   :  { %12214 = vmatmul.mubr.msk.bf16.gmra.mrb[48].mxu0 %vm2594_vm3, %v15464_v11  ;;  %1892 = vrot.lane.b32.xlu1 %v14443_v9, %s14760_s17  ;;  %v14414_v9 = vld [vmem:[%s18649_s0 + $0x330] sm:$0xff]  }
  0xdb   :  { %v2009_v18 = vpop.permute.xlu0 %2008 }
  0xdc   :  { %v15487_v25 = vsel %vm2381_vm2, %v2204_v12, %v2009_v18  ;;  %v2011_v26 = vpop.permute.xlu1 %2010 }
  0xdd   :  { %18738 = vst [vmem:[#allocation8_spill] sm:$0xff] %v15487_v25  ;;  %12217 = vmatprep.mubr.msk.bf16.mxu0 %vm2594_vm3, %v15487_v25  ;;  %v15498_v35 = vsel %vm2381_vm2, %v2207_v28, %v2011_v26  ;;  %2058 = vrot.lane.b32.xlu0 %v14442_v6, %s14761_s22  ;;  %v14444_v26 = vld [vmem:[%s18649_s0 + $0x4d0] sm:$0xff]   ;;  %v14445_v28 = vld [vmem:[%s18649_s0 + $0x4c0] sm:$0xff]  }
  0xde   :  { %18739 = vst [vmem:[#allocation9_spill] sm:$0xff] %v15498_v35  ;;  %2060 = vrot.lane.b32.xlu1 %v14445_v28, %s14761_s22  ;;  %v14416_v28 = vld [vmem:[%s18649_s0 + $0x348] sm:$0xff]  }
  0xdf   :  { %v1845_v32 = vpop.permute.xlu0 %1844 }
  0xe0   :  { %v2210_v36 = vsel %vm2126_vm1, %v14406_v19, %v1845_v32  ;;  %v1847_v38 = vpop.permute.xlu1 %1846  ;;  %v14411_v32 = vld [vmem:[%s18649_s0 + $0x2e8] sm:$0xff]  }
  0xe1   :  { %v2213_v54 = vsel %vm2126_vm1, %v14407_v33, %v1847_v38  ;;  %1894 = vrot.lane.b32.xlu0 %v14444_v26, %s14760_s17  ;;  %v14447_v38 = vld [vmem:[%s18649_s0 + $0x4e8] sm:$0xff]   ;;  %v14453_v26 = vld [vmem:[%s18649_s0 + $0x520] sm:$0xff]  }
  0xe2   :  { %12218 = vmatmul.mubr.msk.bf16.gmra.mrb[52].mxu0 %vm2594_vm3, %v15498_v35  ;;  %1896 = vrot.lane.b32.xlu1 %v14447_v38, %s14760_s17 }
  0xe3   :  { %v2013_v42 = vpop.permute.xlu0 %2012 }
  0xe4   :  { %v15518_v48 = vsel %vm2381_vm2, %v2210_v36, %v2013_v42  ;;  %v2015_v53 = vpop.permute.xlu1 %2014  ;;  %v14446_v36 = vld [vmem:[%s18649_s0 + $0x4d8] sm:$0xff]   ;;  %v14412_v42 = vld [vmem:[%s18649_s0 + $0x300] sm:$0xff]  }
  0xe5   :  { %18740 = vst [vmem:[#allocation10_spill] sm:$0xff] %v15518_v48  ;;  %12221 = vmatprep.mubr.msk.bf16.mxu0 %vm2594_vm3, %v15518_v48  ;;  %v15529_v56 = vsel %vm2381_vm2, %v2213_v54, %v2015_v53  ;;  %2062 = vrot.lane.b32.xlu0 %v14446_v36, %s14761_s22  ;;  %v14455_v36 = vld [vmem:[%s18649_s0 + $0x548] sm:$0xff]  }
  0xe6   :  { %18741 = vst [vmem:[#allocation11_spill] sm:$0xff] %v15529_v56 }
  0xe7   :  { %v1849_v55 = vpop.permute.xlu0 %1848 }
  0xe8   :  { %v2216_v58 = vsel %vm2126_vm1, %v14408_v44, %v1849_v55  ;;  %v1851_v60 = vpop.permute.xlu1 %1850  ;;  %v14448_v55 = vld [vmem:[%s18649_s0 + $0x500] sm:$0xff]  }
  0xe9   :  { %v2219_v17 = vsel %vm2126_vm1, %v14409_v3, %v1851_v60  ;;  %v14413_v60 = vld [vmem:[%s18649_s0 + $0x318] sm:$0xff]   ;;  %1898 = vrot.lane.b32.xlu0 %v14448_v55, %s14760_s17 }
  0xea   :  { %12222 = vmatmul.mubr.msk.bf16.gmra.mrb[56].mxu0 %vm2594_vm3, %v15529_v56  ;;  %v14451_v3 = vld [vmem:[%s18649_s0 + $0x518] sm:$0xff]  }
  0xeb   :  { %v2017_v5 = vpop.permute.xlu0 %2016 }
  0xec   :  { %v15552_v12 = vsel %vm2381_vm2, %v2216_v58, %v2017_v5  ;;  %v2019_v14 = vpop.permute.xlu1 %2018  ;;  %v14449_v58 = vld [vmem:[%s18649_s0 + $0x4f0] sm:$0xff]  }
  0xed   :  { %18742 = vst [vmem:[#allocation12_spill] sm:$0xff] %v15552_v12  ;;  %12225 = vmatprep.mubr.msk.bf16.mxu0 %vm2594_vm3, %v15552_v12  ;;  %v15563_v19 = vsel %vm2381_vm2, %v2219_v17, %v2019_v14  ;;  %2064 = vrot.lane.b32.xlu1 %v14449_v58, %s14761_s22  ;;  %v14456_v58 = vld [vmem:[%s18649_s0 + $0x560] sm:$0xff]  }
  0xee   :  { %18743 = vst [vmem:[#allocation13_spill] sm:$0xff] %v15563_v19  ;;  %2066 = vrot.lane.b32.xlu0 %v14450_v62, %s14761_s22 }
  0xef   :  { %v1853_v18 = vpop.permute.xlu0 %1852 }
  0xf0   :  { %v2222_v22 = vsel %vm2126_vm1, %v14410_v16, %v1853_v18  ;;  %v1855_v24 = vpop.permute.xlu1 %1854 }
  0xf1   :  { %v2225_v44 = vsel %vm2126_vm1, %v14411_v32, %v1855_v24  ;;  %1900 = vrot.lane.b32.xlu1 %v14451_v3, %s14760_s17  ;;  %v14452_v24 = vld [vmem:[%s18649_s0 + $0x530] sm:$0xff]   ;;  %v14458_v3 = vld [vmem:[%s18649_s0 + $0x568] sm:$0xff]  }
  0xf2   :  { %12226 = vmatmul.mubr.msk.bf16.gmra.mrb[60].mxu0 %vm2594_vm3, %v15563_v19  ;;  %1902 = vrot.lane.b32.xlu0 %v14452_v24, %s14760_s17 }
  0xf3   :  { %v2021_v33 = vpop.permute.xlu0 %2020 }
  0xf4   :  { %v15586_v39 = vsel %vm2381_vm2, %v2222_v22, %v2021_v33  ;;  %v2023_v41 = vpop.permute.xlu1 %2022  ;;  %v14454_v33 = vld [vmem:[%s18649_s0 + $0x538] sm:$0xff]  }
  0xf5   :  { %18744 = vst [vmem:[#allocation14_spill] sm:$0xff] %v15586_v39  ;;  %12229 = vmatprep.mubr.msk.bf16.mxu0 %vm2594_vm3, %v15586_v39  ;;  %v15597_v49 = vsel %vm2381_vm2, %v2225_v44, %v2023_v41  ;;  %2068 = vrot.lane.b32.xlu1 %v14453_v26, %s14761_s22 }
  0xf6   :  { %18745 = vst [vmem:[#allocation15_spill] sm:$0xff] %v15597_v49  ;;  %2070 = vrot.lane.b32.xlu0 %v14454_v33, %s14761_s22  ;;  %v14461_v33 = vld [vmem:[%s18649_s0 + $0x580] sm:$0xff]  }
  0xf7   :  { %v1857_v47 = vpop.permute.xlu0 %1856 }
  0xf8   :  { %v2228_v53 = vsel %vm2126_vm1, %v14412_v42, %v1857_v47  ;;  %v1859_v54 = vpop.permute.xlu1 %1858  ;;  %v14417_v42 = vld [vmem:[%s18649_s0 + $0x360] sm:$0xff]  }
  0xf9   :  { %v2231_v14 = vsel %vm2126_vm1, %v14413_v60, %v1859_v54  ;;  %1904 = vrot.lane.b32.xlu1 %v14455_v36, %s14760_s17  ;;  %v14457_v60 = vld [vmem:[%s18649_s0 + $0x550] sm:$0xff]   ;;  %v14420_v36 = vld [vmem:[%s18649_s0 + $0x3a8] sm:$0xff]  }
  0xfa   :  { %12230 = vmatmul.mubr.msk.bf16.gmra.mrb[64].mxu0 %vm2594_vm3, %v15597_v49  ;;  %1906 = vrot.lane.b32.xlu0 %v14456_v58, %s14760_s17 }
  0xfb   :  { %v2025_v61 = vpop.permute.xlu0 %2024 }
  0xfc   :  { %v15620_v5 = vsel %vm2381_vm2, %v2228_v53, %v2025_v61  ;;  %v2027_v6 = vpop.permute.xlu1 %2026  ;;  %v14418_v61 = vld [vmem:[%s18649_s0 + $0x378] sm:$0xff]  }
  0xfd   :  { %18746 = vst [vmem:[#allocation16_spill] sm:$0xff] %v15620_v5  ;;  %12233 = vmatprep.mubr.msk.bf16.mxu0 %vm2594_vm3, %v15620_v5  ;;  %v15631_v17 = vsel %vm2381_vm2, %v2231_v14, %v2027_v6  ;;  %2072 = vrot.lane.b32.xlu1 %v14457_v60, %s14761_s22  ;;  %v14459_v6 = vld [vmem:[%s18649_s0 + $0x578] sm:$0xff]   ;;  %v14464_v60 = vld [vmem:[%s18649_s0 + $0x5c0] sm:$0xff]  }
  0xfe   :  { %18747 = vst [vmem:[#allocation17_spill] sm:$0xff] %v15631_v17  ;;  %2074 = vrot.lane.b32.xlu0 %v14458_v3, %s14761_s22  ;;  %v14467_v3 = vld [vmem:[%s18649_s0 + $0x5d8] sm:$0xff]  }
  0xff   :  { %v1861_v16 = vpop.permute.xlu0 %1860 }
 0x100   :  { %v2234_v18 = vsel %vm2126_vm1, %v14414_v9, %v1861_v16  ;;  %v1863_v22 = vpop.permute.xlu1 %1862  ;;  %v14419_v16 = vld [vmem:[%s18649_s0 + $0x390] sm:$0xff]  }
 0x101   :  { %v2237_v44 = vsel %vm2126_vm1, %v14416_v28, %v1863_v22  ;;  %1908 = vrot.lane.b32.xlu1 %v14459_v6, %s14760_s17  ;;  %v14437_v6 = vld [vmem:[%s18650_s1 + $0x50] sm:$0xff]  }
 0x102   :  { %12234 = vmatmul.mubr.msk.bf16.gmra.mrb[68].mxu0 %vm2594_vm3, %v15631_v17 }
 0x103   :  { %v2029_v32 = vpop.permute.xlu0 %2028 }
 0x104   :  { %v15654_v38 = vsel %vm2381_vm2, %v2234_v18, %v2029_v32  ;;  %v2031_v41 = vpop.permute.xlu1 %2030  ;;  %v14460_v32 = vld [vmem:[%s18649_s0 + $0x590] sm:$0xff]  }
 0x105   :  { %18748 = vst [vmem:[#allocation18_spill] sm:$0xff] %v15654_v38  ;;  %12237 = vmatprep.mubr.msk.bf16.mxu0 %vm2594_vm3, %v15654_v38  ;;  %v15665_v53 = vsel %vm2381_vm2, %v2237_v44, %v2031_v41  ;;  %1910 = vrot.lane.b32.xlu0 %v14460_v32, %s14760_s17  ;;  %v14463_v44 = vld [vmem:[%s18649_s0 + $0x5a8] sm:$0xff]  }
 0x106   :  { %18749 = vst [vmem:[#allocation19_spill] sm:$0xff] %v15665_v53  ;;  %2076 = vrot.lane.b32.xlu1 %v14461_v33, %s14761_s22  ;;  %v14475_v32 = vld [vmem:[%s18649_s0 + $0x628] sm:$0xff]   ;;  %v14476_v33 = vld [vmem:[%s18649_s0 + $0x638] sm:$0xff]  }
 0x107   :  { %v1865_v47 = vpop.permute.xlu0 %1864 }
 0x108   :  { %v2240_v54 = vsel %vm2126_vm1, %v14417_v42, %v1865_v47  ;;  %v1867_v55 = vpop.permute.xlu1 %1866  ;;  %v14462_v42 = vld [vmem:[%s18649_s0 + $0x598] sm:$0xff]  }
 0x109   :  { %v2243_v18 = vsel %vm2126_vm1, %v14418_v61, %v1867_v55  ;;  %2078 = vrot.lane.b32.xlu0 %v14462_v42, %s14761_s22  ;;  %v14465_v61 = vld [vmem:[%s18649_s0 + $0x5b0] sm:$0xff]   ;;  %v14479_v42 = vld [vmem:[%s18649_s0 + $0x658] sm:$0xff]  }
 0x10a   :  { %12238 = vmatmul.mubr.msk.bf16.gmra.mrb[72].mxu0 %vm2594_vm3, %v15665_v53  ;;  %1912 = vrot.lane.b32.xlu1 %v14463_v44, %s14760_s17  ;;  %v14480_v44 = vld [vmem:[%s18649_s0 + $0x668] sm:$0xff]  }
 0x10b   :  { %v2033_v62 = vpop.permute.xlu0 %2032 }
 0x10c   :  { %v15688_v9 = vsel %vm2381_vm2, %v2240_v54, %v2033_v62  ;;  %v2035_v14 = vpop.permute.xlu1 %2034  ;;  %v14466_v62 = vld [vmem:[%s18649_s0 + $0x5c8] sm:$0xff]  }
 0x10d   :  { %18750 = vst [vmem:[#allocation20_spill] sm:$0xff] %v15688_v9  ;;  %12241 = vmatprep.mubr.msk.bf16.mxu0 %vm2594_vm3, %v15688_v9  ;;  %v15699_v24 = vsel %vm2381_vm2, %v2243_v18, %v2035_v14  ;;  %1914 = vrot.lane.b32.xlu0 %v14464_v60, %s14760_s17  ;;  %v14468_v14 = vld [vmem:[%s18649_s0 + $0x5f0] sm:$0xff]   ;;  %v14470_v18 = vld [vmem:[%s18649_s0 + $0x5f8] sm:$0xff]   ;;  %v14482_v60 = vld [vmem:[%s18649_s0 + $0x680] sm:$0xff]  }
 0x10e   :  { %18751 = vst [vmem:[#allocation21_spill] sm:$0xff] %v15699_v24  ;;  %2080 = vrot.lane.b32.xlu1 %v14465_v61, %s14761_s22  ;;  %v14483_v61 = vld [vmem:[%s18649_s0 + $0x670] sm:$0xff]  }
 0x10f   :  { %v1869_v22 = vpop.permute.xlu0 %1868 }
 0x110   :  { %v2246_v26 = vsel %vm2126_vm1, %v14419_v16, %v1869_v22  ;;  %v1871_v28 = vpop.permute.xlu1 %1870  ;;  %v14469_v16 = vld [vmem:[%s18649_s0 + $0x5e0] sm:$0xff]   ;;  %v14472_v22 = vld [vmem:[%s18650_s1 + $0x58] sm:$0xff]  }
 0x111   :  { %v2249_v54 = vsel %vm2126_vm1, %v14420_v36, %v1871_v28  ;;  %2082 = vrot.lane.b32.xlu0 %v14466_v62, %s14761_s22  ;;  %v14474_v28 = vld [vmem:[%s18649_s0 + $0x610] sm:$0xff]  }
 0x112   :  { %12242 = vmatmul.mubr.msk.bf16.gmra.mrb[76].mxu0 %vm2594_vm3, %v15699_v24  ;;  %1916 = vrot.lane.b32.xlu1 %v14467_v3, %s14760_s17  ;;  %v14477_v36 = vld [vmem:[%s18649_s0 + $0x650] sm:$0xff]   ;;  %v14484_v3 = vld [vmem:[%s18649_s0 + $0x3d8] sm:$0xff]  }
 0x113   :  { %v2037_v41 = vpop.permute.xlu0 %2036 }
 0x114   :  { %v15722_v47 = vsel %vm2381_vm2, %v2246_v26, %v2037_v41  ;;  %v2039_v55 = vpop.permute.xlu1 %2038  ;;  %v14471_v26 = vld [vmem:[%s18649_s0 + $0x608] sm:$0xff]   ;;  %v14478_v41 = vld [vmem:[%s18649_s0 + $0x640] sm:$0xff]  }
 0x115   :  { %18752 = vst [vmem:[#allocation22_spill] sm:$0xff] %v15722_v47  ;;  %12245 = vmatprep.mubr.msk.bf16.mxu0 %vm2594_vm3, %v15722_v47  ;;  %v15730_v58 = vsel %vm2381_vm2, %v2249_v54, %v2039_v55  ;;  %1918 = vrot.lane.b32.xlu0 %v14468_v14, %s14760_s17  ;;  %v14481_v54 = vld [vmem:[%s18649_s0 + $0x3c0] sm:$0xff]  }
 0x116   :  { %18753 = vst [vmem:[#allocation23_spill] sm:$0xff] %v15730_v58  ;;  %2084 = vrot.lane.b32.xlu1 %v14469_v16, %s14761_s22 }
 0x117   :  { %v1873_v55 = vpop.permute.xlu0 %1872 }
 0x118   :  { %v2252_v62 = vsel %vm2126_vm1, %v14481_v54, %v1873_v55  ;;  %v2041_v16 = vpop.permute.xlu1 %2040  ;;  %v14491_v54 = vld [vmem:[%s18649_s0 + $0x6b8] sm:$0xff]  }
 0x119   :  { %2086 = vrot.lane.b32.xlu0 %v14470_v18, %s14761_s22  ;;  %v14486_v18 = vld [vmem:[%s18649_s0 + $0x698] sm:$0xff]  }
 0x11a   :  { %12246 = vmatmul.mubr.msk.bf16.gmra.mrb[80].mxu0 %vm2594_vm3, %v15730_v58  ;;  %1920 = vrot.lane.b32.xlu1 %v14471_v26, %s14760_s17 }
 0x11b   :  { %12343 = vmatprep.mubr.msk.bf16.mxu0 %vm2594_vm3, %v15104_v10  ;;  %v1875_v14 = vpop.permute.xlu0 %1874 }
 0x11c   :  { %v2255_v26 = vsel %vm2126_vm1, %v14484_v3, %v1875_v14 }
 0x11e   :  { %2088 = vrot.lane.b32.xlu1 %v14474_v28, %s14761_s22 }
 0x11f   :  { %v2043_v28 = vpop.permute.xlu0 %2042 }
 0x122   :  { %12344 = vmatmul.mubr.msk.bf16.vlgmr.msra.gmra.mrb[0].mxu0 %vm2594_vm3, %v15133_v20  ;;  %1924 = vrot.lane.b32.xlu1 %v14476_v33, %s14760_s17  ;;  %v14488_v33 = vld [vmem:[%s18649_s0 + $0x6b0] sm:$0xff]  }
 0x123   :  { %12347 = vmatprep.mubr.msk.bf16.mxu0 %vm2594_vm3, %v15156_v29  ;;  %12512 = vmatpush3.bf16.msra.mxu0 %v15303_v31  ;;  %v14473_v31 = vld [vmem:[%s18649_s0 + $0x620] sm:$0xff]  }
 0x124   :  { %12513 = vmatprep.subr.bf16.mxu0 %v14437_v6  ;;  %1922 = vrot.lane.b32.xlu0 %v14473_v31, %s14760_s17  ;;  %v14487_v31 = vld [vmem:[%s18649_s0 + $0x3f0] sm:$0xff]  }
 0x126   :  { %2092 = vrot.lane.b32.xlu1 %v14478_v41, %s14761_s22  ;;  %v15864_v41 = vsel %vm2381_vm2, %v2255_v26, %v2043_v28  ;;  %v14495_v26 = vld [vmem:[%s18649_s0 + $0x6d0] sm:$0xff]  }
 0x127   :  { %12514 = vmatpush3.bf16.msra.mxu0 %v14437_v6  ;;  %v14485_v6 = vld [vmem:[%s18649_s0 + $0x688] sm:$0xff]   ;;  %18755 = vst [vmem:[#allocation25_spill] sm:$0xff] %v15864_v41  ;;  %v1879_v55 = vpop.permute.xlu0 %1878 }
 0x128   :  { %12515 = vmatprep.subr.bf16.mxu0 %v14472_v22  ;;  %2090 = vrot.lane.b32.xlu0 %v14475_v32, %s14761_s22  ;;  %v1877_v32 = vpop.permute.xlu1 %1876 }
 0x12a   :  { %12348 = vmatmul.mubr.msk.bf16.gmra.mrb[4].mxu0 %vm2594_vm3, %v15176_v37  ;;  %1928 = vrot.lane.b32.xlu1 %v14480_v44, %s14760_s17  ;;  %v14490_v44 = vld [vmem:[%s18649_s0 + $0x408] sm:$0xff]  }
 0x12b   :  { %12351 = vmatprep.mubr.msk.bf16.mxu0 %vm2594_vm3, %v15195_v45  ;;  %12516 = vmatpush3.bf16.msra.mxu0 %v14472_v22  ;;  %v15845_v22 = vsel %vm2381_vm2, %v2252_v62, %v2041_v16  ;;  %v2261_v3 = vsel %vm2126_vm1, %v14490_v44, %v1879_v55  ;;  %v2047_v14 = vpop.permute.xlu0 %2046  ;;  %v14498_v44 = vld [vmem:[%s18649_s0 + $0x6f8] sm:$0xff]  }
 0x12c   :  { %1926 = vrot.lane.b32.xlu0 %v14477_v36, %s14760_s17  ;;  %18754 = vst [vmem:[#allocation24_spill] sm:$0xff] %v15845_v22  ;;  %12249 = vmatprep.mubr.msk.bf16.mxu1 %vm2594_vm3, %v15845_v22  ;;  %v14489_v36 = vld [vmem:[%s18649_s0 + $0x6a0] sm:$0xff]  }
 0x12d   :  { %12250 = vmatmul.mubr.msk.bf16.vlgmr.msra.gmra.mrb[0].mxu1 %vm2594_vm3, %v15864_v41 }
 0x12e   :  { %2096 = vrot.lane.b32.xlu1 %v14483_v61, %s14761_s22  ;;  %v14492_v61 = vld [vmem:[%s18649_s0 + $0x6c8] sm:$0xff]  }
 0x130   :  { %2094 = vrot.lane.b32.xlu0 %v14479_v42, %s14761_s22  ;;  %v2258_v42 = vsel %vm2126_vm1, %v14487_v31, %v1877_v32  ;;  %v15902_v31 = vsel %vm2381_vm2, %v2261_v3, %v2047_v14  ;;  %v14496_v32 = vld [vmem:[%s18649_s0 + $0x438] sm:$0xff]   ;;  %v14501_v14 = vld [vmem:[%s18649_s0 + $0x700] sm:$0xff]  }
 0x131   :  { %18757 = vst [vmem:[#allocation27_spill] sm:$0xff] %v15902_v31 }
 0x132   :  { %12352 = vmatmul.mubr.msk.bf16.gmra.mrb[8].mxu0 %vm2594_vm3, %v15212_v52  ;;  %1932 = vrot.lane.b32.xlu1 %v14486_v18, %s14760_s17  ;;  %v14494_v18 = vld [vmem:[%s18649_s0 + $0x6e0] sm:$0xff]  }
 0x133   :  { %12355 = vmatprep.mubr.msk.bf16.mxu0 %vm2594_vm3, %v15229_v59 }
 0x134   :  { %1930 = vrot.lane.b32.xlu0 %v14482_v60, %s14760_s17  ;;  %v2045_v60 = vpop.permute.xlu1 %2044 }
 0x135   :  { %v15883_v62 = vsel %vm2381_vm2, %v2258_v42, %v2045_v60  ;;  %v14499_v60 = vld [vmem:[%s18649_s0 + $0x450] sm:$0xff]  }
 0x136   :  { %2100 = vrot.lane.b32.xlu1 %v14489_v36, %s14761_s22  ;;  %18756 = vst [vmem:[#allocation26_spill] sm:$0xff] %v15883_v62  ;;  %12253 = vmatprep.mubr.msk.bf16.mxu1 %vm2594_vm3, %v15883_v62 }
 0x137   :  { %12254 = vmatmul.mubr.msk.bf16.gmra.mrb[4].mxu1 %vm2594_vm3, %v15902_v31  ;;  %v1883_v36 = vpop.permute.xlu0 %1882 }
 0x138   :  { %2098 = vrot.lane.b32.xlu0 %v14485_v6, %s14761_s22  ;;  %v14493_v6 = vld [vmem:[%s18649_s0 + $0x420] sm:$0xff]   ;;  %v1881_v16 = vpop.permute.xlu1 %1880  ;;  %v2267_v55 = vsel %vm2126_vm1, %v14496_v32, %v1883_v36  ;;  %v14504_v36 = vld [vmem:[%s18649_s0 + $0x728] sm:$0xff]  }
 0x139   :  { %v2264_v28 = vsel %vm2126_vm1, %v14493_v6, %v1881_v16  ;;  %v14500_v6 = vld [vmem:[%s18649_s0 + $0x710] sm:$0xff]  }
 0x13a   :  { %12356 = vmatmul.mubr.msk.bf16.gmra.mrb[12].mxu0 %vm2594_vm3, %v15246_v4  ;;  %1936 = vrot.lane.b32.xlu1 %v14492_v61, %s14760_s17 }
 0x13b   :  { %12359 = vmatprep.mubr.msk.bf16.mxu0 %vm2594_vm3, %v15263_v13  ;;  %v2051_v61 = vpop.permute.xlu0 %2050 }
 0x13c   :  { %1934 = vrot.lane.b32.xlu0 %v14488_v33, %s14760_s17  ;;  %v14497_v33 = vld [vmem:[%s18649_s0 + $0x6e8] sm:$0xff]   ;;  %v2049_v42 = vpop.permute.xlu1 %2048  ;;  %v15940_v16 = vsel %vm2381_vm2, %v2267_v55, %v2051_v61  ;;  %v14505_v55 = vld [vmem:[%s18649_s0 + $0x480] sm:$0xff]  }
 0x13d   :  { %18759 = vst [vmem:[#allocation29_spill] sm:$0xff] %v15940_v16 }
 0x13e   :  { %2104 = vrot.lane.b32.xlu1 %v14495_v26, %s14761_s22  ;;  %v14502_v26 = vld [vmem:[%s18649_s0 + $0x468] sm:$0xff]  }
 0x140   :  { %2102 = vrot.lane.b32.xlu0 %v14491_v54, %s14761_s22  ;;  %v15921_v54 = vsel %vm2381_vm2, %v2264_v28, %v2049_v42  ;;  %v1885_v3 = vpop.permute.xlu1 %1884  ;;  %v14503_v28 = vld [vmem:[%s18649_s0 + $0x718] sm:$0xff]  }
 0x141   :  { %18758 = vst [vmem:[#allocation28_spill] sm:$0xff] %v15921_v54  ;;  %12257 = vmatprep.mubr.msk.bf16.mxu1 %vm2594_vm3, %v15921_v54 }
 0x142   :  { %12360 = vmatmul.mubr.msk.bf16.gmra.mrb[16].mxu0 %vm2594_vm3, %v15280_v21  ;;  %1940 = vrot.lane.b32.xlu1 %v14498_v44, %s14760_s17 }
 0x143   :  { %12363 = vmatprep.mubr.msk.bf16.mxu0 %vm2594_vm3, %v15294_v27  ;;  %12258 = vmatmul.mubr.msk.bf16.gmra.mrb[8].mxu1 %vm2594_vm3, %v15940_v16  ;;  %v1887_v32 = vpop.permute.xlu0 %1886 }
 0x144   :  { %1938 = vrot.lane.b32.xlu0 %v14494_v18, %s14760_s17  ;;  %v2270_v18 = vsel %vm2126_vm1, %v14499_v60, %v1885_v3  ;;  %v2273_v44 = vsel %vm2126_vm1, %v14502_v26, %v1887_v32  ;;  %v14506_v3 = vld [vmem:[%s18649_s0 + $0x740] sm:$0xff]   ;;  %v14508_v26 = vld [vmem:[%s18649_s0 + $0x498] sm:$0xff]  }
 0x146   :  { %2108 = vrot.lane.b32.xlu1 %v14501_v14, %s14761_s22 }
 0x147   :  { %v2055_v60 = vpop.permute.xlu0 %2054 }
 0x148   :  { %2106 = vrot.lane.b32.xlu0 %v14497_v33, %s14761_s22  ;;  %v2053_v33 = vpop.permute.xlu1 %2052  ;;  %v15978_v14 = vsel %vm2381_vm2, %v2273_v44, %v2055_v60  ;;  %v14511_v60 = vld [vmem:[%s18649_s0 + $0x4b0] sm:$0xff]  }
 0x149   :  { %v15959_v42 = vsel %vm2381_vm2, %v2270_v18, %v2053_v33 }
 0x14a   :  { %12364 = vmatmul.mubr.msk.bf16.gmra.mrb[20].mxu0 %vm2594_vm3, %v15310_v34  ;;  %18760 = vst [vmem:[#allocation30_spill] sm:$0xff] %v15959_v42  ;;  %12261 = vmatprep.mubr.msk.bf16.mxu1 %vm2594_vm3, %v15959_v42 }
 0x14b   :  { %12367 = vmatprep.mubr.msk.bf16.mxu0 %vm2594_vm3, %v15320_v40  ;;  %1944 = vrot.lane.b32.xlu1 %v14504_v36, %s14760_s17  ;;  %v1891_v32 = vpop.permute.xlu0 %1890  ;;  %v14510_v36 = vld [vmem:[%s18649_s0 + $0x758] sm:$0xff]  }
 0x14c   :  { %1942 = vrot.lane.b32.xlu0 %v14500_v6, %s14760_s17  ;;  %v1889_v61 = vpop.permute.xlu1 %1888  ;;  %v14507_v6 = vld [vmem:[%s18649_s0 + $0x730] sm:$0xff]   ;;  %12262 = vmatmul.mubr.msk.bf16.gmra.mrb[12].mxu1 %vm2594_vm3, %v15978_v14 }
 0x14d   :  { %v2276_v18 = vsel %vm2126_vm1, %v14505_v55, %v1889_v61  ;;  %v2279_v55 = vsel %vm2126_vm1, %v14508_v26, %v1891_v32  ;;  %v14514_v32 = vld [vmem:[%s18649_s0 + $0x4c8] sm:$0xff]  }
 0x14f   :  { %2112 = vrot.lane.b32.xlu1 %v14507_v6, %s14761_s22  ;;  %v2059_v61 = vpop.permute.xlu0 %2058  ;;  %v14512_v6 = vld [vmem:[%s18649_s0 + $0x770] sm:$0xff]  }
 0x150   :  { %2110 = vrot.lane.b32.xlu0 %v14503_v28, %s14761_s22  ;;  %v14509_v28 = vld [vmem:[%s18649_s0 + $0x748] sm:$0xff]   ;;  %v2057_v33 = vpop.permute.xlu1 %2056  ;;  %v16016_v26 = vsel %vm2381_vm2, %v2279_v55, %v2059_v61 }
 0x151   :  { %v15997_v44 = vsel %vm2381_vm2, %v2276_v18, %v2057_v33  ;;  %v14513_v18 = vld [vmem:[%s18649_s0 + $0x760] sm:$0xff]   ;;  %v14515_v33 = vld [vmem:[%s18649_s0 + $0x778] sm:$0xff]  }
 0x152   :  { %12368 = vmatmul.mubr.msk.bf16.gmra.mrb[24].mxu0 %vm2594_vm3, %v15329_v46  ;;  %12265 = vmatprep.mubr.msk.bf16.mxu1 %vm2594_vm3, %v15997_v44 }
 0x153   :  { %12371 = vmatprep.mubr.msk.bf16.mxu0 %vm2594_vm3, %v15338_v51  ;;  %1948 = vrot.lane.b32.xlu1 %v14510_v36, %s14760_s17  ;;  %v1895_v36 = vpop.permute.xlu0 %1894 }
 0x154   :  { %1946 = vrot.lane.b32.xlu0 %v14506_v3, %s14760_s17  ;;  %v1893_v3 = vpop.permute.xlu1 %1892  ;;  %12266 = vmatmul.mubr.msk.bf16.gmra.mrb[16].mxu1 %vm2594_vm3, %v16016_v26 }
 0x157   :  { %2116 = vrot.lane.b32.xlu1 %v14513_v18, %s14761_s22  ;;  %v2063_v18 = vpop.permute.xlu0 %2062 }
 0x158   :  { %2114 = vrot.lane.b32.xlu0 %v14509_v28, %s14761_s22  ;;  %v2282_v28 = vsel %vm2126_vm1, %v14511_v60, %v1893_v3  ;;  %v2061_v55 = vpop.permute.xlu1 %2060  ;;  %v14516_v60 = vld [vmem:[%s18649_s0 + $0x788] sm:$0xff]   ;;  %v2285_v3 = vsel %vm2126_vm1, %v14514_v32, %v1895_v36  ;;  %v14519_v32 = vld [vmem:[%s18649_s0 + $0x790] sm:$0xff]  }
 0x159   :  { %v16035_v61 = vsel %vm2381_vm2, %v2282_v28, %v2061_v55  ;;  %v14518_v28 = vld [vmem:[%s18649_s0 + $0x7a0] sm:$0xff]   ;;  %v16054_v36 = vsel %vm2381_vm2, %v2285_v3, %v2063_v18  ;;  %v14522_v3 = vld [vmem:[%s18649_s0 + $0x7a8] sm:$0xff]  }
 0x15a   :  { %12372 = vmatmul.mubr.msk.bf16.gmra.mrb[28].mxu0 %vm2594_vm3, %v15347_v57  ;;  %12269 = vmatprep.mubr.msk.bf16.mxu1 %vm2594_vm3, %v16035_v61 }
 0x15b   :  { %12375 = vmatprep.mubr.msk.bf16.mxu0 %vm2594_vm3, %v15356_v63  ;;  %1952 = vrot.lane.b32.xlu1 %v14516_v60, %s14760_s17  ;;  %v14521_v60 = vld [vmem:[%s18649_s0 + $0x4f8] sm:$0xff]   ;;  %v1899_v18 = vpop.permute.xlu0 %1898 }
 0x15c   :  { %1950 = vrot.lane.b32.xlu0 %v14512_v6, %s14760_s17  ;;  %v14517_v6 = vld [vmem:[%s18649_s0 + $0x4e0] sm:$0xff]   ;;  %v1897_v0 = vpop.permute.xlu1 %1896  ;;  %12270 = vmatmul.mubr.msk.bf16.gmra.mrb[20].mxu1 %vm2594_vm3, %v16054_v36  ;;  %v2291_v8 = vsel %vm2126_vm1, %v14521_v60, %v1899_v18 }
 0x15d   :  { %v2288_v55 = vsel %vm2126_vm1, %v14517_v6, %v1897_v0  ;;  %v14523_v0 = vld [vmem:[%s18649_s0 + $0x7b8] sm:$0xff]  }
 0x15f   :  { %2120 = vrot.lane.b32.xlu1 %v14519_v32, %s14761_s22 }
 0x160   :  { %2118 = vrot.lane.b32.xlu0 %v14515_v33, %s14761_s22  ;;  %v14520_v33 = vld [vmem:[%s18650_s1 + $0x60] sm:$0xff]   ;;  %v2065_v10 = vpop.permute.xlu1 %2064  ;;  %v2067_v32 = vpop.permute.xlu0 %2066 }
 0x161   :  { %12517 = vmatprep.subr.bf16.mxu0 %v14520_v33  ;;  %v16076_v6 = vsel %vm2381_vm2, %v2288_v55, %v2065_v10  ;;  %v14525_v10 = vld [vmem:[%s18649_s0 + $0x7c0] sm:$0xff]   ;;  %v16092_v55 = vsel %vm2381_vm2, %v2291_v8, %v2067_v32 }
 0x162   :  { %12376 = vmatmul.mubr.msk.bf16.gmra.mrb[32].mxu0 %vm2594_vm3, %v15365_v7  ;;  %12273 = vmatprep.mubr.msk.bf16.mxu1 %vm2594_vm3, %v16076_v6  ;;  %18761 = vst [vmem:[#allocation31_spill] sm:$0xff] %v16092_v55 }
 0x163   :  { %12379 = vmatprep.mubr.msk.bf16.mxu0 %vm2594_vm3, %v15374_v15  ;;  %12518 = vmatpush3.bf16.msra.mxu0 %v14520_v33 }
 0x164   :  { %1954 = vrot.lane.b32.xlu0 %v14518_v28, %s14760_s17  ;;  %v14524_v28 = vld [vmem:[%s18649_s0 + $0x510] sm:$0xff]   ;;  %1956 = vrot.lane.b32.xlu1 %v14523_v0, %s14760_s17  ;;  %v1901_v33 = vpop.permute.xlu1 %1900  ;;  %v1903_v18 = vpop.permute.xlu0 %1902  ;;  %s14765_s17 = smov 100  }
 0x165   :  { %v2294_v60 = vsel %vm2126_vm1, %v14524_v28, %v1901_v33  ;;  %12274 = vmatmul.mubr.msk.bf16.gmra.mrb[24].mxu1 %vm2594_vm3, %v16092_v55  ;;  %v14527_v28 = vld [vmem:[%s18649_s0 + $0x540] sm:$0xff]  }
 0x168   :  { %2122 = vrot.lane.b32.xlu0 %v14522_v3, %s14761_s22  ;;  %v14526_v3 = vld [vmem:[%s18649_s0 + $0x528] sm:$0xff]   ;;  %2124 = vrot.lane.b32.xlu1 %v14525_v10, %s14761_s22  ;;  %v2069_v0 = vpop.permute.xlu1 %2068  ;;  %v2071_v32 = vpop.permute.xlu0 %2070 }
 0x169   :  { %v16104_v2 = vsel %vm2381_vm2, %v2294_v60, %v2069_v0  ;;  %v2297_v8 = vsel %vm2126_vm1, %v14526_v3, %v1903_v18  ;;  %v14528_v3 = vld [vmem:[%s18649_s0 + $0x558] sm:$0xff]  }
 0x16a   :  { %12380 = vmatmul.mubr.msk.bf16.gmra.mrb[36].mxu0 %vm2594_vm3, %v15386_v23  ;;  %12277 = vmatprep.mubr.msk.bf16.mxu1 %vm2594_vm3, %v16104_v2  ;;  %v16115_v10 = vsel %vm2381_vm2, %v2297_v8, %v2071_v32 }
 0x16b   :  { %12383 = vmatprep.mubr.msk.bf16.mxu0 %vm2594_vm3, %v15396_v30 }
 0x16c   :  { %v1905_v33 = vpop.permute.xlu1 %1904  ;;  %v1907_v18 = vpop.permute.xlu0 %1906 }
 0x16d   :  { %v2300_v60 = vsel %vm2126_vm1, %v14527_v28, %v1905_v33  ;;  %12278 = vmatmul.mubr.msk.bf16.gmra.mrb[28].mxu1 %vm2594_vm3, %v16115_v10  ;;  %v2303_v8 = vsel %vm2126_vm1, %v14528_v3, %v1907_v18  ;;  %v14529_v28 = vld [vmem:[%s18649_s0 + $0x570] sm:$0xff]   ;;  %v14530_v3 = vld [vmem:[%s18649_s0 + $0x588] sm:$0xff]  }
 0x170   :  { %v2073_v0 = vpop.permute.xlu1 %2072  ;;  %v2075_v32 = vpop.permute.xlu0 %2074 }
 0x172   :  { %12384 = vmatmul.mubr.msk.bf16.gmra.mrb[40].mxu0 %vm2594_vm3, %v15419_v43 }
 0x173   :  { %12387 = vmatprep.mubr.msk.bf16.mxu0 %vm2594_vm3, %v15430_v50  ;;  %v16126_v50 = vsel %vm2381_vm2, %v2300_v60, %v2073_v0 }
 0x174   :  { %12281 = vmatprep.mubr.msk.bf16.mxu1 %vm2594_vm3, %v16126_v50  ;;  %v1909_v33 = vpop.permute.xlu1 %1908 }
 0x175   :  { %v2306_v60 = vsel %vm2126_vm1, %v14529_v28, %v1909_v33  ;;  %v14531_v28 = vld [vmem:[%s18649_s0 + $0x5a0] sm:$0xff]  }
 0x177   :  { %v1911_v18 = vpop.permute.xlu0 %1910 }
 0x178   :  { %v2077_v0 = vpop.permute.xlu1 %2076 }
 0x17a   :  { %12388 = vmatmul.mubr.msk.bf16.gmra.mrb[44].mxu0 %vm2594_vm3, %v15453_v1  ;;  %v16148_v1 = vsel %vm2381_vm2, %v2306_v60, %v2077_v0  ;;  %v14532_v60 = vld [vmem:[%s18649_s0 + $0x5b8] sm:$0xff]  }
 0x17b   :  { %12391 = vmatprep.mubr.msk.bf16.mxu0 %vm2594_vm3, %v15464_v11  ;;  %v16137_v11 = vsel %vm2381_vm2, %v2303_v8, %v2075_v32  ;;  %v2309_v8 = vsel %vm2126_vm1, %v14530_v3, %v1911_v18  ;;  %v2079_v32 = vpop.permute.xlu0 %2078 }
 0x17c   :  { %12282 = vmatmul.mubr.msk.bf16.gmra.mrb[32].mxu1 %vm2594_vm3, %v16137_v11  ;;  %v1913_v33 = vpop.permute.xlu1 %1912 }
 0x17d   :  { %12285 = vmatprep.mubr.msk.bf16.mxu1 %vm2594_vm3, %v16148_v1  ;;  %v2312_v3 = vsel %vm2126_vm1, %v14531_v28, %v1913_v33 }
 0x17f   :  { %v1915_v18 = vpop.permute.xlu0 %1914 }
 0x180   :  { %v2081_v0 = vpop.permute.xlu1 %2080 }
 0x182   :  { %12392 = vmatmul.mubr.msk.bf16.gmra.mrb[48].mxu0 %vm2594_vm3, %v15487_v25  ;;  %v2315_v25 = vsel %vm2126_vm1, %v14532_v60, %v1915_v18  ;;  %v14534_v60 = vld [vmem:[%s18649_s0 + $0x5e8] sm:$0xff]  }
 0x183   :  { %12395 = vmatprep.mubr.msk.bf16.mxu0 %vm2594_vm3, %v15498_v35  ;;  %v16159_v35 = vsel %vm2381_vm2, %v2309_v8, %v2079_v32  ;;  %v2083_v8 = vpop.permute.xlu0 %2082  ;;  %v14533_v32 = vld [vmem:[%s18649_s0 + $0x5d0] sm:$0xff]  }
 0x184   :  { %12286 = vmatmul.mubr.msk.bf16.gmra.mrb[36].mxu1 %vm2594_vm3, %v16159_v35  ;;  %v16181_v28 = vsel %vm2381_vm2, %v2315_v25, %v2083_v8  ;;  %v1917_v33 = vpop.permute.xlu1 %1916  ;;  %v14535_v8 = vld [vmem:[%s18649_s0 + $0x600] sm:$0xff]  }
 0x185   :  { %18762 = vst [vmem:[#allocation32_spill] sm:$0xff] %v16181_v28 }
 0x187   :  { %v1919_v18 = vpop.permute.xlu0 %1918 }
 0x18a   :  { %12396 = vmatmul.mubr.msk.bf16.gmra.mrb[52].mxu0 %vm2594_vm3, %v15518_v48  ;;  %v16171_v48 = vsel %vm2381_vm2, %v2312_v3, %v2081_v0  ;;  %v2318_v3 = vsel %vm2126_vm1, %v14533_v32, %v1917_v33  ;;  %v2085_v0 = vpop.permute.xlu1 %2084 }
 0x18b   :  { %12399 = vmatprep.mubr.msk.bf16.mxu0 %vm2594_vm3, %v15529_v56  ;;  %12289 = vmatprep.mubr.msk.bf16.mxu1 %vm2594_vm3, %v16171_v48  ;;  %v16193_v25 = vsel %vm2381_vm2, %v2318_v3, %v2085_v0 }
 0x18c   :  { %12290 = vmatmul.mubr.msk.bf16.gmra.mrb[40].mxu1 %vm2594_vm3, %v16181_v28 }
 0x18d   :  { %12293 = vmatprep.mubr.msk.bf16.mxu1 %vm2594_vm3, %v16193_v25 }
 0x18e   :  { %v1921_v33 = vpop.permute.xlu1 %1920 }
 0x18f   :  { %v2324_v3 = vsel %vm2126_vm1, %v14535_v8, %v1921_v33 }
 0x192   :  { %12400 = vmatmul.mubr.msk.bf16.gmra.mrb[56].mxu0 %vm2594_vm3, %v15552_v12  ;;  %v2321_v12 = vsel %vm2126_vm1, %v14534_v60, %v1919_v18  ;;  %v14536_v60 = vld [vmem:[%s18649_s0 + $0x618] sm:$0xff]   ;;  %v2089_v0 = vpop.permute.xlu1 %2088 }
 0x193   :  { %12403 = vmatprep.mubr.msk.bf16.mxu0 %vm2594_vm3, %v15563_v19  ;;  %v2087_v19 = vpop.permute.xlu0 %2086  ;;  %v16215_v56 = vsel %vm2381_vm2, %v2324_v3, %v2089_v0 }
 0x194   :  { %v16205_v32 = vsel %vm2381_vm2, %v2321_v12, %v2087_v19  ;;  %v14537_v12 = vld [vmem:[%s18649_s0 + $0x630] sm:$0xff]  }
 0x195   :  { %12294 = vmatmul.mubr.msk.bf16.gmra.mrb[44].mxu1 %vm2594_vm3, %v16205_v32 }
 0x196   :  { %12297 = vmatprep.mubr.msk.bf16.mxu1 %vm2594_vm3, %v16215_v56  ;;  %v1925_v33 = vpop.permute.xlu1 %1924 }
 0x197   :  { %v1923_v18 = vpop.permute.xlu0 %1922  ;;  %v2330_v3 = vsel %vm2126_vm1, %v14537_v12, %v1925_v33 }
 0x19a   :  { %12404 = vmatmul.mubr.msk.bf16.gmra.mrb[60].mxu0 %vm2594_vm3, %v15586_v39  ;;  %v2327_v39 = vsel %vm2126_vm1, %v14536_v60, %v1923_v18  ;;  %v14538_v60 = vld [vmem:[%s18649_s0 + $0x648] sm:$0xff]   ;;  %v2093_v0 = vpop.permute.xlu1 %2092 }
 0x19b   :  { %12407 = vmatprep.mubr.msk.bf16.mxu0 %vm2594_vm3, %v15597_v49  ;;  %v2091_v19 = vpop.permute.xlu0 %2090  ;;  %v16237_v49 = vsel %vm2381_vm2, %v2330_v3, %v2093_v0  ;;  %v14540_v3 = vld [vmem:[%s18649_s0 + $0x678] sm:$0xff]  }
 0x19c   :  { %v16227_v8 = vsel %vm2381_vm2, %v2327_v39, %v2091_v19  ;;  %v14539_v39 = vld [vmem:[%s18649_s0 + $0x660] sm:$0xff]  }
 0x19d   :  { %12298 = vmatmul.mubr.msk.bf16.gmra.mrb[48].mxu1 %vm2594_vm3, %v16227_v8 }
 0x19e   :  { %12301 = vmatprep.mubr.msk.bf16.mxu1 %vm2594_vm3, %v16237_v49  ;;  %v1929_v33 = vpop.permute.xlu1 %1928 }
 0x19f   :  { %v1927_v18 = vpop.permute.xlu0 %1926 }
 0x1a2   :  { %12408 = vmatmul.mubr.msk.bf16.gmra.mrb[64].mxu0 %vm2594_vm3, %v15620_v5  ;;  %v2333_v5 = vsel %vm2126_vm1, %v14538_v60, %v1927_v18  ;;  %v14541_v60 = vld [vmem:[%s18650_s1 + $0x68] ss:$0 sps:$4 sm:$0x11]   ;;  %v2336_v18 = vsel %vm2126_vm1, %v14539_v39, %v1929_v33 }
 0x1a3   :  { %12411 = vmatprep.mubr.msk.bf16.mxu0 %vm2594_vm3, %v15631_v17  ;;  %v2095_v19 = vpop.permute.xlu0 %2094  ;;  %14280 = vmatprep.subr.msk.bf16.mxu0 %vm2761_vm0, %v14541_v60  ;;  %v4425_v0 = vsel %vm2761_vm0, %v14541_v60, 0  ;;  %v14542_v17 = vld [vmem:[%s18649_s0 + $0x690] sm:$0xff]  }
 0x1a4   :  { %v16249_v12 = vsel %vm2381_vm2, %v2333_v5, %v2095_v19  ;;  %12520 = vmatpush3.bf16.msra.mxu0 %v4425_v0  ;;  %v2097_v19 = vpop.permute.xlu1 %2096 }
 0x1a5   :  { %12302 = vmatmul.mubr.msk.bf16.gmra.mrb[52].mxu1 %vm2594_vm3, %v16249_v12 }
 0x1a7   :  { %v1931_v5 = vpop.permute.xlu0 %1930 }
 0x1a8   :  { %v1933_v60 = vpop.permute.xlu1 %1932 }
 0x1aa   :  { %12412 = vmatmul.mubr.msk.bf16.gmra.mrb[68].mxu0 %vm2594_vm3, %v15654_v38  ;;  %v16264_v38 = vsel %vm2381_vm2, %v2336_v18, %v2097_v19  ;;  %v2342_v18 = vsel %vm2126_vm1, %v14542_v17, %v1933_v60 }
 0x1ab   :  { %12415 = vmatprep.mubr.msk.bf16.mxu0 %vm2594_vm3, %v15665_v53  ;;  %v2339_v53 = vsel %vm2126_vm1, %v14540_v3, %v1931_v5  ;;  %12305 = vmatprep.mubr.msk.bf16.mxu1 %vm2594_vm3, %v16264_v38  ;;  %v2099_v39 = vpop.permute.xlu0 %2098  ;;  %v14543_v3 = vld [vmem:[%s18649_s0 + $0x6a8] sm:$0xff]  }
 0x1ac   :  { %v16276_v33 = vsel %vm2381_vm2, %v2339_v53, %v2099_v39  ;;  %v2101_v5 = vpop.permute.xlu1 %2100  ;;  %v14544_v53 = vld [vmem:[%s18649_s0 + $0x6c0] sm:$0xff]  }
 0x1ad   :  { %12306 = vmatmul.mubr.msk.bf16.gmra.mrb[56].mxu1 %vm2594_vm3, %v16276_v33 }
 0x1af   :  { %v1935_v0 = vpop.permute.xlu0 %1934 }
 0x1b0   :  { %v2345_v19 = vsel %vm2126_vm1, %v14543_v3, %v1935_v0  ;;  %v1937_v60 = vpop.permute.xlu1 %1936  ;;  %v14545_v3 = vld [vmem:[%s18649_s0 + $0x6d8] sm:$0xff]  }
 0x1b2   :  { %12416 = vmatmul.mubr.msk.bf16.gmra.mrb[72].mxu0 %vm2594_vm3, %v15688_v9  ;;  %v16286_v9 = vsel %vm2381_vm2, %v2342_v18, %v2101_v5  ;;  %v2348_v18 = vsel %vm2126_vm1, %v14544_v53, %v1937_v60 }
 0x1b3   :  { %12419 = vmatprep.mubr.msk.bf16.mxu0 %vm2594_vm3, %v15699_v24  ;;  %12309 = vmatprep.mubr.msk.bf16.mxu1 %vm2594_vm3, %v16286_v9  ;;  %v2103_v39 = vpop.permute.xlu0 %2102 }
 0x1b4   :  { %v16298_v17 = vsel %vm2381_vm2, %v2345_v19, %v2103_v39  ;;  %v2105_v5 = vpop.permute.xlu1 %2104  ;;  %v14546_v19 = vld [vmem:[%s18649_s0 + $0x6f0] sm:$0xff]  }
 0x1b5   :  { %18763 = vst [vmem:[#allocation33_spill] sm:$0xff] %v16298_v17  ;;  %12310 = vmatmul.mubr.msk.bf16.gmra.mrb[60].mxu1 %vm2594_vm3, %v16298_v17  ;;  %v16308_v24 = vsel %vm2381_vm2, %v2348_v18, %v2105_v5 }
 0x1b6   :  { %12313 = vmatprep.mubr.msk.bf16.mxu1 %vm2594_vm3, %v16308_v24 }
 0x1b7   :  { %v1939_v0 = vpop.permute.xlu0 %1938 }
 0x1b8   :  { %v1941_v60 = vpop.permute.xlu1 %1940 }
 0x1b9   :  { %v2354_v18 = vsel %vm2126_vm1, %v14546_v19, %v1941_v60 }
 0x1ba   :  { %12420 = vmatmul.mubr.msk.bf16.gmra.mrb[76].mxu0 %vm2594_vm3, %v15722_v47  ;;  %v2351_v47 = vsel %vm2126_vm1, %v14545_v3, %v1939_v0  ;;  %v14547_v3 = vld [vmem:[%s18649_s0 + $0x708] sm:$0xff]  }
 0x1bb   :  { %12423 = vmatprep.mubr.msk.bf16.mxu0 %vm2594_vm3, %v15730_v58  ;;  %v2107_v39 = vpop.permute.xlu0 %2106 }
 0x1bc   :  { %v16320_v53 = vsel %vm2381_vm2, %v2351_v47, %v2107_v39  ;;  %v2109_v5 = vpop.permute.xlu1 %2108  ;;  %v14548_v47 = vld [vmem:[%s18649_s0 + $0x720] sm:$0xff]  }
 0x1bd   :  { %18764 = vst [vmem:[#allocation34_spill] sm:$0xff] %v16320_v53  ;;  %12314 = vmatmul.mubr.msk.bf16.gmra.mrb[64].mxu1 %vm2594_vm3, %v16320_v53  ;;  %v16330_v58 = vsel %vm2381_vm2, %v2354_v18, %v2109_v5 }
 0x1be   :  { %18765 = vst [vmem:[#allocation35_spill] sm:$0xff] %v16330_v58  ;;  %12317 = vmatprep.mubr.msk.bf16.mxu1 %vm2594_vm3, %v16330_v58 }
 0x1bf   :  { %v1943_v0 = vpop.permute.xlu0 %1942 }
 0x1c0   :  { %v1945_v60 = vpop.permute.xlu1 %1944 }
 0x1c1   :  { %v2360_v18 = vsel %vm2126_vm1, %v14548_v47, %v1945_v60 }
 0x1c2   :  { %12424 = vmatmul.mubr.msk.bf16.gmra.mrb[80].mxu0 %vm2594_vm3, %v15845_v22  ;;  %v2357_v22 = vsel %vm2126_vm1, %v14547_v3, %v1943_v0  ;;  %v14549_v3 = vld [vmem:[%s18649_s0 + $0x738] sm:$0xff]  }
 0x1c3   :  { %12427 = vmatprep.mubr.msk.bf16.mxu0 %vm2594_vm3, %v15864_v41  ;;  %v2111_v39 = vpop.permute.xlu0 %2110 }
 0x1c4   :  { %v16342_v19 = vsel %vm2381_vm2, %v2357_v22, %v2111_v39  ;;  %v2113_v5 = vpop.permute.xlu1 %2112  ;;  %v14550_v22 = vld [vmem:[%s18649_s0 + $0x750] sm:$0xff]  }
 0x1c5   :  { %18766 = vst [vmem:[#allocation36_spill] sm:$0xff] %v16342_v19  ;;  %12318 = vmatmul.mubr.msk.bf16.gmra.mrb[68].mxu1 %vm2594_vm3, %v16342_v19  ;;  %v16352_v41 = vsel %vm2381_vm2, %v2360_v18, %v2113_v5 }
 0x1c6   :  { %18767 = vst [vmem:[#allocation37_spill] sm:$0xff] %v16352_v41  ;;  %12321 = vmatprep.mubr.msk.bf16.mxu1 %vm2594_vm3, %v16352_v41 }
 0x1c7   :  { %v1947_v0 = vpop.permute.xlu0 %1946 }
 0x1c8   :  { %v1949_v60 = vpop.permute.xlu1 %1948 }
 0x1c9   :  { %v2366_v18 = vsel %vm2126_vm1, %v14550_v22, %v1949_v60 }
 0x1ca   :  { %12428 = vmatmul.mubr.msk.bf16.gmra.mrb[84].mxu0 %vm2594_vm3, %v15883_v62  ;;  %v2363_v62 = vsel %vm2126_vm1, %v14549_v3, %v1947_v0  ;;  %v14551_v3 = vld [vmem:[%s18649_s0 + $0x768] sm:$0xff]  }
 0x1cb   :  { %12431 = vmatprep.mubr.msk.bf16.mxu0 %vm2594_vm3, %v15902_v31  ;;  %v2115_v39 = vpop.permute.xlu0 %2114 }
 0x1cc   :  { %v16364_v47 = vsel %vm2381_vm2, %v2363_v62, %v2115_v39  ;;  %v2117_v5 = vpop.permute.xlu1 %2116  ;;  %v14552_v62 = vld [vmem:[%s18649_s0 + $0x780] sm:$0xff]  }
 0x1cd   :  { %18768 = vst [vmem:[#allocation38_spill] sm:$0xff] %v16364_v47  ;;  %12322 = vmatmul.mubr.msk.bf16.gmra.mrb[72].mxu1 %vm2594_vm3, %v16364_v47  ;;  %v16374_v31 = vsel %vm2381_vm2, %v2366_v18, %v2117_v5 }
 0x1ce   :  { %18769 = vst [vmem:[#allocation39_spill] sm:$0xff] %v16374_v31  ;;  %12325 = vmatprep.mubr.msk.bf16.mxu1 %vm2594_vm3, %v16374_v31 }
 0x1cf   :  { %v1951_v0 = vpop.permute.xlu0 %1950 }
 0x1d0   :  { %v1953_v60 = vpop.permute.xlu1 %1952 }
 0x1d1   :  { %v2372_v18 = vsel %vm2126_vm1, %v14552_v62, %v1953_v60  ;;  %v16418_v62 = vld [vmem:[%s18650_s1 + $0x6c] sm:$0xff]  }
 0x1d2   :  { %12432 = vmatmul.mubr.msk.bf16.gmra.mrb[88].mxu0 %vm2594_vm3, %v15921_v54  ;;  %v2369_v54 = vsel %vm2126_vm1, %v14551_v3, %v1951_v0  ;;  %v14553_v3 = vld [vmem:[%s18649_s0 + $0x798] sm:$0xff]   ;;  %12689 = vmatprep.subr.bf16.mxu0 %v16418_v62 }
 0x1d3   :  { %12435 = vmatprep.mubr.msk.bf16.mxu0 %vm2594_vm3, %v15940_v16  ;;  %v2119_v39 = vpop.permute.xlu0 %2118 }
 0x1d4   :  { %v16386_v22 = vsel %vm2381_vm2, %v2369_v54, %v2119_v39  ;;  %v2121_v5 = vpop.permute.xlu1 %2120 }
 0x1d5   :  { %18770 = vst [vmem:[#allocation40_spill] sm:$0xff] %v16386_v22  ;;  %12326 = vmatmul.mubr.msk.bf16.gmra.mrb[76].mxu1 %vm2594_vm3, %v16386_v22  ;;  %v16396_v16 = vsel %vm2381_vm2, %v2372_v18, %v2121_v5 }
 0x1d6   :  { %12329 = vmatprep.mubr.msk.bf16.mxu1 %vm2594_vm3, %v16396_v16 }
 0x1d7   :  { %v1955_v0 = vpop.permute.xlu0 %1954 }
 0x1da   :  { %12436 = vmatmul.mubr.msk.bf16.gmra.mrb[92].mxu0 %vm2594_vm3, %v15959_v42  ;;  %v2375_v42 = vsel %vm2126_vm1, %v14553_v3, %v1955_v0 }
 0x1db   :  { %12439 = vmatprep.mubr.msk.bf16.mxu0 %vm2594_vm3, %v15978_v14  ;;  %v2123_v54 = vpop.permute.xlu0 %2122 }
 0x1dc   :  { %v16405_v39 = vsel %vm2381_vm2, %v2375_v42, %v2123_v54 }
 0x1dd   :  { %18771 = vst [vmem:[#allocation41_spill] sm:$0xff] %v16405_v39  ;;  %12330 = vmatmul.mubr.msk.bf16.gmra.mrb[80].mxu1 %vm2594_vm3, %v16405_v39 }
 0x1e2   :  { %12440 = vmatmul.mubr.msk.bf16.gmra.mrb[96].mxu0 %vm2594_vm3, %v15997_v44 }
 0x1e3   :  { %12443 = vmatprep.mubr.msk.bf16.mxu0 %vm2594_vm3, %v16016_v26 }
 0x1ea   :  { %12444 = vmatmul.mubr.msk.bf16.gmra.mrb[100].mxu0 %vm2594_vm3, %v16035_v61 }
 0x1eb   :  { %12447 = vmatprep.mubr.msk.bf16.mxu0 %vm2594_vm3, %v16054_v36 }
 0x1f2   :  { %12448 = vmatmul.mubr.msk.bf16.gmra.mrb[104].mxu0 %vm2594_vm3, %v16076_v6 }
 0x1f3   :  { %12451 = vmatprep.mubr.msk.bf16.mxu0 %vm2594_vm3, %v16092_v55 }
 0x1fa   :  { %12452 = vmatmul.mubr.msk.bf16.gmra.mrb[108].mxu0 %vm2594_vm3, %v16104_v2 }
 0x1fb   :  { %12455 = vmatprep.mubr.msk.bf16.mxu0 %vm2594_vm3, %v16115_v10 }
 0x200   :  { %v16439_v42 = vpop.f32.mrb[0].mxu1 }
 0x201   :  { %18772 = vst [vmem:[#allocation42_spill] sm:$0xff] %v16439_v42  ;;  %v16441_v60 = vpop.f32.mrb[1].mxu1 }
 0x202   :  { %12456 = vmatmul.mubr.msk.bf16.gmra.mrb[112].mxu0 %vm2594_vm3, %v16126_v50  ;;  %18773 = vst [vmem:[#allocation43_spill] sm:$0xff] %v16441_v60  ;;  %v16443_v3 = vpop.f32.mrb[2].mxu1 }
 0x203   :  { %12459 = vmatprep.mubr.msk.bf16.mxu0 %vm2594_vm3, %v16137_v11  ;;  %18774 = vst [vmem:[#allocation44_spill] sm:$0xff] %v16443_v3  ;;  %v16445_v18 = vpop.f32.mrb[3].mxu1 }
 0x204   :  { %18775 = vst [vmem:[#allocation45_spill] sm:$0xff] %v16445_v18 }
 0x20a   :  { %12460 = vmatmul.mubr.msk.bf16.gmra.mrb[116].mxu0 %vm2594_vm3, %v16148_v1  ;;  %v16451_v0 = vpop.f32.mrb[4].mxu1 }
 0x20b   :  { %12463 = vmatprep.mubr.msk.bf16.mxu0 %vm2594_vm3, %v16159_v35  ;;  %18776 = vst [vmem:[#allocation46_spill] sm:$0xff] %v16451_v0  ;;  %v16453_v5 = vpop.f32.mrb[5].mxu1 }
 0x20c   :  { %18777 = vst [vmem:[#allocation47_spill] sm:$0xff] %v16453_v5  ;;  %v16455_v54 = vpop.f32.mrb[6].mxu1 }
 0x20d   :  { %18778 = vst [vmem:[#allocation48_spill] sm:$0xff] %v16455_v54 }
 0x212   :  { %12464 = vmatmul.mubr.msk.bf16.gmra.mrb[120].mxu0 %vm2594_vm3, %v16171_v48 }
 0x213   :  { %12467 = vmatprep.mubr.msk.bf16.mxu0 %vm2594_vm3, %v16181_v28  ;;  %v16457_v28 = vpop.f32.mrb[7].mxu1 }
 0x214   :  { %18779 = vst [vmem:[#allocation49_spill] sm:$0xff] %v16457_v28 }
 0x216   :  { %v16463_v18 = vpop.f32.mrb[8].mxu1 }
 0x217   :  { %18780 = vst [vmem:[#allocation50_spill] sm:$0xff] %v16463_v18  ;;  %v16465_v3 = vpop.f32.mrb[9].mxu1 }
 0x218   :  { %18781 = vst [vmem:[#allocation51_spill] sm:$0xff] %v16465_v3  ;;  %v16467_v60 = vpop.f32.mrb[10].mxu1 }
 0x219   :  { %18782 = vst [vmem:[#allocation52_spill] sm:$0xff] %v16467_v60  ;;  %v16469_v42 = vpop.f32.mrb[11].mxu1 }
 0x21a   :  { %12468 = vmatmul.mubr.msk.bf16.gmra.mrb[124].mxu0 %vm2594_vm3, %v16193_v25  ;;  %18783 = vst [vmem:[#allocation53_spill] sm:$0xff] %v16469_v42 }
 0x21b   :  { %12471 = vmatprep.mubr.msk.bf16.mxu0 %vm2594_vm3, %v16205_v32 }
 0x21f   :  { %v16475_v28 = vpop.f32.mrb[12].mxu1 }
 0x220   :  { %18784 = vst [vmem:[#allocation54_spill] sm:$0xff] %v16475_v28  ;;  %v16477_v54 = vpop.f32.mrb[13].mxu1 }
 0x221   :  { %18785 = vst [vmem:[#allocation55_spill] sm:$0xff] %v16477_v54  ;;  %v16479_v5 = vpop.f32.mrb[14].mxu1 }
 0x222   :  { %12472 = vmatmul.mubr.msk.bf16.gmra.mrb[128].mxu0 %vm2594_vm3, %v16215_v56  ;;  %18786 = vst [vmem:[#allocation56_spill] sm:$0xff] %v16479_v5  ;;  %v16481_v0 = vpop.f32.mrb[15].mxu1 }
 0x223   :  { %12475 = vmatprep.mubr.msk.bf16.mxu0 %vm2594_vm3, %v16227_v8  ;;  %18787 = vst [vmem:[#allocation57_spill] sm:$0xff] %v16481_v0 }
 0x227   :  { %v16487_v42 = vpop.f32.mrb[16].mxu1 }
 0x228   :  { %18788 = vst [vmem:[#allocation58_spill] sm:$0xff] %v16487_v42  ;;  %v16489_v60 = vpop.f32.mrb[17].mxu1 }
 0x229   :  { %18789 = vst [vmem:[#allocation59_spill] sm:$0xff] %v16489_v60  ;;  %v16491_v3 = vpop.f32.mrb[18].mxu1 }
 0x22a   :  { %12476 = vmatmul.mubr.msk.bf16.gmra.mrb[132].mxu0 %vm2594_vm3, %v16237_v49  ;;  %18790 = vst [vmem:[#allocation60_spill] sm:$0xff] %v16491_v3  ;;  %v16493_v18 = vpop.f32.mrb[19].mxu1 }
 0x22b   :  { %12479 = vmatprep.mubr.msk.bf16.mxu0 %vm2594_vm3, %v16249_v12  ;;  %18791 = vst [vmem:[#allocation61_spill] sm:$0xff] %v16493_v18 }
 0x22f   :  { %v16499_v0 = vpop.f32.mrb[20].mxu1 }
 0x230   :  { %18792 = vst [vmem:[#allocation62_spill] sm:$0xff] %v16499_v0  ;;  %v16501_v5 = vpop.f32.mrb[21].mxu1 }
 0x231   :  { %18793 = vst [vmem:[#allocation63_spill] sm:$0xff] %v16501_v5  ;;  %v16503_v54 = vpop.f32.mrb[22].mxu1 }
 0x232   :  { %12480 = vmatmul.mubr.msk.bf16.gmra.mrb[136].mxu0 %vm2594_vm3, %v16264_v38  ;;  %18794 = vst [vmem:[#allocation64_spill] sm:$0xff] %v16503_v54  ;;  %v16505_v28 = vpop.f32.mrb[23].mxu1 }
 0x233   :  { %12483 = vmatprep.mubr.msk.bf16.mxu0 %vm2594_vm3, %v16276_v33  ;;  %18795 = vst [vmem:[#allocation65_spill] sm:$0xff] %v16505_v28 }
 0x238   :  { %v16511_v18 = vpop.f32.mrb[24].mxu1 }
 0x239   :  { %18796 = vst [vmem:[#allocation66_spill] sm:$0xff] %v16511_v18  ;;  %v16513_v3 = vpop.f32.mrb[25].mxu1 }
 0x23a   :  { %12484 = vmatmul.mubr.msk.bf16.gmra.mrb[140].mxu0 %vm2594_vm3, %v16286_v9  ;;  %18797 = vst [vmem:[#allocation67_spill] sm:$0xff] %v16513_v3  ;;  %v16515_v60 = vpop.f32.mrb[26].mxu1 }
 0x23b   :  { %12487 = vmatprep.mubr.msk.bf16.mxu0 %vm2594_vm3, %v16298_v17  ;;  %18798 = vst [vmem:[#allocation68_spill] sm:$0xff] %v16515_v60  ;;  %v16517_v42 = vpop.f32.mrb[27].mxu1 }
 0x23c   :  { %18799 = vst [vmem:[#allocation69_spill] sm:$0xff] %v16517_v42 }
 0x240   :  { %v16523_v28 = vpop.f32.mrb[28].mxu1 }
 0x241   :  { %18800 = vst [vmem:[#allocation70_spill] sm:$0xff] %v16523_v28  ;;  %v16525_v54 = vpop.f32.mrb[29].mxu1 }
 0x242   :  { %12488 = vmatmul.mubr.msk.bf16.gmra.mrb[144].mxu0 %vm2594_vm3, %v16308_v24  ;;  %18801 = vst [vmem:[#allocation71_spill] sm:$0xff] %v16525_v54  ;;  %v16527_v5 = vpop.f32.mrb[30].mxu1  ;;  %v1957_v54 = vpop.permute.xlu1 %1956 }
 0x243   :  { %12491 = vmatprep.mubr.msk.bf16.mxu0 %vm2594_vm3, %v16320_v53  ;;  %18802 = vst [vmem:[#allocation72_spill] sm:$0xff] %v16527_v5  ;;  %v16529_v0 = vpop.f32.mrb[31].mxu1 }
 0x244   :  { %18803 = vst [vmem:[#allocation73_spill] sm:$0xff] %v16529_v0 }
 0x24a   :  { %12492 = vmatmul.mubr.msk.bf16.gmra.mrb[148].mxu0 %vm2594_vm3, %v16330_v58 }
 0x24b   :  { %12495 = vmatprep.mubr.msk.bf16.mxu0 %vm2594_vm3, %v16342_v19 }
 0x24f   :  { %v16535_v42 = vpop.f32.mrb[32].mxu1 }
 0x250   :  { %18804 = vst [vmem:[#allocation74_spill] sm:$0xff] %v16535_v42  ;;  %v16537_v60 = vpop.f32.mrb[33].mxu1 }
 0x251   :  { %18805 = vst [vmem:[#allocation75_spill] sm:$0xff] %v16537_v60  ;;  %v16539_v3 = vpop.f32.mrb[34].mxu1 }
 0x252   :  { %12496 = vmatmul.mubr.msk.bf16.gmra.mrb[152].mxu0 %vm2594_vm3, %v16352_v41  ;;  %18806 = vst [vmem:[#allocation76_spill] sm:$0xff] %v16539_v3  ;;  %v16541_v18 = vpop.f32.mrb[35].mxu1  ;;  %v14554_v3 = vld [vmem:[%s18649_s0 + $0x7b0] sm:$0xff]  }
 0x253   :  { %12499 = vmatprep.mubr.msk.bf16.mxu0 %vm2594_vm3, %v16364_v47  ;;  %18807 = vst [vmem:[#allocation77_spill] sm:$0xff] %v16541_v18  ;;  %v2378_v18 = vsel %vm2126_vm1, %v14554_v3, %v1957_v54  ;;  %v14556_v3 = vld [vmem:[%s18650_s1 + $0x74] sm:$0xff]  }
 0x257   :  { %v16547_v0 = vpop.f32.mrb[36].mxu1 }
 0x258   :  { %18808 = vst [vmem:[#allocation78_spill] sm:$0xff] %v16547_v0  ;;  %v16549_v5 = vpop.f32.mrb[37].mxu1  ;;  %v2125_v0 = vpop.permute.xlu1 %2124 }
 0x259   :  { %18809 = vst [vmem:[#allocation79_spill] sm:$0xff] %v16549_v5  ;;  %v16551_v28 = vpop.f32.mrb[38].mxu1 }
 0x25a   :  { %12500 = vmatmul.mubr.msk.bf16.gmra.mrb[156].mxu0 %vm2594_vm3, %v16374_v31  ;;  %18810 = vst [vmem:[#allocation80_spill] sm:$0xff] %v16551_v28  ;;  %v16553_v42 = vpop.f32.mrb[39].mxu1 }
 0x25b   :  { %12503 = vmatprep.mubr.msk.bf16.mxu0 %vm2594_vm3, %v16386_v22  ;;  %18811 = vst [vmem:[#allocation81_spill] sm:$0xff] %v16553_v42  ;;  %v16570_v42 = vsel %vm2381_vm2, %v2378_v18, %v2125_v0 }
 0x25f   :  { %v16563_v60 = vpop.f32.mrb[40].mxu1 }
 0x260   :  { %18812 = vst [vmem:[#allocation82_spill] sm:$0xff] %v16563_v60  ;;  %v16565_v5 = vpop.f32.mrb[41].mxu1  ;;  %v18866_v60 = vld [vmem:[#allocation15_spill] sm:$0xff] }
 0x261   :  { %18813 = vst [vmem:[#allocation83_spill] sm:$0xff] %v16565_v5  ;;  %v16567_v28 = vpop.f32.mrb[42].mxu1  ;;  %v18865_v5 = vld [vmem:[#allocation14_spill] sm:$0xff] }
 0x262   :  { %12504 = vmatmul.mubr.msk.bf16.gmra.mrb[160].mxu0 %vm2594_vm3, %v16396_v16  ;;  %18814 = vst [vmem:[#allocation84_spill] sm:$0xff] %v16567_v28  ;;  %v16572_v22 = vpop.f32.mrb[43].mxu1 }
 0x263   :  { %12507 = vmatprep.mubr.msk.bf16.mxu0 %vm2594_vm3, %v16405_v39  ;;  %18815 = vst [vmem:[#allocation85_spill] sm:$0xff] %v16572_v22  ;;  %v18864_v22 = vld [vmem:[#allocation13_spill] sm:$0xff] }
 0x268   :  { %v16578_v39 = vpop.f32.mrb[44].mxu1 }
 0x269   :  { %18816 = vst [vmem:[#allocation86_spill] sm:$0xff] %v16578_v39  ;;  %v16583_v54 = vpop.f32.mrb[45].mxu1 }
 0x26a   :  { %12508 = vmatmul.mubr.msk.bf16.gmra.mrb[164].mxu0 %vm2594_vm3, %v16570_v42  ;;  %18817 = vst [vmem:[#allocation87_spill] sm:$0xff] %v16583_v54  ;;  %v16585_v28 = vpop.f32.mrb[46].mxu1 }
 0x26b   :  { %12521 = vmatprep.mubr.msk.bf16.mxu0 %vm2594_vm3, %v15133_v20  ;;  %18818 = vst [vmem:[#allocation88_spill] sm:$0xff] %v16585_v28  ;;  %v16589_v18 = vpop.f32.mrb[47].mxu1  ;;  %v14557_v20 = vld [vmem:[%s18650_s1 + $0x7c] sm:$0xff]  }
 0x26c   :  { %18819 = vst [vmem:[#allocation89_spill] sm:$0xff] %v16589_v18 }
 0x270   :  { %v16597_v0 = vpop.f32.mrb[48].mxu1 }
 0x271   :  { %18820 = vst [vmem:[#allocation90_spill] sm:$0xff] %v16597_v0  ;;  %v16599_v54 = vpop.f32.mrb[49].mxu1 }
 0x272   :  { %12522 = vmatmul.mubr.msk.bf16.vlgmr.msra.gmra.mrb[0].mxu0 %vm2594_vm3, %v15156_v29  ;;  %18821 = vst [vmem:[#allocation91_spill] sm:$0xff] %v16599_v54  ;;  %v16601_v28 = vpop.f32.mrb[50].mxu1 }
 0x273   :  { %12525 = vmatprep.mubr.msk.bf16.mxu0 %vm2594_vm3, %v15176_v37  ;;  %12690 = vmatpush3.bf16.msra.mxu0 %v16418_v62  ;;  %18822 = vst [vmem:[#allocation92_spill] sm:$0xff] %v16601_v28  ;;  %v16605_v18 = vpop.f32.mrb[51].mxu1 }
 0x274   :  { %12691 = vmatprep.subr.bf16.mxu0 %v14556_v3  ;;  %18823 = vst [vmem:[#allocation93_spill] sm:$0xff] %v16605_v18 }
 0x277   :  { %12692 = vmatpush3.bf16.msra.mxu0 %v14556_v3 }
 0x278   :  { %12693 = vmatprep.subr.bf16.mxu0 %v14557_v20  ;;  %v16609_v62 = vpop.f32.mrb[52].mxu1 }
 0x279   :  { %18824 = vst [vmem:[#allocation94_spill] sm:$0xff] %v16609_v62  ;;  %v16611_v39 = vpop.f32.mrb[53].mxu1  ;;  %v18862_v62 = vld [vmem:[#allocation11_spill] sm:$0xff] }
 0x27a   :  { %12526 = vmatmul.mubr.msk.bf16.gmra.mrb[4].mxu0 %vm2594_vm3, %v15195_v45  ;;  %18825 = vst [vmem:[#allocation95_spill] sm:$0xff] %v16611_v39  ;;  %v16613_v3 = vpop.f32.mrb[54].mxu1 }
 0x27b   :  { %12529 = vmatprep.mubr.msk.bf16.mxu0 %vm2594_vm3, %v15212_v52  ;;  %12694 = vmatpush3.bf16.msra.mxu0 %v14557_v20  ;;  %18826 = vst [vmem:[#allocation96_spill] sm:$0xff] %v16613_v3  ;;  %v16617_v54 = vpop.f32.mrb[55].mxu1 }
 0x27c   :  { %18827 = vst [vmem:[#allocation97_spill] sm:$0xff] %v16617_v54 }
 0x280   :  { %v16621_v28 = vpop.f32.mrb[56].mxu1 }
 0x281   :  { %18828 = vst [vmem:[#allocation98_spill] sm:$0xff] %v16621_v28  ;;  %v16623_v18 = vpop.f32.mrb[57].mxu1 }
 0x282   :  { %12530 = vmatmul.mubr.msk.bf16.gmra.mrb[8].mxu0 %vm2594_vm3, %v15229_v59  ;;  %18829 = vst [vmem:[#allocation99_spill] sm:$0xff] %v16623_v18  ;;  %v16625_v0 = vpop.f32.mrb[58].mxu1 }
 0x283   :  { %12533 = vmatprep.mubr.msk.bf16.mxu0 %vm2594_vm3, %v15246_v4  ;;  %18830 = vst [vmem:[#allocation100_spill] sm:$0xff] %v16625_v0  ;;  %v16629_v20 = vpop.f32.mrb[59].mxu1 }
 0x284   :  { %18831 = vst [vmem:[#allocation101_spill] sm:$0xff] %v16629_v20 }
 0x288   :  { %v16633_v3 = vpop.f32.mrb[60].mxu1 }
 0x289   :  { %18832 = vst [vmem:[#allocation102_spill] sm:$0xff] %v16633_v3  ;;  %v16635_v54 = vpop.f32.mrb[61].mxu1 }
 0x28a   :  { %12534 = vmatmul.mubr.msk.bf16.gmra.mrb[12].mxu0 %vm2594_vm3, %v15263_v13  ;;  %18833 = vst [vmem:[#allocation103_spill] sm:$0xff] %v16635_v54  ;;  %v16637_v39 = vpop.f32.mrb[62].mxu1 }
 0x28b   :  { %12537 = vmatprep.mubr.msk.bf16.mxu0 %vm2594_vm3, %v15280_v21  ;;  %18834 = vst [vmem:[#allocation104_spill] sm:$0xff] %v16637_v39  ;;  %v16641_v18 = vpop.f32.mrb[63].mxu1 }
 0x28c   :  { %18835 = vst [vmem:[#allocation105_spill] sm:$0xff] %v16641_v18 }
 0x290   :  { %v16645_v0 = vpop.f32.mrb[64].mxu1 }
 0x291   :  { %18836 = vst [vmem:[#allocation106_spill] sm:$0xff] %v16645_v0  ;;  %v16647_v20 = vpop.f32.mrb[65].mxu1 }
 0x292   :  { %12538 = vmatmul.mubr.msk.bf16.gmra.mrb[16].mxu0 %vm2594_vm3, %v15294_v27  ;;  %18837 = vst [vmem:[#allocation107_spill] sm:$0xff] %v16647_v20  ;;  %v16649_v28 = vpop.f32.mrb[66].mxu1 }
 0x293   :  { %12541 = vmatprep.mubr.msk.bf16.mxu0 %vm2594_vm3, %v15310_v34  ;;  %18838 = vst [vmem:[#allocation108_spill] sm:$0xff] %v16649_v28  ;;  %v16653_v54 = vpop.f32.mrb[67].mxu1 }
 0x294   :  { %18839 = vst [vmem:[#allocation109_spill] sm:$0xff] %v16653_v54 }
 0x298   :  { %v16657_v39 = vpop.f32.mrb[68].mxu1 }
 0x299   :  { %18840 = vst [vmem:[#allocation110_spill] sm:$0xff] %v16657_v39  ;;  %v16659_v18 = vpop.f32.mrb[69].mxu1 }
 0x29a   :  { %12542 = vmatmul.mubr.msk.bf16.gmra.mrb[20].mxu0 %vm2594_vm3, %v15320_v40  ;;  %18841 = vst [vmem:[#allocation111_spill] sm:$0xff] %v16659_v18  ;;  %v16661_v3 = vpop.f32.mrb[70].mxu1 }
 0x29b   :  { %12545 = vmatprep.mubr.msk.bf16.mxu0 %vm2594_vm3, %v15329_v46  ;;  %18842 = vst [vmem:[#allocation112_spill] sm:$0xff] %v16661_v3  ;;  %v16665_v20 = vpop.f32.mrb[71].mxu1 }
 0x29c   :  { %18843 = vst [vmem:[#allocation113_spill] sm:$0xff] %v16665_v20 }
 0x2a0   :  { %v16669_v28 = vpop.f32.mrb[72].mxu1 }
 0x2a1   :  { %18844 = vst [vmem:[#allocation114_spill] sm:$0xff] %v16669_v28  ;;  %v16671_v54 = vpop.f32.mrb[73].mxu1 }
 0x2a2   :  { %12546 = vmatmul.mubr.msk.bf16.gmra.mrb[24].mxu0 %vm2594_vm3, %v15338_v51  ;;  %18845 = vst [vmem:[#allocation115_spill] sm:$0xff] %v16671_v54  ;;  %v16673_v0 = vpop.f32.mrb[74].mxu1 }
 0x2a3   :  { %12549 = vmatprep.mubr.msk.bf16.mxu0 %vm2594_vm3, %v15347_v57  ;;  %18846 = vst [vmem:[#allocation116_spill] sm:$0xff] %v16673_v0  ;;  %v16677_v18 = vpop.f32.mrb[75].mxu1 }
 0x2a4   :  { %18847 = vst [vmem:[#allocation117_spill] sm:$0xff] %v16677_v18 }
 0x2a8   :  { %v16681_v3 = vpop.f32.mrb[76].mxu1 }
 0x2a9   :  { %18848 = vst [vmem:[#allocation118_spill] sm:$0xff] %v16681_v3  ;;  %v16683_v20 = vpop.f32.mrb[77].mxu1  ;;  %v18861_v3 = vld [vmem:[#allocation10_spill] sm:$0xff] }
 0x2aa   :  { %12550 = vmatmul.mubr.msk.bf16.gmra.mrb[28].mxu0 %vm2594_vm3, %v15356_v63  ;;  %18849 = vst [vmem:[#allocation119_spill] sm:$0xff] %v16683_v20  ;;  %v16685_v39 = vpop.f32.mrb[78].mxu1 }
 0x2ab   :  { %12553 = vmatprep.mubr.msk.bf16.mxu0 %vm2594_vm3, %v15365_v7  ;;  %18850 = vst [vmem:[#allocation120_spill] sm:$0xff] %v16685_v39  ;;  %v16689_v54 = vpop.f32.mrb[79].mxu1  ;;  %v18856_v39 = vld [vmem:[#allocation5_spill] sm:$0xff] }
 0x2ac   :  { %18851 = vst [vmem:[#allocation121_spill] sm:$0xff] %v16689_v54  ;;  %v14558_v54 = vld [vmem:[%s18650_s1 + $0x84] sm:$0xff]  }
 0x2ad   :  { %12695 = vmatprep.subr.bf16.mxu0 %v14558_v54 }
 0x2ae   :  { %12696 = vmatpush3.bf16.msra.mxu0 %v14558_v54  ;;  %v18863_v54 = vld [vmem:[#allocation12_spill] sm:$0xff] }
 0x2b0   :  { %v16693_v0 = vpop.f32.mrb[80].mxu1 }
 0x2b1   :  { %18852 = vst [vmem:[#allocation122_spill] sm:$0xff] %v16693_v0  ;;  %v16695_v18 = vpop.f32.mrb[81].mxu1  ;;  %v18859_v0 = vld [vmem:[#allocation8_spill] sm:$0xff] }
 0x2b2   :  { %12554 = vmatmul.mubr.msk.bf16.gmra.mrb[32].mxu0 %vm2594_vm3, %v15374_v15  ;;  %18853 = vst [vmem:[#allocation123_spill] sm:$0xff] %v16695_v18  ;;  %v16697_v28 = vpop.f32.mrb[82].mxu1  ;;  %v18857_v18 = vld [vmem:[#allocation6_spill] sm:$0xff] }
 0x2b3   :  { %12557 = vmatprep.mubr.msk.bf16.mxu0 %vm2594_vm3, %v15386_v23  ;;  %18854 = vst [vmem:[#allocation124_spill] sm:$0xff] %v16697_v28  ;;  %v16701_v20 = vpop.f32.mrb[83].mxu1  ;;  %v18858_v28 = vld [vmem:[#allocation7_spill] sm:$0xff] }
 0x2b4   :  { %18855 = vst [vmem:[#allocation125_spill] sm:$0xff] %v16701_v20  ;;  %v18860_v20 = vld [vmem:[#allocation9_spill] sm:$0xff] }
 0x2ba   :  { %12558 = vmatmul.mubr.msk.bf16.gmra.mrb[36].mxu0 %vm2594_vm3, %v15396_v30 }
 0x2bb   :  { %12561 = vmatprep.mubr.msk.bf16.mxu0 %vm2594_vm3, %v15419_v43 }
 0x2c2   :  { %12562 = vmatmul.mubr.msk.bf16.gmra.mrb[40].mxu0 %vm2594_vm3, %v18856_v39 }
 0x2c3   :  { %12565 = vmatprep.mubr.msk.bf16.mxu0 %vm2594_vm3, %v18857_v18 }
 0x2ca   :  { %12566 = vmatmul.mubr.msk.bf16.gmra.mrb[44].mxu0 %vm2594_vm3, %v18858_v28 }
 0x2cb   :  { %12569 = vmatprep.mubr.msk.bf16.mxu0 %vm2594_vm3, %v18859_v0  ;;  %v18867_v0 = vld [vmem:[#allocation16_spill] sm:$0xff] }
 0x2d2   :  { %12570 = vmatmul.mubr.msk.bf16.gmra.mrb[48].mxu0 %vm2594_vm3, %v18860_v20  ;;  %v18868_v20 = vld [vmem:[#allocation17_spill] sm:$0xff] }
 0x2d3   :  { %12573 = vmatprep.mubr.msk.bf16.mxu0 %vm2594_vm3, %v18861_v3  ;;  %v18869_v3 = vld [vmem:[#allocation18_spill] sm:$0xff] }
 0x2da   :  { %12574 = vmatmul.mubr.msk.bf16.gmra.mrb[52].mxu0 %vm2594_vm3, %v18862_v62  ;;  %v18870_v62 = vld [vmem:[#allocation19_spill] sm:$0xff] }
 0x2db   :  { %12577 = vmatprep.mubr.msk.bf16.mxu0 %vm2594_vm3, %v18863_v54  ;;  %v18871_v54 = vld [vmem:[#allocation20_spill] sm:$0xff] }
 0x2e2   :  { %12578 = vmatmul.mubr.msk.bf16.gmra.mrb[56].mxu0 %vm2594_vm3, %v18864_v22  ;;  %v18877_v22 = vld [vmem:[#allocation26_spill] sm:$0xff] }
 0x2e3   :  { %12581 = vmatprep.mubr.msk.bf16.mxu0 %vm2594_vm3, %v18865_v5  ;;  %v14559_v5 = vld [vmem:[%s18650_s1 + $0x8c] ss:$0 sps:$4 sm:$0x11]  }
 0x2e4   :  { %14281 = vmatprep.subr.msk.bf16.mxu0 %vm2761_vm0, %v14559_v5 }
 0x2ea   :  { %12582 = vmatmul.mubr.msk.bf16.gmra.mrb[60].mxu0 %vm2594_vm3, %v18866_v60  ;;  %v18872_v60 = vld [vmem:[#allocation21_spill] sm:$0xff] }
 0x2eb   :  { %12585 = vmatprep.mubr.msk.bf16.mxu0 %vm2594_vm3, %v18867_v0  ;;  %v5338_v0 = vsel %vm2761_vm0, %v14559_v5, 0  ;;  %v18878_v5 = vld [vmem:[#allocation27_spill] sm:$0xff] }
 0x2ec   :  { %12698 = vmatpush3.bf16.msra.mxu0 %v5338_v0  ;;  %v18879_v0 = vld [vmem:[#allocation28_spill] sm:$0xff] }
 0x2f2   :  { %12586 = vmatmul.mubr.msk.bf16.gmra.mrb[64].mxu0 %vm2594_vm3, %v18868_v20  ;;  %v18873_v20 = vld [vmem:[#allocation22_spill] sm:$0xff] }
 0x2f3   :  { %12589 = vmatprep.mubr.msk.bf16.mxu0 %vm2594_vm3, %v18869_v3  ;;  %v18874_v3 = vld [vmem:[#allocation23_spill] sm:$0xff] }
 0x2fa   :  { %12590 = vmatmul.mubr.msk.bf16.gmra.mrb[68].mxu0 %vm2594_vm3, %v18870_v62  ;;  %v18875_v62 = vld [vmem:[#allocation24_spill] sm:$0xff] }
 0x2fb   :  { %12593 = vmatprep.mubr.msk.bf16.mxu0 %vm2594_vm3, %v18871_v54  ;;  %v18876_v54 = vld [vmem:[#allocation25_spill] sm:$0xff] }
 0x302   :  { %12594 = vmatmul.mubr.msk.bf16.gmra.mrb[72].mxu0 %vm2594_vm3, %v18872_v60  ;;  %v18880_v60 = vld [vmem:[#allocation29_spill] sm:$0xff] }
 0x303   :  { %12597 = vmatprep.mubr.msk.bf16.mxu0 %vm2594_vm3, %v18873_v20  ;;  %v18881_v20 = vld [vmem:[#allocation30_spill] sm:$0xff] }
 0x30a   :  { %12598 = vmatmul.mubr.msk.bf16.gmra.mrb[76].mxu0 %vm2594_vm3, %v18874_v3 }
 0x30b   :  { %12601 = vmatprep.mubr.msk.bf16.mxu0 %vm2594_vm3, %v18875_v62 }
 0x312   :  { %12602 = vmatmul.mubr.msk.bf16.gmra.mrb[80].mxu0 %vm2594_vm3, %v18876_v54 }
 0x313   :  { %12605 = vmatprep.mubr.msk.bf16.mxu0 %vm2594_vm3, %v18877_v22 }
 0x31a   :  { %12606 = vmatmul.mubr.msk.bf16.gmra.mrb[84].mxu0 %vm2594_vm3, %v18878_v5 }
 0x31b   :  { %12609 = vmatprep.mubr.msk.bf16.mxu0 %vm2594_vm3, %v18879_v0 }
 0x322   :  { %12610 = vmatmul.mubr.msk.bf16.gmra.mrb[88].mxu0 %vm2594_vm3, %v18880_v60 }
 0x323   :  { %12613 = vmatprep.mubr.msk.bf16.mxu0 %vm2594_vm3, %v18881_v20 }
 0x32a   :  { %12614 = vmatmul.mubr.msk.bf16.gmra.mrb[92].mxu0 %vm2594_vm3, %v15978_v14 }
 0x32b   :  { %12617 = vmatprep.mubr.msk.bf16.mxu0 %vm2594_vm3, %v15997_v44 }
 0x332   :  { %12618 = vmatmul.mubr.msk.bf16.gmra.mrb[96].mxu0 %vm2594_vm3, %v16016_v26 }
 0x333   :  { %12621 = vmatprep.mubr.msk.bf16.mxu0 %vm2594_vm3, %v16035_v61 }
 0x33a   :  { %12622 = vmatmul.mubr.msk.bf16.gmra.mrb[100].mxu0 %vm2594_vm3, %v16054_v36 }
 0x33b   :  { %12625 = vmatprep.mubr.msk.bf16.mxu0 %vm2594_vm3, %v16076_v6 }
 0x342   :  { %12626 = vmatmul.mubr.msk.bf16.gmra.mrb[104].mxu0 %vm2594_vm3, %v16092_v55  ;;  %v18882_v55 = vld [vmem:[#allocation32_spill] sm:$0xff] }
 0x343   :  { %12629 = vmatprep.mubr.msk.bf16.mxu0 %vm2594_vm3, %v16104_v2 }
 0x34a   :  { %12630 = vmatmul.mubr.msk.bf16.gmra.mrb[108].mxu0 %vm2594_vm3, %v16115_v10 }
 0x34b   :  { %12633 = vmatprep.mubr.msk.bf16.mxu0 %vm2594_vm3, %v16126_v50 }
 0x352   :  { %12634 = vmatmul.mubr.msk.bf16.gmra.mrb[112].mxu0 %vm2594_vm3, %v16137_v11 }
 0x353   :  { %12637 = vmatprep.mubr.msk.bf16.mxu0 %vm2594_vm3, %v16148_v1 }
 0x35a   :  { %12638 = vmatmul.mubr.msk.bf16.gmra.mrb[116].mxu0 %vm2594_vm3, %v16159_v35 }
 0x35b   :  { %12641 = vmatprep.mubr.msk.bf16.mxu0 %vm2594_vm3, %v16171_v48 }
 0x362   :  { %12642 = vmatmul.mubr.msk.bf16.gmra.mrb[120].mxu0 %vm2594_vm3, %v18882_v55 }
 0x363   :  { %12645 = vmatprep.mubr.msk.bf16.mxu0 %vm2594_vm3, %v16193_v25 }
 0x36a   :  { %12646 = vmatmul.mubr.msk.bf16.gmra.mrb[124].mxu0 %vm2594_vm3, %v16205_v32 }
 0x36b   :  { %12649 = vmatprep.mubr.msk.bf16.mxu0 %vm2594_vm3, %v16215_v56 }
 0x372   :  { %12650 = vmatmul.mubr.msk.bf16.gmra.mrb[128].mxu0 %vm2594_vm3, %v16227_v8 }
 0x373   :  { %12653 = vmatprep.mubr.msk.bf16.mxu0 %vm2594_vm3, %v16237_v49 }
 0x37a   :  { %12654 = vmatmul.mubr.msk.bf16.gmra.mrb[132].mxu0 %vm2594_vm3, %v16249_v12 }
 0x37b   :  { %12657 = vmatprep.mubr.msk.bf16.mxu0 %vm2594_vm3, %v16264_v38 }
 0x382   :  { %12658 = vmatmul.mubr.msk.bf16.gmra.mrb[136].mxu0 %vm2594_vm3, %v16276_v33 }
 0x383   :  { %12661 = vmatprep.mubr.msk.bf16.mxu0 %vm2594_vm3, %v16286_v9 }
 0x38a   :  { %12662 = vmatmul.mubr.msk.bf16.gmra.mrb[140].mxu0 %vm2594_vm3, %v16298_v17  ;;  %v18883_v17 = vld [vmem:[#allocation40_spill] sm:$0xff] }
 0x38b   :  { %12665 = vmatprep.mubr.msk.bf16.mxu0 %vm2594_vm3, %v16308_v24 }
 0x392   :  { %12666 = vmatmul.mubr.msk.bf16.gmra.mrb[144].mxu0 %vm2594_vm3, %v16320_v53  ;;  %v18884_v53 = vld [vmem:[#allocation41_spill] sm:$0xff] }
 0x393   :  { %12669 = vmatprep.mubr.msk.bf16.mxu0 %vm2594_vm3, %v16330_v58 }
 0x39a   :  { %12670 = vmatmul.mubr.msk.bf16.gmra.mrb[148].mxu0 %vm2594_vm3, %v16342_v19 }
 0x39b   :  { %12673 = vmatprep.mubr.msk.bf16.mxu0 %vm2594_vm3, %v16352_v41  ;;  %v14349_v41 = vld [vmem:[%s18649_s0 + $0x7c8] sm:$0xff]   ;;  %s14762_s0 = smov 25  }
 0x3a2   :  { %12674 = vmatmul.mubr.msk.bf16.gmra.mrb[152].mxu0 %vm2594_vm3, %v16364_v47  ;;  %v18885_v47 = vld [vmem:[#allocation2_spill] sm:$0xff] }
 0x3a3   :  { %12677 = vmatprep.mubr.msk.bf16.mxu0 %vm2594_vm3, %v16374_v31  ;;  %v2380_v19 = vsel %vm2126_vm1, %v14349_v41, %v18885_v47  ;;  %v18886_v31 = vld [vmem:[#allocation3_spill] sm:$0xff]  ;;  %v14563_v41 = vld [vmem:[%s18651_s3 + $0x18] sm:$0xff]  }
 0x3a4   :  { %v16844_v58 = vsel %vm2381_vm2, %v2380_v19, %v18886_v31  ;;  %v14564_v31 = vld [vmem:[%s18651_s3 + $0x20] sm:$0x3f]  }
 0x3aa   :  { %12678 = vmatmul.mubr.msk.bf16.gmra.mrb[156].mxu0 %vm2594_vm3, %v18883_v17 }
 0x3ab   :  { %12681 = vmatprep.mubr.msk.bf16.mxu0 %vm2594_vm3, %v16396_v16 }
 0x3b2   :  { %12682 = vmatmul.mubr.msk.bf16.gmra.mrb[160].mxu0 %vm2594_vm3, %v18884_v53 }
 0x3b3   :  { %12685 = vmatprep.mubr.msk.bf16.mxu0 %vm2594_vm3, %v16570_v42 }
 0x3ba   :  { %12686 = vmatmul.mubr.msk.bf16.gmra.mrb[164].mxu0 %vm2594_vm3, %v16844_v58 }
 0x3bb   :  { %12699 = vmatprep.mubr.msk.bf16.mxu0 %vm2594_vm3, %v15156_v29  ;;  %v18887_v29 = vld [vmem:[#allocation8_spill] sm:$0xff] }
 0x3c2   :  { %12700 = vmatmul.mubr.msk.bf16.vlgmr.msra.gmra.mrb[0].mxu0 %vm2594_vm3, %v15176_v37  ;;  %v18888_v37 = vmov 0  }
 0x3c3   :  { %12703 = vmatprep.mubr.msk.bf16.mxu0 %vm2594_vm3, %v15195_v45  ;;  %6493 = vrot.lane.b32.xlu0 %v18888_v37, %s14762_s0  ;;  %v18889_v45 = vld [vmem:[#allocation9_spill] sm:$0xff] }
 0x3c4   :  { %6579 = vrot.lane.b32.xlu1 %v18888_v37, %s14763_s23 }
 0x3ca   :  { %12704 = vmatmul.mubr.msk.bf16.gmra.mrb[4].mxu0 %vm2594_vm3, %v15212_v52  ;;  %v18890_v52 = vld [vmem:[#allocation10_spill] sm:$0xff] }
 0x3cb   :  { %12707 = vmatprep.mubr.msk.bf16.mxu0 %vm2594_vm3, %v15229_v59  ;;  %v18891_v59 = vld [vmem:[#allocation11_spill] sm:$0xff] }
 0x3d2   :  { %12708 = vmatmul.mubr.msk.bf16.gmra.mrb[8].mxu0 %vm2594_vm3, %v15246_v4  ;;  %v18892_v4 = vld [vmem:[#allocation12_spill] sm:$0xff] }
 0x3d3   :  { %12711 = vmatprep.mubr.msk.bf16.mxu0 %vm2594_vm3, %v15263_v13  ;;  %v18893_v13 = vld [vmem:[#allocation13_spill] sm:$0xff] }
 0x3da   :  { %12712 = vmatmul.mubr.msk.bf16.gmra.mrb[12].mxu0 %vm2594_vm3, %v15280_v21  ;;  %v18894_v21 = vld [vmem:[#allocation14_spill] sm:$0xff] }
 0x3db   :  { %12715 = vmatprep.mubr.msk.bf16.mxu0 %vm2594_vm3, %v15294_v27  ;;  %v18895_v27 = vld [vmem:[#allocation15_spill] sm:$0xff] }
 0x3e2   :  { %12716 = vmatmul.mubr.msk.bf16.gmra.mrb[16].mxu0 %vm2594_vm3, %v15310_v34  ;;  %v18896_v34 = vld [vmem:[#allocation16_spill] sm:$0xff] }
 0x3e3   :  { %12719 = vmatprep.mubr.msk.bf16.mxu0 %vm2594_vm3, %v15320_v40  ;;  %v18897_v40 = vld [vmem:[#allocation17_spill] sm:$0xff] }
 0x3ea   :  { %12720 = vmatmul.mubr.msk.bf16.gmra.mrb[20].mxu0 %vm2594_vm3, %v15329_v46  ;;  %v18898_v46 = vld [vmem:[#allocation18_spill] sm:$0xff] }
 0x3eb   :  { %12723 = vmatprep.mubr.msk.bf16.mxu0 %vm2594_vm3, %v15338_v51  ;;  %v18899_v51 = vld [vmem:[#allocation19_spill] sm:$0xff] }
 0x3f2   :  { %12724 = vmatmul.mubr.msk.bf16.gmra.mrb[24].mxu0 %vm2594_vm3, %v15347_v57  ;;  %v18900_v57 = vld [vmem:[#allocation20_spill] sm:$0xff] }
 0x3f3   :  { %12727 = vmatprep.mubr.msk.bf16.mxu0 %vm2594_vm3, %v15356_v63  ;;  %v18901_v63 = vld [vmem:[#allocation21_spill] sm:$0xff] }
 0x3fa   :  { %12728 = vmatmul.mubr.msk.bf16.gmra.mrb[28].mxu0 %vm2594_vm3, %v15365_v7  ;;  %v18902_v7 = vld [vmem:[#allocation22_spill] sm:$0xff] }
 0x3fb   :  { %12731 = vmatprep.mubr.msk.bf16.mxu0 %vm2594_vm3, %v15374_v15  ;;  %v14560_v15 = vld [vmem:[%s18651_s3] sm:$0xff]  }
 0x3fc   :  { %12867 = vmatprep.subr.bf16.mxu1 %v14560_v15 }
 0x3fd   :  { %12868 = vmatpush3.bf16.msra.mxu1 %v14560_v15 }
 0x402   :  { %12732 = vmatmul.mubr.msk.bf16.gmra.mrb[32].mxu0 %vm2594_vm3, %v15386_v23  ;;  %v14561_v23 = vld [vmem:[%s18651_s3 + $0x8] sm:$0xff]  }
 0x403   :  { %12735 = vmatprep.mubr.msk.bf16.mxu0 %vm2594_vm3, %v15396_v30  ;;  %12869 = vmatprep.subr.bf16.mxu1 %v14561_v23  ;;  %v18903_v30 = vld [vmem:[#allocation31_spill] sm:$0xff] }
 0x404   :  { %12870 = vmatpush3.bf16.msra.mxu1 %v14561_v23 }
 0x40a   :  { %12736 = vmatmul.mubr.msk.bf16.gmra.mrb[36].mxu0 %vm2594_vm3, %v15419_v43  ;;  %v14562_v43 = vld [vmem:[%s18651_s3 + $0x10] sm:$0xff]  }
 0x40b   :  { %12739 = vmatprep.mubr.msk.bf16.mxu0 %vm2594_vm3, %v18856_v39  ;;  %12871 = vmatprep.subr.bf16.mxu1 %v14562_v43 }
 0x40c   :  { %12872 = vmatpush3.bf16.msra.mxu1 %v14562_v43 }
 0x40d   :  { %12873 = vmatprep.subr.bf16.mxu1 %v14563_v41 }
 0x410   :  { %12874 = vmatpush3.bf16.msra.mxu1 %v14563_v41 }
 0x412   :  { %12740 = vmatmul.mubr.msk.bf16.gmra.mrb[40].mxu0 %vm2594_vm3, %v18857_v18 }
 0x413   :  { %12743 = vmatprep.mubr.msk.bf16.mxu0 %vm2594_vm3, %v18858_v28 }
 0x41a   :  { %12744 = vmatmul.mubr.msk.bf16.gmra.mrb[44].mxu0 %vm2594_vm3, %v18887_v29 }
 0x41b   :  { %12747 = vmatprep.mubr.msk.bf16.mxu0 %vm2594_vm3, %v18889_v45 }
 0x422   :  { %12748 = vmatmul.mubr.msk.bf16.gmra.mrb[48].mxu0 %vm2594_vm3, %v18890_v52 }
 0x423   :  { %12751 = vmatprep.mubr.msk.bf16.mxu0 %vm2594_vm3, %v18891_v59 }
 0x42a   :  { %12752 = vmatmul.mubr.msk.bf16.gmra.mrb[52].mxu0 %vm2594_vm3, %v18892_v4 }
 0x42b   :  { %12755 = vmatprep.mubr.msk.bf16.mxu0 %vm2594_vm3, %v18893_v13 }
 0x432   :  { %12756 = vmatmul.mubr.msk.bf16.gmra.mrb[56].mxu0 %vm2594_vm3, %v18894_v21 }
 0x433   :  { %12759 = vmatprep.mubr.msk.bf16.mxu0 %vm2594_vm3, %v18895_v27 }
 0x43a   :  { %12760 = vmatmul.mubr.msk.bf16.gmra.mrb[60].mxu0 %vm2594_vm3, %v18896_v34 }
 0x43b   :  { %12763 = vmatprep.mubr.msk.bf16.mxu0 %vm2594_vm3, %v18897_v40 }
 0x442   :  { %12764 = vmatmul.mubr.msk.bf16.gmra.mrb[64].mxu0 %vm2594_vm3, %v18898_v46 }
 0x443   :  { %12767 = vmatprep.mubr.msk.bf16.mxu0 %vm2594_vm3, %v18899_v51 }
 0x44a   :  { %12768 = vmatmul.mubr.msk.bf16.gmra.mrb[68].mxu0 %vm2594_vm3, %v18900_v57 }
 0x44b   :  { %12771 = vmatprep.mubr.msk.bf16.mxu0 %vm2594_vm3, %v18901_v63 }
 0x452   :  { %12772 = vmatmul.mubr.msk.bf16.gmra.mrb[72].mxu0 %vm2594_vm3, %v18902_v7 }
 0x453   :  { %12775 = vmatprep.mubr.msk.bf16.mxu0 %vm2594_vm3, %v18874_v3 }
 0x45a   :  { %12776 = vmatmul.mubr.msk.bf16.gmra.mrb[76].mxu0 %vm2594_vm3, %v18875_v62 }
 0x45b   :  { %12779 = vmatprep.mubr.msk.bf16.mxu0 %vm2594_vm3, %v18876_v54 }
 0x462   :  { %12780 = vmatmul.mubr.msk.bf16.gmra.mrb[80].mxu0 %vm2594_vm3, %v18877_v22 }
 0x463   :  { %12783 = vmatprep.mubr.msk.bf16.mxu0 %vm2594_vm3, %v18878_v5 }
 0x46a   :  { %12784 = vmatmul.mubr.msk.bf16.gmra.mrb[84].mxu0 %vm2594_vm3, %v18879_v0 }
 0x46b   :  { %12787 = vmatprep.mubr.msk.bf16.mxu0 %vm2594_vm3, %v18880_v60 }
 0x472   :  { %12788 = vmatmul.mubr.msk.bf16.gmra.mrb[88].mxu0 %vm2594_vm3, %v18881_v20 }
 0x473   :  { %12791 = vmatprep.mubr.msk.bf16.mxu0 %vm2594_vm3, %v15978_v14  ;;  %v14764_v14 = vmov 65535  }
 0x47a   :  { %12792 = vmatmul.mubr.msk.bf16.gmra.mrb[92].mxu0 %vm2594_vm3, %v15997_v44  ;;  %v6886_v44 = vsel %vm6884_vm4, 4294967295, %v14764_v14 }
 0x47b   :  { %12795 = vmatprep.mubr.msk.bf16.mxu0 %vm2594_vm3, %v16016_v26  ;;  %v16978_v26 = vld [vmem:[%s18652_s2] ss:$0 sm:$0xff] }
 0x482   :  { %12796 = vmatmul.mubr.msk.bf16.gmra.mrb[96].mxu0 %vm2594_vm3, %v16035_v61  ;;  %v6494_v61 = vpop.permute.xlu0 %6493 }
 0x483   :  { %12799 = vmatprep.mubr.msk.bf16.mxu0 %vm2594_vm3, %v16054_v36  ;;  %v6639_v28 = vsel %vm6637_vm6, 0, %v6494_v61 }
 0x48a   :  { %12800 = vmatmul.mubr.msk.bf16.gmra.mrb[100].mxu0 %vm2594_vm3, %v16076_v6 }
 0x48b   :  { %12803 = vmatprep.mubr.msk.bf16.mxu0 %vm2594_vm3, %v18903_v30 }
 0x492   :  { %12804 = vmatmul.mubr.msk.bf16.gmra.mrb[104].mxu0 %vm2594_vm3, %v16104_v2  ;;  %v16983_v2 = vsel %vm6885_vm5, %v6886_v44, 0 }
 0x493   :  { %12807 = vmatprep.mubr.msk.bf16.mxu0 %vm2594_vm3, %v16115_v10  ;;  %v6889_v36 = vand.u32 %v14564_v31, %v16983_v2  ;;  %v16989_v10 = vpop.permute.xlu1 %6579 }
 0x494   :  { %v16994_v62 = vsel %vm6724_vm7, %v6639_v28, %v16989_v10 }
 0x495   :  { %v12701_v6 = vpop.f32.mrb[0].mxu0  ;;  %12875 = vmatprep.subr.bf16.mxu1 %v6889_v36  ;;  %12877 = vmatprep.mubr.msk.bf16.mxu1 %vm6829_vm8, %v16994_v62 }
 0x496   :  { %v13207_v19 = vadd.f32 %v12701_v6, %v16978_v26  ;;  %v5374_v47 = vpop.f32.mrb[1].mxu0  ;;  %12876 = vmatpush3.bf16.msra.mxu1 %v6889_v36 }
 0x497   :  { %v13208_v22 = vadd.f32 %v16978_v26, %v5374_v47  ;;  %v12702_v39 = vpop.f32.mrb[2].mxu0 }
 0x498   :  { %v13209_v60 = vadd.f32 %v12702_v39, %v16978_v26  ;;  %v5377_v18 = vpop.f32.mrb[3].mxu0  ;;  %v6215_v20 = vmax.f32 %v13207_v19, 0.0 }
 0x499   :  { %v13210_v3 = vadd.f32 %v16978_v26, %v5377_v18  ;;  %12878 = vmatmul.mubr.msk.bf16.vlgmr.msra.gmra.mrb[84].mxu1 %vm6829_vm8, %v16994_v62  ;;  %v6213_v5 = vmax.f32 %v13208_v22, 0.0 }
 0x49a   :  { %v6216_v54 = vmax.f32 %v13209_v60, 0.0  ;;  %12808 = vmatmul.mubr.msk.bf16.gmra.mrb[108].mxu0 %vm2594_vm3, %v16126_v50 }
 0x49b   :  { %v6214_v0 = vmax.f32 %v13210_v3, 0.0  ;;  %12811 = vmatprep.mubr.msk.bf16.mxu0 %vm2594_vm3, %v16137_v11 }
 0x49c   :  { %v6382_v29 = vpack.c.bf16 %v6216_v54, %v6215_v20 }
 0x49d   :  { %v17005_v45 = vpack.c.bf16 %v6214_v0, %v6213_v5  ;;  %v12705_v52 = vpop.f32.mrb[4].mxu0 }
 0x49e   :  { %v13211_v59 = vadd.f32 %v12705_v52, %v16978_v26  ;;  %6495 = vrot.lane.b32.xlu0 %v6382_v29, %s14762_s0  ;;  %v5390_v4 = vpop.f32.mrb[5].mxu0 }
 0x49f   :  { %v13212_v13 = vadd.f32 %v16978_v26, %v5390_v4  ;;  %v12706_v50 = vpop.f32.mrb[6].mxu0 }
 0x4a0   :  { %v13213_v21 = vadd.f32 %v12706_v50, %v16978_v26  ;;  %v5393_v27 = vpop.f32.mrb[7].mxu0  ;;  %v6219_v40 = vmax.f32 %v13211_v59, 0.0 }
 0x4a1   :  { %v13214_v34 = vadd.f32 %v16978_v26, %v5393_v27  ;;  %v6217_v11 = vmax.f32 %v13212_v13, 0.0 }
 0x4a2   :  { %v6220_v46 = vmax.f32 %v13213_v21, 0.0  ;;  %12812 = vmatmul.mubr.msk.bf16.gmra.mrb[112].mxu0 %vm2594_vm3, %v16148_v1 }
 0x4a3   :  { %v6218_v51 = vmax.f32 %v13214_v34, 0.0  ;;  %12815 = vmatprep.mubr.msk.bf16.mxu0 %vm2594_vm3, %v16159_v35 }
 0x4a4   :  { %v17016_v57 = vpack.c.bf16 %v6220_v46, %v6219_v40 }
 0x4a5   :  { %v6383_v63 = vpack.c.bf16 %v6218_v51, %v6217_v11  ;;  %v12709_v7 = vpop.f32.mrb[8].mxu0 }
 0x4a6   :  { %v13215_v15 = vadd.f32 %v12709_v7, %v16978_v26  ;;  %v5406_v23 = vpop.f32.mrb[9].mxu0 }
 0x4a7   :  { %v13216_v30 = vadd.f32 %v16978_v26, %v5406_v23  ;;  %6581 = vrot.lane.b32.xlu0 %v6383_v63, %s14763_s23  ;;  %v12710_v43 = vpop.f32.mrb[10].mxu0 }
 0x4a8   :  { %v13217_v41 = vadd.f32 %v12710_v43, %v16978_v26  ;;  %v5409_v1 = vpop.f32.mrb[11].mxu0  ;;  %v6223_v14 = vmax.f32 %v13215_v15, 0.0 }
 0x4a9   :  { %v13218_v31 = vadd.f32 %v16978_v26, %v5409_v1  ;;  %v6221_v35 = vmax.f32 %v13216_v30, 0.0 }
 0x4aa   :  { %v6224_v44 = vmax.f32 %v13217_v41, 0.0  ;;  %12816 = vmatmul.mubr.msk.bf16.gmra.mrb[116].mxu0 %vm2594_vm3, %v16171_v48 }
 0x4ab   :  { %v6222_v61 = vmax.f32 %v13218_v31, 0.0  ;;  %12819 = vmatprep.mubr.msk.bf16.mxu0 %vm2594_vm3, %v18882_v55 }
 0x4ac   :  { %v6386_v36 = vpack.c.bf16 %v6224_v44, %v6223_v14 }
 0x4ad   :  { %v6385_v6 = vpack.c.bf16 %v6222_v61, %v6221_v35  ;;  %v12713_v28 = vpop.f32.mrb[12].mxu0 }
 0x4ae   :  { %v13219_v19 = vadd.f32 %v12713_v28, %v16978_v26  ;;  %v5422_v47 = vpop.f32.mrb[13].mxu0 }
 0x4af   :  { %v13220_v22 = vadd.f32 %v16978_v26, %v5422_v47  ;;  %6497 = vrot.lane.b32.xlu1 %v6385_v6, %s14762_s0  ;;  %v12714_v39 = vpop.f32.mrb[14].mxu0 }
 0x4b0   :  { %v13221_v60 = vadd.f32 %v12714_v39, %v16978_v26  ;;  %v5425_v18 = vpop.f32.mrb[15].mxu0  ;;  %v6227_v3 = vmax.f32 %v13219_v19, 0.0 }
 0x4b1   :  { %v13222_v48 = vadd.f32 %v16978_v26, %v5425_v18  ;;  %v6225_v55 = vmax.f32 %v13220_v22, 0.0 }
 0x4b2   :  { %v6228_v20 = vmax.f32 %v13221_v60, 0.0  ;;  %12820 = vmatmul.mubr.msk.bf16.gmra.mrb[120].mxu0 %vm2594_vm3, %v16193_v25 }
 0x4b3   :  { %v6226_v54 = vmax.f32 %v13222_v48, 0.0  ;;  %12823 = vmatprep.mubr.msk.bf16.mxu0 %vm2594_vm3, %v16205_v32  ;;  %6583 = vrot.lane.b32.xlu1 %v6386_v36, %s14763_s23 }
 0x4b4   :  { %v6388_v5 = vpack.c.bf16 %v6228_v20, %v6227_v3 }
 0x4b5   :  { %v17037_v0 = vpack.c.bf16 %v6226_v54, %v6225_v55  ;;  %v12717_v29 = vpop.f32.mrb[16].mxu0 }
 0x4b6   :  { %v13223_v52 = vadd.f32 %v12717_v29, %v16978_v26  ;;  %6499 = vrot.lane.b32.xlu0 %v6388_v5, %s14762_s0  ;;  %v5438_v59 = vpop.f32.mrb[17].mxu0 }
 0x4b7   :  { %v13224_v4 = vadd.f32 %v16978_v26, %v5438_v59  ;;  %v12718_v13 = vpop.f32.mrb[18].mxu0 }
 0x4b8   :  { %v13225_v25 = vadd.f32 %v12718_v13, %v16978_v26  ;;  %v5441_v50 = vpop.f32.mrb[19].mxu0  ;;  %v6231_v32 = vmax.f32 %v13223_v52, 0.0 }
 0x4b9   :  { %v13226_v21 = vadd.f32 %v16978_v26, %v5441_v50  ;;  %v6229_v34 = vmax.f32 %v13224_v4, 0.0 }
 0x4ba   :  { %v6232_v27 = vmax.f32 %v13225_v25, 0.0  ;;  %12824 = vmatmul.mubr.msk.bf16.gmra.mrb[124].mxu0 %vm2594_vm3, %v16215_v56  ;;  %v18904_v25 = vld [vmem:[#allocation33_spill] sm:$0xff] }
 0x4bb   :  { %v6230_v40 = vmax.f32 %v13226_v21, 0.0  ;;  %12827 = vmatprep.mubr.msk.bf16.mxu0 %vm2594_vm3, %v16227_v8 }
 0x4bc   :  { %v17048_v46 = vpack.c.bf16 %v6232_v27, %v6231_v32 }
 0x4bd   :  { %v6389_v11 = vpack.c.bf16 %v6230_v40, %v6229_v34  ;;  %v12721_v51 = vpop.f32.mrb[20].mxu0 }
 0x4be   :  { %v13227_v63 = vadd.f32 %v12721_v51, %v16978_v26  ;;  %v5454_v7 = vpop.f32.mrb[21].mxu0 }
 0x4bf   :  { %v13228_v15 = vadd.f32 %v16978_v26, %v5454_v7  ;;  %6585 = vrot.lane.b32.xlu0 %v6389_v11, %s14763_s23  ;;  %v12722_v23 = vpop.f32.mrb[22].mxu0 }
 0x4c0   :  { %v13229_v30 = vadd.f32 %v12722_v23, %v16978_v26  ;;  %v5457_v56 = vpop.f32.mrb[23].mxu0  ;;  %v6235_v41 = vmax.f32 %v13227_v63, 0.0 }
 0x4c1   :  { %v13230_v43 = vadd.f32 %v16978_v26, %v5457_v56  ;;  %v6233_v8 = vmax.f32 %v13228_v15, 0.0  ;;  %v18905_v56 = vld [vmem:[#allocation34_spill] sm:$0xff] }
 0x4c2   :  { %v6236_v1 = vmax.f32 %v13229_v30, 0.0  ;;  %12828 = vmatmul.mubr.msk.bf16.gmra.mrb[128].mxu0 %vm2594_vm3, %v16237_v49 }
 0x4c3   :  { %v6234_v31 = vmax.f32 %v13230_v43, 0.0  ;;  %12831 = vmatprep.mubr.msk.bf16.mxu0 %vm2594_vm3, %v16249_v12 }
 0x4c4   :  { %v6392_v14 = vpack.c.bf16 %v6236_v1, %v6235_v41 }
 0x4c5   :  { %v6391_v44 = vpack.c.bf16 %v6234_v31, %v6233_v8  ;;  %v12725_v35 = vpop.f32.mrb[24].mxu0 }
 0x4c6   :  { %v13231_v61 = vadd.f32 %v12725_v35, %v16978_v26  ;;  %v5470_v36 = vpop.f32.mrb[25].mxu0 }
 0x4c7   :  { %v13232_v6 = vadd.f32 %v16978_v26, %v5470_v36  ;;  %6501 = vrot.lane.b32.xlu1 %v6391_v44, %s14762_s0  ;;  %v12726_v28 = vpop.f32.mrb[26].mxu0 }
 0x4c8   :  { %v13233_v19 = vadd.f32 %v12726_v28, %v16978_v26  ;;  %v5473_v47 = vpop.f32.mrb[27].mxu0  ;;  %v6239_v22 = vmax.f32 %v13231_v61, 0.0  ;;  %v18906_v28 = vld [vmem:[#allocation35_spill] sm:$0xff] }
 0x4c9   :  { %v13234_v49 = vadd.f32 %v16978_v26, %v5473_v47  ;;  %v6237_v12 = vmax.f32 %v13232_v6, 0.0 }
 0x4ca   :  { %v6240_v39 = vmax.f32 %v13233_v19, 0.0  ;;  %12832 = vmatmul.mubr.msk.bf16.gmra.mrb[132].mxu0 %vm2594_vm3, %v16264_v38 }
 0x4cb   :  { %v6238_v60 = vmax.f32 %v13234_v49, 0.0  ;;  %12835 = vmatprep.mubr.msk.bf16.mxu0 %vm2594_vm3, %v16276_v33  ;;  %6587 = vrot.lane.b32.xlu1 %v6392_v14, %s14763_s23  ;;  %v18907_v49 = vld [vmem:[#allocation36_spill] sm:$0xff] }
 0x4cc   :  { %v6394_v18 = vpack.c.bf16 %v6240_v39, %v6239_v22 }
 0x4cd   :  { %v17069_v48 = vpack.c.bf16 %v6238_v60, %v6237_v12  ;;  %v12729_v3 = vpop.f32.mrb[28].mxu0 }
 0x4ce   :  { %v13235_v20 = vadd.f32 %v12729_v3, %v16978_v26  ;;  %6503 = vrot.lane.b32.xlu0 %v6394_v18, %s14762_s0  ;;  %v5486_v55 = vpop.f32.mrb[29].mxu0 }
 0x4cf   :  { %v13236_v54 = vadd.f32 %v16978_v26, %v5486_v55  ;;  %v12730_v5 = vpop.f32.mrb[30].mxu0 }
 0x4d0   :  { %v13237_v38 = vadd.f32 %v12730_v5, %v16978_v26  ;;  %v5489_v29 = vpop.f32.mrb[31].mxu0  ;;  %v6243_v33 = vmax.f32 %v13235_v20, 0.0 }
 0x4d1   :  { %v13238_v52 = vadd.f32 %v16978_v26, %v5489_v29  ;;  %v6241_v4 = vmax.f32 %v13236_v54, 0.0 }
 0x4d2   :  { %v6244_v59 = vmax.f32 %v13237_v38, 0.0  ;;  %12836 = vmatmul.mubr.msk.bf16.gmra.mrb[136].mxu0 %vm2594_vm3, %v16286_v9 }
 0x4d3   :  { %v6242_v13 = vmax.f32 %v13238_v52, 0.0  ;;  %12839 = vmatprep.mubr.msk.bf16.mxu0 %vm2594_vm3, %v18904_v25  ;;  %v18908_v52 = vld [vmem:[#allocation37_spill] sm:$0xff] }
 0x4d4   :  { %v17080_v50 = vpack.c.bf16 %v6244_v59, %v6243_v33 }
 0x4d5   :  { %v6395_v21 = vpack.c.bf16 %v6242_v13, %v6241_v4  ;;  %v12733_v32 = vpop.f32.mrb[32].mxu0  ;;  %v18909_v4 = vld [vmem:[#allocation38_spill] sm:$0xff] }
 0x4d6   :  { %v13239_v27 = vadd.f32 %v12733_v32, %v16978_v26  ;;  %v5502_v34 = vpop.f32.mrb[33].mxu0 }
 0x4d7   :  { %v13240_v40 = vadd.f32 %v16978_v26, %v5502_v34  ;;  %6589 = vrot.lane.b32.xlu0 %v6395_v21, %s14763_s23  ;;  %v12734_v11 = vpop.f32.mrb[34].mxu0 }
 0x4d8   :  { %v13241_v51 = vadd.f32 %v12734_v11, %v16978_v26  ;;  %v5505_v9 = vpop.f32.mrb[35].mxu0  ;;  %v6247_v7 = vmax.f32 %v13239_v27, 0.0 }
 0x4d9   :  { %v13242_v63 = vadd.f32 %v16978_v26, %v5505_v9  ;;  %v6245_v23 = vmax.f32 %v13240_v40, 0.0 }
 0x4da   :  { %v6248_v15 = vmax.f32 %v13241_v51, 0.0  ;;  %12840 = vmatmul.mubr.msk.bf16.gmra.mrb[140].mxu0 %vm2594_vm3, %v16308_v24 }
 0x4db   :  { %v6246_v30 = vmax.f32 %v13242_v63, 0.0  ;;  %12843 = vmatprep.mubr.msk.bf16.mxu0 %vm2594_vm3, %v18905_v56 }
 0x4dc   :  { %v6398_v43 = vpack.c.bf16 %v6248_v15, %v6247_v7  ;;  %v18910_v15 = vld [vmem:[#allocation39_spill] sm:$0xff] }
 0x4dd   :  { %v6397_v41 = vpack.c.bf16 %v6246_v30, %v6245_v23  ;;  %v12737_v1 = vpop.f32.mrb[36].mxu0 }
 0x4de   :  { %v13243_v8 = vadd.f32 %v12737_v1, %v16978_v26  ;;  %v5518_v31 = vpop.f32.mrb[37].mxu0 }
 0x4df   :  { %v13244_v14 = vadd.f32 %v16978_v26, %v5518_v31  ;;  %6505 = vrot.lane.b32.xlu1 %v6397_v41, %s14762_s0  ;;  %v12738_v44 = vpop.f32.mrb[38].mxu0 }
 0x4e0   :  { %v13245_v35 = vadd.f32 %v12738_v44, %v16978_v26  ;;  %v5521_v61 = vpop.f32.mrb[39].mxu0  ;;  %v6251_v36 = vmax.f32 %v13243_v8, 0.0 }
 0x4e1   :  { %v13246_v24 = vadd.f32 %v16978_v26, %v5521_v61  ;;  %v6249_v19 = vmax.f32 %v13244_v14, 0.0 }
 0x4e2   :  { %v6252_v6 = vmax.f32 %v13245_v35, 0.0  ;;  %12844 = vmatmul.mubr.msk.bf16.gmra.mrb[144].mxu0 %vm2594_vm3, %v18906_v28 }
 0x4e3   :  { %v6250_v47 = vmax.f32 %v13246_v24, 0.0  ;;  %12847 = vmatprep.mubr.msk.bf16.mxu0 %vm2594_vm3, %v18907_v49  ;;  %6591 = vrot.lane.b32.xlu1 %v6398_v43, %s14763_s23 }
 0x4e4   :  { %v6400_v22 = vpack.c.bf16 %v6252_v6, %v6251_v36 }
 0x4e5   :  { %v17101_v39 = vpack.c.bf16 %v6250_v47, %v6249_v19  ;;  %v12741_v12 = vpop.f32.mrb[40].mxu0 }
 0x4e6   :  { %v13247_v60 = vadd.f32 %v12741_v12, %v16978_v26  ;;  %6507 = vrot.lane.b32.xlu0 %v6400_v22, %s14762_s0  ;;  %v5534_v18 = vpop.f32.mrb[41].mxu0 }
 0x4e7   :  { %v13248_v3 = vadd.f32 %v16978_v26, %v5534_v18  ;;  %v12742_v20 = vpop.f32.mrb[42].mxu0 }
 0x4e8   :  { %v13249_v55 = vadd.f32 %v12742_v20, %v16978_v26  ;;  %v5537_v54 = vpop.f32.mrb[43].mxu0  ;;  %v6255_v38 = vmax.f32 %v13247_v60, 0.0 }
 0x4e9   :  { %v13250_v5 = vadd.f32 %v16978_v26, %v5537_v54  ;;  %v6253_v33 = vmax.f32 %v13248_v3, 0.0 }
 0x4ea   :  { %v6256_v29 = vmax.f32 %v13249_v55, 0.0  ;;  %12848 = vmatmul.mubr.msk.bf16.gmra.mrb[148].mxu0 %vm2594_vm3, %v18908_v52 }
 0x4eb   :  { %v6254_v59 = vmax.f32 %v13250_v5, 0.0  ;;  %12851 = vmatprep.mubr.msk.bf16.mxu0 %vm2594_vm3, %v18909_v4 }
 0x4ec   :  { %v17112_v13 = vpack.c.bf16 %v6256_v29, %v6255_v38 }
 0x4ed   :  { %v6401_v25 = vpack.c.bf16 %v6254_v59, %v6253_v33  ;;  %v12745_v21 = vpop.f32.mrb[44].mxu0 }
 0x4ee   :  { %v13251_v32 = vadd.f32 %v12745_v21, %v16978_v26  ;;  %v5550_v27 = vpop.f32.mrb[45].mxu0 }
 0x4ef   :  { %v13252_v34 = vadd.f32 %v16978_v26, %v5550_v27  ;;  %6593 = vrot.lane.b32.xlu0 %v6401_v25, %s14763_s23  ;;  %v12746_v40 = vpop.f32.mrb[46].mxu0 }
 0x4f0   :  { %v13253_v11 = vadd.f32 %v12746_v40, %v16978_v26  ;;  %v5553_v51 = vpop.f32.mrb[47].mxu0  ;;  %v6259_v63 = vmax.f32 %v13251_v32, 0.0 }
 0x4f1   :  { %v13254_v9 = vadd.f32 %v16978_v26, %v5553_v51  ;;  %v6257_v23 = vmax.f32 %v13252_v34, 0.0 }
 0x4f2   :  { %v6260_v7 = vmax.f32 %v13253_v11, 0.0  ;;  %12852 = vmatmul.mubr.msk.bf16.gmra.mrb[152].mxu0 %vm2594_vm3, %v18910_v15 }
 0x4f3   :  { %v6258_v30 = vmax.f32 %v13254_v9, 0.0  ;;  %12855 = vmatprep.mubr.msk.bf16.mxu0 %vm2594_vm3, %v18883_v17 }
 0x4f4   :  { %v6404_v56 = vpack.c.bf16 %v6260_v7, %v6259_v63 }
 0x4f5   :  { %v6403_v43 = vpack.c.bf16 %v6258_v30, %v6257_v23  ;;  %v12749_v41 = vpop.f32.mrb[48].mxu0 }
 0x4f6   :  { %v13255_v1 = vadd.f32 %v12749_v41, %v16978_v26  ;;  %v5566_v8 = vpop.f32.mrb[49].mxu0 }
 0x4f7   :  { %v13256_v31 = vadd.f32 %v16978_v26, %v5566_v8  ;;  %6509 = vrot.lane.b32.xlu1 %v6403_v43, %s14762_s0  ;;  %v12750_v14 = vpop.f32.mrb[50].mxu0 }
 0x4f8   :  { %v13257_v44 = vadd.f32 %v12750_v14, %v16978_v26  ;;  %v5569_v35 = vpop.f32.mrb[51].mxu0  ;;  %v6263_v24 = vmax.f32 %v13255_v1, 0.0 }
 0x4f9   :  { %v13258_v61 = vadd.f32 %v16978_v26, %v5569_v35  ;;  %v6261_v17 = vmax.f32 %v13256_v31, 0.0 }
 0x4fa   :  { %v6264_v36 = vmax.f32 %v13257_v44, 0.0  ;;  %12856 = vmatmul.mubr.msk.bf16.gmra.mrb[156].mxu0 %vm2594_vm3, %v16396_v16 }
 0x4fb   :  { %v6262_v6 = vmax.f32 %v13258_v61, 0.0  ;;  %12859 = vmatprep.mubr.msk.bf16.mxu0 %vm2594_vm3, %v18884_v53  ;;  %6595 = vrot.lane.b32.xlu1 %v6404_v56, %s14763_s23 }
 0x4fc   :  { %v6406_v28 = vpack.c.bf16 %v6264_v36, %v6263_v24 }
 0x4fd   :  { %v17133_v19 = vpack.c.bf16 %v6262_v6, %v6261_v17  ;;  %v12753_v47 = vpop.f32.mrb[52].mxu0 }
 0x4fe   :  { %v13259_v49 = vadd.f32 %v12753_v47, %v16978_v26  ;;  %6511 = vrot.lane.b32.xlu0 %v6406_v28, %s14762_s0  ;;  %v5582_v22 = vpop.f32.mrb[53].mxu0 }
 0x4ff   :  { %v13260_v12 = vadd.f32 %v16978_v26, %v5582_v22  ;;  %v12754_v60 = vpop.f32.mrb[54].mxu0 }
 0x500   :  { %v13261_v16 = vadd.f32 %v12754_v60, %v16978_v26  ;;  %v5585_v18 = vpop.f32.mrb[55].mxu0  ;;  %v6267_v53 = vmax.f32 %v13259_v49, 0.0 }
 0x501   :  { %v13262_v3 = vadd.f32 %v16978_v26, %v5585_v18  ;;  %v6265_v55 = vmax.f32 %v13260_v12, 0.0 }
 0x502   :  { %v6268_v20 = vmax.f32 %v13261_v16, 0.0  ;;  %12860 = vmatmul.mubr.msk.bf16.gmra.mrb[160].mxu0 %vm2594_vm3, %v16570_v42 }
 0x503   :  { %v6266_v54 = vmax.f32 %v13262_v3, 0.0  ;;  %12863 = vmatprep.mubr.msk.bf16.mxu0 %vm2594_vm3, %v16844_v58  ;;  %v18911_v58 = vld [vmem:[#allocation4_spill] sm:$0xff] }
 0x504   :  { %v17144_v5 = vpack.c.bf16 %v6268_v20, %v6267_v53 }
 0x505   :  { %v6407_v38 = vpack.c.bf16 %v6266_v54, %v6265_v55  ;;  %v12757_v29 = vpop.f32.mrb[56].mxu0 }
 0x506   :  { %v13263_v52 = vadd.f32 %v12757_v29, %v16978_v26  ;;  %v5598_v33 = vpop.f32.mrb[57].mxu0 }
 0x507   :  { %v13264_v59 = vadd.f32 %v16978_v26, %v5598_v33  ;;  %6597 = vrot.lane.b32.xlu0 %v6407_v38, %s14763_s23  ;;  %v12758_v4 = vpop.f32.mrb[58].mxu0 }
 0x508   :  { %v13265_v25 = vadd.f32 %v12758_v4, %v16978_v26  ;;  %v5601_v42 = vpop.f32.mrb[59].mxu0  ;;  %v6271_v32 = vmax.f32 %v13263_v52, 0.0 }
 0x509   :  { %v13266_v21 = vadd.f32 %v16978_v26, %v5601_v42  ;;  %v6269_v34 = vmax.f32 %v13264_v59, 0.0 }
 0x50a   :  { %v6272_v27 = vmax.f32 %v13265_v25, 0.0  ;;  %12864 = vmatmul.mubr.msk.bf16.gmra.mrb[164].mxu0 %vm2594_vm3, %v18911_v58 }
 0x50b   :  { %v6270_v40 = vmax.f32 %v13266_v21, 0.0 }
 0x50c   :  { %v6410_v11 = vpack.c.bf16 %v6272_v27, %v6271_v32 }
 0x50d   :  { %v6409_v51 = vpack.c.bf16 %v6270_v40, %v6269_v34  ;;  %v12761_v9 = vpop.f32.mrb[60].mxu0 }
 0x50e   :  { %v13267_v63 = vadd.f32 %v12761_v9, %v16978_v26  ;;  %v5614_v7 = vpop.f32.mrb[61].mxu0 }
 0x50f   :  { %v13268_v15 = vadd.f32 %v16978_v26, %v5614_v7  ;;  %6513 = vrot.lane.b32.xlu1 %v6409_v51, %s14762_s0  ;;  %v12762_v23 = vpop.f32.mrb[62].mxu0 }
 0x510   :  { %v13269_v30 = vadd.f32 %v12762_v23, %v16978_v26  ;;  %v5617_v56 = vpop.f32.mrb[63].mxu0  ;;  %v6275_v41 = vmax.f32 %v13267_v63, 0.0  ;;  %v6496_v44 = vpop.permute.xlu0 %6495 }
 0x511   :  { %v13270_v43 = vadd.f32 %v16978_v26, %v5617_v56  ;;  %v6273_v8 = vmax.f32 %v13268_v15, 0.0  ;;  %v6642_v49 = vsel %vm6637_vm6, %v17005_v45, %v6496_v44 }
 0x512   :  { %v6276_v1 = vmax.f32 %v13269_v30, 0.0 }
 0x513   :  { %v6274_v31 = vmax.f32 %v13270_v43, 0.0  ;;  %6599 = vrot.lane.b32.xlu1 %v6410_v11, %s14763_s23 }
 0x514   :  { %v6412_v14 = vpack.c.bf16 %v6276_v1, %v6275_v41 }
 0x515   :  { %v17159_v35 = vpack.c.bf16 %v6274_v31, %v6273_v8  ;;  %v12765_v61 = vpop.f32.mrb[64].mxu0 }
 0x516   :  { %v13271_v24 = vadd.f32 %v12765_v61, %v16978_v26  ;;  %6515 = vrot.lane.b32.xlu0 %v6412_v14, %s14762_s0  ;;  %v5630_v36 = vpop.f32.mrb[65].mxu0 }
 0x517   :  { %v13272_v17 = vadd.f32 %v16978_v26, %v5630_v36  ;;  %v12766_v6 = vpop.f32.mrb[66].mxu0 }
 0x518   :  { %v13273_v28 = vadd.f32 %v12766_v6, %v16978_v26  ;;  %v5633_v47 = vpop.f32.mrb[67].mxu0  ;;  %v6279_v60 = vmax.f32 %v13271_v24, 0.0 }
 0x519   :  { %v13274_v22 = vadd.f32 %v16978_v26, %v5633_v47  ;;  %v6582_v12 = vpop.permute.xlu0 %6581  ;;  %v6277_v3 = vmax.f32 %v13272_v17, 0.0 }
 0x51a   :  { %v6280_v16 = vmax.f32 %v13273_v28, 0.0  ;;  %v17169_v18 = vsel %vm6724_vm7, %v6642_v49, %v6582_v12 }
 0x51b   :  { %v6278_v53 = vmax.f32 %v13274_v22, 0.0  ;;  %12881 = vmatprep.mubr.msk.bf16.mxu1 %vm6829_vm8, %v17169_v18 }
 0x51c   :  { %v17173_v20 = vpack.c.bf16 %v6280_v16, %v6279_v60 }
 0x51d   :  { %v6413_v55 = vpack.c.bf16 %v6278_v53, %v6277_v3  ;;  %v12769_v54 = vpop.f32.mrb[68].mxu0 }
 0x51e   :  { %v13275_v38 = vadd.f32 %v12769_v54, %v16978_v26  ;;  %v5646_v45 = vpop.f32.mrb[69].mxu0 }
 0x51f   :  { %v13276_v29 = vadd.f32 %v16978_v26, %v5646_v45  ;;  %6601 = vrot.lane.b32.xlu0 %v6413_v55, %s14763_s23  ;;  %v12770_v52 = vpop.f32.mrb[70].mxu0 }
 0x520   :  { %v13277_v33 = vadd.f32 %v12770_v52, %v16978_v26  ;;  %v5649_v59 = vpop.f32.mrb[71].mxu0  ;;  %v6283_v42 = vmax.f32 %v13275_v38, 0.0 }
 0x521   :  { %v13278_v4 = vadd.f32 %v16978_v26, %v5649_v59  ;;  %v6498_v25 = vpop.permute.xlu1 %6497  ;;  %v6281_v32 = vmax.f32 %v13276_v29, 0.0 }
 0x522   :  { %v6284_v21 = vmax.f32 %v13277_v33, 0.0  ;;  %v6645_v40 = vsel %vm6637_vm6, %v17016_v57, %v6498_v25 }
 0x523   :  { %v6282_v27 = vmax.f32 %v13278_v4, 0.0 }
 0x524   :  { %v6416_v58 = vpack.c.bf16 %v6284_v21, %v6283_v42 }
 0x525   :  { %v6415_v34 = vpack.c.bf16 %v6282_v27, %v6281_v32  ;;  %v6584_v11 = vpop.permute.xlu1 %6583  ;;  %v12773_v51 = vpop.f32.mrb[72].mxu0 }
 0x526   :  { %v17183_v9 = vsel %vm6724_vm7, %v6645_v40, %v6584_v11  ;;  %v13279_v63 = vadd.f32 %v12773_v51, %v16978_v26  ;;  %v5662_v7 = vpop.f32.mrb[73].mxu0  ;;  %v18913_v51 = vld [vmem:[#allocation43_spill] sm:$0xff] }
 0x527   :  { %v13280_v15 = vadd.f32 %v16978_v26, %v5662_v7  ;;  %12882 = vmatmul.mubr.msk.bf16.gmra.mrb[88].mxu1 %vm6829_vm8, %v17183_v9  ;;  %6517 = vrot.lane.b32.xlu1 %v6415_v34, %s14762_s0  ;;  %v12774_v23 = vpop.f32.mrb[74].mxu0  ;;  %v18912_v34 = vld [vmem:[#allocation42_spill] sm:$0xff] }
 0x528   :  { %v13281_v30 = vadd.f32 %v12774_v23, %v16978_v26  ;;  %v5665_v56 = vpop.f32.mrb[75].mxu0  ;;  %v6287_v43 = vmax.f32 %v13279_v63, 0.0  ;;  %v6500_v14 = vpop.permute.xlu0 %6499  ;;  %v3144_v40 = vadd.f32 %v18912_v34, %v16978_v26  ;;  %v3136_v63 = vadd.f32 %v16978_v26, %v18913_v51 }
 0x529   :  { %v13282_v57 = vadd.f32 %v16978_v26, %v5665_v56  ;;  %v6285_v1 = vmax.f32 %v13280_v15, 0.0  ;;  %v6648_v49 = vsel %vm6637_vm6, %v17037_v0, %v6500_v14  ;;  %v18914_v56 = vld [vmem:[#allocation44_spill] sm:$0xff] }
 0x52a   :  { %v6288_v41 = vmax.f32 %v13281_v30, 0.0 }
 0x52b   :  { %v6286_v8 = vmax.f32 %v13282_v57, 0.0  ;;  %6603 = vrot.lane.b32.xlu1 %v6416_v58, %s14763_s23  ;;  %v3147_v57 = vadd.f32 %v18914_v56, %v16978_v26 }
 0x52c   :  { %v6418_v31 = vpack.c.bf16 %v6288_v41, %v6287_v43 }
 0x52d   :  { %v17193_v44 = vpack.c.bf16 %v6286_v8, %v6285_v1  ;;  %v12777_v61 = vpop.f32.mrb[76].mxu0  ;;  %v18915_v8 = vld [vmem:[#allocation45_spill] sm:$0xff] }
 0x52e   :  { %v13283_v24 = vadd.f32 %v12777_v61, %v16978_v26  ;;  %6519 = vrot.lane.b32.xlu0 %v6418_v31, %s14762_s0  ;;  %v5678_v36 = vpop.f32.mrb[77].mxu0  ;;  %v3139_v31 = vadd.f32 %v16978_v26, %v18915_v8 }
 0x52f   :  { %v13284_v17 = vadd.f32 %v16978_v26, %v5678_v36  ;;  %v12778_v6 = vpop.f32.mrb[78].mxu0 }
 0x530   :  { %v13285_v28 = vadd.f32 %v12778_v6, %v16978_v26  ;;  %v5681_v47 = vpop.f32.mrb[79].mxu0  ;;  %v6291_v60 = vmax.f32 %v13283_v24, 0.0 }
 0x531   :  { %v13286_v22 = vadd.f32 %v16978_v26, %v5681_v47  ;;  %v6586_v12 = vpop.permute.xlu0 %6585  ;;  %v6289_v53 = vmax.f32 %v13284_v17, 0.0 }
 0x532   :  { %v6292_v16 = vmax.f32 %v13285_v28, 0.0  ;;  %v17203_v3 = vsel %vm6724_vm7, %v6648_v49, %v6586_v12  ;;  %v18916_v49 = vld [vmem:[#allocation46_spill] sm:$0xff] }
 0x533   :  { %v6290_v55 = vmax.f32 %v13286_v22, 0.0  ;;  %12885 = vmatprep.mubr.msk.bf16.mxu1 %vm6829_vm8, %v17203_v3  ;;  %v3160_v22 = vadd.f32 %v18916_v49, %v16978_v26 }
 0x534   :  { %v17207_v54 = vpack.c.bf16 %v6292_v16, %v6291_v60  ;;  %v18917_v60 = vld [vmem:[#allocation47_spill] sm:$0xff] }
 0x535   :  { %v6419_v38 = vpack.c.bf16 %v6290_v55, %v6289_v53  ;;  %v12781_v45 = vpop.f32.mrb[80].mxu0  ;;  %v3152_v16 = vadd.f32 %v16978_v26, %v18917_v60  ;;  %v18924_v60 = vld [vmem:[#allocation54_spill] sm:$0xff] }
 0x536   :  { %v13287_v29 = vadd.f32 %v12781_v45, %v16978_v26  ;;  %v5694_v0 = vpop.f32.mrb[81].mxu0  ;;  %v18918_v45 = vld [vmem:[#allocation48_spill] sm:$0xff] }
 0x537   :  { %v13288_v52 = vadd.f32 %v16978_v26, %v5694_v0  ;;  %6605 = vrot.lane.b32.xlu0 %v6419_v38, %s14763_s23  ;;  %v12782_v33 = vpop.f32.mrb[82].mxu0 }
 0x538   :  { %v13289_v59 = vadd.f32 %v12782_v33, %v16978_v26  ;;  %v5697_v4 = vpop.f32.mrb[83].mxu0  ;;  %v6295_v21 = vmax.f32 %v13287_v29, 0.0  ;;  %v3163_v29 = vadd.f32 %v18918_v45, %v16978_v26  ;;  %v18919_v33 = vld [vmem:[#allocation49_spill] sm:$0xff] }
 0x539   :  { %v13290_v25 = vadd.f32 %v16978_v26, %v5697_v4  ;;  %v6502_v42 = vpop.permute.xlu1 %6501  ;;  %v6293_v27 = vmax.f32 %v13288_v52, 0.0 }
 0x53a   :  { %v6296_v32 = vmax.f32 %v13289_v59, 0.0  ;;  %v6651_v15 = vsel %vm6637_vm6, %v17048_v46, %v6502_v42  ;;  %v3155_v59 = vadd.f32 %v16978_v26, %v18919_v33 }
 0x53b   :  { %v6294_v58 = vmax.f32 %v13290_v25, 0.0 }
 0x53c   :  { %v6422_v11 = vpack.c.bf16 %v6296_v32, %v6295_v21 }
 0x53d   :  { %v6421_v7 = vpack.c.bf16 %v6294_v58, %v6293_v27  ;;  %v6588_v23 = vpop.permute.xlu1 %6587  ;;  %v12785_v30 = vpop.f32.mrb[84].mxu0 }
 0x53e   :  { %v17223_v43 = vsel %vm6724_vm7, %v6651_v15, %v6588_v23  ;;  %v13292_v41 = vadd.f32 %v12785_v30, %v3144_v40  ;;  %v5710_v1 = vpop.f32.mrb[85].mxu0  ;;  %v18921_v30 = vld [vmem:[#allocation51_spill] sm:$0xff] }
 0x53f   :  { %v13294_v14 = vadd.f32 %v5710_v1, %v3136_v63  ;;  %12886 = vmatmul.mubr.msk.bf16.gmra.mrb[92].mxu1 %vm6829_vm8, %v17223_v43  ;;  %6521 = vrot.lane.b32.xlu1 %v6421_v7, %s14762_s0  ;;  %v12786_v46 = vpop.f32.mrb[86].mxu0  ;;  %v18920_v7 = vld [vmem:[#allocation50_spill] sm:$0xff] }
 0x540   :  { %v13296_v61 = vadd.f32 %v12786_v46, %v3147_v57  ;;  %v5713_v24 = vpop.f32.mrb[87].mxu0  ;;  %v6299_v17 = vmax.f32 %v13292_v41, 0.0  ;;  %v6504_v53 = vpop.permute.xlu0 %6503  ;;  %v3176_v15 = vadd.f32 %v18920_v7, %v16978_v26  ;;  %v18922_v41 = vld [vmem:[#allocation52_spill] sm:$0xff] }
 0x541   :  { %v13298_v36 = vadd.f32 %v5713_v24, %v3139_v31  ;;  %v6297_v28 = vmax.f32 %v13294_v14, 0.0  ;;  %v6654_v32 = vsel %vm6637_vm6, %v17069_v48, %v6504_v53  ;;  %v3168_v48 = vadd.f32 %v16978_v26, %v18921_v30  ;;  %v18923_v14 = vld [vmem:[#allocation53_spill] sm:$0xff] }
 0x542   :  { %v6300_v6 = vmax.f32 %v13296_v61, 0.0  ;;  %v3179_v1 = vadd.f32 %v18922_v41, %v16978_v26  ;;  %v3171_v46 = vadd.f32 %v16978_v26, %v18923_v14  ;;  %v18929_v41 = vld [vmem:[#allocation59_spill] sm:$0xff] }
 0x543   :  { %v6298_v47 = vmax.f32 %v13298_v36, 0.0  ;;  %6607 = vrot.lane.b32.xlu1 %v6422_v11, %s14763_s23 }
 0x544   :  { %v6424_v12 = vpack.c.bf16 %v6300_v6, %v6299_v17 }
 0x545   :  { %v17235_v55 = vpack.c.bf16 %v6298_v47, %v6297_v28  ;;  %v12789_v38 = vpop.f32.mrb[88].mxu0 }
 0x546   :  { %v13300_v0 = vadd.f32 %v12789_v38, %v3160_v22  ;;  %6523 = vrot.lane.b32.xlu0 %v6424_v12, %s14762_s0  ;;  %v5726_v52 = vpop.f32.mrb[89].mxu0  ;;  %v18925_v38 = vld [vmem:[#allocation55_spill] sm:$0xff] }
 0x547   :  { %v13302_v4 = vadd.f32 %v5726_v52, %v3152_v16  ;;  %v12790_v25 = vpop.f32.mrb[90].mxu0  ;;  %v3192_v16 = vadd.f32 %v18924_v60, %v16978_v26  ;;  %v3184_v45 = vadd.f32 %v16978_v26, %v18925_v38 }
 0x548   :  { %v13304_v42 = vadd.f32 %v12790_v25, %v3163_v29  ;;  %v5729_v21 = vpop.f32.mrb[91].mxu0  ;;  %v6303_v34 = vmax.f32 %v13300_v0, 0.0 }
 0x549   :  { %v13306_v27 = vadd.f32 %v5729_v21, %v3155_v59  ;;  %v6590_v58 = vpop.permute.xlu0 %6589  ;;  %v6301_v51 = vmax.f32 %v13302_v4, 0.0  ;;  %v18926_v59 = vld [vmem:[#allocation56_spill] sm:$0xff] }
 0x54a   :  { %v6304_v40 = vmax.f32 %v13304_v42, 0.0  ;;  %v17245_v11 = vsel %vm6724_vm7, %v6654_v32, %v6590_v58  ;;  %v3195_v4 = vadd.f32 %v18926_v59, %v16978_v26  ;;  %v18927_v32 = vld [vmem:[#allocation57_spill] sm:$0xff] }
 0x54b   :  { %v6302_v63 = vmax.f32 %v13306_v27, 0.0  ;;  %12889 = vmatprep.mubr.msk.bf16.mxu1 %vm6829_vm8, %v17245_v11  ;;  %v3187_v27 = vadd.f32 %v16978_v26, %v18927_v32 }
 0x54c   :  { %v17251_v23 = vpack.c.bf16 %v6304_v40, %v6303_v34 }
 0x54d   :  { %v6425_v56 = vpack.c.bf16 %v6302_v63, %v6301_v51  ;;  %v12793_v57 = vpop.f32.mrb[92].mxu0 }
 0x54e   :  { %v13308_v8 = vadd.f32 %v12793_v57, %v3176_v15  ;;  %v5742_v31 = vpop.f32.mrb[93].mxu0 }
 0x54f   :  { %v13310_v61 = vadd.f32 %v5742_v31, %v3168_v48  ;;  %6609 = vrot.lane.b32.xlu0 %v6425_v56, %s14763_s23  ;;  %v12794_v24 = vpop.f32.mrb[94].mxu0  ;;  %v18928_v48 = vld [vmem:[#allocation58_spill] sm:$0xff] }
 0x550   :  { %v13312_v36 = vadd.f32 %v12794_v24, %v3179_v1  ;;  %v5745_v17 = vpop.f32.mrb[95].mxu0  ;;  %v6307_v47 = vmax.f32 %v13308_v8, 0.0  ;;  %v3208_v56 = vadd.f32 %v18928_v48, %v16978_v26  ;;  %v3200_v1 = vadd.f32 %v16978_v26, %v18929_v41 }
 0x551   :  { %v13314_v6 = vadd.f32 %v5745_v17, %v3171_v46  ;;  %v6506_v28 = vpop.permute.xlu1 %6505  ;;  %v6305_v22 = vmax.f32 %v13310_v61, 0.0  ;;  %v18930_v46 = vld [vmem:[#allocation60_spill] sm:$0xff]  ;;  %v18931_v17 = vld [vmem:[#allocation61_spill] sm:$0xff] }
 0x552   :  { %v6308_v49 = vmax.f32 %v13312_v36, 0.0  ;;  %v6657_v0 = vsel %vm6637_vm6, %v17080_v50, %v6506_v28  ;;  %v3211_v61 = vadd.f32 %v18930_v46, %v16978_v26 }
 0x553   :  { %v6306_v12 = vmax.f32 %v13314_v6, 0.0  ;;  %v3203_v6 = vadd.f32 %v16978_v26, %v18931_v17 }
 0x554   :  { %v6428_v53 = vpack.c.bf16 %v6308_v49, %v6307_v47 }
 0x555   :  { %v6427_v29 = vpack.c.bf16 %v6306_v12, %v6305_v22  ;;  %v6592_v52 = vpop.permute.xlu1 %6591  ;;  %v12797_v33 = vpop.f32.mrb[96].mxu0 }
 0x556   :  { %v17269_v25 = vsel %vm6724_vm7, %v6657_v0, %v6592_v52  ;;  %v13316_v42 = vadd.f32 %v12797_v33, %v3192_v16  ;;  %v5758_v21 = vpop.f32.mrb[97].mxu0  ;;  %v18932_v33 = vld [vmem:[#allocation62_spill] sm:$0xff] }
 0x557   :  { %v13318_v58 = vadd.f32 %v5758_v21, %v3184_v45  ;;  %12890 = vmatmul.mubr.msk.bf16.gmra.mrb[96].mxu1 %vm6829_vm8, %v17269_v25  ;;  %6525 = vrot.lane.b32.xlu1 %v6427_v29, %s14762_s0  ;;  %v12798_v50 = vpop.f32.mrb[98].mxu0 }
 0x558   :  { %v13320_v34 = vadd.f32 %v12798_v50, %v3195_v4  ;;  %v5761_v40 = vpop.f32.mrb[99].mxu0  ;;  %v6311_v63 = vmax.f32 %v13316_v42, 0.0  ;;  %v6508_v8 = vpop.permute.xlu0 %6507  ;;  %v17305_v4 = vld [vmem:[%s18652_s2] ss:$0 sm:$0xff]  ;;  %v18933_v42 = vld [vmem:[#allocation63_spill] sm:$0xff] }
 0x559   :  { %v13322_v51 = vadd.f32 %v5761_v40, %v3187_v27  ;;  %v6309_v15 = vmax.f32 %v13318_v58, 0.0  ;;  %v6660_v12 = vsel %vm6637_vm6, %v17101_v39, %v6508_v8  ;;  %v3224_v39 = vadd.f32 %v18932_v33, %v16978_v26  ;;  %v18934_v58 = vld [vmem:[#allocation64_spill] sm:$0xff] }
 0x55a   :  { %v6312_v7 = vmax.f32 %v13320_v34, 0.0  ;;  %v3216_v21 = vadd.f32 %v17305_v4, %v18933_v42  ;;  %v3227_v50 = vadd.f32 %v17305_v4, %v18934_v58  ;;  %v18940_v58 = vld [vmem:[#allocation70_spill] sm:$0xff] }
 0x55b   :  { %v6310_v30 = vmax.f32 %v13322_v51, 0.0  ;;  %6611 = vrot.lane.b32.xlu1 %v6428_v53, %s14763_s23  ;;  %v14565_v53 = vld [vmem:[%s18651_s3 + $0x28] sm:$0xff]   ;;  %v18935_v51 = vld [vmem:[#allocation65_spill] sm:$0xff] }
 0x55c   :  { %v6430_v57 = vpack.c.bf16 %v6312_v7, %v6311_v63  ;;  %12933 = vmatprep.subr.bf16.mxu1 %v14565_v53  ;;  %v3219_v26 = vadd.f32 %v17305_v4, %v18935_v51 }
 0x55d   :  { %v17281_v31 = vpack.c.bf16 %v6310_v30, %v6309_v15  ;;  %v12801_v14 = vpop.f32.mrb[100].mxu0  ;;  %12934 = vmatpush3.bf16.msra.mxu1 %v14565_v53  ;;  %v18939_v53 = vld [vmem:[#allocation69_spill] sm:$0xff] }
 0x55e   :  { %v13324_v24 = vadd.f32 %v12801_v14, %v3208_v56  ;;  %6527 = vrot.lane.b32.xlu0 %v6430_v57, %s14762_s0  ;;  %v5774_v36 = vpop.f32.mrb[101].mxu0  ;;  %v18936_v14 = vld [vmem:[#allocation66_spill] sm:$0xff] }
 0x55f   :  { %v13326_v28 = vadd.f32 %v5774_v36, %v3200_v1  ;;  %v12802_v47 = vpop.f32.mrb[102].mxu0  ;;  %v3240_v46 = vadd.f32 %v17305_v4, %v18936_v14 }
 0x560   :  { %v13328_v49 = vadd.f32 %v12802_v47, %v3211_v61  ;;  %v5777_v22 = vpop.f32.mrb[103].mxu0  ;;  %v6315_v38 = vmax.f32 %v13324_v24, 0.0  ;;  %v18937_v24 = vld [vmem:[#allocation67_spill] sm:$0xff] }
 0x561   :  { %v13330_v60 = vadd.f32 %v5777_v22, %v3203_v6  ;;  %v6594_v16 = vpop.permute.xlu0 %6593  ;;  %v6313_v0 = vmax.f32 %v13326_v28, 0.0  ;;  %v3232_v36 = vadd.f32 %v17305_v4, %v18937_v24 }
 0x562   :  { %v6316_v45 = vmax.f32 %v13328_v49, 0.0  ;;  %v17294_v29 = vsel %vm6724_vm7, %v6660_v12, %v6594_v16  ;;  %v18938_v49 = vld [vmem:[#allocation68_spill] sm:$0xff] }
 0x563   :  { %v6314_v52 = vmax.f32 %v13330_v60, 0.0  ;;  %12893 = vmatprep.mubr.msk.bf16.mxu1 %vm6829_vm8, %v17294_v29  ;;  %v3243_v22 = vadd.f32 %v17305_v4, %v18938_v49 }
 0x564   :  { %v17300_v59 = vpack.c.bf16 %v6316_v45, %v6315_v38  ;;  %v3235_v38 = vadd.f32 %v17305_v4, %v18939_v53  ;;  %v18945_v53 = vld [vmem:[#allocation75_spill] sm:$0xff] }
 0x565   :  { %v6431_v32 = vpack.c.bf16 %v6314_v52, %v6313_v0  ;;  %v12805_v27 = vpop.f32.mrb[104].mxu0 }
 0x566   :  { %v13332_v34 = vadd.f32 %v12805_v27, %v3224_v39  ;;  %v5790_v40 = vpop.f32.mrb[105].mxu0  ;;  %v14566_v27 = vld [vmem:[%s18651_s3 + $0x30] sm:$0xff]  }
 0x567   :  { %v13334_v63 = vadd.f32 %v5790_v40, %v3216_v21  ;;  %6613 = vrot.lane.b32.xlu0 %v6431_v32, %s14763_s23  ;;  %v12806_v7 = vpop.f32.mrb[106].mxu0  ;;  %v18941_v40 = vld [vmem:[#allocation71_spill] sm:$0xff]  ;;  %12935 = vmatprep.subr.bf16.mxu1 %v14566_v27 }
 0x568   :  { %v13336_v15 = vadd.f32 %v12806_v7, %v3227_v50  ;;  %v5793_v30 = vpop.f32.mrb[107].mxu0  ;;  %v6319_v57 = vmax.f32 %v13332_v34, 0.0  ;;  %v3256_v50 = vadd.f32 %v17305_v4, %v18940_v58  ;;  %v3248_v51 = vadd.f32 %v17305_v4, %v18941_v40  ;;  %12936 = vmatpush3.bf16.msra.mxu1 %v14566_v27 }
 0x569   :  { %v13338_v48 = vadd.f32 %v5793_v30, %v3219_v26  ;;  %v6510_v56 = vpop.permute.xlu1 %6509  ;;  %v6317_v1 = vmax.f32 %v13334_v63, 0.0 }
 0x56a   :  { %v6320_v41 = vmax.f32 %v13336_v15, 0.0  ;;  %v6663_v6 = vsel %vm6637_vm6, %v17112_v13, %v6510_v56  ;;  %v18942_v15 = vld [vmem:[#allocation72_spill] sm:$0xff] }
 0x56b   :  { %v6318_v8 = vmax.f32 %v13338_v48, 0.0  ;;  %v3259_v30 = vadd.f32 %v17305_v4, %v18942_v15  ;;  %v18948_v15 = vld [vmem:[#allocation78_spill] sm:$0xff] }
 0x56c   :  { %v6434_v61 = vpack.c.bf16 %v6320_v41, %v6319_v57  ;;  %v18943_v57 = vld [vmem:[#allocation73_spill] sm:$0xff] }
 0x56d   :  { %v6433_v17 = vpack.c.bf16 %v6318_v8, %v6317_v1  ;;  %v6596_v28 = vpop.permute.xlu1 %6595  ;;  %v12809_v47 = vpop.f32.mrb[108].mxu0  ;;  %v3251_v41 = vadd.f32 %v17305_v4, %v18943_v57 }
 0x56e   :  { %v17323_v12 = vsel %vm6724_vm7, %v6663_v6, %v6596_v28  ;;  %v13340_v60 = vadd.f32 %v12809_v47, %v3240_v46  ;;  %v5806_v16 = vpop.f32.mrb[109].mxu0 }
 0x56f   :  { %v13342_v45 = vadd.f32 %v5806_v16, %v3232_v36  ;;  %12894 = vmatmul.mubr.msk.bf16.gmra.mrb[100].mxu1 %vm6829_vm8, %v17323_v12  ;;  %6529 = vrot.lane.b32.xlu1 %v6433_v17, %s14762_s0  ;;  %v12810_v13 = vpop.f32.mrb[110].mxu0 }
 0x570   :  { %v13344_v0 = vadd.f32 %v12810_v13, %v3243_v22  ;;  %v5809_v52 = vpop.f32.mrb[111].mxu0  ;;  %v6323_v39 = vmax.f32 %v13340_v60, 0.0  ;;  %v6512_v26 = vpop.permute.xlu0 %6511  ;;  %v18944_v22 = vld [vmem:[#allocation74_spill] sm:$0xff]  ;;  %v18946_v13 = vld [vmem:[#allocation76_spill] sm:$0xff] }
 0x571   :  { %v13346_v33 = vadd.f32 %v5809_v52, %v3235_v38  ;;  %v6321_v21 = vmax.f32 %v13342_v45, 0.0  ;;  %v3272_v60 = vadd.f32 %v17305_v4, %v18944_v22 }
 0x572   :  { %v6324_v42 = vmax.f32 %v13344_v0, 0.0  ;;  %v3275_v0 = vadd.f32 %v17305_v4, %v18946_v13 }
 0x573   :  { %v6322_v32 = vmax.f32 %v13346_v33, 0.0  ;;  %6615 = vrot.lane.b32.xlu1 %v6434_v61, %s14763_s23  ;;  %v6666_v61 = vsel %vm6637_vm6, %v17133_v19, %v6512_v26  ;;  %v3264_v19 = vadd.f32 %v17305_v4, %v18945_v53 }
 0x574   :  { %v6436_v34 = vpack.c.bf16 %v6324_v42, %v6323_v39  ;;  %v18947_v39 = vld [vmem:[#allocation77_spill] sm:$0xff] }
 0x575   :  { %v17338_v63 = vpack.c.bf16 %v6322_v32, %v6321_v21  ;;  %v12813_v7 = vpop.f32.mrb[112].mxu0  ;;  %v3267_v42 = vadd.f32 %v17305_v4, %v18947_v39 }
 0x576   :  { %v13348_v48 = vadd.f32 %v12813_v7, %v3256_v50  ;;  %6531 = vrot.lane.b32.xlu0 %v6436_v34, %s14762_s0  ;;  %v5822_v56 = vpop.f32.mrb[113].mxu0 }
 0x577   :  { %v13350_v1 = vadd.f32 %v5822_v56, %v3248_v51  ;;  %v12814_v8 = vpop.f32.mrb[114].mxu0  ;;  %v18949_v56 = vld [vmem:[#allocation79_spill] sm:$0xff] }
 0x578   :  { %v13352_v14 = vadd.f32 %v12814_v8, %v3259_v30  ;;  %v5825_v46 = vpop.f32.mrb[115].mxu0  ;;  %v6327_v17 = vmax.f32 %v13348_v48, 0.0  ;;  %v3288_v30 = vadd.f32 %v17305_v4, %v18948_v15  ;;  %v3280_v57 = vadd.f32 %v17305_v4, %v18949_v56 }
 0x579   :  { %v13354_v24 = vadd.f32 %v5825_v46, %v3251_v41  ;;  %v6598_v36 = vpop.permute.xlu0 %6597  ;;  %v6325_v47 = vmax.f32 %v13350_v1, 0.0  ;;  %v18950_v46 = vld [vmem:[#allocation80_spill] sm:$0xff] }
 0x57a   :  { %v6328_v6 = vmax.f32 %v13352_v14, 0.0  ;;  %v17348_v28 = vsel %vm6724_vm7, %v6666_v61, %v6598_v36  ;;  %v3291_v61 = vadd.f32 %v17305_v4, %v18950_v46 }
 0x57b   :  { %v6326_v49 = vmax.f32 %v13354_v24, 0.0  ;;  %12897 = vmatprep.mubr.msk.bf16.mxu1 %vm6829_vm8, %v17348_v28 }
 0x57c   :  { %v17354_v16 = vpack.c.bf16 %v6328_v6, %v6327_v17  ;;  %v18951_v6 = vld [vmem:[#allocation81_spill] sm:$0xff] }
 0x57d   :  { %v6437_v38 = vpack.c.bf16 %v6326_v49, %v6325_v47  ;;  %v12817_v45 = vpop.f32.mrb[116].mxu0  ;;  %v3283_v47 = vadd.f32 %v17305_v4, %v18951_v6 }
 0x57e   :  { %v13356_v52 = vadd.f32 %v12817_v45, %v3272_v60  ;;  %v5838_v33 = vpop.f32.mrb[117].mxu0 }
 0x57f   :  { %v13358_v21 = vadd.f32 %v5838_v33, %v3264_v19  ;;  %6617 = vrot.lane.b32.xlu0 %v6437_v38, %s14763_s23  ;;  %v12818_v32 = vpop.f32.mrb[118].mxu0 }
 0x580   :  { %v13360_v27 = vadd.f32 %v12818_v32, %v3275_v0  ;;  %v5841_v58 = vpop.f32.mrb[119].mxu0  ;;  %v6331_v40 = vmax.f32 %v13356_v52, 0.0  ;;  %v14567_v0 = vld [vmem:[%s18651_s3 + $0x38] sm:$0xff]   ;;  %v18952_v52 = vld [vmem:[#allocation82_spill] sm:$0xff] }
 0x581   :  { %v13362_v50 = vadd.f32 %v5841_v58, %v3267_v42  ;;  %v6514_v34 = vpop.permute.xlu1 %6513  ;;  %v6329_v26 = vmax.f32 %v13358_v21, 0.0  ;;  %v3304_v33 = vadd.f32 %v17305_v4, %v18952_v52  ;;  %v18953_v42 = vld [vmem:[#allocation83_spill] sm:$0xff]  ;;  %12937 = vmatprep.subr.bf16.mxu1 %v14567_v0 }
 0x582   :  { %v6332_v51 = vmax.f32 %v13360_v27, 0.0  ;;  %v6669_v1 = vsel %vm6637_vm6, %v17144_v5, %v6514_v34  ;;  %v3296_v21 = vadd.f32 %v17305_v4, %v18953_v42  ;;  %12938 = vmatpush3.bf16.msra.mxu1 %v14567_v0 }
 0x583   :  { %v6330_v7 = vmax.f32 %v13362_v50, 0.0  ;;  %v18954_v50 = vld [vmem:[#allocation84_spill] sm:$0xff] }
 0x584   :  { %v6440_v48 = vpack.c.bf16 %v6332_v51, %v6331_v40  ;;  %v3307_v34 = vadd.f32 %v17305_v4, %v18954_v50 }
 0x585   :  { %v6439_v41 = vpack.c.bf16 %v6330_v7, %v6329_v26  ;;  %v6600_v8 = vpop.permute.xlu1 %6599  ;;  %v12821_v14 = vpop.f32.mrb[120].mxu0  ;;  %v18955_v26 = vld [vmem:[#allocation85_spill] sm:$0xff] }
 0x586   :  { %v17372_v24 = vsel %vm6724_vm7, %v6669_v1, %v6600_v8  ;;  %v13364_v36 = vadd.f32 %v12821_v14, %v3288_v30  ;;  %v5854_v17 = vpop.f32.mrb[121].mxu0  ;;  %v3299_v7 = vadd.f32 %v17305_v4, %v18955_v26 }
 0x587   :  { %v13366_v49 = vadd.f32 %v5854_v17, %v3280_v57  ;;  %12898 = vmatmul.mubr.msk.bf16.gmra.mrb[104].mxu1 %vm6829_vm8, %v17372_v24  ;;  %6533 = vrot.lane.b32.xlu1 %v6439_v41, %s14762_s0  ;;  %v12822_v5 = vpop.f32.mrb[122].mxu0  ;;  %v18956_v17 = vld [vmem:[#allocation86_spill] sm:$0xff] }
 0x588   :  { %v13368_v22 = vadd.f32 %v12822_v5, %v3291_v61  ;;  %v5857_v60 = vpop.f32.mrb[123].mxu0  ;;  %v6335_v19 = vmax.f32 %v13364_v36, 0.0  ;;  %v6516_v32 = vpop.permute.xlu0 %6515  ;;  %v3320_v6 = vadd.f32 %v17305_v4, %v18956_v17 }
 0x589   :  { %v13370_v53 = vadd.f32 %v5857_v60, %v3283_v47  ;;  %v6333_v45 = vmax.f32 %v13366_v49, 0.0  ;;  %v6672_v57 = vsel %vm6637_vm6, %v17159_v35, %v6516_v32  ;;  %v18957_v49 = vld [vmem:[#allocation87_spill] sm:$0xff]  ;;  %v18958_v60 = vld [vmem:[#allocation88_spill] sm:$0xff] }
 0x58a   :  { %v6336_v38 = vmax.f32 %v13368_v22, 0.0  ;;  %v3312_v35 = vadd.f32 %v17305_v4, %v18957_v49 }
 0x58b   :  { %v6334_v13 = vmax.f32 %v13370_v53, 0.0  ;;  %6619 = vrot.lane.b32.xlu1 %v6440_v48, %s14763_s23  ;;  %v3323_v53 = vadd.f32 %v17305_v4, %v18958_v60 }
 0x58c   :  { %v6442_v39 = vpack.c.bf16 %v6336_v38, %v6335_v19 }
 0x58d   :  { %v17387_v27 = vpack.c.bf16 %v6334_v13, %v6333_v45  ;;  %v12825_v58 = vpop.f32.mrb[124].mxu0  ;;  %v18959_v45 = vld [vmem:[#allocation89_spill] sm:$0xff] }
 0x58e   :  { %v13372_v40 = vadd.f32 %v12825_v58, %v3304_v33  ;;  %6535 = vrot.lane.b32.xlu0 %v6442_v39, %s14762_s0  ;;  %v5870_v51 = vpop.f32.mrb[125].mxu0  ;;  %v3315_v13 = vadd.f32 %v17305_v4, %v18959_v45  ;;  %v18964_v45 = vld [vmem:[#allocation94_spill] sm:$0xff] }
 0x58f   :  { %v13374_v15 = vadd.f32 %v5870_v51, %v3296_v21  ;;  %v12826_v30 = vpop.f32.mrb[126].mxu0 }
 0x590   :  { %v13376_v48 = vadd.f32 %v12826_v30, %v3307_v34  ;;  %v5873_v56 = vpop.f32.mrb[127].mxu0  ;;  %v6339_v8 = vmax.f32 %v13372_v40, 0.0  ;;  %v18960_v40 = vld [vmem:[#allocation90_spill] sm:$0xff] }
 0x591   :  { %v13378_v41 = vadd.f32 %v5873_v56, %v3299_v7  ;;  %v6602_v1 = vpop.permute.xlu0 %6601  ;;  %v6337_v61 = vmax.f32 %v13374_v15, 0.0  ;;  %v3336_v51 = vadd.f32 %v17305_v4, %v18960_v40  ;;  %v18961_v7 = vld [vmem:[#allocation91_spill] sm:$0xff]  ;;  %v18967_v40 = vld [vmem:[#allocation97_spill] sm:$0xff] }
 0x592   :  { %v6340_v14 = vmax.f32 %v13376_v48, 0.0  ;;  %v17397_v46 = vsel %vm6724_vm7, %v6672_v57, %v6602_v1  ;;  %v3328_v15 = vadd.f32 %v17305_v4, %v18961_v7 }
 0x593   :  { %v6338_v36 = vmax.f32 %v13378_v41, 0.0  ;;  %12901 = vmatprep.mubr.msk.bf16.mxu1 %vm6829_vm8, %v17397_v46  ;;  %v18962_v41 = vld [vmem:[#allocation92_spill] sm:$0xff] }
 0x594   :  { %v17403_v47 = vpack.c.bf16 %v6340_v14, %v6339_v8  ;;  %v3339_v1 = vadd.f32 %v17305_v4, %v18962_v41 }
 0x595   :  { %v6443_v5 = vpack.c.bf16 %v6338_v36, %v6337_v61  ;;  %v12829_v22 = vpop.f32.mrb[128].mxu0  ;;  %v18963_v36 = vld [vmem:[#allocation93_spill] sm:$0xff] }
 0x596   :  { %v13380_v19 = vadd.f32 %v12829_v22, %v3320_v6  ;;  %v5886_v38 = vpop.f32.mrb[129].mxu0  ;;  %v3331_v17 = vadd.f32 %v17305_v4, %v18963_v36 }
 0x597   :  { %v13382_v0 = vadd.f32 %v5886_v38, %v3312_v35  ;;  %6621 = vrot.lane.b32.xlu0 %v6443_v5, %s14763_s23  ;;  %v12830_v52 = vpop.f32.mrb[130].mxu0  ;;  %v14568_v38 = vld [vmem:[%s18651_s3 + $0x40] sm:$0xff]  }
 0x598   :  { %v13384_v33 = vadd.f32 %v12830_v52, %v3323_v53  ;;  %v5889_v39 = vpop.f32.mrb[131].mxu0  ;;  %v6343_v32 = vmax.f32 %v13380_v19, 0.0  ;;  %v18965_v52 = vld [vmem:[#allocation95_spill] sm:$0xff]  ;;  %12939 = vmatprep.subr.bf16.mxu1 %v14568_v38 }
 0x599   :  { %v13386_v42 = vadd.f32 %v5889_v39, %v3315_v13  ;;  %v6518_v21 = vpop.permute.xlu1 %6517  ;;  %v6341_v50 = vmax.f32 %v13382_v0, 0.0  ;;  %v3352_v13 = vadd.f32 %v17305_v4, %v18964_v45  ;;  %12940 = vmatpush3.bf16.msra.mxu1 %v14568_v38  ;;  %v18971_v38 = vld [vmem:[#allocation101_spill] sm:$0xff] }
 0x59a   :  { %v6344_v58 = vmax.f32 %v13384_v33, 0.0  ;;  %v6675_v48 = vsel %vm6637_vm6, %v17173_v20, %v6518_v21  ;;  %v3344_v33 = vadd.f32 %v17305_v4, %v18965_v52  ;;  %v3363_v45 = vadd.f32 %v17305_v4, %v18971_v38 }
 0x59b   :  { %v6342_v34 = vmax.f32 %v13386_v42, 0.0 }
 0x59c   :  { %v6446_v26 = vpack.c.bf16 %v6344_v58, %v6343_v32  ;;  %v18966_v32 = vld [vmem:[#allocation96_spill] sm:$0xff] }
 0x59d   :  { %v6445_v30 = vpack.c.bf16 %v6342_v34, %v6341_v50  ;;  %v6604_v56 = vpop.permute.xlu1 %6603  ;;  %v12833_v57 = vpop.f32.mrb[132].mxu0  ;;  %v3355_v58 = vadd.f32 %v17305_v4, %v18966_v32  ;;  %v14569_v32 = vld [vmem:[%s18651_s3 + $0x48] sm:$0x3f]  }
 0x59e   :  { %v17421_v8 = vsel %vm6724_vm7, %v6675_v48, %v6604_v56  ;;  %v13388_v14 = vadd.f32 %v12833_v57, %v3336_v51  ;;  %v5902_v61 = vpop.f32.mrb[133].mxu0  ;;  %v3347_v51 = vadd.f32 %v17305_v4, %v18967_v40 }
 0x59f   :  { %v13390_v6 = vadd.f32 %v5902_v61, %v3328_v15  ;;  %12902 = vmatmul.mubr.msk.bf16.gmra.mrb[108].mxu1 %vm6829_vm8, %v17421_v8  ;;  %6537 = vrot.lane.b32.xlu1 %v6445_v30, %s14762_s0  ;;  %v12834_v20 = vpop.f32.mrb[134].mxu0 }
 0x5a0   :  { %v13392_v49 = vadd.f32 %v12834_v20, %v3339_v1  ;;  %v5905_v35 = vpop.f32.mrb[135].mxu0  ;;  %v6347_v22 = vmax.f32 %v13388_v14, 0.0  ;;  %v6520_v39 = vpop.permute.xlu0 %6519 }
 0x5a1   :  { %v13394_v5 = vadd.f32 %v5905_v35, %v3331_v17  ;;  %v6345_v53 = vmax.f32 %v13390_v6, 0.0  ;;  %v6678_v48 = vsel %vm6637_vm6, %v17193_v44, %v6520_v39  ;;  %v18968_v17 = vld [vmem:[#allocation98_spill] sm:$0xff] }
 0x5a2   :  { %v6348_v60 = vmax.f32 %v13392_v49, 0.0  ;;  %v3368_v6 = vadd.f32 %v17305_v4, %v18968_v17  ;;  %v18969_v49 = vld [vmem:[#allocation99_spill] sm:$0xff] }
 0x5a3   :  { %v6346_v19 = vmax.f32 %v13394_v5, 0.0  ;;  %6623 = vrot.lane.b32.xlu1 %v6446_v26, %s14763_s23  ;;  %v3360_v44 = vadd.f32 %v17305_v4, %v18969_v49 }
 0x5a4   :  { %v6448_v0 = vpack.c.bf16 %v6348_v60, %v6347_v22  ;;  %v18970_v22 = vld [vmem:[#allocation100_spill] sm:$0xff] }
 0x5a5   :  { %v17436_v42 = vpack.c.bf16 %v6346_v19, %v6345_v53  ;;  %v12837_v21 = vpop.f32.mrb[136].mxu0  ;;  %v3371_v60 = vadd.f32 %v17305_v4, %v18970_v22 }
 0x5a6   :  { %v13396_v50 = vadd.f32 %v12837_v21, %v3352_v13  ;;  %6539 = vrot.lane.b32.xlu0 %v6448_v0, %s14762_s0  ;;  %v5918_v34 = vpop.f32.mrb[137].mxu0 }
 0x5a7   :  { %v13398_v26 = vadd.f32 %v5918_v34, %v3344_v33  ;;  %v12838_v7 = vpop.f32.mrb[138].mxu0 }
 0x5a8   :  { %v13400_v15 = vadd.f32 %v12838_v7, %v3355_v58  ;;  %v5921_v30 = vpop.f32.mrb[139].mxu0  ;;  %v6351_v41 = vmax.f32 %v13396_v50, 0.0 }
 0x5a9   :  { %v13402_v56 = vadd.f32 %v5921_v30, %v3347_v51  ;;  %v6606_v57 = vpop.permute.xlu0 %6605  ;;  %v6349_v61 = vmax.f32 %v13398_v26, 0.0  ;;  %v7191_v51 = vand.u32 %v14569_v32, %v16983_v2  ;;  %v18972_v26 = vld [vmem:[#allocation102_spill] sm:$0xff]  ;;  %v18973_v30 = vld [vmem:[#allocation103_spill] sm:$0xff] }
 0x5aa   :  { %v6352_v1 = vmax.f32 %v13400_v15, 0.0  ;;  %v17446_v14 = vsel %vm6724_vm7, %v6678_v48, %v6606_v57  ;;  %v3384_v7 = vadd.f32 %v17305_v4, %v18972_v26  ;;  %v3376_v48 = vadd.f32 %v17305_v4, %v18973_v30 }
 0x5ab   :  { %v6350_v36 = vmax.f32 %v13402_v56, 0.0  ;;  %12905 = vmatprep.mubr.msk.bf16.mxu1 %vm6829_vm8, %v17446_v14  ;;  %12941 = vmatprep.subr.bf16.mxu1 %v7191_v51 }
 0x5ac   :  { %v17452_v20 = vpack.c.bf16 %v6352_v1, %v6351_v41  ;;  %12942 = vmatpush3.bf16.msra.mxu1 %v7191_v51 }
 0x5ad   :  { %v6449_v35 = vpack.c.bf16 %v6350_v36, %v6349_v61  ;;  %v12841_v5 = vpop.f32.mrb[140].mxu0  ;;  %v18974_v61 = vld [vmem:[#allocation104_spill] sm:$0xff] }
 0x5ae   :  { %v13404_v53 = vadd.f32 %v12841_v5, %v3368_v6  ;;  %v5934_v19 = vpop.f32.mrb[141].mxu0  ;;  %v3387_v36 = vadd.f32 %v17305_v4, %v18974_v61 }
 0x5af   :  { %v13406_v13 = vadd.f32 %v5934_v19, %v3360_v44  ;;  %6625 = vrot.lane.b32.xlu0 %v6449_v35, %s14763_s23  ;;  %v12842_v0 = vpop.f32.mrb[142].mxu0  ;;  %v18975_v44 = vld [vmem:[#allocation105_spill] sm:$0xff] }
 0x5b0   :  { %v13408_v52 = vadd.f32 %v12842_v0, %v3371_v60  ;;  %v5937_v33 = vpop.f32.mrb[143].mxu0  ;;  %v6355_v58 = vmax.f32 %v13404_v53, 0.0  ;;  %v3379_v35 = vadd.f32 %v17305_v4, %v18975_v44  ;;  %v18976_v0 = vld [vmem:[#allocation106_spill] sm:$0xff] }
 0x5b1   :  { %v13410_v39 = vadd.f32 %v5937_v33, %v3363_v45  ;;  %v6522_v21 = vpop.permute.xlu1 %6521  ;;  %v6353_v34 = vmax.f32 %v13406_v13, 0.0 }
 0x5b2   :  { %v6356_v50 = vmax.f32 %v13408_v52, 0.0  ;;  %v6681_v57 = vsel %vm6637_vm6, %v17207_v54, %v6522_v21  ;;  %v3400_v52 = vadd.f32 %v17305_v4, %v18976_v0 }
 0x5b3   :  { %v6354_v40 = vmax.f32 %v13410_v39, 0.0  ;;  %v18977_v39 = vld [vmem:[#allocation107_spill] sm:$0xff] }
 0x5b4   :  { %v6452_v15 = vpack.c.bf16 %v6356_v50, %v6355_v58  ;;  %v3392_v21 = vadd.f32 %v17305_v4, %v18977_v39 }
 0x5b5   :  { %v6451_v56 = vpack.c.bf16 %v6354_v40, %v6353_v34  ;;  %v6608_v41 = vpop.permute.xlu1 %6607  ;;  %v12845_v1 = vpop.f32.mrb[144].mxu0  ;;  %v18978_v34 = vld [vmem:[#allocation108_spill] sm:$0xff] }
 0x5b6   :  { %v17474_v17 = vsel %vm6724_vm7, %v6681_v57, %v6608_v41  ;;  %v13412_v6 = vadd.f32 %v12845_v1, %v3384_v7  ;;  %v5950_v49 = vpop.f32.mrb[145].mxu0  ;;  %v3403_v40 = vadd.f32 %v17305_v4, %v18978_v34  ;;  %v18979_v7 = vld [vmem:[#allocation109_spill] sm:$0xff] }
 0x5b7   :  { %v13414_v5 = vadd.f32 %v5950_v49, %v3376_v48  ;;  %12906 = vmatmul.mubr.msk.bf16.gmra.mrb[112].mxu1 %vm6829_vm8, %v17474_v17  ;;  %6541 = vrot.lane.b32.xlu1 %v6451_v56, %s14762_s0  ;;  %v12846_v54 = vpop.f32.mrb[146].mxu0 }
 0x5b8   :  { %v13416_v22 = vadd.f32 %v12846_v54, %v3387_v36  ;;  %v5953_v60 = vpop.f32.mrb[147].mxu0  ;;  %v6359_v19 = vmax.f32 %v13412_v6, 0.0  ;;  %v6524_v32 = vpop.permute.xlu0 %6523 }
 0x5b9   :  { %v13418_v53 = vadd.f32 %v5953_v60, %v3379_v35  ;;  %v6357_v45 = vmax.f32 %v13414_v5, 0.0  ;;  %v6684_v41 = vsel %vm6637_vm6, %v17235_v55, %v6524_v32  ;;  %v18980_v5 = vld [vmem:[#allocation110_spill] sm:$0xff]  ;;  %v18981_v60 = vld [vmem:[#allocation111_spill] sm:$0xff] }
 0x5ba   :  { %v6360_v38 = vmax.f32 %v13416_v22, 0.0  ;;  %v3416_v54 = vadd.f32 %v17305_v4, %v18980_v5  ;;  %v3408_v55 = vadd.f32 %v17305_v4, %v18981_v60 }
 0x5bb   :  { %v6358_v13 = vmax.f32 %v13418_v53, 0.0  ;;  %6627 = vrot.lane.b32.xlu1 %v6452_v15, %s14763_s23  ;;  %v3395_v15 = vadd.f32 %v17305_v4, %v18979_v7 }
 0x5bc   :  { %v6454_v33 = vpack.c.bf16 %v6360_v38, %v6359_v19  ;;  %v18982_v38 = vld [vmem:[#allocation112_spill] sm:$0xff] }
 0x5bd   :  { %v17486_v58 = vpack.c.bf16 %v6358_v13, %v6357_v45  ;;  %v12849_v50 = vpop.f32.mrb[148].mxu0  ;;  %v3419_v45 = vadd.f32 %v17305_v4, %v18982_v38  ;;  %v17530_v38 = vld [vmem:[%s18651_s3 + $0x50] sm:$0xff]  }
 0x5be   :  { %v13420_v51 = vadd.f32 %v12849_v50, %v3400_v52  ;;  %6543 = vrot.lane.b32.xlu0 %v6454_v33, %s14762_s0  ;;  %v5966_v26 = vpop.f32.mrb[149].mxu0  ;;  %v18983_v52 = vld [vmem:[#allocation113_spill] sm:$0xff]  ;;  %12999 = vmatprep.subr.bf16.mxu1 %v17530_v38 }
 0x5bf   :  { %v13422_v30 = vadd.f32 %v5966_v26, %v3392_v21  ;;  %v12850_v48 = vpop.f32.mrb[150].mxu0  ;;  %v3411_v33 = vadd.f32 %v17305_v4, %v18983_v52 }
 0x5c0   :  { %v13424_v56 = vadd.f32 %v12850_v48, %v3403_v40  ;;  %v5969_v57 = vpop.f32.mrb[151].mxu0  ;;  %v6363_v36 = vmax.f32 %v13420_v51, 0.0 }
 0x5c1   :  { %v13426_v1 = vadd.f32 %v5969_v57, %v3395_v15  ;;  %v6610_v61 = vpop.permute.xlu0 %6609  ;;  %v6361_v44 = vmax.f32 %v13422_v30, 0.0  ;;  %v18984_v30 = vld [vmem:[#allocation114_spill] sm:$0xff]  ;;  %v18985_v57 = vld [vmem:[#allocation115_spill] sm:$0xff] }
 0x5c2   :  { %v6364_v6 = vmax.f32 %v13424_v56, 0.0  ;;  %v17496_v49 = vsel %vm6724_vm7, %v6684_v41, %v6610_v61  ;;  %v3432_v48 = vadd.f32 %v17305_v4, %v18984_v30  ;;  %v3424_v41 = vadd.f32 %v17305_v4, %v18985_v57  ;;  %v18990_v30 = vld [vmem:[#allocation120_spill] sm:$0xff] }
 0x5c3   :  { %v6362_v35 = vmax.f32 %v13426_v1, 0.0  ;;  %12909 = vmatprep.mubr.msk.bf16.mxu1 %vm6829_vm8, %v17496_v49 }
 0x5c4   :  { %v17502_v22 = vpack.c.bf16 %v6364_v6, %v6363_v36 }
 0x5c5   :  { %v6455_v53 = vpack.c.bf16 %v6362_v35, %v6361_v44  ;;  %v12853_v19 = vpop.f32.mrb[152].mxu0  ;;  %v18986_v44 = vld [vmem:[#allocation116_spill] sm:$0xff] }
 0x5c6   :  { %v13428_v13 = vadd.f32 %v12853_v19, %v3416_v54  ;;  %v5982_v0 = vpop.f32.mrb[153].mxu0  ;;  %v3435_v35 = vadd.f32 %v17305_v4, %v18986_v44 }
 0x5c7   :  { %v13430_v39 = vadd.f32 %v5982_v0, %v3408_v55  ;;  %6629 = vrot.lane.b32.xlu0 %v6455_v53, %s14763_s23  ;;  %v12854_v21 = vpop.f32.mrb[154].mxu0  ;;  %v18987_v55 = vld [vmem:[#allocation117_spill] sm:$0xff] }
 0x5c8   :  { %v13432_v32 = vadd.f32 %v12854_v21, %v3419_v45  ;;  %v5985_v50 = vpop.f32.mrb[155].mxu0  ;;  %v6367_v51 = vmax.f32 %v13428_v13, 0.0  ;;  %v3427_v53 = vadd.f32 %v17305_v4, %v18987_v55 }
 0x5c9   :  { %v13434_v34 = vadd.f32 %v5985_v50, %v3411_v33  ;;  %v6526_v40 = vpop.permute.xlu1 %6525  ;;  %v6365_v7 = vmax.f32 %v13430_v39, 0.0 }
 0x5ca   :  { %v6368_v26 = vmax.f32 %v13432_v32, 0.0  ;;  %v6687_v61 = vsel %vm6637_vm6, %v17251_v23, %v6526_v40  ;;  %v18988_v32 = vld [vmem:[#allocation118_spill] sm:$0xff]  ;;  %v18989_v40 = vld [vmem:[#allocation119_spill] sm:$0xff] }
 0x5cb   :  { %v6366_v15 = vmax.f32 %v13434_v34, 0.0  ;;  %v3448_v50 = vadd.f32 %v17305_v4, %v18988_v32  ;;  %v18994_v32 = vld [vmem:[#allocation124_spill] sm:$0xff] }
 0x5cc   :  { %v6458_v56 = vpack.c.bf16 %v6368_v26, %v6367_v51  ;;  %v3440_v51 = vadd.f32 %v17305_v4, %v18989_v40 }
 0x5cd   :  { %v6457_v1 = vpack.c.bf16 %v6366_v15, %v6365_v7  ;;  %v6612_v36 = vpop.permute.xlu1 %6611  ;;  %v12857_v6 = vpop.f32.mrb[156].mxu0 }
 0x5ce   :  { %v17520_v5 = vsel %vm6724_vm7, %v6687_v61, %v6612_v36  ;;  %v13436_v54 = vadd.f32 %v12857_v6, %v3432_v48  ;;  %v5998_v60 = vpop.f32.mrb[157].mxu0  ;;  %v3451_v48 = vadd.f32 %v17305_v4, %v18990_v30 }
 0x5cf   :  { %v13438_v19 = vadd.f32 %v5998_v60, %v3424_v41  ;;  %12910 = vmatmul.mubr.msk.bf16.gmra.mrb[116].mxu1 %vm6829_vm8, %v17520_v5  ;;  %6545 = vrot.lane.b32.xlu1 %v6457_v1, %s14762_s0  ;;  %v12858_v23 = vpop.f32.mrb[158].mxu0  ;;  %v18991_v1 = vld [vmem:[#allocation121_spill] sm:$0xff] }
 0x5d0   :  { %v13440_v45 = vadd.f32 %v12858_v23, %v3435_v35  ;;  %v6001_v13 = vpop.f32.mrb[159].mxu0  ;;  %v6371_v52 = vmax.f32 %v13436_v54, 0.0  ;;  %v6528_v26 = vpop.permute.xlu0 %6527 }
 0x5d1   :  { %v13442_v0 = vadd.f32 %v6001_v13, %v3427_v53  ;;  %v6369_v39 = vmax.f32 %v13438_v19, 0.0  ;;  %v6690_v35 = vsel %vm6637_vm6, %v17281_v31, %v6528_v26  ;;  %v18992_v13 = vld [vmem:[#allocation122_spill] sm:$0xff] }
 0x5d2   :  { %v6372_v33 = vmax.f32 %v13440_v45, 0.0 }
 0x5d3   :  { %v6370_v21 = vmax.f32 %v13442_v0, 0.0  ;;  %6631 = vrot.lane.b32.xlu1 %v6458_v56, %s14763_s23  ;;  %v3443_v56 = vadd.f32 %v17305_v4, %v18991_v1  ;;  %v3464_v0 = vadd.f32 %v17305_v4, %v18992_v13 }
 0x5d4   :  { %v6460_v34 = vpack.c.bf16 %v6372_v33, %v6371_v52  ;;  %v18993_v33 = vld [vmem:[#allocation123_spill] sm:$0xff] }
 0x5d5   :  { %v17538_v7 = vpack.c.bf16 %v6370_v21, %v6369_v39  ;;  %v12861_v15 = vpop.f32.mrb[160].mxu0  ;;  %v3456_v31 = vadd.f32 %v17305_v4, %v18993_v33 }
 0x5d6   :  { %v13444_v57 = vadd.f32 %v12861_v15, %v3448_v50  ;;  %6547 = vrot.lane.b32.xlu0 %v6460_v34, %s14762_s0  ;;  %v6014_v41 = vpop.f32.mrb[161].mxu0  ;;  %v3467_v50 = vadd.f32 %v17305_v4, %v18994_v32 }
 0x5d7   :  { %v13446_v61 = vadd.f32 %v6014_v41, %v3440_v51  ;;  %v12862_v36 = vpop.f32.mrb[162].mxu0  ;;  %v18995_v51 = vld [vmem:[#allocation125_spill] sm:$0xff] }
 0x5d8   :  { %v13448_v6 = vadd.f32 %v12862_v36, %v3451_v48  ;;  %v6017_v44 = vpop.f32.mrb[163].mxu0  ;;  %v6375_v55 = vmax.f32 %v13444_v57, 0.0  ;;  %v3459_v26 = vadd.f32 %v17305_v4, %v18995_v51 }
 0x5d9   :  { %v13450_v54 = vadd.f32 %v6017_v44, %v3443_v56  ;;  %v6614_v60 = vpop.permute.xlu0 %6613  ;;  %v6373_v23 = vmax.f32 %v13446_v61, 0.0 }
 0x5da   :  { %v6376_v53 = vmax.f32 %v13448_v6, 0.0  ;;  %v17548_v19 = vsel %vm6724_vm7, %v6690_v35, %v6614_v60 }
 0x5db   :  { %v6374_v45 = vmax.f32 %v13450_v54, 0.0  ;;  %12913 = vmatprep.mubr.msk.bf16.mxu1 %vm6829_vm8, %v17548_v19 }
 0x5dc   :  { %v17554_v52 = vpack.c.bf16 %v6376_v53, %v6375_v55 }
 0x5dd   :  { %v6461_v39 = vpack.c.bf16 %v6374_v45, %v6373_v23  ;;  %v12865_v21 = vpop.f32.mrb[164].mxu0 }
 0x5de   :  { %v13452_v34 = vadd.f32 %v12865_v21, %v3464_v0  ;;  %v6030_v40 = vpop.f32.mrb[165].mxu0 }
 0x5df   :  { %v13454_v15 = vadd.f32 %v6030_v40, %v3456_v31  ;;  %6633 = vrot.lane.b32.xlu1 %v6461_v39, %s14763_s23  ;;  %v12866_v30 = vpop.f32.mrb[166].mxu0 }
 0x5e0   :  { %v13456_v48 = vadd.f32 %v12866_v30, %v3467_v50  ;;  %v6033_v57 = vpop.f32.mrb[167].mxu0  ;;  %v6379_v56 = vmax.f32 %v13452_v34, 0.0 }
 0x5e1   :  { %v13458_v41 = vadd.f32 %v6033_v57, %v3459_v26  ;;  %v6530_v1 = vpop.permute.xlu1 %6529  ;;  %v6377_v36 = vmax.f32 %v13454_v15, 0.0 }
 0x5e2   :  { %v6380_v61 = vmax.f32 %v13456_v48, 0.0  ;;  %v6693_v54 = vsel %vm6637_vm6, %v17300_v59, %v6530_v1 }
 0x5e3   :  { %v6378_v6 = vmax.f32 %v13458_v41, 0.0 }
 0x5e4   :  { %v6464_v44 = vpack.c.bf16 %v6380_v61, %v6379_v56 }
 0x5e5   :  { %v6463_v35 = vpack.c.bf16 %v6378_v6, %v6377_v36  ;;  %v6616_v60 = vpop.permute.xlu1 %6615  ;;  %v14573_v6 = vld [vmem:[%s18651_s3 + $0x68] sm:$0xff]  }
 0x5e6   :  { %v17566_v4 = vsel %vm6724_vm7, %v6693_v54, %v6616_v60  ;;  %6635 = vrot.lane.b32.xlu1 %v6464_v44, %s14763_s23  ;;  %v14574_v44 = vld [vmem:[%s18651_s3 + $0x70] sm:$0x3f]  }
 0x5e7   :  { %12914 = vmatmul.mubr.msk.bf16.gmra.mrb[120].mxu1 %vm6829_vm8, %v17566_v4  ;;  %6549 = vrot.lane.b32.xlu0 %v6463_v35, %s14762_s0  ;;  %v14575_v35 = vld [vmem:[%s18651_s3 + $0x78] sm:$0xff]   ;;  %s14766_s0 = smov 72  }
 0x5e8   :  { %v6532_v55 = vpop.permute.xlu0 %6531 }
 0x5e9   :  { %v6696_v53 = vsel %vm6637_vm6, %v17338_v63, %v6532_v55 }
 0x5eb   :  { %8696 = vrot.lane.b32.xlu0 %v18888_v37, %s14765_s17 }
 0x5f1   :  { %v6618_v59 = vpop.permute.xlu0 %6617 }
 0x5f2   :  { %v17577_v23 = vsel %vm6724_vm7, %v6696_v53, %v6618_v59  ;;  %v14576_v59 = vld [vmem:[%s18651_s3 + $0x80] sm:$0xff]  }
 0x5f3   :  { %12917 = vmatprep.mubr.msk.bf16.mxu1 %vm6829_vm8, %v17577_v23 }
 0x5f9   :  { %v6534_v45 = vpop.permute.xlu1 %6533 }
 0x5fa   :  { %v6699_v13 = vsel %vm6637_vm6, %v17354_v16, %v6534_v45  ;;  %v14579_v45 = vld [vmem:[%s18651_s3 + $0x98] sm:$0x3f]  }
 0x5fd   :  { %v6620_v0 = vpop.permute.xlu1 %6619 }
 0x5fe   :  { %v17584_v33 = vsel %vm6724_vm7, %v6699_v13, %v6620_v0  ;;  %v7905_v13 = vand.u32 %v14579_v45, %v16983_v2  ;;  %v14580_v0 = vld [vmem:[%s18651_s3 + $0xa0] sm:$0xff]  }
 0x5ff   :  { %12918 = vmatmul.mubr.msk.bf16.gmra.mrb[124].mxu1 %vm6829_vm8, %v17584_v33 }
 0x600   :  { %v6536_v31 = vpop.permute.xlu0 %6535 }
 0x601   :  { %v6702_v63 = vsel %vm6637_vm6, %v17387_v27, %v6536_v31 }
 0x609   :  { %v6622_v39 = vpop.permute.xlu0 %6621 }
 0x60a   :  { %v17591_v21 = vsel %vm6724_vm7, %v6702_v63, %v6622_v39 }
 0x60b   :  { %12921 = vmatprep.mubr.msk.bf16.mxu1 %vm6829_vm8, %v17591_v21 }
 0x611   :  { %v6538_v32 = vpop.permute.xlu1 %6537 }
 0x612   :  { %v6705_v16 = vsel %vm6637_vm6, %v17403_v47, %v6538_v32 }
 0x615   :  { %v6624_v50 = vpop.permute.xlu1 %6623 }
 0x616   :  { %v17598_v34 = vsel %vm6724_vm7, %v6705_v16, %v6624_v50  ;;  %v14581_v16 = vld [vmem:[%s18651_s3 + $0xa8] sm:$0xff]   ;;  %v14584_v50 = vld [vmem:[%s18651_s3 + $0xc0] sm:$0x3f]  }
 0x617   :  { %12922 = vmatmul.mubr.msk.bf16.gmra.mrb[128].mxu1 %vm6829_vm8, %v17598_v34 }
 0x618   :  { %v6540_v40 = vpop.permute.xlu0 %6539 }
 0x619   :  { %v6708_v27 = vsel %vm6637_vm6, %v17436_v42, %v6540_v40  ;;  %v8261_v40 = vand.u32 %v14584_v50, %v16983_v2 }
 0x621   :  { %v6626_v51 = vpop.permute.xlu0 %6625 }
 0x622   :  { %v17605_v26 = vsel %vm6724_vm7, %v6708_v27, %v6626_v51  ;;  %v14586_v27 = vld [vmem:[%s18653_s5 + $0x8] sm:$0xff]  }
 0x623   :  { %12925 = vmatprep.mubr.msk.bf16.mxu1 %vm6829_vm8, %v17605_v26 }
 0x629   :  { %v6542_v15 = vpop.permute.xlu1 %6541 }
 0x62a   :  { %v6711_v47 = vsel %vm6637_vm6, %v17452_v20, %v6542_v15 }
 0x62d   :  { %v6628_v30 = vpop.permute.xlu1 %6627 }
 0x62e   :  { %v17612_v48 = vsel %vm6724_vm7, %v6711_v47, %v6628_v30 }
 0x62f   :  { %12926 = vmatmul.mubr.msk.bf16.gmra.mrb[132].mxu1 %vm6829_vm8, %v17612_v48 }
 0x630   :  { %v6544_v57 = vpop.permute.xlu0 %6543 }
 0x631   :  { %v6714_v42 = vsel %vm6637_vm6, %v17486_v58, %v6544_v57  ;;  %v14571_v58 = vld [vmem:[%s18651_s3 + $0x58] sm:$0xff]  }
 0x639   :  { %v6630_v41 = vpop.permute.xlu0 %6629 }
 0x63a   :  { %v17619_v1 = vsel %vm6724_vm7, %v6714_v42, %v6630_v41 }
 0x63b   :  { %12929 = vmatprep.mubr.msk.bf16.mxu1 %vm6829_vm8, %v17619_v1 }
 0x641   :  { %v6546_v56 = vpop.permute.xlu1 %6545 }
 0x642   :  { %v6717_v20 = vsel %vm6637_vm6, %v17502_v22, %v6546_v56  ;;  %v14572_v22 = vld [vmem:[%s18651_s3 + $0x60] sm:$0xff]  }
 0x645   :  { %v6632_v61 = vpop.permute.xlu1 %6631 }
 0x646   :  { %v17626_v36 = vsel %vm6724_vm7, %v6717_v20, %v6632_v61 }
 0x647   :  { %12930 = vmatmul.mubr.msk.bf16.gmra.mrb[136].mxu1 %vm6829_vm8, %v17626_v36 }
 0x648   :  { %12943 = vmatprep.mubr.msk.bf16.mxu1 %vm6829_vm8, %v16994_v62  ;;  %v6548_v54 = vpop.permute.xlu0 %6547 }
 0x649   :  { %v6720_v55 = vsel %vm6637_vm6, %v17538_v7, %v6548_v54  ;;  %v14577_v7 = vld [vmem:[%s18651_s3 + $0x88] sm:$0xff]  }
 0x64f   :  { %12944 = vmatmul.mubr.msk.bf16.vlgmr.msra.gmra.mrb[84].mxu1 %vm6829_vm8, %v17169_v18 }
 0x650   :  { %12947 = vmatprep.mubr.msk.bf16.mxu1 %vm6829_vm8, %v17183_v9  ;;  %13000 = vmatpush3.bf16.msra.mxu1 %v17530_v38  ;;  %v7549_v38 = vand.u32 %v14574_v44, %v16983_v2  ;;  %v14585_v2 = vld [vmem:[%s18653_s5] sm:$0xff]  }
 0x651   :  { %13001 = vmatprep.subr.bf16.mxu1 %v14571_v58  ;;  %v6634_v60 = vpop.permute.xlu1 %6633 }
 0x652   :  { %v17704_v53 = vsel %vm6724_vm7, %v6720_v55, %v6634_v60 }
 0x654   :  { %13002 = vmatpush3.bf16.msra.mxu1 %v14571_v58 }
 0x655   :  { %13003 = vmatprep.subr.bf16.mxu1 %v14572_v22 }
 0x657   :  { %12948 = vmatmul.mubr.msk.bf16.gmra.mrb[88].mxu1 %vm6829_vm8, %v17203_v3 }
 0x658   :  { %12951 = vmatprep.mubr.msk.bf16.mxu1 %vm6829_vm8, %v17223_v43  ;;  %13004 = vmatpush3.bf16.msra.mxu1 %v14572_v22  ;;  %v6636_v39 = vpop.permute.xlu1 %6635 }
 0x659   :  { %13005 = vmatprep.subr.bf16.mxu1 %v14573_v6  ;;  %v6550_v31 = vpop.permute.xlu0 %6549 }
 0x65a   :  { %v6723_v63 = vsel %vm6637_vm6, %v17554_v52, %v6550_v31  ;;  %v14582_v52 = vld [vmem:[%s18651_s3 + $0xb0] sm:$0xff]  }
 0x65b   :  { %v17781_v32 = vsel %vm6724_vm7, %v6723_v63, %v6636_v39 }
 0x65c   :  { %13006 = vmatpush3.bf16.msra.mxu1 %v14573_v6 }
 0x65d   :  { %13007 = vmatprep.subr.bf16.mxu1 %v7549_v38 }
 0x65f   :  { %12952 = vmatmul.mubr.msk.bf16.gmra.mrb[92].mxu1 %vm6829_vm8, %v17245_v11 }
 0x660   :  { %12955 = vmatprep.mubr.msk.bf16.mxu1 %vm6829_vm8, %v17269_v25  ;;  %13008 = vmatpush3.bf16.msra.mxu1 %v7549_v38 }
 0x661   :  { %13065 = vmatprep.subr.bf16.mxu1 %v14575_v35 }
 0x667   :  { %12956 = vmatmul.mubr.msk.bf16.gmra.mrb[96].mxu1 %vm6829_vm8, %v17294_v29 }
 0x668   :  { %12959 = vmatprep.mubr.msk.bf16.mxu1 %vm6829_vm8, %v17323_v12 }
 0x66f   :  { %12960 = vmatmul.mubr.msk.bf16.gmra.mrb[100].mxu1 %vm6829_vm8, %v17348_v28 }
 0x670   :  { %12963 = vmatprep.mubr.msk.bf16.mxu1 %vm6829_vm8, %v17372_v24 }
 0x677   :  { %12964 = vmatmul.mubr.msk.bf16.gmra.mrb[104].mxu1 %vm6829_vm8, %v17397_v46 }
 0x678   :  { %12967 = vmatprep.mubr.msk.bf16.mxu1 %vm6829_vm8, %v17421_v8 }
 0x67f   :  { %12968 = vmatmul.mubr.msk.bf16.gmra.mrb[108].mxu1 %vm6829_vm8, %v17446_v14 }
 0x680   :  { %12971 = vmatprep.mubr.msk.bf16.mxu1 %vm6829_vm8, %v17474_v17 }
 0x687   :  { %12972 = vmatmul.mubr.msk.bf16.gmra.mrb[112].mxu1 %vm6829_vm8, %v17496_v49 }
 0x688   :  { %12975 = vmatprep.mubr.msk.bf16.mxu1 %vm6829_vm8, %v17520_v5 }
 0x68f   :  { %12976 = vmatmul.mubr.msk.bf16.gmra.mrb[116].mxu1 %vm6829_vm8, %v17548_v19 }
 0x690   :  { %12979 = vmatprep.mubr.msk.bf16.mxu1 %vm6829_vm8, %v17566_v4 }
 0x697   :  { %12980 = vmatmul.mubr.msk.bf16.gmra.mrb[120].mxu1 %vm6829_vm8, %v17577_v23 }
 0x698   :  { %12983 = vmatprep.mubr.msk.bf16.mxu1 %vm6829_vm8, %v17584_v33 }
 0x69f   :  { %12984 = vmatmul.mubr.msk.bf16.gmra.mrb[124].mxu1 %vm6829_vm8, %v17591_v21 }
 0x6a0   :  { %12987 = vmatprep.mubr.msk.bf16.mxu1 %vm6829_vm8, %v17598_v34 }
 0x6a7   :  { %12988 = vmatmul.mubr.msk.bf16.gmra.mrb[128].mxu1 %vm6829_vm8, %v17605_v26 }
 0x6a8   :  { %12991 = vmatprep.mubr.msk.bf16.mxu1 %vm6829_vm8, %v17612_v48 }
 0x6af   :  { %12992 = vmatmul.mubr.msk.bf16.gmra.mrb[132].mxu1 %vm6829_vm8, %v17619_v1 }
 0x6b0   :  { %12995 = vmatprep.mubr.msk.bf16.mxu1 %vm6829_vm8, %v17626_v36 }
 0x6b7   :  { %12996 = vmatmul.mubr.msk.bf16.gmra.mrb[136].mxu1 %vm6829_vm8, %v17704_v53 }
 0x6b8   :  { %13009 = vmatprep.mubr.msk.bf16.mxu1 %vm6829_vm8, %v17169_v18  ;;  %v14578_v18 = vld [vmem:[%s18651_s3 + $0x90] sm:$0xff]  }
 0x6bf   :  { %13010 = vmatmul.mubr.msk.bf16.vlgmr.msra.gmra.mrb[84].mxu1 %vm6829_vm8, %v17183_v9 }
 0x6c0   :  { %13013 = vmatprep.mubr.msk.bf16.mxu1 %vm6829_vm8, %v17203_v3  ;;  %13066 = vmatpush3.bf16.msra.mxu1 %v14575_v35 }
 0x6c1   :  { %13067 = vmatprep.subr.bf16.mxu1 %v14576_v59 }
 0x6c4   :  { %13068 = vmatpush3.bf16.msra.mxu1 %v14576_v59 }
 0x6c5   :  { %13069 = vmatprep.subr.bf16.mxu1 %v14577_v7 }
 0x6c7   :  { %13014 = vmatmul.mubr.msk.bf16.gmra.mrb[88].mxu1 %vm6829_vm8, %v17223_v43 }
 0x6c8   :  { %13017 = vmatprep.mubr.msk.bf16.mxu1 %vm6829_vm8, %v17245_v11  ;;  %13070 = vmatpush3.bf16.msra.mxu1 %v14577_v7 }
 0x6c9   :  { %13071 = vmatprep.subr.bf16.mxu1 %v14578_v18 }
 0x6cc   :  { %13072 = vmatpush3.bf16.msra.mxu1 %v14578_v18 }
 0x6cd   :  { %13073 = vmatprep.subr.bf16.mxu1 %v7905_v13 }
 0x6cf   :  { %13018 = vmatmul.mubr.msk.bf16.gmra.mrb[92].mxu1 %vm6829_vm8, %v17269_v25 }
 0x6d0   :  { %13021 = vmatprep.mubr.msk.bf16.mxu1 %vm6829_vm8, %v17294_v29  ;;  %13074 = vmatpush3.bf16.msra.mxu1 %v7905_v13 }
 0x6d1   :  { %13131 = vmatprep.subr.bf16.mxu1 %v14580_v0 }
 0x6d7   :  { %13022 = vmatmul.mubr.msk.bf16.gmra.mrb[96].mxu1 %vm6829_vm8, %v17323_v12 }
 0x6d8   :  { %13025 = vmatprep.mubr.msk.bf16.mxu1 %vm6829_vm8, %v17348_v28 }
 0x6df   :  { %13026 = vmatmul.mubr.msk.bf16.gmra.mrb[100].mxu1 %vm6829_vm8, %v17372_v24 }
 0x6e0   :  { %13029 = vmatprep.mubr.msk.bf16.mxu1 %vm6829_vm8, %v17397_v46 }
 0x6e7   :  { %13030 = vmatmul.mubr.msk.bf16.gmra.mrb[104].mxu1 %vm6829_vm8, %v17421_v8 }
 0x6e8   :  { %13033 = vmatprep.mubr.msk.bf16.mxu1 %vm6829_vm8, %v17446_v14 }
 0x6ef   :  { %13034 = vmatmul.mubr.msk.bf16.gmra.mrb[108].mxu1 %vm6829_vm8, %v17474_v17 }
 0x6f0   :  { %13037 = vmatprep.mubr.msk.bf16.mxu1 %vm6829_vm8, %v17496_v49 }
 0x6f7   :  { %13038 = vmatmul.mubr.msk.bf16.gmra.mrb[112].mxu1 %vm6829_vm8, %v17520_v5 }
 0x6f8   :  { %13041 = vmatprep.mubr.msk.bf16.mxu1 %vm6829_vm8, %v17548_v19 }
 0x6ff   :  { %13042 = vmatmul.mubr.msk.bf16.gmra.mrb[116].mxu1 %vm6829_vm8, %v17566_v4 }
 0x700   :  { %13045 = vmatprep.mubr.msk.bf16.mxu1 %vm6829_vm8, %v17577_v23 }
 0x707   :  { %13046 = vmatmul.mubr.msk.bf16.gmra.mrb[120].mxu1 %vm6829_vm8, %v17584_v33 }
 0x708   :  { %13049 = vmatprep.mubr.msk.bf16.mxu1 %vm6829_vm8, %v17591_v21 }
 0x70f   :  { %13050 = vmatmul.mubr.msk.bf16.gmra.mrb[124].mxu1 %vm6829_vm8, %v17598_v34 }
 0x710   :  { %13053 = vmatprep.mubr.msk.bf16.mxu1 %vm6829_vm8, %v17605_v26 }
 0x717   :  { %13054 = vmatmul.mubr.msk.bf16.gmra.mrb[128].mxu1 %vm6829_vm8, %v17612_v48 }
 0x718   :  { %13057 = vmatprep.mubr.msk.bf16.mxu1 %vm6829_vm8, %v17619_v1 }
 0x71f   :  { %13058 = vmatmul.mubr.msk.bf16.gmra.mrb[132].mxu1 %vm6829_vm8, %v17626_v36 }
 0x720   :  { %13061 = vmatprep.mubr.msk.bf16.mxu1 %vm6829_vm8, %v17704_v53 }
 0x727   :  { %13062 = vmatmul.mubr.msk.bf16.gmra.mrb[136].mxu1 %vm6829_vm8, %v17781_v32 }
 0x728   :  { %13075 = vmatprep.mubr.msk.bf16.mxu1 %vm6829_vm8, %v17183_v9  ;;  %v14583_v9 = vld [vmem:[%s18651_s3 + $0xb8] sm:$0xff]  }
 0x72f   :  { %13076 = vmatmul.mubr.msk.bf16.vlgmr.msra.gmra.mrb[84].mxu1 %vm6829_vm8, %v17203_v3 }
 0x730   :  { %13079 = vmatprep.mubr.msk.bf16.mxu1 %vm6829_vm8, %v17223_v43  ;;  %13132 = vmatpush3.bf16.msra.mxu1 %v14580_v0 }
 0x731   :  { %13133 = vmatprep.subr.bf16.mxu1 %v14581_v16 }
 0x734   :  { %13134 = vmatpush3.bf16.msra.mxu1 %v14581_v16 }
 0x735   :  { %13135 = vmatprep.subr.bf16.mxu1 %v14582_v52 }
 0x737   :  { %13080 = vmatmul.mubr.msk.bf16.gmra.mrb[88].mxu1 %vm6829_vm8, %v17245_v11 }
 0x738   :  { %13083 = vmatprep.mubr.msk.bf16.mxu1 %vm6829_vm8, %v17269_v25  ;;  %13136 = vmatpush3.bf16.msra.mxu1 %v14582_v52 }
 0x739   :  { %13137 = vmatprep.subr.bf16.mxu1 %v14583_v9 }
 0x73c   :  { %13138 = vmatpush3.bf16.msra.mxu1 %v14583_v9 }
 0x73d   :  { %13139 = vmatprep.subr.bf16.mxu1 %v8261_v40 }
 0x73f   :  { %13084 = vmatmul.mubr.msk.bf16.gmra.mrb[92].mxu1 %vm6829_vm8, %v17294_v29 }
 0x740   :  { %13087 = vmatprep.mubr.msk.bf16.mxu1 %vm6829_vm8, %v17323_v12  ;;  %13140 = vmatpush3.bf16.msra.mxu1 %v8261_v40 }
 0x741   :  { %8886 = vmatprep.subr.bf16.mxu1 %v18888_v37 }
 0x747   :  { %13088 = vmatmul.mubr.msk.bf16.gmra.mrb[96].mxu1 %vm6829_vm8, %v17348_v28 }
 0x748   :  { %13091 = vmatprep.mubr.msk.bf16.mxu1 %vm6829_vm8, %v17372_v24 }
 0x74f   :  { %13092 = vmatmul.mubr.msk.bf16.gmra.mrb[100].mxu1 %vm6829_vm8, %v17397_v46 }
 0x750   :  { %13095 = vmatprep.mubr.msk.bf16.mxu1 %vm6829_vm8, %v17421_v8 }
 0x757   :  { %13096 = vmatmul.mubr.msk.bf16.gmra.mrb[104].mxu1 %vm6829_vm8, %v17446_v14 }
 0x758   :  { %13099 = vmatprep.mubr.msk.bf16.mxu1 %vm6829_vm8, %v17474_v17 }
 0x75f   :  { %13100 = vmatmul.mubr.msk.bf16.gmra.mrb[108].mxu1 %vm6829_vm8, %v17496_v49 }
 0x760   :  { %13103 = vmatprep.mubr.msk.bf16.mxu1 %vm6829_vm8, %v17520_v5 }
 0x767   :  { %13104 = vmatmul.mubr.msk.bf16.gmra.mrb[112].mxu1 %vm6829_vm8, %v17548_v19 }
 0x768   :  { %13107 = vmatprep.mubr.msk.bf16.mxu1 %vm6829_vm8, %v17566_v4 }
 0x76f   :  { %13108 = vmatmul.mubr.msk.bf16.gmra.mrb[116].mxu1 %vm6829_vm8, %v17577_v23 }
 0x770   :  { %13111 = vmatprep.mubr.msk.bf16.mxu1 %vm6829_vm8, %v17584_v33 }
 0x777   :  { %13112 = vmatmul.mubr.msk.bf16.gmra.mrb[120].mxu1 %vm6829_vm8, %v17591_v21 }
 0x778   :  { %13115 = vmatprep.mubr.msk.bf16.mxu1 %vm6829_vm8, %v17598_v34 }
 0x77f   :  { %13116 = vmatmul.mubr.msk.bf16.gmra.mrb[124].mxu1 %vm6829_vm8, %v17605_v26 }
 0x780   :  { %13119 = vmatprep.mubr.msk.bf16.mxu1 %vm6829_vm8, %v17612_v48 }
 0x787   :  { %13120 = vmatmul.mubr.msk.bf16.gmra.mrb[128].mxu1 %vm6829_vm8, %v17619_v1 }
 0x788   :  { %13123 = vmatprep.mubr.msk.bf16.mxu1 %vm6829_vm8, %v17626_v36 }
 0x78f   :  { %13124 = vmatmul.mubr.msk.bf16.gmra.mrb[132].mxu1 %vm6829_vm8, %v17704_v53 }
 0x790   :  { %13127 = vmatprep.mubr.msk.bf16.mxu1 %vm6829_vm8, %v17781_v32 }
 0x797   :  { %13128 = vmatmul.mubr.msk.bf16.gmra.mrb[136].mxu1 %vm6829_vm8, %v16994_v62 }
 0x798   :  { %13141 = vmatprep.mubr.msk.bf16.mxu1 %vm6829_vm8, %v17203_v3  ;;  %v14587_v3 = vld [vmem:[%s18653_s5 + $0x10] sm:$0xff]  }
 0x79f   :  { %13142 = vmatmul.mubr.msk.bf16.vlgmr.msra.gmra.mrb[84].mxu1 %vm6829_vm8, %v17223_v43  ;;  %v14588_v43 = vld [vmem:[%s18653_s5 + $0x18] sm:$0xff]  }
 0x7a0   :  { %13145 = vmatprep.mubr.msk.bf16.mxu1 %vm6829_vm8, %v17245_v11  ;;  %8887 = vmatpush1.bf16.msra.mxu1 %v14585_v2  ;;  %v14589_v11 = vld [vmem:[%s18653_s5 + $0x20] sm:$0xff]  }
 0x7a1   :  { %8888 = vmatprep.subr.bf16.mxu1 %v18888_v37 }
 0x7a4   :  { %8889 = vmatpush1.bf16.msra.mxu1 %v14586_v27 }
 0x7a5   :  { %8890 = vmatprep.subr.bf16.mxu1 %v18888_v37 }
 0x7a7   :  { %13146 = vmatmul.mubr.msk.bf16.gmra.mrb[88].mxu1 %vm6829_vm8, %v17269_v25  ;;  %v14590_v25 = vld [vmem:[%s18653_s5 + $0x28] sm:$0xff]  }
 0x7a8   :  { %13149 = vmatprep.mubr.msk.bf16.mxu1 %vm6829_vm8, %v17294_v29  ;;  %8891 = vmatpush1.bf16.msra.mxu1 %v14587_v3  ;;  %v14591_v29 = vld [vmem:[%s18653_s5 + $0x30] sm:$0xff]  }
 0x7a9   :  { %8892 = vmatprep.subr.bf16.mxu1 %v18888_v37 }
 0x7ac   :  { %8893 = vmatpush1.bf16.msra.mxu1 %v14588_v43 }
 0x7ad   :  { %8894 = vmatprep.subr.bf16.mxu1 %v18888_v37 }
 0x7af   :  { %13150 = vmatmul.mubr.msk.bf16.gmra.mrb[92].mxu1 %vm6829_vm8, %v17323_v12  ;;  %v14592_v12 = vld [vmem:[%s18653_s5 + $0x38] sm:$0xff]  }
 0x7b0   :  { %13153 = vmatprep.mubr.msk.bf16.mxu1 %vm6829_vm8, %v17348_v28  ;;  %8895 = vmatpush1.bf16.msra.mxu1 %v14589_v11  ;;  %v14593_v28 = vld [vmem:[%s18653_s5 + $0x40] sm:$0xff]  }
 0x7b1   :  { %8896 = vmatprep.subr.bf16.mxu1 %v18888_v37 }
 0x7b4   :  { %8897 = vmatpush1.bf16.msra.mxu1 %v14590_v25 }
 0x7b5   :  { %8898 = vmatprep.subr.bf16.mxu1 %v18888_v37 }
 0x7b7   :  { %13154 = vmatmul.mubr.msk.bf16.gmra.mrb[96].mxu1 %vm6829_vm8, %v17372_v24  ;;  %v14594_v24 = vld [vmem:[%s18653_s5 + $0x48] ss:$0 sps:$4 sm:$0x77]  }
 0x7b8   :  { %13157 = vmatprep.mubr.msk.bf16.mxu1 %vm6829_vm8, %v17397_v46  ;;  %8899 = vmatpush1.bf16.msra.mxu1 %v14591_v29  ;;  %v8884_v46 = vsel %vm8882_vm9, %v14594_v24, 0 }
 0x7b9   :  { %8900 = vmatprep.subr.bf16.mxu1 %v18888_v37 }
 0x7bc   :  { %8901 = vmatpush1.bf16.msra.mxu1 %v14592_v12  ;;  %v14595_v12 = vld [vmem:[%s18653_s5 + $0x4c] sm:$0xff]  }
 0x7bd   :  { %8902 = vmatprep.subr.bf16.mxu1 %v18888_v37 }
 0x7bf   :  { %13158 = vmatmul.mubr.msk.bf16.gmra.mrb[100].mxu1 %vm6829_vm8, %v17421_v8  ;;  %v17950_v8 = vpop.permute.xlu0 %8696 }
 0x7c0   :  { %13161 = vmatprep.mubr.msk.bf16.mxu1 %vm6829_vm8, %v17446_v14  ;;  %8903 = vmatpush1.bf16.msra.mxu1 %v14593_v28  ;;  %v8716_v14 = vsel %vm6724_vm7, 0, %v16989_v10 }
 0x7c1   :  { %8904 = vmatprep.subr.bf16.mxu1 %v18888_v37 }
 0x7c4   :  { %8905 = vmatpush1.bf16.msra.mxu1 %v8884_v46 }
 0x7c5   :  { %9079 = vmatprep.subr.bf16.mxu1 %v18888_v37 }
 0x7c7   :  { %13162 = vmatmul.mubr.msk.bf16.gmra.mrb[104].mxu1 %vm6829_vm8, %v17474_v17  ;;  %v8748_v17 = vsel %vm8746_vm10, %v8716_v14, %v17950_v8 }
 0x7c8   :  { %13165 = vmatprep.mubr.msk.bf16.mxu1 %vm6829_vm8, %v17496_v49  ;;  %v17963_v49 = vld [vmem:[%s18654_s4] ss:$0 sm:$0xff] }
 0x7cf   :  { %13166 = vmatmul.mubr.msk.bf16.gmra.mrb[108].mxu1 %vm6829_vm8, %v17520_v5 }
 0x7d0   :  { %13169 = vmatprep.mubr.msk.bf16.mxu1 %vm6829_vm8, %v17548_v19 }
 0x7d7   :  { %13170 = vmatmul.mubr.msk.bf16.gmra.mrb[112].mxu1 %vm6829_vm8, %v17566_v4 }
 0x7d8   :  { %13173 = vmatprep.mubr.msk.bf16.mxu1 %vm6829_vm8, %v17577_v23 }
 0x7df   :  { %13174 = vmatmul.mubr.msk.bf16.gmra.mrb[116].mxu1 %vm6829_vm8, %v17584_v33 }
 0x7e0   :  { %13177 = vmatprep.mubr.msk.bf16.mxu1 %vm6829_vm8, %v17591_v21 }
 0x7e7   :  { %13178 = vmatmul.mubr.msk.bf16.gmra.mrb[120].mxu1 %vm6829_vm8, %v17598_v34 }
 0x7e8   :  { %13181 = vmatprep.mubr.msk.bf16.mxu1 %vm6829_vm8, %v17605_v26 }
 0x7ef   :  { %13182 = vmatmul.mubr.msk.bf16.gmra.mrb[124].mxu1 %vm6829_vm8, %v17612_v48 }
 0x7f0   :  { %13185 = vmatprep.mubr.msk.bf16.mxu1 %vm6829_vm8, %v17619_v1 }
 0x7f7   :  { %13186 = vmatmul.mubr.msk.bf16.gmra.mrb[128].mxu1 %vm6829_vm8, %v17626_v36 }
 0x7f8   :  { %13189 = vmatprep.mubr.msk.bf16.mxu1 %vm6829_vm8, %v17704_v53 }
 0x7ff   :  { %13190 = vmatmul.mubr.msk.bf16.gmra.mrb[132].mxu1 %vm6829_vm8, %v17781_v32 }
 0x800   :  { %13193 = vmatprep.mubr.msk.bf16.mxu1 %vm6829_vm8, %v16994_v62 }
 0x807   :  { %13194 = vmatmul.mubr.msk.bf16.gmra.mrb[136].mxu1 %vm6829_vm8, %v16994_v62 }
 0x808   :  { %11370 = vmatprep.mubr.msk.bf16.mxu1 %vm2126_vm1, %v17950_v8 }
 0x80f   :  { %8919 = vmatmul.mubr.bf16.vlgmr.msra.gmra.mrb[140].mxu1 %v8748_v17 }
 0x810   :  { %9080 = vmatpush1.bf16.msra.mxu1 %v14595_v12 }
 0x811   :  { %9081 = vmatprep.subr.bf16.mxu1 %v18888_v37 }
 0x872   :  { %v13143_v5 = vpop.f32.mrb[84].mxu1 }
 0x873   :  { %v13459_v19 = vadd.f32 %v13143_v5, %v17963_v49  ;;  %v8297_v62 = vpop.f32.mrb[85].mxu1 }
 0x874   :  { %v13460_v4 = vadd.f32 %v17963_v49, %v8297_v62  ;;  %v13144_v23 = vpop.f32.mrb[86].mxu1 }
 0x875   :  { %v13461_v33 = vadd.f32 %v13144_v23, %v17963_v49  ;;  %v8300_v21 = vpop.f32.mrb[87].mxu1  ;;  %v8578_v51 = vmax.f32 %v13459_v19, 0.0 }
 0x876   :  { %v13462_v34 = vadd.f32 %v17963_v49, %v8300_v21  ;;  %v8576_v15 = vmax.f32 %v13460_v4, 0.0 }
 0x877   :  { %v8579_v26 = vmax.f32 %v13461_v33, 0.0 }
 0x878   :  { %v8577_v47 = vmax.f32 %v13462_v34, 0.0 }
 0x879   :  { %v8633_v30 = vpack.c.bf16 %v8579_v26, %v8578_v51 }
 0x87a   :  { %v17969_v48 = vpack.c.bf16 %v8577_v47, %v8576_v15  ;;  %v13147_v57 = vpop.f32.mrb[88].mxu1  ;;  %v14596_v15 = vld [vmem:[%s18653_s5 + $0x54] sm:$0xff]  }
 0x87b   :  { %v13463_v42 = vadd.f32 %v13147_v57, %v17963_v49  ;;  %8669 = vrot.lane.b32.xlu1 %v8633_v30, %s14763_s23  ;;  %v8313_v41 = vpop.f32.mrb[89].mxu1  ;;  %9082 = vmatpush1.bf16.msra.mxu1 %v14596_v15 }
 0x87c   :  { %v13464_v1 = vadd.f32 %v17963_v49, %v8313_v41  ;;  %v13148_v56 = vpop.f32.mrb[90].mxu1  ;;  %9083 = vmatprep.subr.bf16.mxu1 %v18888_v37 }
 0x87d   :  { %v13465_v20 = vadd.f32 %v13148_v56, %v17963_v49  ;;  %v8316_v61 = vpop.f32.mrb[91].mxu1  ;;  %v8582_v58 = vmax.f32 %v13463_v42, 0.0 }
 0x87e   :  { %v13466_v36 = vadd.f32 %v17963_v49, %v8316_v61  ;;  %v8580_v6 = vmax.f32 %v13464_v1, 0.0 }
 0x87f   :  { %v8583_v22 = vmax.f32 %v13465_v20, 0.0 }
 0x880   :  { %v8581_v44 = vmax.f32 %v13466_v36, 0.0  ;;  %v14597_v36 = vld [vmem:[%s18653_s5 + $0x5c] sm:$0xff]  }
 0x881   :  { %v17976_v38 = vpack.c.bf16 %v8583_v22, %v8582_v58  ;;  %9084 = vmatpush1.bf16.msra.mxu1 %v14597_v36 }
 0x882   :  { %v8634_v35 = vpack.c.bf16 %v8581_v44, %v8580_v6  ;;  %v13151_v54 = vpop.f32.mrb[92].mxu1  ;;  %9085 = vmatprep.subr.bf16.mxu1 %v18888_v37 }
 0x883   :  { %v13467_v60 = vadd.f32 %v13151_v54, %v17963_v49  ;;  %v8329_v55 = vpop.f32.mrb[93].mxu1 }
 0x884   :  { %v13468_v53 = vadd.f32 %v17963_v49, %v8329_v55  ;;  %8698 = vrot.lane.b32.xlu0 %v8634_v35, %s14765_s17  ;;  %v13152_v59 = vpop.f32.mrb[94].mxu1 }
 0x885   :  { %v13469_v7 = vadd.f32 %v13152_v59, %v17963_v49  ;;  %v8332_v18 = vpop.f32.mrb[95].mxu1  ;;  %v8586_v13 = vmax.f32 %v13467_v60, 0.0 }
 0x886   :  { %v13470_v45 = vadd.f32 %v17963_v49, %v8332_v18  ;;  %v8584_v31 = vmax.f32 %v13468_v53, 0.0 }
 0x887   :  { %v8587_v0 = vmax.f32 %v13469_v7, 0.0 }
 0x888   :  { %v8585_v63 = vmax.f32 %v13470_v45, 0.0 }
 0x889   :  { %v8637_v39 = vpack.c.bf16 %v8587_v0, %v8586_v13 }
 0x88a   :  { %v8636_v32 = vpack.c.bf16 %v8585_v63, %v8584_v31  ;;  %v13155_v16 = vpop.f32.mrb[96].mxu1 }
 0x88b   :  { %v13471_v52 = vadd.f32 %v13155_v16, %v17963_v49  ;;  %8700 = vrot.lane.b32.xlu0 %v8637_v39, %s14765_s17  ;;  %v8345_v9 = vpop.f32.mrb[97].mxu1 }
 0x88c   :  { %v13472_v50 = vadd.f32 %v17963_v49, %v8345_v9  ;;  %8671 = vrot.lane.b32.xlu1 %v8636_v32, %s14763_s23  ;;  %v13156_v40 = vpop.f32.mrb[98].mxu1  ;;  %v14598_v32 = vld [vmem:[%s18653_s5 + $0x64] sm:$0xff]  }
 0x88d   :  { %v13473_v2 = vadd.f32 %v13156_v40, %v17963_v49  ;;  %v8348_v27 = vpop.f32.mrb[99].mxu1  ;;  %v8590_v43 = vmax.f32 %v13471_v52, 0.0  ;;  %9086 = vmatpush1.bf16.msra.mxu1 %v14598_v32 }
 0x88e   :  { %v13474_v3 = vadd.f32 %v17963_v49, %v8348_v27  ;;  %v8588_v25 = vmax.f32 %v13472_v50, 0.0  ;;  %9087 = vmatprep.subr.bf16.mxu1 %v18888_v37 }
 0x88f   :  { %v8591_v11 = vmax.f32 %v13473_v2, 0.0 }
 0x890   :  { %v8589_v29 = vmax.f32 %v13474_v3, 0.0 }
 0x891   :  { %v8639_v28 = vpack.c.bf16 %v8591_v11, %v8590_v43 }
 0x892   :  { %v17992_v24 = vpack.c.bf16 %v8589_v29, %v8588_v25  ;;  %v13159_v46 = vpop.f32.mrb[100].mxu1 }
 0x893   :  { %v13475_v14 = vadd.f32 %v13159_v46, %v17963_v49  ;;  %8673 = vrot.lane.b32.xlu1 %v8639_v28, %s14763_s23  ;;  %v8361_v17 = vpop.f32.mrb[101].mxu1 }
 0x894   :  { %v13476_v5 = vadd.f32 %v17963_v49, %v8361_v17  ;;  %v13160_v19 = vpop.f32.mrb[102].mxu1 }
 0x895   :  { %v13477_v62 = vadd.f32 %v13160_v19, %v17963_v49  ;;  %v8364_v4 = vpop.f32.mrb[103].mxu1  ;;  %v8594_v33 = vmax.f32 %v13475_v14, 0.0  ;;  %v14599_v14 = vld [vmem:[%s18653_s5 + $0x6c] sm:$0xff]  }
 0x896   :  { %v13478_v23 = vadd.f32 %v17963_v49, %v8364_v4  ;;  %v8592_v34 = vmax.f32 %v13476_v5, 0.0  ;;  %9088 = vmatpush1.bf16.msra.mxu1 %v14599_v14 }
 0x897   :  { %v8595_v21 = vmax.f32 %v13477_v62, 0.0  ;;  %9089 = vmatprep.subr.bf16.mxu1 %v18888_v37 }
 0x898   :  { %v8593_v51 = vmax.f32 %v13478_v23, 0.0 }
 0x899   :  { %v18000_v26 = vpack.c.bf16 %v8595_v21, %v8594_v33 }
 0x89a   :  { %v8640_v47 = vpack.c.bf16 %v8593_v51, %v8592_v34  ;;  %v13163_v30 = vpop.f32.mrb[104].mxu1  ;;  %v14600_v51 = vld [vmem:[%s18653_s5 + $0x74] sm:$0xff]  }
 0x89b   :  { %v13479_v57 = vadd.f32 %v13163_v30, %v17963_v49  ;;  %v8377_v42 = vpop.f32.mrb[105].mxu1  ;;  %9090 = vmatpush1.bf16.msra.mxu1 %v14600_v51 }
 0x89c   :  { %v13480_v41 = vadd.f32 %v17963_v49, %v8377_v42  ;;  %8702 = vrot.lane.b32.xlu0 %v8640_v47, %s14765_s17  ;;  %v13164_v1 = vpop.f32.mrb[106].mxu1  ;;  %9091 = vmatprep.subr.bf16.mxu1 %v18888_v37 }
 0x89d   :  { %v13481_v56 = vadd.f32 %v13164_v1, %v17963_v49  ;;  %v8380_v20 = vpop.f32.mrb[107].mxu1  ;;  %v8598_v58 = vmax.f32 %v13479_v57, 0.0 }
 0x89e   :  { %v13482_v61 = vadd.f32 %v17963_v49, %v8380_v20  ;;  %v8596_v6 = vmax.f32 %v13480_v41, 0.0 }
 0x89f   :  { %v8599_v22 = vmax.f32 %v13481_v56, 0.0 }
 0x8a0   :  { %v8597_v44 = vmax.f32 %v13482_v61, 0.0 }
 0x8a1   :  { %v8643_v35 = vpack.c.bf16 %v8599_v22, %v8598_v58 }
 0x8a2   :  { %v8642_v54 = vpack.c.bf16 %v8597_v44, %v8596_v6  ;;  %v13167_v60 = vpop.f32.mrb[108].mxu1 }
 0x8a3   :  { %v13483_v55 = vadd.f32 %v13167_v60, %v17963_v49  ;;  %8704 = vrot.lane.b32.xlu0 %v8643_v35, %s14765_s17  ;;  %v8393_v53 = vpop.f32.mrb[109].mxu1 }
 0x8a4   :  { %v13484_v59 = vadd.f32 %v17963_v49, %v8393_v53  ;;  %8675 = vrot.lane.b32.xlu1 %v8642_v54, %s14763_s23  ;;  %v13168_v7 = vpop.f32.mrb[110].mxu1 }
 0x8a5   :  { %v13485_v18 = vadd.f32 %v13168_v7, %v17963_v49  ;;  %v8396_v45 = vpop.f32.mrb[111].mxu1  ;;  %v8602_v0 = vmax.f32 %v13483_v55, 0.0  ;;  %v14601_v55 = vld [vmem:[%s18653_s5 + $0x7c] sm:$0xff]  }
 0x8a6   :  { %v13486_v13 = vadd.f32 %v17963_v49, %v8396_v45  ;;  %v8600_v63 = vmax.f32 %v13484_v59, 0.0  ;;  %9092 = vmatpush1.bf16.msra.mxu1 %v14601_v55 }
 0x8a7   :  { %v8603_v31 = vmax.f32 %v13485_v18, 0.0  ;;  %9093 = vmatprep.subr.bf16.mxu1 %v18888_v37 }
 0x8a8   :  { %v8601_v39 = vmax.f32 %v13486_v13, 0.0 }
 0x8a9   :  { %v8645_v16 = vpack.c.bf16 %v8603_v31, %v8602_v0 }
 0x8aa   :  { %v18024_v52 = vpack.c.bf16 %v8601_v39, %v8600_v63  ;;  %v13171_v9 = vpop.f32.mrb[112].mxu1 }
 0x8ab   :  { %v13487_v50 = vadd.f32 %v13171_v9, %v17963_v49  ;;  %8677 = vrot.lane.b32.xlu1 %v8645_v16, %s14763_s23  ;;  %v8409_v40 = vpop.f32.mrb[113].mxu1 }
 0x8ac   :  { %v13488_v2 = vadd.f32 %v17963_v49, %v8409_v40  ;;  %v13172_v27 = vpop.f32.mrb[114].mxu1 }
 0x8ad   :  { %v13489_v3 = vadd.f32 %v13172_v27, %v17963_v49  ;;  %v8412_v43 = vpop.f32.mrb[115].mxu1  ;;  %v8606_v25 = vmax.f32 %v13487_v50, 0.0 }
 0x8ae   :  { %v13490_v11 = vadd.f32 %v17963_v49, %v8412_v43  ;;  %v8604_v12 = vmax.f32 %v13488_v2, 0.0  ;;  %v14602_v2 = vld [vmem:[%s18653_s5 + $0x84] sm:$0xff]  }
 0x8af   :  { %v8607_v29 = vmax.f32 %v13489_v3, 0.0  ;;  %9094 = vmatpush1.bf16.msra.mxu1 %v14602_v2 }
 0x8b0   :  { %v8605_v28 = vmax.f32 %v13490_v11, 0.0  ;;  %9095 = vmatprep.subr.bf16.mxu1 %v18888_v37 }
 0x8b1   :  { %v18032_v46 = vpack.c.bf16 %v8607_v29, %v8606_v25 }
 0x8b2   :  { %v8646_v17 = vpack.c.bf16 %v8605_v28, %v8604_v12  ;;  %v13175_v5 = vpop.f32.mrb[116].mxu1 }
 0x8b3   :  { %v13491_v19 = vadd.f32 %v13175_v5, %v17963_v49  ;;  %v8425_v62 = vpop.f32.mrb[117].mxu1 }
 0x8b4   :  { %v13492_v4 = vadd.f32 %v17963_v49, %v8425_v62  ;;  %8706 = vrot.lane.b32.xlu0 %v8646_v17, %s14765_s17  ;;  %v13176_v23 = vpop.f32.mrb[118].mxu1  ;;  %v14603_v17 = vld [vmem:[%s18653_s5 + $0x8c] sm:$0xff]  }
 0x8b5   :  { %v13493_v33 = vadd.f32 %v13176_v23, %v17963_v49  ;;  %v8428_v21 = vpop.f32.mrb[119].mxu1  ;;  %v8610_v15 = vmax.f32 %v13491_v19, 0.0  ;;  %9096 = vmatpush1.bf16.msra.mxu1 %v14603_v17 }
 0x8b6   :  { %v13494_v34 = vadd.f32 %v17963_v49, %v8428_v21  ;;  %v8608_v30 = vmax.f32 %v13492_v4, 0.0  ;;  %9097 = vmatprep.subr.bf16.mxu1 %v18888_v37 }
 0x8b7   :  { %v8611_v47 = vmax.f32 %v13493_v33, 0.0 }
 0x8b8   :  { %v8609_v57 = vmax.f32 %v13494_v34, 0.0 }
 0x8b9   :  { %v8649_v42 = vpack.c.bf16 %v8611_v47, %v8610_v15 }
 0x8ba   :  { %v8648_v41 = vpack.c.bf16 %v8609_v57, %v8608_v30  ;;  %v13179_v1 = vpop.f32.mrb[120].mxu1 }
 0x8bb   :  { %v13495_v56 = vadd.f32 %v13179_v1, %v17963_v49  ;;  %8708 = vrot.lane.b32.xlu0 %v8649_v42, %s14765_s17  ;;  %v8441_v20 = vpop.f32.mrb[121].mxu1 }
 0x8bc   :  { %v13496_v61 = vadd.f32 %v17963_v49, %v8441_v20  ;;  %8679 = vrot.lane.b32.xlu1 %v8648_v41, %s14763_s23  ;;  %v13180_v36 = vpop.f32.mrb[122].mxu1 }
 0x8bd   :  { %v13497_v58 = vadd.f32 %v13180_v36, %v17963_v49  ;;  %v8444_v22 = vpop.f32.mrb[123].mxu1  ;;  %v8614_v44 = vmax.f32 %v13495_v56, 0.0 }
 0x8be   :  { %v13498_v6 = vadd.f32 %v17963_v49, %v8444_v22  ;;  %v8612_v54 = vmax.f32 %v13496_v61, 0.0  ;;  %v14604_v61 = vld [vmem:[%s18653_s5 + $0x94] ss:$0 sps:$4 sm:$0x77]  }
 0x8bf   :  { %v8615_v35 = vmax.f32 %v13497_v58, 0.0 }
 0x8c0   :  { %v8613_v60 = vmax.f32 %v13498_v6, 0.0  ;;  %v9077_v6 = vsel %vm8882_vm9, %v14604_v61, 0  ;;  %v14616_v61 = vld [vmem:[%s18655_s7 + $0x34] ss:$8 sps:$4 sm:$0xff]  }
 0x8c1   :  { %v8651_v53 = vpack.c.bf16 %v8615_v35, %v8614_v44  ;;  %9098 = vmatpush1.bf16.msra.mxu1 %v9077_v6  ;;  %v14622_v6 = vld [vmem:[%s18655_s7 + $0x54] ss:$8 sps:$4 sm:$0xff]  }
 0x8c2   :  { %v18056_v59 = vpack.c.bf16 %v8613_v60, %v8612_v54  ;;  %v13183_v7 = vpop.f32.mrb[124].mxu1 }
 0x8c3   :  { %v13499_v18 = vadd.f32 %v13183_v7, %v17963_v49  ;;  %8681 = vrot.lane.b32.xlu1 %v8651_v53, %s14763_s23  ;;  %v8457_v45 = vpop.f32.mrb[125].mxu1 }
 0x8c4   :  { %v13500_v13 = vadd.f32 %v17963_v49, %v8457_v45  ;;  %v13184_v0 = vpop.f32.mrb[126].mxu1 }
 0x8c5   :  { %v13501_v31 = vadd.f32 %v13184_v0, %v17963_v49  ;;  %v8460_v63 = vpop.f32.mrb[127].mxu1  ;;  %v8618_v32 = vmax.f32 %v13499_v18, 0.0 }
 0x8c6   :  { %v13502_v39 = vadd.f32 %v17963_v49, %v8460_v63  ;;  %v8616_v9 = vmax.f32 %v13500_v13, 0.0 }
 0x8c7   :  { %v8619_v16 = vmax.f32 %v13501_v31, 0.0 }
 0x8c8   :  { %v8617_v50 = vmax.f32 %v13502_v39, 0.0 }
 0x8c9   :  { %v18064_v40 = vpack.c.bf16 %v8619_v16, %v8618_v32 }
 0x8ca   :  { %v8652_v27 = vpack.c.bf16 %v8617_v50, %v8616_v9  ;;  %v13187_v3 = vpop.f32.mrb[128].mxu1 }
 0x8cb   :  { %v13503_v43 = vadd.f32 %v13187_v3, %v17963_v49  ;;  %v8473_v11 = vpop.f32.mrb[129].mxu1 }
 0x8cc   :  { %v13504_v25 = vadd.f32 %v17963_v49, %v8473_v11  ;;  %8710 = vrot.lane.b32.xlu0 %v8652_v27, %s14765_s17  ;;  %v13188_v29 = vpop.f32.mrb[130].mxu1 }
 0x8cd   :  { %v13505_v12 = vadd.f32 %v13188_v29, %v17963_v49  ;;  %v8476_v28 = vpop.f32.mrb[131].mxu1  ;;  %v8622_v5 = vmax.f32 %v13503_v43, 0.0 }
 0x8ce   :  { %v13506_v14 = vadd.f32 %v17963_v49, %v8476_v28  ;;  %v8620_v62 = vmax.f32 %v13504_v25, 0.0 }
 0x8cf   :  { %v8623_v19 = vmax.f32 %v13505_v12, 0.0 }
 0x8d0   :  { %v8621_v4 = vmax.f32 %v13506_v14, 0.0 }
 0x8d1   :  { %v8655_v23 = vpack.c.bf16 %v8623_v19, %v8622_v5 }
 0x8d2   :  { %v8654_v33 = vpack.c.bf16 %v8621_v4, %v8620_v62  ;;  %v13191_v21 = vpop.f32.mrb[132].mxu1 }
 0x8d3   :  { %v13507_v34 = vadd.f32 %v13191_v21, %v17963_v49  ;;  %8712 = vrot.lane.b32.xlu0 %v8655_v23, %s14765_s17  ;;  %v8489_v51 = vpop.f32.mrb[133].mxu1 }
 0x8d4   :  { %v13508_v15 = vadd.f32 %v17963_v49, %v8489_v51  ;;  %8683 = vrot.lane.b32.xlu1 %v8654_v33, %s14763_s23  ;;  %v13192_v47 = vpop.f32.mrb[134].mxu1 }
 0x8d5   :  { %v13509_v30 = vadd.f32 %v13192_v47, %v17963_v49  ;;  %v8492_v57 = vpop.f32.mrb[135].mxu1  ;;  %v8626_v41 = vmax.f32 %v13507_v34, 0.0 }
 0x8d6   :  { %v13510_v42 = vadd.f32 %v17963_v49, %v8492_v57  ;;  %v8624_v56 = vmax.f32 %v13508_v15, 0.0 }
 0x8d7   :  { %v8627_v1 = vmax.f32 %v13509_v30, 0.0 }
 0x8d8   :  { %v8625_v20 = vmax.f32 %v13510_v42, 0.0  ;;  %v14607_v42 = vld [vmem:[%s18655_s7 + $0x4] ss:$8 sps:$4 sm:$0xff]  }
 0x8d9   :  { %v8657_v36 = vpack.c.bf16 %v8627_v1, %v8626_v41  ;;  %v14605_v41 = vld [vmem:[%s18655_s7] ss:$8 sps:$4 sm:$0xff]   ;;  %9540 = vmatprep.subr.bf16.mxu1 %v14607_v42  ;;  %v14608_v1 = vld [vmem:[%s18655_s7 + $0x10] ss:$8 sps:$4 sm:$0xff]  }
 0x8da   :  { %v18088_v58 = vpack.c.bf16 %v8625_v20, %v8624_v56  ;;  %v13195_v22 = vpop.f32.mrb[136].mxu1  ;;  %v14613_v56 = vld [vmem:[%s18655_s7 + $0x24] ss:$8 sps:$4 sm:$0xff]   ;;  %v14611_v20 = vld [vmem:[%s18655_s7 + $0x20] ss:$8 sps:$4 sm:$0xff]  }
 0x8db   :  { %v13511_v44 = vadd.f32 %v13195_v22, %v17963_v49  ;;  %8685 = vrot.lane.b32.xlu1 %v8657_v36, %s14763_s23  ;;  %v8505_v35 = vpop.f32.mrb[137].mxu1  ;;  %v14614_v36 = vld [vmem:[%s18655_s7 + $0x30] ss:$8 sps:$4 sm:$0xff]   ;;  %v14617_v22 = vld [vmem:[%s18655_s7 + $0x40] ss:$8 sps:$4 sm:$0xff]  }
 0x8dc   :  { %v13512_v54 = vadd.f32 %v17963_v49, %v8505_v35  ;;  %v13196_v60 = vpop.f32.mrb[138].mxu1  ;;  %v14625_v35 = vld [vmem:[%s18655_s7 + $0x64] ss:$8 sps:$4 sm:$0xff]  }
 0x8dd   :  { %v13513_v55 = vadd.f32 %v13196_v60, %v17963_v49  ;;  %v8508_v53 = vpop.f32.mrb[139].mxu1  ;;  %v8630_v18 = vmax.f32 %v13511_v44, 0.0  ;;  %v14620_v44 = vld [vmem:[%s18655_s7 + $0x50] ss:$8 sps:$4 sm:$0xff]   ;;  %v14628_v60 = vld [vmem:[%s18655_s7 + $0x74] ss:$8 sps:$4 sm:$0xff]  }
 0x8de   :  { %v13514_v7 = vadd.f32 %v17963_v49, %v8508_v53  ;;  %v8628_v13 = vmax.f32 %v13512_v54, 0.0  ;;  %v14623_v54 = vld [vmem:[%s18655_s7 + $0x60] ss:$8 sps:$4 sm:$0xff]   ;;  %v14631_v53 = vld [vmem:[%s18655_s7 + $0x84] ss:$8 sps:$4 sm:$0xff]  }
 0x8df   :  { %v8631_v45 = vmax.f32 %v13513_v55, 0.0  ;;  %v14626_v55 = vld [vmem:[%s18655_s7 + $0x70] ss:$8 sps:$4 sm:$0xff]  }
 0x8e0   :  { %v8629_v0 = vmax.f32 %v13514_v7, 0.0  ;;  %v14629_v7 = vld [vmem:[%s18655_s7 + $0x80] ss:$8 sps:$4 sm:$0xff]  }
 0x8e1   :  { %v18096_v31 = vpack.c.bf16 %v8631_v45, %v8630_v18  ;;  %v14634_v18 = vld [vmem:[%s18655_s7 + $0x94] ss:$8 sps:$4 sm:$0xff]   ;;  %v14632_v45 = vld [vmem:[%s18655_s7 + $0x90] ss:$8 sps:$4 sm:$0xff]  }
 0x8e2   :  { %v8658_v63 = vpack.c.bf16 %v8629_v0, %v8628_v13  ;;  %v14637_v13 = vld [vmem:[%s18655_s7 + $0xa4] ss:$8 sps:$4 sm:$0xff]   ;;  %v14635_v0 = vld [vmem:[%s18655_s7 + $0xa0] ss:$8 sps:$4 sm:$0xff]  }
 0x8e4   :  { %8714 = vrot.lane.b32.xlu0 %v8658_v63, %s14765_s17  ;;  %v14638_v63 = vld [vmem:[%s18655_s7 + $0xb0] ss:$8 sps:$4 sm:$0xff]  }
 0x8ed   :  { %v8670_v39 = vpop.permute.xlu1 %8669 }
 0x8ee   :  { %v8719_v32 = vsel %vm6724_vm7, %v17969_v48, %v8670_v39  ;;  %v14643_v39 = vld [vmem:[%s18655_s7 + $0xc4] ss:$8 sps:$4 sm:$0xff]  }
 0x8f6   :  { %v8699_v16 = vpop.permute.xlu0 %8698 }
 0x8f7   :  { %11371 = vmatprep.mubr.msk.bf16.mxu1 %vm2126_vm1, %v8699_v16  ;;  %v8751_v9 = vsel %vm8746_vm10, %v8719_v32, %v8699_v16  ;;  %v14641_v32 = vld [vmem:[%s18655_s7 + $0xc0] ss:$8 sps:$4 sm:$0xff]  }
 0x8f8   :  { %8927 = vmatmul.mubr.bf16.gmra.mrb[144].mxu1 %v8751_v9 }
 0x8fd   :  { %v8701_v49 = vpop.permute.xlu0 %8700 }
 0x8fe   :  { %v8672_v50 = vpop.permute.xlu1 %8671  ;;  %11372 = vmatprep.mubr.msk.bf16.mxu1 %vm2126_vm1, %v8701_v49 }
 0x8ff   :  { %v8722_v2 = vsel %vm6724_vm7, %v17976_v38, %v8672_v50 }
 0x900   :  { %v8754_v27 = vsel %vm8746_vm10, %v8722_v2, %v8701_v49 }
 0x901   :  { %8935 = vmatmul.mubr.bf16.gmra.mrb[148].mxu1 %v8754_v27 }
 0x905   :  { %v8674_v3 = vpop.permute.xlu1 %8673 }
 0x906   :  { %v8725_v48 = vsel %vm6724_vm7, %v17992_v24, %v8674_v3 }
 0x90e   :  { %v8703_v43 = vpop.permute.xlu0 %8702 }
 0x90f   :  { %11373 = vmatprep.mubr.msk.bf16.mxu1 %vm2126_vm1, %v8703_v43  ;;  %v8757_v11 = vsel %vm8746_vm10, %v8725_v48, %v8703_v43 }
 0x910   :  { %8943 = vmatmul.mubr.bf16.gmra.mrb[152].mxu1 %v8757_v11 }
 0x915   :  { %v8705_v25 = vpop.permute.xlu0 %8704 }
 0x916   :  { %v8676_v29 = vpop.permute.xlu1 %8675  ;;  %11374 = vmatprep.mubr.msk.bf16.mxu1 %vm2126_vm1, %v8705_v25 }
 0x917   :  { %v8728_v38 = vsel %vm6724_vm7, %v18000_v26, %v8676_v29 }
 0x918   :  { %v8760_v12 = vsel %vm8746_vm10, %v8728_v38, %v8705_v25 }
 0x919   :  { %8951 = vmatmul.mubr.bf16.gmra.mrb[156].mxu1 %v8760_v12 }
 0x91d   :  { %v8678_v28 = vpop.permute.xlu1 %8677 }
 0x91e   :  { %v8731_v24 = vsel %vm6724_vm7, %v18024_v52, %v8678_v28 }
 0x926   :  { %v8707_v14 = vpop.permute.xlu0 %8706 }
 0x927   :  { %11375 = vmatprep.mubr.msk.bf16.mxu1 %vm2126_vm1, %v8707_v14  ;;  %v8763_v17 = vsel %vm8746_vm10, %v8731_v24, %v8707_v14  ;;  %v14650_v24 = vld [vmem:[%s18655_s7 + $0xf0] ss:$8 sps:$4 sm:$0xff]  }
 0x928   :  { %8959 = vmatmul.mubr.bf16.gmra.mrb[160].mxu1 %v8763_v17 }
 0x92d   :  { %v8709_v5 = vpop.permute.xlu0 %8708 }
 0x92e   :  { %v8680_v19 = vpop.permute.xlu1 %8679  ;;  %11376 = vmatprep.mubr.msk.bf16.mxu1 %vm2126_vm1, %v8709_v5 }
 0x92f   :  { %v8734_v26 = vsel %vm6724_vm7, %v18032_v46, %v8680_v19 }
 0x930   :  { %v8766_v62 = vsel %vm8746_vm10, %v8734_v26, %v8709_v5 }
 0x931   :  { %8967 = vmatmul.mubr.bf16.gmra.mrb[164].mxu1 %v8766_v62 }
 0x935   :  { %v8682_v4 = vpop.permute.xlu1 %8681 }
 0x936   :  { %v8737_v52 = vsel %vm6724_vm7, %v18056_v59, %v8682_v4 }
 0x93e   :  { %v8711_v23 = vpop.permute.xlu0 %8710 }
 0x93f   :  { %11377 = vmatprep.mubr.msk.bf16.mxu1 %vm2126_vm1, %v8711_v23  ;;  %v8769_v33 = vsel %vm8746_vm10, %v8737_v52, %v8711_v23 }
 0x940   :  { %8975 = vmatmul.mubr.bf16.gmra.mrb[168].mxu1 %v8769_v33 }
 0x945   :  { %v8713_v21 = vpop.permute.xlu0 %8712 }
 0x946   :  { %v8684_v34 = vpop.permute.xlu1 %8683  ;;  %11378 = vmatprep.mubr.msk.bf16.mxu1 %vm2126_vm1, %v8713_v21 }
 0x947   :  { %v8740_v46 = vsel %vm6724_vm7, %v18064_v40, %v8684_v34  ;;  %v8745_v40 = vsel %vm6724_vm7, %v18096_v31, %v16989_v10  ;;  %v14610_v10 = vld [vmem:[%s18655_s7 + $0x14] ss:$8 sps:$4 sm:$0xff]  }
 0x948   :  { %v8772_v51 = vsel %vm8746_vm10, %v8740_v46, %v8713_v21  ;;  %v8777_v57 = vsel %vm8746_vm10, %v8745_v40, %v17950_v8  ;;  %v14640_v31 = vld [vmem:[%s18655_s7 + $0xb4] ss:$8 sps:$4 sm:$0xff]  }
 0x949   :  { %8983 = vmatmul.mubr.bf16.gmra.mrb[172].mxu1 %v8772_v51 }
 0x94d   :  { %v8686_v15 = vpop.permute.xlu1 %8685 }
 0x94e   :  { %v8743_v59 = vsel %vm6724_vm7, %v18088_v58, %v8686_v15  ;;  %v14619_v58 = vld [vmem:[%s18655_s7 + $0x44] ss:$8 sps:$4 sm:$0xff]  }
 0x956   :  { %v8715_v47 = vpop.permute.xlu0 %8714 }
 0x957   :  { %11379 = vmatprep.mubr.msk.bf16.mxu1 %vm2126_vm1, %v8715_v47  ;;  %v8775_v30 = vsel %vm8746_vm10, %v8743_v59, %v8715_v47 }
 0x958   :  { %8991 = vmatmul.mubr.bf16.gmra.mrb[176].mxu1 %v8775_v30 }
 0x959   :  { %11409 = vmatprep.mubr.msk.bf16.mxu1 %vm2126_vm1, %v8699_v16  ;;  %v14646_v16 = vld [vmem:[%s18655_s7 + $0xd4] ss:$8 sps:$4 sm:$0xff]  }
 0x960   :  { %9112 = vmatmul.mubr.bf16.vlgmr.msra.gmra.mrb[140].mxu1 %v8751_v9  ;;  %v18235_v9 = vld [vmem:[%s18656_s6] ss:$0 sm:$0xff] }
 0x961   :  { %11410 = vmatprep.mubr.msk.bf16.mxu1 %vm2126_vm1, %v8701_v49  ;;  %9541 = vmatpush1.bf16.msra.mxu1 %v14605_v41  ;;  %v14644_v49 = vld [vmem:[%s18655_s7 + $0xd0] ss:$8 sps:$4 sm:$0xff]  }
 0x962   :  { %9542 = vmatprep.subr.bf16.mxu1 %v14610_v10 }
 0x965   :  { %9543 = vmatpush1.bf16.msra.mxu1 %v14608_v1 }
 0x966   :  { %9544 = vmatprep.subr.bf16.mxu1 %v14613_v56 }
 0x968   :  { %9120 = vmatmul.mubr.bf16.gmra.mrb[144].mxu1 %v8754_v27 }
 0x969   :  { %11411 = vmatprep.mubr.msk.bf16.mxu1 %vm2126_vm1, %v8703_v43  ;;  %9545 = vmatpush1.bf16.msra.mxu1 %v14611_v20 }
 0x96a   :  { %9546 = vmatprep.subr.bf16.mxu1 %v14616_v61 }
 0x96d   :  { %9547 = vmatpush1.bf16.msra.mxu1 %v14614_v36 }
 0x96e   :  { %9548 = vmatprep.subr.bf16.mxu1 %v14619_v58 }
 0x970   :  { %9128 = vmatmul.mubr.bf16.gmra.mrb[148].mxu1 %v8757_v11  ;;  %v14647_v11 = vld [vmem:[%s18655_s7 + $0xe0] ss:$8 sps:$4 sm:$0xff]  }
 0x971   :  { %11412 = vmatprep.mubr.msk.bf16.mxu1 %vm2126_vm1, %v8705_v25  ;;  %9549 = vmatpush1.bf16.msra.mxu1 %v14617_v22  ;;  %v14649_v25 = vld [vmem:[%s18655_s7 + $0xe4] ss:$8 sps:$4 sm:$0xff]  }
 0x972   :  { %9550 = vmatprep.subr.bf16.mxu1 %v14622_v6 }
 0x975   :  { %9551 = vmatpush1.bf16.msra.mxu1 %v14620_v44 }
 0x976   :  { %9552 = vmatprep.subr.bf16.mxu1 %v14625_v35 }
 0x978   :  { %9136 = vmatmul.mubr.bf16.gmra.mrb[152].mxu1 %v8760_v12  ;;  %v14652_v12 = vld [vmem:[%s18655_s7 + $0xf4] ss:$8 sps:$4 sm:$0xff]  }
 0x979   :  { %11413 = vmatprep.mubr.msk.bf16.mxu1 %vm2126_vm1, %v8707_v14  ;;  %9553 = vmatpush1.bf16.msra.mxu1 %v14623_v54 }
 0x97a   :  { %9554 = vmatprep.subr.bf16.mxu1 %v14628_v60 }
 0x97d   :  { %9555 = vmatpush1.bf16.msra.mxu1 %v14626_v55  ;;  %v14655_v55 = vld [vmem:[%s18655_s7 + $0x104] ss:$8 sps:$4 sm:$0xff]  }
 0x97e   :  { %9556 = vmatprep.subr.bf16.mxu1 %v14631_v53 }
 0x980   :  { %9144 = vmatmul.mubr.bf16.gmra.mrb[156].mxu1 %v8763_v17 }
 0x981   :  { %11414 = vmatprep.mubr.msk.bf16.mxu1 %vm2126_vm1, %v8709_v5  ;;  %9557 = vmatpush1.bf16.msra.mxu1 %v14629_v7 }
 0x982   :  { %9558 = vmatprep.subr.bf16.mxu1 %v14634_v18 }
 0x985   :  { %9559 = vmatpush1.bf16.msra.mxu1 %v14632_v45 }
 0x986   :  { %9560 = vmatprep.subr.bf16.mxu1 %v14637_v13 }
 0x988   :  { %9152 = vmatmul.mubr.bf16.gmra.mrb[160].mxu1 %v8766_v62 }
 0x989   :  { %11415 = vmatprep.mubr.msk.bf16.mxu1 %vm2126_vm1, %v8711_v23  ;;  %9561 = vmatpush1.bf16.msra.mxu1 %v14635_v0 }
 0x98a   :  { %9562 = vmatprep.subr.bf16.mxu1 %v14640_v31 }
 0x98d   :  { %9563 = vmatpush1.bf16.msra.mxu1 %v14638_v63 }
 0x98e   :  { %9564 = vmatprep.subr.bf16.mxu1 %v14643_v39 }
 0x990   :  { %9160 = vmatmul.mubr.bf16.gmra.mrb[164].mxu1 %v8769_v33 }
 0x991   :  { %11416 = vmatprep.mubr.msk.bf16.mxu1 %vm2126_vm1, %v8713_v21  ;;  %9565 = vmatpush1.bf16.msra.mxu1 %v14641_v32 }
 0x992   :  { %9566 = vmatprep.subr.bf16.mxu1 %v14646_v16 }
 0x995   :  { %9567 = vmatpush1.bf16.msra.mxu1 %v14644_v49 }
 0x996   :  { %9568 = vmatprep.subr.bf16.mxu1 %v14649_v25 }
 0x998   :  { %9168 = vmatmul.mubr.bf16.gmra.mrb[168].mxu1 %v8772_v51 }
 0x999   :  { %11417 = vmatprep.mubr.msk.bf16.mxu1 %vm2126_vm1, %v8715_v47  ;;  %9569 = vmatpush1.bf16.msra.mxu1 %v14647_v11 }
 0x99a   :  { %9570 = vmatprep.subr.bf16.mxu1 %v14652_v12 }
 0x99d   :  { %9571 = vmatpush1.bf16.msra.mxu1 %v14650_v24 }
 0x99e   :  { %9603 = vmatprep.subr.bf16.mxu1 %v14655_v55 }
 0x9a0   :  { %9176 = vmatmul.mubr.bf16.gmra.mrb[172].mxu1 %v8775_v30 }
 0x9a1   :  { %11418 = vmatprep.mubr.msk.bf16.mxu1 %vm2126_vm1, %v17950_v8 }
 0x9a8   :  { %9184 = vmatmul.mubr.bf16.gmra.mrb[176].mxu1 %v8777_v57 }
 0xa33   :  { %v9113_v50 = vpop.f32.mrb[140].mxu1 }
 0xa34   :  { %v13515_v2 = vadd.f32 %v18235_v9, %v9113_v50  ;;  %v9115_v27 = vpop.f32.mrb[141].mxu1 }
 0xa35   :  { %v9116_v3 = vpop.f32.mrb[142].mxu1 }
 0xa36   :  { %v13516_v48 = vadd.f32 %v18235_v9, %v9116_v3  ;;  %v9118_v43 = vpop.f32.mrb[143].mxu1  ;;  %v9212_v29 = vmax.f32 %v13515_v2, 0.0 }
 0xa38   :  { %v9213_v38 = vmax.f32 %v13516_v48, 0.0 }
 0xa3a   :  { %v18251_v28 = vpack.c.bf16 %v9213_v38, %v9212_v29 }
 0xa3b   :  { %v9121_v14 = vpop.f32.mrb[144].mxu1 }
 0xa3c   :  { %v13517_v17 = vadd.f32 %v18235_v9, %v9121_v14  ;;  %v9123_v5 = vpop.f32.mrb[145].mxu1 }
 0xa3d   :  { %v9124_v19 = vpop.f32.mrb[146].mxu1 }
 0xa3e   :  { %v13518_v26 = vadd.f32 %v18235_v9, %v9124_v19  ;;  %v9126_v62 = vpop.f32.mrb[147].mxu1  ;;  %v9214_v4 = vmax.f32 %v13517_v17, 0.0 }
 0xa40   :  { %v9215_v52 = vmax.f32 %v13518_v26, 0.0 }
 0xa42   :  { %v9233_v23 = vpack.c.bf16 %v9215_v52, %v9214_v4 }
 0xa43   :  { %v9129_v33 = vpop.f32.mrb[148].mxu1 }
 0xa44   :  { %v13519_v21 = vadd.f32 %v18235_v9, %v9129_v33  ;;  %9245 = vrot.lane.b32.xlu1 %v9233_v23, %s14765_s17  ;;  %v9131_v34 = vpop.f32.mrb[149].mxu1 }
 0xa45   :  { %v9132_v46 = vpop.f32.mrb[150].mxu1 }
 0xa46   :  { %v13520_v51 = vadd.f32 %v18235_v9, %v9132_v46  ;;  %v9134_v15 = vpop.f32.mrb[151].mxu1  ;;  %v9216_v59 = vmax.f32 %v13519_v21, 0.0 }
 0xa48   :  { %v9217_v47 = vmax.f32 %v13520_v51, 0.0 }
 0xa4a   :  { %v9234_v30 = vpack.c.bf16 %v9217_v47, %v9216_v59 }
 0xa4b   :  { %v9137_v40 = vpop.f32.mrb[152].mxu1 }
 0xa4c   :  { %v13521_v57 = vadd.f32 %v18235_v9, %v9137_v40  ;;  %9254 = vrot.lane.b32.xlu0 %v9234_v30, %s14766_s0  ;;  %v9139_v42 = vpop.f32.mrb[153].mxu1 }
 0xa4d   :  { %v9140_v41 = vpop.f32.mrb[154].mxu1 }
 0xa4e   :  { %v13522_v1 = vadd.f32 %v18235_v9, %v9140_v41  ;;  %v9142_v10 = vpop.f32.mrb[155].mxu1  ;;  %v9218_v56 = vmax.f32 %v13521_v57, 0.0 }
 0xa50   :  { %v9219_v20 = vmax.f32 %v13522_v1, 0.0 }
 0xa52   :  { %v18264_v61 = vpack.c.bf16 %v9219_v20, %v9218_v56  ;;  %v14653_v56 = vld [vmem:[%s18655_s7 + $0x100] ss:$8 sps:$4 sm:$0xff]  }
 0xa53   :  { %v9145_v36 = vpop.f32.mrb[156].mxu1 }
 0xa54   :  { %v13523_v58 = vadd.f32 %v18235_v9, %v9145_v36  ;;  %v9147_v22 = vpop.f32.mrb[157].mxu1  ;;  %v14658_v36 = vld [vmem:[%s18655_s7 + $0x114] ss:$8 sps:$4 sm:$0xff]  }
 0xa55   :  { %v9148_v6 = vpop.f32.mrb[158].mxu1  ;;  %v14659_v22 = vld [vmem:[%s18655_s7 + $0x124] ss:$8 sps:$4 sm:$0x3f]  }
 0xa56   :  { %v13524_v44 = vadd.f32 %v18235_v9, %v9148_v6  ;;  %v9150_v35 = vpop.f32.mrb[159].mxu1  ;;  %v9220_v54 = vmax.f32 %v13523_v58, 0.0  ;;  %v14656_v58 = vld [vmem:[%s18655_s7 + $0x110] ss:$8 sps:$4 sm:$0xff]  }
 0xa57   :  { %v14661_v6 = vld [vmem:[%s18655_s7 + $0x120] ss:$8 sps:$4 sm:$0x3f]  }
 0xa58   :  { %v9221_v60 = vmax.f32 %v13524_v44, 0.0  ;;  %v14664_v44 = vld [vmem:[%s18655_s7 + $0x134] ss:$8 sps:$4 sm:$0xff]  }
 0xa5a   :  { %v9236_v53 = vpack.c.bf16 %v9221_v60, %v9220_v54 }
 0xa5b   :  { %v9153_v7 = vpop.f32.mrb[160].mxu1 }
 0xa5c   :  { %v13525_v18 = vadd.f32 %v18235_v9, %v9153_v7  ;;  %9247 = vrot.lane.b32.xlu1 %v9236_v53, %s14765_s17  ;;  %v9155_v45 = vpop.f32.mrb[161].mxu1 }
 0xa5d   :  { %v9156_v13 = vpop.f32.mrb[162].mxu1 }
 0xa5e   :  { %v13526_v0 = vadd.f32 %v18235_v9, %v9156_v13  ;;  %v9158_v31 = vpop.f32.mrb[163].mxu1  ;;  %v9222_v63 = vmax.f32 %v13525_v18, 0.0  ;;  %v14667_v13 = vld [vmem:[%s18655_s7 + $0x144] ss:$8 sps:$4 sm:$0xff]  }
 0xa5f   :  { %v14670_v31 = vld [vmem:[%s18655_s7 + $0x154] ss:$8 sps:$4 sm:$0xff]  }
 0xa60   :  { %v9223_v39 = vmax.f32 %v13526_v0, 0.0  ;;  %v14665_v0 = vld [vmem:[%s18655_s7 + $0x140] ss:$8 sps:$4 sm:$0xff]  }
 0xa62   :  { %v9237_v32 = vpack.c.bf16 %v9223_v39, %v9222_v63  ;;  %v14668_v63 = vld [vmem:[%s18655_s7 + $0x150] ss:$8 sps:$4 sm:$0xff]   ;;  %v14673_v39 = vld [vmem:[%s18655_s7 + $0x164] ss:$8 sps:$4 sm:$0xff]  }
 0xa63   :  { %v9161_v16 = vpop.f32.mrb[164].mxu1 }
 0xa64   :  { %v13527_v49 = vadd.f32 %v18235_v9, %v9161_v16  ;;  %9256 = vrot.lane.b32.xlu0 %v9237_v32, %s14766_s0  ;;  %v9163_v50 = vpop.f32.mrb[165].mxu1  ;;  %v14671_v32 = vld [vmem:[%s18655_s7 + $0x160] ss:$8 sps:$4 sm:$0xff]   ;;  %v14676_v16 = vld [vmem:[%s18655_s7 + $0x174] ss:$8 sps:$4 sm:$0xff]  }
 0xa65   :  { %v9164_v2 = vpop.f32.mrb[166].mxu1  ;;  %v14679_v50 = vld [vmem:[%s18655_s7 + $0x184] ss:$8 sps:$4 sm:$0xff]  }
 0xa66   :  { %v13528_v27 = vadd.f32 %v18235_v9, %v9164_v2  ;;  %v9166_v3 = vpop.f32.mrb[167].mxu1  ;;  %v9224_v48 = vmax.f32 %v13527_v49, 0.0  ;;  %v14674_v49 = vld [vmem:[%s18655_s7 + $0x170] ss:$8 sps:$4 sm:$0xff]   ;;  %v14677_v2 = vld [vmem:[%s18655_s7 + $0x180] ss:$8 sps:$4 sm:$0xff]  }
 0xa67   :  { %v14680_v3 = vld [vmem:[%s18655_s7 + $0x190] ss:$8 sps:$4 sm:$0xff]  }
 0xa68   :  { %v9225_v43 = vmax.f32 %v13528_v27, 0.0  ;;  %v14682_v27 = vld [vmem:[%s18655_s7 + $0x194] ss:$8 sps:$4 sm:$0xff]  }
 0xa6a   :  { %v18277_v11 = vpack.c.bf16 %v9225_v43, %v9224_v48  ;;  %v14685_v48 = vld [vmem:[%s18655_s7 + $0x1a4] ss:$8 sps:$4 sm:$0xff]   ;;  %v14683_v43 = vld [vmem:[%s18655_s7 + $0x1a0] ss:$8 sps:$4 sm:$0xff]  }
 0xa6b   :  { %v9169_v25 = vpop.f32.mrb[168].mxu1 }
 0xa6c   :  { %v13529_v29 = vadd.f32 %v18235_v9, %v9169_v25  ;;  %v9171_v38 = vpop.f32.mrb[169].mxu1  ;;  %v14686_v25 = vld [vmem:[%s18655_s7 + $0x1b0] ss:$8 sps:$4 sm:$0xff]  }
 0xa6d   :  { %v9172_v12 = vpop.f32.mrb[170].mxu1  ;;  %v14689_v38 = vld [vmem:[%s18655_s7 + $0x1c0] ss:$8 sps:$4 sm:$0xff]  }
 0xa6e   :  { %v13530_v24 = vadd.f32 %v18235_v9, %v9172_v12  ;;  %v9174_v14 = vpop.f32.mrb[171].mxu1  ;;  %v9226_v17 = vmax.f32 %v13529_v29, 0.0  ;;  %v14691_v29 = vld [vmem:[%s18655_s7 + $0x1c4] ss:$8 sps:$4 sm:$0xff]   ;;  %v14694_v12 = vld [vmem:[%s18655_s7 + $0x1d4] ss:$8 sps:$4 sm:$0xff]  }
 0xa6f   :  { %v14697_v14 = vld [vmem:[%s18655_s7 + $0x1e4] ss:$8 sps:$4 sm:$0xff]  }
 0xa70   :  { %v9227_v5 = vmax.f32 %v13530_v24, 0.0  ;;  %v14692_v24 = vld [vmem:[%s18655_s7 + $0x1d0] ss:$8 sps:$4 sm:$0xff]  }
 0xa72   :  { %v9239_v19 = vpack.c.bf16 %v9227_v5, %v9226_v17  ;;  %v14695_v17 = vld [vmem:[%s18655_s7 + $0x1e0] ss:$8 sps:$4 sm:$0xff]   ;;  %v14700_v5 = vld [vmem:[%s18655_s7 + $0x1f4] ss:$8 sps:$4 sm:$0xff]  }
 0xa73   :  { %v9177_v26 = vpop.f32.mrb[172].mxu1 }
 0xa74   :  { %v13531_v62 = vadd.f32 %v18235_v9, %v9177_v26  ;;  %9249 = vrot.lane.b32.xlu1 %v9239_v19, %s14765_s17  ;;  %v9179_v4 = vpop.f32.mrb[173].mxu1  ;;  %v14698_v19 = vld [vmem:[%s18655_s7 + $0x1f0] ss:$8 sps:$4 sm:$0xff]   ;;  %v14703_v26 = vld [vmem:[%s18655_s7 + $0x204] ss:$8 sps:$4 sm:$0xff]  }
 0xa75   :  { %v9180_v52 = vpop.f32.mrb[174].mxu1  ;;  %v14706_v4 = vld [vmem:[%s18655_s7 + $0x214] ss:$8 sps:$4 sm:$0xff]  }
 0xa76   :  { %v13532_v23 = vadd.f32 %v18235_v9, %v9180_v52  ;;  %v9182_v33 = vpop.f32.mrb[175].mxu1  ;;  %v9228_v21 = vmax.f32 %v13531_v62, 0.0  ;;  %v14701_v62 = vld [vmem:[%s18655_s7 + $0x200] ss:$8 sps:$4 sm:$0xff]   ;;  %v14704_v52 = vld [vmem:[%s18655_s7 + $0x210] ss:$8 sps:$4 sm:$0xff]  }
 0xa77   :  { %v14707_v33 = vld [vmem:[%s18655_s7 + $0x220] ss:$8 sps:$4 sm:$0xff]  }
 0xa78   :  { %v9229_v34 = vmax.f32 %v13532_v23, 0.0  ;;  %9260 = vrot.lane.b32.xlu1 %v18888_v37, %s14766_s0  ;;  %v14709_v23 = vld [vmem:[%s18655_s7 + $0x224] ss:$8 sps:$4 sm:$0xff]  }
 0xa7a   :  { %v9240_v46 = vpack.c.bf16 %v9229_v34, %v9228_v21  ;;  %v14712_v21 = vld [vmem:[%s18655_s7 + $0x234] ss:$8 sps:$4 sm:$0xff]   ;;  %v14710_v34 = vld [vmem:[%s18655_s7 + $0x230] ss:$8 sps:$4 sm:$0xff]  }
 0xa7b   :  { %v9185_v51 = vpop.f32.mrb[176].mxu1 }
 0xa7c   :  { %v13533_v15 = vadd.f32 %v18235_v9, %v9185_v51  ;;  %9258 = vrot.lane.b32.xlu0 %v9240_v46, %s14766_s0  ;;  %v9187_v59 = vpop.f32.mrb[177].mxu1  ;;  %v14715_v46 = vld [vmem:[%s18655_s7 + $0x244] ss:$8 sps:$4 sm:$0xff]   ;;  %v14713_v51 = vld [vmem:[%s18655_s7 + $0x240] ss:$8 sps:$4 sm:$0xff]  }
 0xa7d   :  { %v9188_v47 = vpop.f32.mrb[178].mxu1  ;;  %v14718_v59 = vld [vmem:[%s18655_s7 + $0x250] ss:$8 sps:$4 sm:$0x3f]  }
 0xa7e   :  { %v13534_v30 = vadd.f32 %v18235_v9, %v9188_v47  ;;  %v9190_v40 = vpop.f32.mrb[179].mxu1  ;;  %v9230_v57 = vmax.f32 %v13533_v15, 0.0  ;;  %v14716_v15 = vld [vmem:[%s18655_s7 + $0x254] ss:$8 sps:$4 sm:$0x3f]  }
 0xa80   :  { %v9231_v42 = vmax.f32 %v13534_v30, 0.0  ;;  %v9896_v30 = vsel %vm6885_vm5, %v14718_v59, 0 }
 0xa82   :  { %v18289_v41 = vpack.c.bf16 %v9231_v42, %v9230_v57  ;;  %v14719_v42 = vld [vmem:[%s18657_s9] sm:$0xff]  }
 0xa84   :  { %v9275_v57 = vsel %vm8746_vm10, %v18289_v41, %v17950_v8  ;;  %v14722_v41 = vld [vmem:[%s18657_s9 + $0x18] sm:$0xff]  }
 0xab6   :  { %v9246_v1 = vpop.permute.xlu1 %9245 }
 0xab7   :  { %v9264_v9 = vsel %vm8746_vm10, %v18251_v28, %v9246_v1  ;;  %v9535_v28 = vsel %vm6885_vm5, %v14661_v6, 0  ;;  %v14730_v6 = vld [vmem:[%s18657_s9 + $0x58] sm:$0xff]  }
 0xabe   :  { %v9255_v10 = vpop.permute.xlu0 %9254 }
 0xabf   :  { %v9279_v20 = vsel %vm9277_vm11, %v9246_v1, %v9255_v10  ;;  %v14720_v1 = vld [vmem:[%s18657_s9 + $0x8] sm:$0xff]  }
 0xac0   :  { %9572 = vmatprep.mubr.bf16.mxu1 %v9279_v20  ;;  %v14725_v20 = vld [vmem:[%s18657_s9 + $0x30] sm:$0xff]  }
 0xac1   :  { %9573 = vmatmul.mubr.bf16.vlgmr.msra.gmra.mrb[180].mxu1 %v9264_v9  ;;  %v14727_v9 = vld [vmem:[%s18657_s9 + $0x40] sm:$0xff]  }
 0xac2   :  { %9604 = vmatpush1.bf16.msra.mxu1 %v14653_v56  ;;  %v14724_v56 = vld [vmem:[%s18657_s9 + $0x28] sm:$0xff]  }
 0xac3   :  { %9605 = vmatprep.subr.bf16.mxu1 %v14658_v36  ;;  %v14726_v36 = vld [vmem:[%s18657_s9 + $0x38] sm:$0xff]  }
 0xac6   :  { %9606 = vmatpush1.bf16.msra.mxu1 %v14656_v58  ;;  %v14728_v58 = vld [vmem:[%s18657_s9 + $0x48] sm:$0xff]  }
 0xac7   :  { %11457 = vmatprep.subr.msk.bf16.mxu1 %vm6885_vm5, %v14659_v22  ;;  %v14729_v22 = vld [vmem:[%s18657_s9 + $0x50] sm:$0xff]  }
 0xaca   :  { %9608 = vmatpush1.bf16.msra.mxu1 %v9535_v28  ;;  %v14731_v28 = vld [vmem:[%s18657_s9 + $0x60] ss:$0 sps:$4 sm:$0xff]  }
 0xacb   :  { %9901 = vmatprep.subr.bf16.mxu1 %v14664_v44  ;;  %v10169_v44 = vsel %vm10167_vm12, %v14731_v28, 0  ;;  %v14744_v28 = vld [vmem:[%s18657_s9 + $0xc4] ss:$0 sps:$4 sm:$0xff]  }
 0xace   :  { %v9248_v35 = vpop.permute.xlu1 %9247 }
 0xacf   :  { %v18320_v55 = vsel %vm8746_vm10, %v18264_v61, %v9248_v35  ;;  %v14662_v61 = vld [vmem:[%s18655_s7 + $0x130] ss:$8 sps:$4 sm:$0xff]  }
 0xad6   :  { %v18314_v54 = vpop.permute.xlu0 %9256 }
 0xad7   :  { %v9282_v60 = vsel %vm9277_vm11, %v9248_v35, %v18314_v54  ;;  %v9330_v35 = vlaneseq }
 0xad8   :  { %9582 = vmatprep.mubr.bf16.mxu1 %v9282_v60 }
 0xad9   :  { %9583 = vmatmul.mubr.bf16.gmra.mrb[184].mxu1 %v18320_v55 }
 0xae6   :  { %v9250_v53 = vpop.permute.xlu1 %9249 }
 0xae7   :  { %v18332_v45 = vsel %vm8746_vm10, %v18277_v11, %v9250_v53  ;;  %v14688_v11 = vld [vmem:[%s18655_s7 + $0x1b4] ss:$8 sps:$4 sm:$0xff]  }
 0xaea   :  { %v9261_v47 = vpop.permute.xlu1 %9260 }
 0xaeb   :  { %v9288_v40 = vsel %vm9277_vm11, %v17950_v8, %v9261_v47  ;;  %v14721_v8 = vld [vmem:[%s18657_s9 + $0x10] sm:$0xff]  }
 0xaee   :  { %v18323_v7 = vpop.permute.xlu0 %9258 }
 0xaef   :  { %v18327_v18 = vsel %vm9277_vm11, %v9250_v53, %v18323_v7 }
 0xaf0   :  { %9592 = vmatprep.mubr.bf16.mxu1 %v18327_v18 }
 0xaf1   :  { %9593 = vmatmul.mubr.bf16.gmra.mrb[188].mxu1 %v18332_v45 }
 0xaf2   :  { %9635 = vmatprep.mubr.bf16.mxu1 %v18888_v37 }
 0xaf9   :  { %11458 = vmatmul.mubr.msk.bf16.vlgmr.msra.gmra.mrb[180].mxu1 %vm2381_vm2, %v9255_v10  ;;  %v14723_v10 = vld [vmem:[%s18657_s9 + $0x20] sm:$0xff]  }
 0xafa   :  { %9902 = vmatpush1.bf16.msra.mxu1 %v14662_v61  ;;  %9645 = vmatprep.mubr.bf16.mxu1 %v18888_v37 }
 0xafb   :  { %9903 = vmatprep.subr.bf16.mxu1 %v14667_v13 }
 0xafe   :  { %9904 = vmatpush1.bf16.msra.mxu1 %v14665_v0 }
 0xaff   :  { %9905 = vmatprep.subr.bf16.mxu1 %v14670_v31 }
 0xb01   :  { %11459 = vmatmul.mubr.msk.bf16.gmra.mrb[184].mxu1 %vm2381_vm2, %v18314_v54 }
 0xb02   :  { %9906 = vmatpush1.bf16.msra.mxu1 %v14668_v63  ;;  %9655 = vmatprep.mubr.bf16.mxu1 %v18888_v37 }
 0xb03   :  { %9907 = vmatprep.subr.bf16.mxu1 %v14673_v39 }
 0xb06   :  { %9908 = vmatpush1.bf16.msra.mxu1 %v14671_v32 }
 0xb07   :  { %9909 = vmatprep.subr.bf16.mxu1 %v14676_v16 }
 0xb09   :  { %11460 = vmatmul.mubr.msk.bf16.gmra.mrb[188].mxu1 %vm2381_vm2, %v18323_v7 }
 0xb0a   :  { %9910 = vmatpush1.bf16.msra.mxu1 %v14674_v49  ;;  %9933 = vmatprep.mubr.bf16.mxu1 %v9282_v60 }
 0xb0b   :  { %9911 = vmatprep.subr.bf16.mxu1 %v14679_v50 }
 0xb0e   :  { %9912 = vmatpush1.bf16.msra.mxu1 %v14677_v2 }
 0xb0f   :  { %9913 = vmatprep.subr.bf16.mxu1 %v14682_v27 }
 0xb12   :  { %9914 = vmatpush1.bf16.msra.mxu1 %v14680_v3 }
 0xb13   :  { %9915 = vmatprep.subr.bf16.mxu1 %v14685_v48 }
 0xb16   :  { %9916 = vmatpush1.bf16.msra.mxu1 %v14683_v43  ;;  %v14732_v43 = vld [vmem:[%s18657_s9 + $0x64] sm:$0xff]  }
 0xb17   :  { %9917 = vmatprep.subr.bf16.mxu1 %v14688_v11 }
 0xb1a   :  { %9918 = vmatpush1.bf16.msra.mxu1 %v14686_v25 }
 0xb1b   :  { %9919 = vmatprep.subr.bf16.mxu1 %v14691_v29 }
 0xb1e   :  { %9920 = vmatpush1.bf16.msra.mxu1 %v14689_v38 }
 0xb1f   :  { %9921 = vmatprep.subr.bf16.mxu1 %v14694_v12 }
 0xb22   :  { %9922 = vmatpush1.bf16.msra.mxu1 %v14692_v24 }
 0xb23   :  { %9923 = vmatprep.subr.bf16.mxu1 %v14697_v14 }
 0xb26   :  { %9924 = vmatpush1.bf16.msra.mxu1 %v14695_v17  ;;  %v14733_v17 = vld [vmem:[%s18657_s9 + $0x6c] sm:$0xff]  }
 0xb27   :  { %9925 = vmatprep.subr.bf16.mxu1 %v14700_v5 }
 0xb2a   :  { %9926 = vmatpush1.bf16.msra.mxu1 %v14698_v19 }
 0xb2b   :  { %9927 = vmatprep.subr.bf16.mxu1 %v14703_v26 }
 0xb2e   :  { %9928 = vmatpush1.bf16.msra.mxu1 %v14701_v62 }
 0xb2f   :  { %9929 = vmatprep.subr.bf16.mxu1 %v14706_v4 }
 0xb32   :  { %9930 = vmatpush1.bf16.msra.mxu1 %v14704_v52 }
 0xb33   :  { %9931 = vmatprep.subr.bf16.mxu1 %v14709_v23 }
 0xb36   :  { %9932 = vmatpush1.bf16.msra.mxu1 %v14707_v33  ;;  %v14734_v33 = vld [vmem:[%s18657_s9 + $0x74] sm:$0xff]  }
 0xb37   :  { %9964 = vmatprep.subr.bf16.mxu1 %v14712_v21 }
 0xb39   :  { %9934 = vmatmul.mubr.bf16.vlgmr.msra.gmra.mrb[180].mxu1 %v18320_v55  ;;  %v9328_v55 = vld [vmem:[%s18658_s8] sm:$0x3] }
 0xb3a   :  { %9943 = vmatprep.mubr.bf16.mxu1 %v18327_v18  ;;  %9965 = vmatpush1.bf16.msra.mxu1 %v14710_v34 }
 0xb3b   :  { %9966 = vmatprep.subr.bf16.mxu1 %v14715_v46 }
 0xb3e   :  { %9967 = vmatpush1.bf16.msra.mxu1 %v14713_v51 }
 0xb3f   :  { %11537 = vmatprep.subr.msk.bf16.mxu1 %vm6885_vm5, %v14716_v15 }
 0xb41   :  { %9944 = vmatmul.mubr.bf16.gmra.mrb[184].mxu1 %v18332_v45 }
 0xb42   :  { %9953 = vmatprep.mubr.bf16.mxu1 %v9288_v40  ;;  %9969 = vmatpush1.bf16.msra.mxu1 %v9896_v30  ;;  %v14735_v30 = vld [vmem:[%s18657_s9 + $0x7c] sm:$0xff]  }
 0xb43   :  { %10171 = vmatprep.subr.bf16.mxu1 %v18888_v37 }
 0xb49   :  { %9954 = vmatmul.mubr.bf16.gmra.mrb[188].mxu1 %v9275_v57 }
 0xb4a   :  { %9996 = vmatprep.mubr.bf16.mxu1 %v18888_v37 }
 0xb51   :  { %11538 = vmatmul.mubr.msk.bf16.vlgmr.msra.gmra.mrb[180].mxu1 %vm2381_vm2, %v18314_v54  ;;  %v9331_v54 = vshrl.u32 %v9330_v35, 7  ;;  %v14745_v35 = vld [vmem:[%s18657_s9 + $0xc8] sm:$0xff]  }
 0xb52   :  { %10006 = vmatprep.mubr.bf16.mxu1 %v18888_v37  ;;  %10172 = vmatpush1.bf16.msra.mxu1 %v14719_v42 }
 0xb53   :  { %10173 = vmatprep.subr.bf16.mxu1 %v18888_v37  ;;  %v9332_v60 = vsub.s32 0, %v9331_v54  ;;  %v9336_v53 = vsub.s32 1, %v9331_v54  ;;  %v14746_v54 = vld [vmem:[%s18657_s9 + $0xd0] sm:$0xff]  }
 0xb55   :  { %v9337_v18 = vrot.slane %v9328_v55, %v9336_v53  ;;  %v14749_v53 = vld [vmem:[%s18657_s9 + $0xe8] sm:$0xff]  }
 0xb56   :  { %10174 = vmatpush1.bf16.msra.mxu1 %v14720_v1 }
 0xb57   :  { %10175 = vmatprep.subr.bf16.mxu1 %v18888_v37 }
 0xb59   :  { %11539 = vmatmul.mubr.msk.bf16.gmra.mrb[184].mxu1 %vm2381_vm2, %v18323_v7  ;;  %v9333_v7 = vrot.slane %v9328_v55, %v9332_v60  ;;  %v14747_v60 = vld [vmem:[%s18657_s9 + $0xd8] sm:$0xff]   ;;  %v14748_v55 = vld [vmem:[%s18657_s9 + $0xe0] sm:$0xff]  }
 0xb5a   :  { %10016 = vmatprep.mubr.bf16.mxu1 %v18888_v37  ;;  %10176 = vmatpush1.bf16.msra.mxu1 %v14721_v8 }
 0xb5b   :  { %10177 = vmatprep.subr.bf16.mxu1 %v18888_v37 }
 0xb5e   :  { %10178 = vmatpush1.bf16.msra.mxu1 %v14722_v41 }
 0xb5f   :  { %10179 = vmatprep.subr.bf16.mxu1 %v18888_v37 }
 0xb61   :  { %11540 = vmatmul.mubr.msk.bf16.gmra.mrb[188].mxu1 %vm2381_vm2, %v9261_v47 }
 0xb62   :  { %10180 = vmatpush1.bf16.msra.mxu1 %v14723_v10  ;;  %v14736_v10 = vld [vmem:[%s18657_s9 + $0x84] sm:$0xff]  }
 0xb63   :  { %10181 = vmatprep.subr.bf16.mxu1 %v18888_v37 }
 0xb66   :  { %10182 = vmatpush1.bf16.msra.mxu1 %v14724_v56  ;;  %v14737_v56 = vld [vmem:[%s18657_s9 + $0x8c] sm:$0xff]  }
 0xb67   :  { %10183 = vmatprep.subr.bf16.mxu1 %v18888_v37 }
 0xb6a   :  { %10184 = vmatpush1.bf16.msra.mxu1 %v14725_v20  ;;  %v14738_v20 = vld [vmem:[%s18657_s9 + $0x94] sm:$0xff]  }
 0xb6b   :  { %10185 = vmatprep.subr.bf16.mxu1 %v18888_v37 }
 0xb6e   :  { %10186 = vmatpush1.bf16.msra.mxu1 %v14726_v36  ;;  %v14739_v36 = vld [vmem:[%s18657_s9 + $0x9c] sm:$0xff]  }
 0xb6f   :  { %10187 = vmatprep.subr.bf16.mxu1 %v18888_v37 }
 0xb72   :  { %10188 = vmatpush1.bf16.msra.mxu1 %v14727_v9  ;;  %v14740_v9 = vld [vmem:[%s18657_s9 + $0xa4] sm:$0xff]  }
 0xb73   :  { %10189 = vmatprep.subr.bf16.mxu1 %v18888_v37 }
 0xb76   :  { %10190 = vmatpush1.bf16.msra.mxu1 %v14728_v58  ;;  %v14741_v58 = vld [vmem:[%s18657_s9 + $0xac] sm:$0xff]  }
 0xb77   :  { %10191 = vmatprep.subr.bf16.mxu1 %v18888_v37 }
 0xb7a   :  { %10192 = vmatpush1.bf16.msra.mxu1 %v14729_v22  ;;  %v14742_v22 = vld [vmem:[%s18657_s9 + $0xb4] sm:$0xff]  }
 0xb7b   :  { %10193 = vmatprep.subr.bf16.mxu1 %v18888_v37 }
 0xb7e   :  { %10194 = vmatpush1.bf16.msra.mxu1 %v14730_v6  ;;  %v14743_v6 = vld [vmem:[%s18657_s9 + $0xbc] sm:$0xff]  }
 0xb7f   :  { %10195 = vmatprep.subr.bf16.mxu1 %v18888_v37 }
 0xb82   :  { %10196 = vmatpush1.bf16.msra.mxu1 %v10169_v44  ;;  %v10317_v44 = vsel %vm10167_vm12, %v14744_v28, 0 }
 0xb83   :  { %10319 = vmatprep.subr.bf16.mxu1 %v18888_v37 }
 0xc24   :  { %v9998_v45 = vpop.f32.mrb[180].mxu1 }
 0xc25   :  { %v13535_v61 = vadd.f32 %v9998_v45, %v9333_v7  ;;  %v10000_v13 = vpop.f32.mrb[181].mxu1  ;;  %v14752_v45 = vld [vmem:[%s18657_s9 + $0x100] sm:$0xff]  }
 0xc26   :  { %v13536_v0 = vadd.f32 %v10000_v13, %v9337_v18  ;;  %v10002_v31 = vpop.f32.mrb[182].mxu1  ;;  %v14754_v13 = vld [vmem:[%s18657_s9 + $0x110] sm:$0xff]  }
 0xc27   :  { %v13537_v63 = vadd.f32 %v10002_v31, %v9333_v7  ;;  %v10004_v39 = vpop.f32.mrb[183].mxu1  ;;  %v10039_v16 = vmax.f32 %v13535_v61, 0.0  ;;  %v14753_v61 = vld [vmem:[%s18657_s9 + $0x108] sm:$0xff]   ;;  %v14756_v31 = vld [vmem:[%s18657_s9 + $0x120] sm:$0xff]  }
 0xc28   :  { %v13538_v32 = vadd.f32 %v10004_v39, %v9337_v18  ;;  %v10040_v50 = vmax.f32 %v13536_v0, 0.0  ;;  %v14755_v0 = vld [vmem:[%s18657_s9 + $0x118] sm:$0xff]  }
 0xc29   :  { %v10041_v49 = vmax.f32 %v13537_v63, 0.0  ;;  %v14757_v63 = vld [vmem:[%s18657_s9 + $0x128] ss:$0 sps:$4 sm:$0xff]  }
 0xc2a   :  { %v10042_v2 = vmax.f32 %v13538_v32, 0.0  ;;  %v10467_v39 = vsel %vm10167_vm12, %v14757_v63, 0  ;;  %v11541_v32 = vld [vmem:[%s18659_s10] ss:$0 sm:$0xff] }
 0xc2b   :  { %v10051_v27 = vpack.c.bf16 %v10041_v49, %v10039_v16 }
 0xc2c   :  { %v10052_v3 = vpack.c.bf16 %v10042_v2, %v10040_v50  ;;  %v10008_v48 = vpop.f32.mrb[184].mxu1 }
 0xc2d   :  { %v13539_v11 = vadd.f32 %v10008_v48, %v9333_v7  ;;  %v10010_v25 = vpop.f32.mrb[185].mxu1 }
 0xc2e   :  { %v13540_v29 = vadd.f32 %v10010_v25, %v9337_v18  ;;  %v10012_v38 = vpop.f32.mrb[186].mxu1  ;;  %11555 = vmatprep.mubr.msk.bf16.mxu1 %vm9277_vm11, %v10052_v3 }
 0xc2f   :  { %v13541_v12 = vadd.f32 %v10012_v38, %v9333_v7  ;;  %v10014_v24 = vpop.f32.mrb[187].mxu1  ;;  %10204 = vmatmul.mubr.bf16.vlgmr.msra.gmra.mrb[192].mxu1 %v10051_v27  ;;  %v10043_v5 = vmax.f32 %v13539_v11, 0.0 }
 0xc30   :  { %v13542_v14 = vadd.f32 %v10014_v24, %v9337_v18  ;;  %10320 = vmatpush1.bf16.msra.mxu1 %v14732_v43  ;;  %v10044_v26 = vmax.f32 %v13540_v29, 0.0 }
 0xc31   :  { %v10045_v19 = vmax.f32 %v13541_v12, 0.0  ;;  %10321 = vmatprep.subr.bf16.mxu1 %v18888_v37 }
 0xc32   :  { %v10046_v62 = vmax.f32 %v13542_v14, 0.0 }
 0xc33   :  { %v10053_v4 = vpack.c.bf16 %v10045_v19, %v10043_v5 }
 0xc34   :  { %v10054_v52 = vpack.c.bf16 %v10046_v62, %v10044_v26  ;;  %10322 = vmatpush1.bf16.msra.mxu1 %v14733_v17  ;;  %v10018_v23 = vpop.f32.mrb[188].mxu1 }
 0xc35   :  { %v13543_v21 = vadd.f32 %v10018_v23, %v9333_v7  ;;  %v10020_v34 = vpop.f32.mrb[189].mxu1  ;;  %10323 = vmatprep.subr.bf16.mxu1 %v18888_v37 }
 0xc36   :  { %v13544_v46 = vadd.f32 %v10020_v34, %v9337_v18  ;;  %v10022_v51 = vpop.f32.mrb[190].mxu1  ;;  %11594 = vmatprep.mubr.msk.bf16.mxu1 %vm9277_vm11, %v10054_v52 }
 0xc37   :  { %v13545_v15 = vadd.f32 %v10022_v51, %v9333_v7  ;;  %v10024_v59 = vpop.f32.mrb[191].mxu1  ;;  %v10047_v40 = vmax.f32 %v13543_v21, 0.0  ;;  %v14750_v7 = vld [vmem:[%s18657_s9 + $0xf0] sm:$0xff]  }
 0xc38   :  { %v13546_v47 = vadd.f32 %v10024_v59, %v9337_v18  ;;  %10324 = vmatpush1.bf16.msra.mxu1 %v14734_v33  ;;  %v10048_v42 = vmax.f32 %v13544_v46, 0.0  ;;  %v14751_v18 = vld [vmem:[%s18657_s9 + $0xf8] sm:$0xff]  }
 0xc39   :  { %v10049_v57 = vmax.f32 %v13545_v15, 0.0  ;;  %10325 = vmatprep.subr.bf16.mxu1 %v18888_v37 }
 0xc3a   :  { %v10050_v1 = vmax.f32 %v13546_v47, 0.0 }
 0xc3b   :  { %v18546_v8 = vpack.c.bf16 %v10049_v57, %v10047_v40 }
 0xc3c   :  { %v10056_v41 = vpack.c.bf16 %v10050_v1, %v10048_v42  ;;  %10326 = vmatpush1.bf16.msra.mxu1 %v14735_v30 }
 0xc3d   :  { %10327 = vmatprep.subr.bf16.mxu1 %v18888_v37 }
 0xc40   :  { %10328 = vmatpush1.bf16.msra.mxu1 %v14736_v10 }
 0xc41   :  { %10329 = vmatprep.subr.bf16.mxu1 %v18888_v37 }
 0xc44   :  { %10330 = vmatpush1.bf16.msra.mxu1 %v14737_v56 }
 0xc45   :  { %10331 = vmatprep.subr.bf16.mxu1 %v18888_v37 }
 0xc48   :  { %10332 = vmatpush1.bf16.msra.mxu1 %v14738_v20 }
 0xc49   :  { %10333 = vmatprep.subr.bf16.mxu1 %v18888_v37 }
 0xc4c   :  { %10334 = vmatpush1.bf16.msra.mxu1 %v14739_v36 }
 0xc4d   :  { %10335 = vmatprep.subr.bf16.mxu1 %v18888_v37 }
 0xc50   :  { %10336 = vmatpush1.bf16.msra.mxu1 %v14740_v9 }
 0xc51   :  { %10337 = vmatprep.subr.bf16.mxu1 %v18888_v37 }
 0xc54   :  { %10338 = vmatpush1.bf16.msra.mxu1 %v14741_v58 }
 0xc55   :  { %10339 = vmatprep.subr.bf16.mxu1 %v18888_v37 }
 0xc58   :  { %10340 = vmatpush1.bf16.msra.mxu1 %v14742_v22 }
 0xc59   :  { %10341 = vmatprep.subr.bf16.mxu1 %v18888_v37 }
 0xc5c   :  { %10342 = vmatpush1.bf16.msra.mxu1 %v14743_v6 }
 0xc5d   :  { %10343 = vmatprep.subr.bf16.mxu1 %v18888_v37 }
 0xc60   :  { %10344 = vmatpush1.bf16.msra.mxu1 %v10317_v44 }
 0xc61   :  { %10469 = vmatprep.subr.bf16.mxu1 %v18888_v37 }
 0xc63   :  { %10352 = vmatmul.mubr.bf16.vlgmr.msra.gmra.mrb[192].mxu1 %v10053_v4 }
 0xc64   :  { %10470 = vmatpush1.bf16.msra.mxu1 %v14745_v35  ;;  %11633 = vmatprep.mubr.msk.bf16.mxu1 %vm9277_vm11, %v10056_v41 }
 0xc65   :  { %10471 = vmatprep.subr.bf16.mxu1 %v18888_v37 }
 0xc68   :  { %10472 = vmatpush1.bf16.msra.mxu1 %v14746_v54 }
 0xc69   :  { %10473 = vmatprep.subr.bf16.mxu1 %v18888_v37 }
 0xc6c   :  { %10474 = vmatpush1.bf16.msra.mxu1 %v14747_v60 }
 0xc6d   :  { %10475 = vmatprep.subr.bf16.mxu1 %v18888_v37 }
 0xc70   :  { %10476 = vmatpush1.bf16.msra.mxu1 %v14748_v55 }
 0xc71   :  { %10477 = vmatprep.subr.bf16.mxu1 %v18888_v37 }
 0xc74   :  { %10478 = vmatpush1.bf16.msra.mxu1 %v14749_v53 }
 0xc75   :  { %10479 = vmatprep.subr.bf16.mxu1 %v18888_v37 }
 0xc78   :  { %10480 = vmatpush1.bf16.msra.mxu1 %v14750_v7 }
 0xc79   :  { %10481 = vmatprep.subr.bf16.mxu1 %v18888_v37 }
 0xc7c   :  { %10482 = vmatpush1.bf16.msra.mxu1 %v14751_v18 }
 0xc7d   :  { %10483 = vmatprep.subr.bf16.mxu1 %v18888_v37 }
 0xc80   :  { %10484 = vmatpush1.bf16.msra.mxu1 %v14752_v45 }
 0xc81   :  { %10485 = vmatprep.subr.bf16.mxu1 %v18888_v37 }
 0xc84   :  { %10486 = vmatpush1.bf16.msra.mxu1 %v14753_v61 }
 0xc85   :  { %10487 = vmatprep.subr.bf16.mxu1 %v18888_v37 }
 0xc88   :  { %10488 = vmatpush1.bf16.msra.mxu1 %v14754_v13 }
 0xc89   :  { %10489 = vmatprep.subr.bf16.mxu1 %v18888_v37 }
 0xc8c   :  { %10490 = vmatpush1.bf16.msra.mxu1 %v14755_v0 }
 0xc8d   :  { %10491 = vmatprep.subr.bf16.mxu1 %v18888_v37 }
 0xc90   :  { %10492 = vmatpush1.bf16.msra.mxu1 %v14756_v31 }
 0xc91   :  { %10493 = vmatprep.subr.bf16.mxu1 %v18888_v37 }
 0xc94   :  { %10494 = vmatpush1.bf16.msra.mxu1 %v10467_v39 }
 0xc97   :  { %10502 = vmatmul.mubr.bf16.vlgmr.msra.gmra.mrb[192].mxu1 %v18546_v8 }
 0xd6a   :  { %v10503_v16 = vpop.f32.mrb[192].mxu1 }
 0xd6b   :  { %v13547_v49 = vadd.f32 %v11541_v32, %v10503_v16  ;;  %v10505_v50 = vpop.f32.mrb[193].mxu1 }
 0xd6c   :  { %v10506_v2 = vpop.f32.mrb[194].mxu1 }
 0xd6d   :  { %10513 = vst.msk [vmem:[%s18660_s11] sm:$0xff] %vm10512_vm13, %v13547_v49  ;;  %v13548_v27 = vadd.f32 %v11541_v32, %v10506_v2  ;;  %v10508_v37 = vpop.f32.mrb[195].mxu1 }
 0xd6f   :  { %10514 = vst.msk [vmem:[%s18660_s11 + $0x8] sm:$0xff] %vm10512_vm13, %v13548_v27 }

</bundles_post_ra>
